<compile_context>
chip_gen: v6e
topology: v6e:2x2x1
jax: 0.10.0
libtpu: 0.0.40
codegen_flags: <defaults>
</compile_context>

<pallas_src>
import jax
import jax.numpy as jnp
from jax import lax
from jax.experimental import pallas as pl
from jax.experimental.pallas import tpu as pltpu


# --------------------------------------------------------------------------
# Pallas kernel: avgpool + fc(2048->256)+ReLU + fused heads (256->128 padded)
# --------------------------------------------------------------------------
_VMEM_LIMIT_BYTES = 48 * 1024 * 1024   # < v7x 64 MiB physical, > v5e/v6e defaults
_ACT_VMEM_BUDGET = 24 * 1024 * 1024    # double-buffered bf16 activation blocks


def _heads_kernel(x_ref, wfc_ref, bfc_ref, whead_ref, bhead_ref, out_ref):
    # x_ref: (Bt, S, 2048) bf16 -- spatial S on sublanes, channels on lanes.
    bt, s, c = x_ref.shape
    # Spatial sum (the 1/S pool scale is folded into wfc outside the kernel).
    # Chunked over S so only a small f32 temporary plus the (Bt, 2048) f32
    # accumulator are live -- never a full f32 copy of the activation block.
    feat = jnp.zeros((bt, c), jnp.float32)
    chunk = 8
    for s0 in range(0, s, chunk):               # static Python loop (S static)
        ch = min(chunk, s - s0)
        feat = feat + jnp.sum(x_ref[:, s0:s0 + ch, :], axis=1,
                              dtype=jnp.float32)
    # fc + ReLU (bf16 MXU operands, f32 accumulation).
    h = jnp.dot(feat.astype(jnp.bfloat16), wfc_ref[...],
                preferred_element_type=jnp.float32) + bfc_ref[...]
    h = jnp.maximum(h, 0.0)                                       # (Bt, 256)
    # Fused, lane-padded heads: one matmul, one unmasked lane-dense store.
    out_ref[...] = jnp.dot(h.astype(jnp.bfloat16), whead_ref[...],
                           preferred_element_type=jnp.float32) + bhead_ref[...]


def _select_batch_tile(B, S, C):
    """VMEM-budgeted batch tile: multiple of 8, capped at 128."""
    s_pad = -(-S // 16) * 16                 # S sits on bf16 sublanes -> pad to 16
    per_row_bytes = s_pad * C * 2            # one padded bf16 batch row
    cap = _ACT_VMEM_BUDGET // (2 * per_row_bytes)   # 2 = double buffering
    cap = max(8, (cap // 8) * 8)
    bt = min(-(-B // 8) * 8, cap, 128)       # 128 fills MXU M; grid>=2 at B>=256
    return int(bt)


def heads_pallas(x, wfc, bfc, whead, bhead):
    """x: (B, S, 2048) bf16 -> (B, 128) f32 (padded logits, cols 0:16 valid)."""
    B, S, C = x.shape
    NPAD = whead.shape[1]                     # 128 (lane-padded head width)
    Bt = _select_batch_tile(B, S, C)
    B_pad = pl.cdiv(B, Bt) * Bt
    if B_pad != B:
        # Pad batch so every block is full: unmasked stores, bounded pipeline.
        x = jnp.pad(x, ((0, B_pad - B), (0, 0), (0, 0)))
    grid = (B_pad // Bt,)

    resident = dict(pipeline_mode=pl.Buffered(buffer_count=1))   # no double-buffer

    out = pl.pallas_call(
        _heads_kernel,
        out_shape=jax.ShapeDtypeStruct((B_pad, NPAD), jnp.float32),
        grid_spec=pltpu.PrefetchScalarGridSpec(
            num_scalar_prefetch=0,
            grid=grid,
            in_specs=[
                pl.BlockSpec((Bt, S, C), lambda i: (i, 0, 0)),           # activations
                pl.BlockSpec((C, 256), lambda i: (0, 0), **resident),    # wfc (1/S folded)
                pl.BlockSpec((1, 256), lambda i: (0, 0), **resident),    # bfc
                pl.BlockSpec((256, NPAD), lambda i: (0, 0), **resident), # fused head W
                pl.BlockSpec((1, NPAD), lambda i: (0, 0), **resident),   # fused head b
            ],
            out_specs=pl.BlockSpec((Bt, NPAD), lambda i: (i, 0)),
        ),
        compiler_params=pltpu.CompilerParams(
            dimension_semantics=("parallel",),
            vmem_limit_bytes=_VMEM_LIMIT_BYTES),
    )(x, wfc, bfc, whead, bhead)
    return out[:B]


# --------------------------------------------------------------------------
# Plain-JAX ResNet-50 backbone (NHWC, bf16, eval-mode BN folded into weights)
# --------------------------------------------------------------------------
# (n_blocks, mid_c, out_c, first_block_stride) -- STATIC config.
_LAYERS_CFG = [(3, 64, 256, 1),
               (4, 128, 512, 2),
               (6, 256, 1024, 2),
               (3, 512, 2048, 2)]

# Eval-mode BN with identity running stats (gamma=1, beta=0, mean=0, var=1)
# folds to a single scalar 1/sqrt(1+eps) baked into every conv weight at init.
# TODO(synk): real checkpoint BN stats would need per-channel gamma/beta/mean/
# var folding into conv weights plus an added bias term.
_BN_SCALE = float(1.0 / (1.0 + 1e-5) ** 0.5)


def _relu(x):
    return jnp.maximum(x, 0.0)


def _conv2d(x, w, stride=1, padding=0):
    return lax.conv_general_dilated(
        x, w,
        window_strides=(stride, stride),
        padding=[(padding, padding), (padding, padding)],
        dimension_numbers=('NHWC', 'HWIO', 'NHWC'))


def _maxpool_3x3_s2(x):
    init = jnp.array(-jnp.inf, dtype=x.dtype)
    return lax.reduce_window(
        x, init, lax.max,
        window_dimensions=(1, 3, 3, 1),
        window_strides=(1, 2, 2, 1),
        padding=((0, 0), (1, 1), (1, 1), (0, 0)))


def _init_conv(key, kh, kw, in_c, out_c):
    fan_in = in_c * kh * kw
    w = jax.random.normal(key, (kh, kw, in_c, out_c), jnp.float32)
    w = w * jnp.sqrt(2.0 / fan_in) * _BN_SCALE        # BN folded at init
    return w.astype(jnp.bfloat16)


def _bottleneck_params(key, in_c, mid_c, out_c, stride):
    k1, k2, k3, k4 = jax.random.split(key, 4)
    p = {
        'conv1': _init_conv(k1, 1, 1, in_c, mid_c),
        'conv2': _init_conv(k2, 3, 3, mid_c, mid_c),
        'conv3': _init_conv(k3, 1, 1, mid_c, out_c),
        'downsample': None,
    }
    if stride != 1 or in_c != out_c:
        p['downsample'] = _init_conv(k4, 1, 1, in_c, out_c)
    return p


def _bottleneck_fwd(p, x, stride):
    out = _relu(_conv2d(x, p['conv1']))
    out = _relu(_conv2d(out, p['conv2'], stride=stride, padding=1))
    out = _conv2d(out, p['conv3'])
    if p['downsample'] is not None:
        shortcut = _conv2d(x, p['downsample'], stride=stride)
    else:
        shortcut = x
    return _relu(out + shortcut)


def make_resnet50_params(key):
    params = {'conv1': _init_conv(jax.random.fold_in(key, 0), 7, 7, 3, 64)}
    layers = []
    in_c = 64
    ki = 1
    for n_blocks, mid_c, out_c, stride in _LAYERS_CFG:
        blocks = []
        for b in range(n_blocks):
            blocks.append(_bottleneck_params(
                jax.random.fold_in(key, ki),
                in_c, mid_c, out_c, stride if b == 0 else 1))
            ki += 1
            in_c = out_c
        layers.append(blocks)
    params['layers'] = layers
    return params


def resnet50_backbone(params, x):
    # conv1 7x7/2 + (folded BN) + ReLU + maxpool 3x3/2, then layers 1-4.
    x = _relu(_conv2d(x, params['conv1'], stride=2, padding=3))
    x = _maxpool_3x3_s2(x)
    for layer_idx, (n_blocks, _, _, layer_stride) in enumerate(_LAYERS_CFG):
        for b in range(n_blocks):
            stride = layer_stride if b == 0 else 1        # static Python int
            x = _bottleneck_fwd(params['layers'][layer_idx][b], x, stride)
    return x    # (B, Hf, Wf, 2048); avgpool happens inside the Pallas kernel


def make_head_params(key):
    k1, k2, k3, k4, k5, k6 = jax.random.split(key, 6)
    # Stored transposed relative to torch nn.Linear (i.e. W^T), bf16 for MXU.
    wfc = (jax.random.normal(k1, (2048, 256), jnp.float32)
           * jnp.sqrt(2.0 / 2048)).astype(jnp.bfloat16)
    bfc = jax.random.normal(k2, (1, 256), jnp.float32) * 0.01
    wlab = jax.random.normal(k3, (256, 10), jnp.float32) * jnp.sqrt(1.0 / 256)
    blab = jax.random.normal(k4, (1, 10), jnp.float32) * 0.01
    wunl = jax.random.normal(k5, (256, 6), jnp.float32) * jnp.sqrt(1.0 / 256)
    bunl = jax.random.normal(k6, (1, 6), jnp.float32) * 0.01
    # Fuse the two heads into one lane-padded (256, 128) weight; cols 0:10 are
    # head_lab, cols 10:16 head_unl, rest zero (sliced off in the wrapper).
    whead = jnp.zeros((256, 128), jnp.float32)
    whead = whead.at[:, :10].set(wlab).at[:, 10:16].set(wunl)
    whead = whead.astype(jnp.bfloat16)
    bhead = jnp.zeros((1, 128), jnp.float32)
    bhead = bhead.at[:, :10].set(blab).at[:, 10:16].set(bunl)
    return wfc, bfc, whead, bhead


@jax.jit
def model2_forward(x, resnet_params, wfc, bfc, whead, bhead):
    # NCHW f32 input (PyTorch convention) -> NHWC bf16 for the conv stack.
    x = jnp.transpose(x, (0, 2, 3, 1)).astype(jnp.bfloat16)
    feat = resnet50_backbone(resnet_params, x)            # (B, Hf, Wf, 2048)
    B, Hf, Wf, C = feat.shape
    S = Hf * Wf
    feat_flat = feat.reshape(B, S, C)                     # (B, S, 2048) lane-dense
    # Fold the 1/S average-pool scale into the fc weight (one tiny op outside
    # the kernel; removes a per-grid-step VPU multiply inside it).
    wfc_scaled = (wfc.astype(jnp.float32) * (1.0 / S)).astype(jnp.bfloat16)
    out = heads_pallas(feat_flat, wfc_scaled, bfc, whead, bhead)  # (B, 128) f32
    lab_logits = out[:, :10]
    unl_logits = out[:, 10:16]
    return lab_logits, unl_logits


if __name__ == "__main__":
    key = jax.random.PRNGKey(0)
    k_in, k_res, k_head = jax.random.split(key, 3)

    # Small shapes: batch=2, RGB 64x64 (survives the /32 downsampling -> S=4).
    x = jax.random.normal(k_in, (2, 3, 64, 64), jnp.float32)

    resnet_params = make_resnet50_params(k_res)
    wfc, bfc, whead, bhead = make_head_params(k_head)

    lab_logits, unl_logits = model2_forward(
        x, resnet_params, wfc, bfc, whead, bhead)
    jax.block_until_ready((lab_logits, unl_logits))

    assert lab_logits.shape == (2, 10) and unl_logits.shape == (2, 6)
    assert bool(jnp.all(jnp.isfinite(lab_logits)))
    assert bool(jnp.all(jnp.isfinite(unl_logits)))
    print("KERNEL_OK")
</pallas_src>

<mosaic_0001>
module attributes {stable_mosaic.version = 11 : i64} {
  func.func @_heads_kernel(%arg0: i32, %arg1: memref<8x4x2048xbf16, #tpu.memory_space<vmem>>, %arg2: memref<2048x256xbf16, #tpu.memory_space<vmem>>, %arg3: memref<1x256xf32, #tpu.memory_space<vmem>>, %arg4: memref<256x128xbf16, #tpu.memory_space<vmem>>, %arg5: memref<1x128xf32, #tpu.memory_space<vmem>>, %arg6: memref<8x128xf32, #tpu.memory_space<vmem>>) attributes {dimension_semantics = [#tpu.dimension_semantics<parallel>], iteration_bounds = array<i64: 1>, scalar_prefetch = 0 : i64, scratch_operands = 0 : i64, tpu.core_type = #tpu.core_type<tc>, window_params = [{transform_indices = @transform_0, window_bounds = array<i64: 8, 4, 2048>}, {pipeline_mode = #tpu.pipeline_mode<synchronous>, transform_indices = @transform_1, window_bounds = array<i64: 2048, 256>}, {pipeline_mode = #tpu.pipeline_mode<synchronous>, transform_indices = @transform_2, window_bounds = array<i64: 1, 256>}, {pipeline_mode = #tpu.pipeline_mode<synchronous>, transform_indices = @transform_3, window_bounds = array<i64: 256, 128>}, {pipeline_mode = #tpu.pipeline_mode<synchronous>, transform_indices = @transform_4, window_bounds = array<i64: 1, 128>}, {transform_indices = @transform_5, window_bounds = array<i64: 8, 128>}]} {
    %cst = arith.constant 0.000000e+00 : f32
    %0 = vector.broadcast %cst : f32 to vector<8x2048xf32>
    %c0 = arith.constant 0 : index
    %c0_0 = arith.constant 0 : index
    %c0_1 = arith.constant 0 : index
    %1 = vector.load %arg1[%c0, %c0_0, %c0_1] : memref<8x4x2048xbf16, #tpu.memory_space<vmem>>, vector<8x4x2048xbf16>
    %2 = arith.extf %1 : vector<8x4x2048xbf16> to vector<8x4x2048xf32>
    %cst_2 = arith.constant dense<0.000000e+00> : vector<8x2048xf32>
    %3 = vector.multi_reduction <add>, %2, %cst_2 [1] : vector<8x4x2048xf32> to vector<8x2048xf32>
    %4 = arith.addf %0, %3 : vector<8x2048xf32>
    %5 = arith.truncf %4 : vector<8x2048xf32> to vector<8x2048xbf16>
    %c0_3 = arith.constant 0 : index
    %c0_4 = arith.constant 0 : index
    %6 = vector.load %arg2[%c0_3, %c0_4] : memref<2048x256xbf16, #tpu.memory_space<vmem>>, vector<2048x256xbf16>
    %cst_5 = arith.constant dense<0.000000e+00> : vector<8x256xf32>
    %7 = tpu.matmul %5, %6, %cst_5 {dimension_numbers = #tpu.dot_dimension_numbers<[1], [0], [0], [1], [0, 0, 1, 1], [], []>} : vector<8x2048xbf16>, vector<2048x256xbf16>, vector<8x256xf32> -> vector<8x256xf32>
    %c0_6 = arith.constant 0 : index
    %c0_7 = arith.constant 0 : index
    %8 = vector.load %arg3[%c0_6, %c0_7] : memref<1x256xf32, #tpu.memory_space<vmem>>, vector<1x256xf32>
    %9 = vector.broadcast %8 : vector<1x256xf32> to vector<8x256xf32>
    %10 = arith.addf %7, %9 : vector<8x256xf32>
    %cst_8 = arith.constant 0.000000e+00 : f32
    %11 = vector.broadcast %cst_8 : f32 to vector<8x256xf32>
    %12 = arith.maximumf %10, %11 : vector<8x256xf32>
    %13 = arith.truncf %12 : vector<8x256xf32> to vector<8x256xbf16>
    %c0_9 = arith.constant 0 : index
    %c0_10 = arith.constant 0 : index
    %14 = vector.load %arg4[%c0_9, %c0_10] : memref<256x128xbf16, #tpu.memory_space<vmem>>, vector<256x128xbf16>
    %cst_11 = arith.constant dense<0.000000e+00> : vector<8x128xf32>
    %15 = tpu.matmul %13, %14, %cst_11 {dimension_numbers = #tpu.dot_dimension_numbers<[1], [0], [0], [1], [0, 0, 1, 1], [], []>} : vector<8x256xbf16>, vector<256x128xbf16>, vector<8x128xf32> -> vector<8x128xf32>
    %c0_12 = arith.constant 0 : index
    %c0_13 = arith.constant 0 : index
    %16 = vector.load %arg5[%c0_12, %c0_13] : memref<1x128xf32, #tpu.memory_space<vmem>>, vector<1x128xf32>
    %17 = vector.broadcast %16 : vector<1x128xf32> to vector<8x128xf32>
    %18 = arith.addf %15, %17 : vector<8x128xf32>
    %c0_14 = arith.constant 0 : index
    %c0_15 = arith.constant 0 : index
    %19 = vector.load %arg6[%c0_14, %c0_15] : memref<8x128xf32, #tpu.memory_space<vmem>>, vector<8x128xf32>
    tpu.vector_store %arg6[%c0_14, %c0_15], %18 {strides = array<i32>} : memref<8x128xf32, #tpu.memory_space<vmem>>, vector<8x128xf32>,
    return
  }
  func.func @transform_0(%arg0: i32) -> (i32, i32, i32) {
    %c0_i32 = arith.constant 0 : i32
    %c0_i32_0 = arith.constant 0 : i32
    %c0_i32_1 = arith.constant 0 : i32
    return %arg0, %c0_i32, %c0_i32_0 : i32, i32, i32
  }
  func.func @transform_1(%arg0: i32) -> (i32, i32) {
    %c0_i32 = arith.constant 0 : i32
    %c0_i32_0 = arith.constant 0 : i32
    %c0_i32_1 = arith.constant 0 : i32
    return %c0_i32, %c0_i32_0 : i32, i32
  }
  func.func @transform_2(%arg0: i32) -> (i32, i32) {
    %c0_i32 = arith.constant 0 : i32
    %c0_i32_0 = arith.constant 0 : i32
    %c0_i32_1 = arith.constant 0 : i32
    return %c0_i32, %c0_i32_0 : i32, i32
  }
  func.func @transform_3(%arg0: i32) -> (i32, i32) {
    %c0_i32 = arith.constant 0 : i32
    %c0_i32_0 = arith.constant 0 : i32
    %c0_i32_1 = arith.constant 0 : i32
    return %c0_i32, %c0_i32_0 : i32, i32
  }
  func.func @transform_4(%arg0: i32) -> (i32, i32) {
    %c0_i32 = arith.constant 0 : i32
    %c0_i32_0 = arith.constant 0 : i32
    %c0_i32_1 = arith.constant 0 : i32
    return %c0_i32, %c0_i32_0 : i32, i32
  }
  func.func @transform_5(%arg0: i32) -> (i32, i32) {
    %c0_i32 = arith.constant 0 : i32
    %c0_i32_0 = arith.constant 0 : i32
    return %arg0, %c0_i32 : i32, i32
  }
}

</mosaic_0001>

<bundles_post_ra>
// kernel: reverse
= control target key start
LH: loop header
LB: loop body
LE: loop exit
PB: predicated region body
PF: predicated region fallthrough
CT: control target
= control target key end

     0   :  { %s33417_s0 = inlined_call_operand.vmem [shape: bf16[3,3,512,512], index: 0, kind: input, shape index: {}]   ;;  %s33418_s1 = inlined_call_operand.vmem [shape: bf16[3,3,512,512], index: 1, kind: output, shape index: {}]  }
   0x1   :  { %v25343_v0 = vld [vmem:[%s33417_s0 + $0x2000] sm:$0xff]   ;;  %v25352_v9 = vld [vmem:[%s33417_s0 + $0x2010] sm:$0xff]  }
   0x2   :  { %v25344_v1 = vld [vmem:[%s33417_s0 + $0x1400] sm:$0xff]   ;;  %20162 = vst [vmem:[%s33418_s1] sm:$0xff] %v25343_v0  ;;  %v25353_v10 = vld [vmem:[%s33417_s0 + $0x1410] sm:$0xff]   ;;  %20198 = vst [vmem:[%s33418_s1 + $0x10] sm:$0xff] %v25352_v9 }
   0x3   :  { %v25345_v2 = vld [vmem:[%s33417_s0 + $0x800] sm:$0xff]   ;;  %20166 = vst [vmem:[%s33418_s1 + $0xc00] sm:$0xff] %v25344_v1  ;;  %v25354_v11 = vld [vmem:[%s33417_s0 + $0x810] sm:$0xff]   ;;  %20202 = vst [vmem:[%s33418_s1 + $0xc10] sm:$0xff] %v25353_v10 }
   0x4   :  { %v25346_v3 = vld [vmem:[%s33417_s0 + $0x1c00] sm:$0xff]   ;;  %20170 = vst [vmem:[%s33418_s1 + $0x1800] sm:$0xff] %v25345_v2  ;;  %v25355_v12 = vld [vmem:[%s33417_s0 + $0x1c10] sm:$0xff]   ;;  %20206 = vst [vmem:[%s33418_s1 + $0x1810] sm:$0xff] %v25354_v11 }
   0x5   :  { %v25347_v4 = vld [vmem:[%s33417_s0 + $0x1000] sm:$0xff]   ;;  %20174 = vst [vmem:[%s33418_s1 + $0x400] sm:$0xff] %v25346_v3  ;;  %v25356_v13 = vld [vmem:[%s33417_s0 + $0x1010] sm:$0xff]   ;;  %20210 = vst [vmem:[%s33418_s1 + $0x410] sm:$0xff] %v25355_v12 }
   0x6   :  { %v25348_v5 = vld [vmem:[%s33417_s0 + $0x400] sm:$0xff]   ;;  %20178 = vst [vmem:[%s33418_s1 + $0x1000] sm:$0xff] %v25347_v4  ;;  %v25357_v14 = vld [vmem:[%s33417_s0 + $0x410] sm:$0xff]   ;;  %20214 = vst [vmem:[%s33418_s1 + $0x1010] sm:$0xff] %v25356_v13 }
   0x7   :  { %v25349_v6 = vld [vmem:[%s33417_s0 + $0x1800] sm:$0xff]   ;;  %20182 = vst [vmem:[%s33418_s1 + $0x1c00] sm:$0xff] %v25348_v5  ;;  %v25358_v15 = vld [vmem:[%s33417_s0 + $0x1810] sm:$0xff]   ;;  %20218 = vst [vmem:[%s33418_s1 + $0x1c10] sm:$0xff] %v25357_v14 }
   0x8   :  { %v25350_v7 = vld [vmem:[%s33417_s0 + $0xc00] sm:$0xff]   ;;  %20186 = vst [vmem:[%s33418_s1 + $0x800] sm:$0xff] %v25349_v6  ;;  %v25359_v16 = vld [vmem:[%s33417_s0 + $0xc10] sm:$0xff]   ;;  %20222 = vst [vmem:[%s33418_s1 + $0x810] sm:$0xff] %v25358_v15 }
   0x9   :  { %v25351_v8 = vld [vmem:[%s33417_s0] sm:$0xff]   ;;  %20190 = vst [vmem:[%s33418_s1 + $0x1400] sm:$0xff] %v25350_v7  ;;  %v25360_v17 = vld [vmem:[%s33417_s0 + $0x10] sm:$0xff]   ;;  %20226 = vst [vmem:[%s33418_s1 + $0x1410] sm:$0xff] %v25359_v16 }
   0xa   :  { %20194 = vst [vmem:[%s33418_s1 + $0x2000] sm:$0xff] %v25351_v8  ;;  %v25361_v18 = vld [vmem:[%s33417_s0 + $0x2020] sm:$0xff]   ;;  %20230 = vst [vmem:[%s33418_s1 + $0x2010] sm:$0xff] %v25360_v17  ;;  %v25370_v27 = vld [vmem:[%s33417_s0 + $0x2030] sm:$0xff]  }
   0xb   :  { %v25362_v19 = vld [vmem:[%s33417_s0 + $0x1420] sm:$0xff]   ;;  %20234 = vst [vmem:[%s33418_s1 + $0x20] sm:$0xff] %v25361_v18  ;;  %v25371_v28 = vld [vmem:[%s33417_s0 + $0x1430] sm:$0xff]   ;;  %20270 = vst [vmem:[%s33418_s1 + $0x30] sm:$0xff] %v25370_v27 }
   0xc   :  { %v25363_v20 = vld [vmem:[%s33417_s0 + $0x820] sm:$0xff]   ;;  %20238 = vst [vmem:[%s33418_s1 + $0xc20] sm:$0xff] %v25362_v19  ;;  %v25372_v29 = vld [vmem:[%s33417_s0 + $0x830] sm:$0xff]   ;;  %20274 = vst [vmem:[%s33418_s1 + $0xc30] sm:$0xff] %v25371_v28 }
   0xd   :  { %v25364_v21 = vld [vmem:[%s33417_s0 + $0x1c20] sm:$0xff]   ;;  %20242 = vst [vmem:[%s33418_s1 + $0x1820] sm:$0xff] %v25363_v20  ;;  %v25373_v30 = vld [vmem:[%s33417_s0 + $0x1c30] sm:$0xff]   ;;  %20278 = vst [vmem:[%s33418_s1 + $0x1830] sm:$0xff] %v25372_v29 }
   0xe   :  { %v25365_v22 = vld [vmem:[%s33417_s0 + $0x1020] sm:$0xff]   ;;  %20246 = vst [vmem:[%s33418_s1 + $0x420] sm:$0xff] %v25364_v21  ;;  %v25374_v31 = vld [vmem:[%s33417_s0 + $0x1030] sm:$0xff]   ;;  %20282 = vst [vmem:[%s33418_s1 + $0x430] sm:$0xff] %v25373_v30 }
   0xf   :  { %v25366_v23 = vld [vmem:[%s33417_s0 + $0x420] sm:$0xff]   ;;  %20250 = vst [vmem:[%s33418_s1 + $0x1020] sm:$0xff] %v25365_v22  ;;  %v25375_v32 = vld [vmem:[%s33417_s0 + $0x430] sm:$0xff]   ;;  %20286 = vst [vmem:[%s33418_s1 + $0x1030] sm:$0xff] %v25374_v31 }
  0x10   :  { %v25367_v24 = vld [vmem:[%s33417_s0 + $0x1820] sm:$0xff]   ;;  %20254 = vst [vmem:[%s33418_s1 + $0x1c20] sm:$0xff] %v25366_v23  ;;  %v25376_v33 = vld [vmem:[%s33417_s0 + $0x1830] sm:$0xff]   ;;  %20290 = vst [vmem:[%s33418_s1 + $0x1c30] sm:$0xff] %v25375_v32 }
  0x11   :  { %v25368_v25 = vld [vmem:[%s33417_s0 + $0xc20] sm:$0xff]   ;;  %20258 = vst [vmem:[%s33418_s1 + $0x820] sm:$0xff] %v25367_v24  ;;  %v25377_v34 = vld [vmem:[%s33417_s0 + $0xc30] sm:$0xff]   ;;  %20294 = vst [vmem:[%s33418_s1 + $0x830] sm:$0xff] %v25376_v33 }
  0x12   :  { %v25369_v26 = vld [vmem:[%s33417_s0 + $0x20] sm:$0xff]   ;;  %20262 = vst [vmem:[%s33418_s1 + $0x1420] sm:$0xff] %v25368_v25  ;;  %v25378_v35 = vld [vmem:[%s33417_s0 + $0x30] sm:$0xff]   ;;  %20298 = vst [vmem:[%s33418_s1 + $0x1430] sm:$0xff] %v25377_v34 }
  0x13   :  { %20266 = vst [vmem:[%s33418_s1 + $0x2020] sm:$0xff] %v25369_v26  ;;  %v25379_v36 = vld [vmem:[%s33417_s0 + $0x2040] sm:$0xff]   ;;  %20302 = vst [vmem:[%s33418_s1 + $0x2030] sm:$0xff] %v25378_v35  ;;  %v25388_v45 = vld [vmem:[%s33417_s0 + $0x2050] sm:$0xff]  }
  0x14   :  { %v25380_v37 = vld [vmem:[%s33417_s0 + $0x1440] sm:$0xff]   ;;  %20306 = vst [vmem:[%s33418_s1 + $0x40] sm:$0xff] %v25379_v36  ;;  %v25389_v46 = vld [vmem:[%s33417_s0 + $0x1450] sm:$0xff]   ;;  %20342 = vst [vmem:[%s33418_s1 + $0x50] sm:$0xff] %v25388_v45 }
  0x15   :  { %v25381_v38 = vld [vmem:[%s33417_s0 + $0x840] sm:$0xff]   ;;  %20310 = vst [vmem:[%s33418_s1 + $0xc40] sm:$0xff] %v25380_v37  ;;  %v25390_v47 = vld [vmem:[%s33417_s0 + $0x850] sm:$0xff]   ;;  %20346 = vst [vmem:[%s33418_s1 + $0xc50] sm:$0xff] %v25389_v46 }
  0x16   :  { %v25382_v39 = vld [vmem:[%s33417_s0 + $0x1c40] sm:$0xff]   ;;  %20314 = vst [vmem:[%s33418_s1 + $0x1840] sm:$0xff] %v25381_v38  ;;  %v25391_v48 = vld [vmem:[%s33417_s0 + $0x1c50] sm:$0xff]   ;;  %20350 = vst [vmem:[%s33418_s1 + $0x1850] sm:$0xff] %v25390_v47 }
  0x17   :  { %v25383_v40 = vld [vmem:[%s33417_s0 + $0x1040] sm:$0xff]   ;;  %20318 = vst [vmem:[%s33418_s1 + $0x440] sm:$0xff] %v25382_v39  ;;  %v25392_v49 = vld [vmem:[%s33417_s0 + $0x1050] sm:$0xff]   ;;  %20354 = vst [vmem:[%s33418_s1 + $0x450] sm:$0xff] %v25391_v48 }
  0x18   :  { %v25384_v41 = vld [vmem:[%s33417_s0 + $0x440] sm:$0xff]   ;;  %20322 = vst [vmem:[%s33418_s1 + $0x1040] sm:$0xff] %v25383_v40  ;;  %v25393_v50 = vld [vmem:[%s33417_s0 + $0x450] sm:$0xff]   ;;  %20358 = vst [vmem:[%s33418_s1 + $0x1050] sm:$0xff] %v25392_v49 }
  0x19   :  { %v25385_v42 = vld [vmem:[%s33417_s0 + $0x1840] sm:$0xff]   ;;  %20326 = vst [vmem:[%s33418_s1 + $0x1c40] sm:$0xff] %v25384_v41  ;;  %v25394_v51 = vld [vmem:[%s33417_s0 + $0x1850] sm:$0xff]   ;;  %20362 = vst [vmem:[%s33418_s1 + $0x1c50] sm:$0xff] %v25393_v50 }
  0x1a   :  { %v25386_v43 = vld [vmem:[%s33417_s0 + $0xc40] sm:$0xff]   ;;  %20330 = vst [vmem:[%s33418_s1 + $0x840] sm:$0xff] %v25385_v42  ;;  %v25395_v52 = vld [vmem:[%s33417_s0 + $0xc50] sm:$0xff]   ;;  %20366 = vst [vmem:[%s33418_s1 + $0x850] sm:$0xff] %v25394_v51 }
  0x1b   :  { %v25387_v44 = vld [vmem:[%s33417_s0 + $0x40] sm:$0xff]   ;;  %20334 = vst [vmem:[%s33418_s1 + $0x1440] sm:$0xff] %v25386_v43  ;;  %v25396_v53 = vld [vmem:[%s33417_s0 + $0x50] sm:$0xff]   ;;  %20370 = vst [vmem:[%s33418_s1 + $0x1450] sm:$0xff] %v25395_v52 }
  0x1c   :  { %20338 = vst [vmem:[%s33418_s1 + $0x2040] sm:$0xff] %v25387_v44  ;;  %v25397_v54 = vld [vmem:[%s33417_s0 + $0x2060] sm:$0xff]   ;;  %20374 = vst [vmem:[%s33418_s1 + $0x2050] sm:$0xff] %v25396_v53  ;;  %v25406_v63 = vld [vmem:[%s33417_s0 + $0x2070] sm:$0xff]  }
  0x1d   :  { %v25398_v55 = vld [vmem:[%s33417_s0 + $0x1460] sm:$0xff]   ;;  %20378 = vst [vmem:[%s33418_s1 + $0x60] sm:$0xff] %v25397_v54  ;;  %v25407_v0 = vld [vmem:[%s33417_s0 + $0x1470] sm:$0xff]   ;;  %20414 = vst [vmem:[%s33418_s1 + $0x70] sm:$0xff] %v25406_v63 }
  0x1e   :  { %v25399_v56 = vld [vmem:[%s33417_s0 + $0x860] sm:$0xff]   ;;  %20382 = vst [vmem:[%s33418_s1 + $0xc60] sm:$0xff] %v25398_v55  ;;  %v25408_v1 = vld [vmem:[%s33417_s0 + $0x870] sm:$0xff]   ;;  %20418 = vst [vmem:[%s33418_s1 + $0xc70] sm:$0xff] %v25407_v0 }
  0x1f   :  { %v25400_v57 = vld [vmem:[%s33417_s0 + $0x1c60] sm:$0xff]   ;;  %20386 = vst [vmem:[%s33418_s1 + $0x1860] sm:$0xff] %v25399_v56  ;;  %v25409_v2 = vld [vmem:[%s33417_s0 + $0x1c70] sm:$0xff]   ;;  %20422 = vst [vmem:[%s33418_s1 + $0x1870] sm:$0xff] %v25408_v1 }
  0x20   :  { %v25401_v58 = vld [vmem:[%s33417_s0 + $0x1060] sm:$0xff]   ;;  %20390 = vst [vmem:[%s33418_s1 + $0x460] sm:$0xff] %v25400_v57  ;;  %v25410_v3 = vld [vmem:[%s33417_s0 + $0x1070] sm:$0xff]   ;;  %20426 = vst [vmem:[%s33418_s1 + $0x470] sm:$0xff] %v25409_v2 }
  0x21   :  { %v25402_v59 = vld [vmem:[%s33417_s0 + $0x460] sm:$0xff]   ;;  %20394 = vst [vmem:[%s33418_s1 + $0x1060] sm:$0xff] %v25401_v58  ;;  %v25411_v4 = vld [vmem:[%s33417_s0 + $0x470] sm:$0xff]   ;;  %20430 = vst [vmem:[%s33418_s1 + $0x1070] sm:$0xff] %v25410_v3 }
  0x22   :  { %v25403_v60 = vld [vmem:[%s33417_s0 + $0x1860] sm:$0xff]   ;;  %20398 = vst [vmem:[%s33418_s1 + $0x1c60] sm:$0xff] %v25402_v59  ;;  %v25412_v5 = vld [vmem:[%s33417_s0 + $0x1870] sm:$0xff]   ;;  %20434 = vst [vmem:[%s33418_s1 + $0x1c70] sm:$0xff] %v25411_v4 }
  0x23   :  { %v25404_v61 = vld [vmem:[%s33417_s0 + $0xc60] sm:$0xff]   ;;  %20402 = vst [vmem:[%s33418_s1 + $0x860] sm:$0xff] %v25403_v60  ;;  %v25413_v6 = vld [vmem:[%s33417_s0 + $0xc70] sm:$0xff]   ;;  %20438 = vst [vmem:[%s33418_s1 + $0x870] sm:$0xff] %v25412_v5 }
  0x24   :  { %v25405_v62 = vld [vmem:[%s33417_s0 + $0x60] sm:$0xff]   ;;  %20406 = vst [vmem:[%s33418_s1 + $0x1460] sm:$0xff] %v25404_v61  ;;  %v25414_v7 = vld [vmem:[%s33417_s0 + $0x70] sm:$0xff]   ;;  %20442 = vst [vmem:[%s33418_s1 + $0x1470] sm:$0xff] %v25413_v6 }
  0x25   :  { %20410 = vst [vmem:[%s33418_s1 + $0x2060] sm:$0xff] %v25405_v62  ;;  %v25415_v8 = vld [vmem:[%s33417_s0 + $0x2080] sm:$0xff]   ;;  %20446 = vst [vmem:[%s33418_s1 + $0x2070] sm:$0xff] %v25414_v7  ;;  %v25424_v17 = vld [vmem:[%s33417_s0 + $0x2090] sm:$0xff]  }
  0x26   :  { %v25416_v9 = vld [vmem:[%s33417_s0 + $0x1480] sm:$0xff]   ;;  %20450 = vst [vmem:[%s33418_s1 + $0x80] sm:$0xff] %v25415_v8  ;;  %v25425_v18 = vld [vmem:[%s33417_s0 + $0x1490] sm:$0xff]   ;;  %20486 = vst [vmem:[%s33418_s1 + $0x90] sm:$0xff] %v25424_v17 }
  0x27   :  { %v25417_v10 = vld [vmem:[%s33417_s0 + $0x880] sm:$0xff]   ;;  %20454 = vst [vmem:[%s33418_s1 + $0xc80] sm:$0xff] %v25416_v9  ;;  %v25426_v19 = vld [vmem:[%s33417_s0 + $0x890] sm:$0xff]   ;;  %20490 = vst [vmem:[%s33418_s1 + $0xc90] sm:$0xff] %v25425_v18 }
  0x28   :  { %v25418_v11 = vld [vmem:[%s33417_s0 + $0x1c80] sm:$0xff]   ;;  %20458 = vst [vmem:[%s33418_s1 + $0x1880] sm:$0xff] %v25417_v10  ;;  %v25427_v20 = vld [vmem:[%s33417_s0 + $0x1c90] sm:$0xff]   ;;  %20494 = vst [vmem:[%s33418_s1 + $0x1890] sm:$0xff] %v25426_v19 }
  0x29   :  { %v25419_v12 = vld [vmem:[%s33417_s0 + $0x1080] sm:$0xff]   ;;  %20462 = vst [vmem:[%s33418_s1 + $0x480] sm:$0xff] %v25418_v11  ;;  %v25428_v21 = vld [vmem:[%s33417_s0 + $0x1090] sm:$0xff]   ;;  %20498 = vst [vmem:[%s33418_s1 + $0x490] sm:$0xff] %v25427_v20 }
  0x2a   :  { %v25420_v13 = vld [vmem:[%s33417_s0 + $0x480] sm:$0xff]   ;;  %20466 = vst [vmem:[%s33418_s1 + $0x1080] sm:$0xff] %v25419_v12  ;;  %v25429_v22 = vld [vmem:[%s33417_s0 + $0x490] sm:$0xff]   ;;  %20502 = vst [vmem:[%s33418_s1 + $0x1090] sm:$0xff] %v25428_v21 }
  0x2b   :  { %v25421_v14 = vld [vmem:[%s33417_s0 + $0x1880] sm:$0xff]   ;;  %20470 = vst [vmem:[%s33418_s1 + $0x1c80] sm:$0xff] %v25420_v13  ;;  %v25430_v23 = vld [vmem:[%s33417_s0 + $0x1890] sm:$0xff]   ;;  %20506 = vst [vmem:[%s33418_s1 + $0x1c90] sm:$0xff] %v25429_v22 }
  0x2c   :  { %v25422_v15 = vld [vmem:[%s33417_s0 + $0xc80] sm:$0xff]   ;;  %20474 = vst [vmem:[%s33418_s1 + $0x880] sm:$0xff] %v25421_v14  ;;  %v25431_v24 = vld [vmem:[%s33417_s0 + $0xc90] sm:$0xff]   ;;  %20510 = vst [vmem:[%s33418_s1 + $0x890] sm:$0xff] %v25430_v23 }
  0x2d   :  { %v25423_v16 = vld [vmem:[%s33417_s0 + $0x80] sm:$0xff]   ;;  %20478 = vst [vmem:[%s33418_s1 + $0x1480] sm:$0xff] %v25422_v15  ;;  %v25432_v25 = vld [vmem:[%s33417_s0 + $0x90] sm:$0xff]   ;;  %20514 = vst [vmem:[%s33418_s1 + $0x1490] sm:$0xff] %v25431_v24 }
  0x2e   :  { %20482 = vst [vmem:[%s33418_s1 + $0x2080] sm:$0xff] %v25423_v16  ;;  %v25433_v26 = vld [vmem:[%s33417_s0 + $0x20a0] sm:$0xff]   ;;  %20518 = vst [vmem:[%s33418_s1 + $0x2090] sm:$0xff] %v25432_v25  ;;  %v25442_v35 = vld [vmem:[%s33417_s0 + $0x20b0] sm:$0xff]  }
  0x2f   :  { %v25434_v27 = vld [vmem:[%s33417_s0 + $0x14a0] sm:$0xff]   ;;  %20522 = vst [vmem:[%s33418_s1 + $0xa0] sm:$0xff] %v25433_v26  ;;  %v25443_v36 = vld [vmem:[%s33417_s0 + $0x14b0] sm:$0xff]   ;;  %20558 = vst [vmem:[%s33418_s1 + $0xb0] sm:$0xff] %v25442_v35 }
  0x30   :  { %v25435_v28 = vld [vmem:[%s33417_s0 + $0x8a0] sm:$0xff]   ;;  %20526 = vst [vmem:[%s33418_s1 + $0xca0] sm:$0xff] %v25434_v27  ;;  %v25444_v37 = vld [vmem:[%s33417_s0 + $0x8b0] sm:$0xff]   ;;  %20562 = vst [vmem:[%s33418_s1 + $0xcb0] sm:$0xff] %v25443_v36 }
  0x31   :  { %v25436_v29 = vld [vmem:[%s33417_s0 + $0x1ca0] sm:$0xff]   ;;  %20530 = vst [vmem:[%s33418_s1 + $0x18a0] sm:$0xff] %v25435_v28  ;;  %v25445_v38 = vld [vmem:[%s33417_s0 + $0x1cb0] sm:$0xff]   ;;  %20566 = vst [vmem:[%s33418_s1 + $0x18b0] sm:$0xff] %v25444_v37 }
  0x32   :  { %v25437_v30 = vld [vmem:[%s33417_s0 + $0x10a0] sm:$0xff]   ;;  %20534 = vst [vmem:[%s33418_s1 + $0x4a0] sm:$0xff] %v25436_v29  ;;  %v25446_v39 = vld [vmem:[%s33417_s0 + $0x10b0] sm:$0xff]   ;;  %20570 = vst [vmem:[%s33418_s1 + $0x4b0] sm:$0xff] %v25445_v38 }
  0x33   :  { %v25438_v31 = vld [vmem:[%s33417_s0 + $0x4a0] sm:$0xff]   ;;  %20538 = vst [vmem:[%s33418_s1 + $0x10a0] sm:$0xff] %v25437_v30  ;;  %v25447_v40 = vld [vmem:[%s33417_s0 + $0x4b0] sm:$0xff]   ;;  %20574 = vst [vmem:[%s33418_s1 + $0x10b0] sm:$0xff] %v25446_v39 }
  0x34   :  { %v25439_v32 = vld [vmem:[%s33417_s0 + $0x18a0] sm:$0xff]   ;;  %20542 = vst [vmem:[%s33418_s1 + $0x1ca0] sm:$0xff] %v25438_v31  ;;  %v25448_v41 = vld [vmem:[%s33417_s0 + $0x18b0] sm:$0xff]   ;;  %20578 = vst [vmem:[%s33418_s1 + $0x1cb0] sm:$0xff] %v25447_v40 }
  0x35   :  { %v25440_v33 = vld [vmem:[%s33417_s0 + $0xca0] sm:$0xff]   ;;  %20546 = vst [vmem:[%s33418_s1 + $0x8a0] sm:$0xff] %v25439_v32  ;;  %v25449_v42 = vld [vmem:[%s33417_s0 + $0xcb0] sm:$0xff]   ;;  %20582 = vst [vmem:[%s33418_s1 + $0x8b0] sm:$0xff] %v25448_v41 }
  0x36   :  { %v25441_v34 = vld [vmem:[%s33417_s0 + $0xa0] sm:$0xff]   ;;  %20550 = vst [vmem:[%s33418_s1 + $0x14a0] sm:$0xff] %v25440_v33  ;;  %v25450_v43 = vld [vmem:[%s33417_s0 + $0xb0] sm:$0xff]   ;;  %20586 = vst [vmem:[%s33418_s1 + $0x14b0] sm:$0xff] %v25449_v42 }
  0x37   :  { %20554 = vst [vmem:[%s33418_s1 + $0x20a0] sm:$0xff] %v25441_v34  ;;  %v25451_v44 = vld [vmem:[%s33417_s0 + $0x20c0] sm:$0xff]   ;;  %20590 = vst [vmem:[%s33418_s1 + $0x20b0] sm:$0xff] %v25450_v43  ;;  %v25460_v53 = vld [vmem:[%s33417_s0 + $0x20d0] sm:$0xff]  }
  0x38   :  { %v25452_v45 = vld [vmem:[%s33417_s0 + $0x14c0] sm:$0xff]   ;;  %20594 = vst [vmem:[%s33418_s1 + $0xc0] sm:$0xff] %v25451_v44  ;;  %v25461_v54 = vld [vmem:[%s33417_s0 + $0x14d0] sm:$0xff]   ;;  %20630 = vst [vmem:[%s33418_s1 + $0xd0] sm:$0xff] %v25460_v53 }
  0x39   :  { %v25453_v46 = vld [vmem:[%s33417_s0 + $0x8c0] sm:$0xff]   ;;  %20598 = vst [vmem:[%s33418_s1 + $0xcc0] sm:$0xff] %v25452_v45  ;;  %v25462_v55 = vld [vmem:[%s33417_s0 + $0x8d0] sm:$0xff]   ;;  %20634 = vst [vmem:[%s33418_s1 + $0xcd0] sm:$0xff] %v25461_v54 }
  0x3a   :  { %v25454_v47 = vld [vmem:[%s33417_s0 + $0x1cc0] sm:$0xff]   ;;  %20602 = vst [vmem:[%s33418_s1 + $0x18c0] sm:$0xff] %v25453_v46  ;;  %v25463_v56 = vld [vmem:[%s33417_s0 + $0x1cd0] sm:$0xff]   ;;  %20638 = vst [vmem:[%s33418_s1 + $0x18d0] sm:$0xff] %v25462_v55 }
  0x3b   :  { %v25455_v48 = vld [vmem:[%s33417_s0 + $0x10c0] sm:$0xff]   ;;  %20606 = vst [vmem:[%s33418_s1 + $0x4c0] sm:$0xff] %v25454_v47  ;;  %v25464_v57 = vld [vmem:[%s33417_s0 + $0x10d0] sm:$0xff]   ;;  %20642 = vst [vmem:[%s33418_s1 + $0x4d0] sm:$0xff] %v25463_v56 }
  0x3c   :  { %v25456_v49 = vld [vmem:[%s33417_s0 + $0x4c0] sm:$0xff]   ;;  %20610 = vst [vmem:[%s33418_s1 + $0x10c0] sm:$0xff] %v25455_v48  ;;  %v25465_v58 = vld [vmem:[%s33417_s0 + $0x4d0] sm:$0xff]   ;;  %20646 = vst [vmem:[%s33418_s1 + $0x10d0] sm:$0xff] %v25464_v57 }
  0x3d   :  { %v25457_v50 = vld [vmem:[%s33417_s0 + $0x18c0] sm:$0xff]   ;;  %20614 = vst [vmem:[%s33418_s1 + $0x1cc0] sm:$0xff] %v25456_v49  ;;  %v25466_v59 = vld [vmem:[%s33417_s0 + $0x18d0] sm:$0xff]   ;;  %20650 = vst [vmem:[%s33418_s1 + $0x1cd0] sm:$0xff] %v25465_v58 }
  0x3e   :  { %v25458_v51 = vld [vmem:[%s33417_s0 + $0xcc0] sm:$0xff]   ;;  %20618 = vst [vmem:[%s33418_s1 + $0x8c0] sm:$0xff] %v25457_v50  ;;  %v25467_v60 = vld [vmem:[%s33417_s0 + $0xcd0] sm:$0xff]   ;;  %20654 = vst [vmem:[%s33418_s1 + $0x8d0] sm:$0xff] %v25466_v59 }
  0x3f   :  { %v25459_v52 = vld [vmem:[%s33417_s0 + $0xc0] sm:$0xff]   ;;  %20622 = vst [vmem:[%s33418_s1 + $0x14c0] sm:$0xff] %v25458_v51  ;;  %v25468_v61 = vld [vmem:[%s33417_s0 + $0xd0] sm:$0xff]   ;;  %20658 = vst [vmem:[%s33418_s1 + $0x14d0] sm:$0xff] %v25467_v60 }
  0x40   :  { %20626 = vst [vmem:[%s33418_s1 + $0x20c0] sm:$0xff] %v25459_v52  ;;  %v25469_v62 = vld [vmem:[%s33417_s0 + $0x20e0] sm:$0xff]   ;;  %20662 = vst [vmem:[%s33418_s1 + $0x20d0] sm:$0xff] %v25468_v61  ;;  %v25478_v7 = vld [vmem:[%s33417_s0 + $0x20f0] sm:$0xff]  }
  0x41   :  { %v25470_v63 = vld [vmem:[%s33417_s0 + $0x14e0] sm:$0xff]   ;;  %20666 = vst [vmem:[%s33418_s1 + $0xe0] sm:$0xff] %v25469_v62  ;;  %v25479_v8 = vld [vmem:[%s33417_s0 + $0x14f0] sm:$0xff]   ;;  %20702 = vst [vmem:[%s33418_s1 + $0xf0] sm:$0xff] %v25478_v7 }
  0x42   :  { %v25471_v0 = vld [vmem:[%s33417_s0 + $0x8e0] sm:$0xff]   ;;  %20670 = vst [vmem:[%s33418_s1 + $0xce0] sm:$0xff] %v25470_v63  ;;  %v25480_v9 = vld [vmem:[%s33417_s0 + $0x8f0] sm:$0xff]   ;;  %20706 = vst [vmem:[%s33418_s1 + $0xcf0] sm:$0xff] %v25479_v8 }
  0x43   :  { %v25472_v1 = vld [vmem:[%s33417_s0 + $0x1ce0] sm:$0xff]   ;;  %20674 = vst [vmem:[%s33418_s1 + $0x18e0] sm:$0xff] %v25471_v0  ;;  %v25481_v10 = vld [vmem:[%s33417_s0 + $0x1cf0] sm:$0xff]   ;;  %20710 = vst [vmem:[%s33418_s1 + $0x18f0] sm:$0xff] %v25480_v9 }
  0x44   :  { %v25473_v2 = vld [vmem:[%s33417_s0 + $0x10e0] sm:$0xff]   ;;  %20678 = vst [vmem:[%s33418_s1 + $0x4e0] sm:$0xff] %v25472_v1  ;;  %v25482_v11 = vld [vmem:[%s33417_s0 + $0x10f0] sm:$0xff]   ;;  %20714 = vst [vmem:[%s33418_s1 + $0x4f0] sm:$0xff] %v25481_v10 }
  0x45   :  { %v25474_v3 = vld [vmem:[%s33417_s0 + $0x4e0] sm:$0xff]   ;;  %20682 = vst [vmem:[%s33418_s1 + $0x10e0] sm:$0xff] %v25473_v2  ;;  %v25483_v12 = vld [vmem:[%s33417_s0 + $0x4f0] sm:$0xff]   ;;  %20718 = vst [vmem:[%s33418_s1 + $0x10f0] sm:$0xff] %v25482_v11 }
  0x46   :  { %v25475_v4 = vld [vmem:[%s33417_s0 + $0x18e0] sm:$0xff]   ;;  %20686 = vst [vmem:[%s33418_s1 + $0x1ce0] sm:$0xff] %v25474_v3  ;;  %v25484_v13 = vld [vmem:[%s33417_s0 + $0x18f0] sm:$0xff]   ;;  %20722 = vst [vmem:[%s33418_s1 + $0x1cf0] sm:$0xff] %v25483_v12 }
  0x47   :  { %v25476_v5 = vld [vmem:[%s33417_s0 + $0xce0] sm:$0xff]   ;;  %20690 = vst [vmem:[%s33418_s1 + $0x8e0] sm:$0xff] %v25475_v4  ;;  %v25485_v14 = vld [vmem:[%s33417_s0 + $0xcf0] sm:$0xff]   ;;  %20726 = vst [vmem:[%s33418_s1 + $0x8f0] sm:$0xff] %v25484_v13 }
  0x48   :  { %v25477_v6 = vld [vmem:[%s33417_s0 + $0xe0] sm:$0xff]   ;;  %20694 = vst [vmem:[%s33418_s1 + $0x14e0] sm:$0xff] %v25476_v5  ;;  %v25486_v15 = vld [vmem:[%s33417_s0 + $0xf0] sm:$0xff]   ;;  %20730 = vst [vmem:[%s33418_s1 + $0x14f0] sm:$0xff] %v25485_v14 }
  0x49   :  { %20698 = vst [vmem:[%s33418_s1 + $0x20e0] sm:$0xff] %v25477_v6  ;;  %v25487_v16 = vld [vmem:[%s33417_s0 + $0x2100] sm:$0xff]   ;;  %20734 = vst [vmem:[%s33418_s1 + $0x20f0] sm:$0xff] %v25486_v15  ;;  %v25496_v25 = vld [vmem:[%s33417_s0 + $0x2110] sm:$0xff]  }
  0x4a   :  { %v25488_v17 = vld [vmem:[%s33417_s0 + $0x1500] sm:$0xff]   ;;  %20738 = vst [vmem:[%s33418_s1 + $0x100] sm:$0xff] %v25487_v16  ;;  %v25497_v26 = vld [vmem:[%s33417_s0 + $0x1510] sm:$0xff]   ;;  %20774 = vst [vmem:[%s33418_s1 + $0x110] sm:$0xff] %v25496_v25 }
  0x4b   :  { %v25489_v18 = vld [vmem:[%s33417_s0 + $0x900] sm:$0xff]   ;;  %20742 = vst [vmem:[%s33418_s1 + $0xd00] sm:$0xff] %v25488_v17  ;;  %v25498_v27 = vld [vmem:[%s33417_s0 + $0x910] sm:$0xff]   ;;  %20778 = vst [vmem:[%s33418_s1 + $0xd10] sm:$0xff] %v25497_v26 }
  0x4c   :  { %v25490_v19 = vld [vmem:[%s33417_s0 + $0x1d00] sm:$0xff]   ;;  %20746 = vst [vmem:[%s33418_s1 + $0x1900] sm:$0xff] %v25489_v18  ;;  %v25499_v28 = vld [vmem:[%s33417_s0 + $0x1d10] sm:$0xff]   ;;  %20782 = vst [vmem:[%s33418_s1 + $0x1910] sm:$0xff] %v25498_v27 }
  0x4d   :  { %v25491_v20 = vld [vmem:[%s33417_s0 + $0x1100] sm:$0xff]   ;;  %20750 = vst [vmem:[%s33418_s1 + $0x500] sm:$0xff] %v25490_v19  ;;  %v25500_v29 = vld [vmem:[%s33417_s0 + $0x1110] sm:$0xff]   ;;  %20786 = vst [vmem:[%s33418_s1 + $0x510] sm:$0xff] %v25499_v28 }
  0x4e   :  { %v25492_v21 = vld [vmem:[%s33417_s0 + $0x500] sm:$0xff]   ;;  %20754 = vst [vmem:[%s33418_s1 + $0x1100] sm:$0xff] %v25491_v20  ;;  %v25501_v30 = vld [vmem:[%s33417_s0 + $0x510] sm:$0xff]   ;;  %20790 = vst [vmem:[%s33418_s1 + $0x1110] sm:$0xff] %v25500_v29 }
  0x4f   :  { %v25493_v22 = vld [vmem:[%s33417_s0 + $0x1900] sm:$0xff]   ;;  %20758 = vst [vmem:[%s33418_s1 + $0x1d00] sm:$0xff] %v25492_v21  ;;  %v25502_v31 = vld [vmem:[%s33417_s0 + $0x1910] sm:$0xff]   ;;  %20794 = vst [vmem:[%s33418_s1 + $0x1d10] sm:$0xff] %v25501_v30 }
  0x50   :  { %v25494_v23 = vld [vmem:[%s33417_s0 + $0xd00] sm:$0xff]   ;;  %20762 = vst [vmem:[%s33418_s1 + $0x900] sm:$0xff] %v25493_v22  ;;  %v25503_v32 = vld [vmem:[%s33417_s0 + $0xd10] sm:$0xff]   ;;  %20798 = vst [vmem:[%s33418_s1 + $0x910] sm:$0xff] %v25502_v31 }
  0x51   :  { %v25495_v24 = vld [vmem:[%s33417_s0 + $0x100] sm:$0xff]   ;;  %20766 = vst [vmem:[%s33418_s1 + $0x1500] sm:$0xff] %v25494_v23  ;;  %v25504_v33 = vld [vmem:[%s33417_s0 + $0x110] sm:$0xff]   ;;  %20802 = vst [vmem:[%s33418_s1 + $0x1510] sm:$0xff] %v25503_v32 }
  0x52   :  { %20770 = vst [vmem:[%s33418_s1 + $0x2100] sm:$0xff] %v25495_v24  ;;  %v25505_v34 = vld [vmem:[%s33417_s0 + $0x2120] sm:$0xff]   ;;  %20806 = vst [vmem:[%s33418_s1 + $0x2110] sm:$0xff] %v25504_v33  ;;  %v25514_v43 = vld [vmem:[%s33417_s0 + $0x2130] sm:$0xff]  }
  0x53   :  { %v25506_v35 = vld [vmem:[%s33417_s0 + $0x1520] sm:$0xff]   ;;  %20810 = vst [vmem:[%s33418_s1 + $0x120] sm:$0xff] %v25505_v34  ;;  %v25515_v44 = vld [vmem:[%s33417_s0 + $0x1530] sm:$0xff]   ;;  %20846 = vst [vmem:[%s33418_s1 + $0x130] sm:$0xff] %v25514_v43 }
  0x54   :  { %v25507_v36 = vld [vmem:[%s33417_s0 + $0x920] sm:$0xff]   ;;  %20814 = vst [vmem:[%s33418_s1 + $0xd20] sm:$0xff] %v25506_v35  ;;  %v25516_v45 = vld [vmem:[%s33417_s0 + $0x930] sm:$0xff]   ;;  %20850 = vst [vmem:[%s33418_s1 + $0xd30] sm:$0xff] %v25515_v44 }
  0x55   :  { %v25508_v37 = vld [vmem:[%s33417_s0 + $0x1d20] sm:$0xff]   ;;  %20818 = vst [vmem:[%s33418_s1 + $0x1920] sm:$0xff] %v25507_v36  ;;  %v25517_v46 = vld [vmem:[%s33417_s0 + $0x1d30] sm:$0xff]   ;;  %20854 = vst [vmem:[%s33418_s1 + $0x1930] sm:$0xff] %v25516_v45 }
  0x56   :  { %v25509_v38 = vld [vmem:[%s33417_s0 + $0x1120] sm:$0xff]   ;;  %20822 = vst [vmem:[%s33418_s1 + $0x520] sm:$0xff] %v25508_v37  ;;  %v25518_v47 = vld [vmem:[%s33417_s0 + $0x1130] sm:$0xff]   ;;  %20858 = vst [vmem:[%s33418_s1 + $0x530] sm:$0xff] %v25517_v46 }
  0x57   :  { %v25510_v39 = vld [vmem:[%s33417_s0 + $0x520] sm:$0xff]   ;;  %20826 = vst [vmem:[%s33418_s1 + $0x1120] sm:$0xff] %v25509_v38  ;;  %v25519_v48 = vld [vmem:[%s33417_s0 + $0x530] sm:$0xff]   ;;  %20862 = vst [vmem:[%s33418_s1 + $0x1130] sm:$0xff] %v25518_v47 }
  0x58   :  { %v25511_v40 = vld [vmem:[%s33417_s0 + $0x1920] sm:$0xff]   ;;  %20830 = vst [vmem:[%s33418_s1 + $0x1d20] sm:$0xff] %v25510_v39  ;;  %v25520_v49 = vld [vmem:[%s33417_s0 + $0x1930] sm:$0xff]   ;;  %20866 = vst [vmem:[%s33418_s1 + $0x1d30] sm:$0xff] %v25519_v48 }
  0x59   :  { %v25512_v41 = vld [vmem:[%s33417_s0 + $0xd20] sm:$0xff]   ;;  %20834 = vst [vmem:[%s33418_s1 + $0x920] sm:$0xff] %v25511_v40  ;;  %v25521_v50 = vld [vmem:[%s33417_s0 + $0xd30] sm:$0xff]   ;;  %20870 = vst [vmem:[%s33418_s1 + $0x930] sm:$0xff] %v25520_v49 }
  0x5a   :  { %v25513_v42 = vld [vmem:[%s33417_s0 + $0x120] sm:$0xff]   ;;  %20838 = vst [vmem:[%s33418_s1 + $0x1520] sm:$0xff] %v25512_v41  ;;  %v25522_v51 = vld [vmem:[%s33417_s0 + $0x130] sm:$0xff]   ;;  %20874 = vst [vmem:[%s33418_s1 + $0x1530] sm:$0xff] %v25521_v50 }
  0x5b   :  { %20842 = vst [vmem:[%s33418_s1 + $0x2120] sm:$0xff] %v25513_v42  ;;  %v25523_v52 = vld [vmem:[%s33417_s0 + $0x2140] sm:$0xff]   ;;  %20878 = vst [vmem:[%s33418_s1 + $0x2130] sm:$0xff] %v25522_v51  ;;  %v25532_v61 = vld [vmem:[%s33417_s0 + $0x2150] sm:$0xff]  }
  0x5c   :  { %v25524_v53 = vld [vmem:[%s33417_s0 + $0x1540] sm:$0xff]   ;;  %20882 = vst [vmem:[%s33418_s1 + $0x140] sm:$0xff] %v25523_v52  ;;  %v25533_v62 = vld [vmem:[%s33417_s0 + $0x1550] sm:$0xff]   ;;  %20918 = vst [vmem:[%s33418_s1 + $0x150] sm:$0xff] %v25532_v61 }
  0x5d   :  { %v25525_v54 = vld [vmem:[%s33417_s0 + $0x940] sm:$0xff]   ;;  %20886 = vst [vmem:[%s33418_s1 + $0xd40] sm:$0xff] %v25524_v53  ;;  %v25534_v63 = vld [vmem:[%s33417_s0 + $0x950] sm:$0xff]   ;;  %20922 = vst [vmem:[%s33418_s1 + $0xd50] sm:$0xff] %v25533_v62 }
  0x5e   :  { %v25526_v55 = vld [vmem:[%s33417_s0 + $0x1d40] sm:$0xff]   ;;  %20890 = vst [vmem:[%s33418_s1 + $0x1940] sm:$0xff] %v25525_v54  ;;  %v25535_v0 = vld [vmem:[%s33417_s0 + $0x1d50] sm:$0xff]   ;;  %20926 = vst [vmem:[%s33418_s1 + $0x1950] sm:$0xff] %v25534_v63 }
  0x5f   :  { %v25527_v56 = vld [vmem:[%s33417_s0 + $0x1140] sm:$0xff]   ;;  %20894 = vst [vmem:[%s33418_s1 + $0x540] sm:$0xff] %v25526_v55  ;;  %v25536_v1 = vld [vmem:[%s33417_s0 + $0x1150] sm:$0xff]   ;;  %20930 = vst [vmem:[%s33418_s1 + $0x550] sm:$0xff] %v25535_v0 }
  0x60   :  { %v25528_v57 = vld [vmem:[%s33417_s0 + $0x540] sm:$0xff]   ;;  %20898 = vst [vmem:[%s33418_s1 + $0x1140] sm:$0xff] %v25527_v56  ;;  %v25537_v2 = vld [vmem:[%s33417_s0 + $0x550] sm:$0xff]   ;;  %20934 = vst [vmem:[%s33418_s1 + $0x1150] sm:$0xff] %v25536_v1 }
  0x61   :  { %v25529_v58 = vld [vmem:[%s33417_s0 + $0x1940] sm:$0xff]   ;;  %20902 = vst [vmem:[%s33418_s1 + $0x1d40] sm:$0xff] %v25528_v57  ;;  %v25538_v3 = vld [vmem:[%s33417_s0 + $0x1950] sm:$0xff]   ;;  %20938 = vst [vmem:[%s33418_s1 + $0x1d50] sm:$0xff] %v25537_v2 }
  0x62   :  { %v25530_v59 = vld [vmem:[%s33417_s0 + $0xd40] sm:$0xff]   ;;  %20906 = vst [vmem:[%s33418_s1 + $0x940] sm:$0xff] %v25529_v58  ;;  %v25539_v4 = vld [vmem:[%s33417_s0 + $0xd50] sm:$0xff]   ;;  %20942 = vst [vmem:[%s33418_s1 + $0x950] sm:$0xff] %v25538_v3 }
  0x63   :  { %v25531_v60 = vld [vmem:[%s33417_s0 + $0x140] sm:$0xff]   ;;  %20910 = vst [vmem:[%s33418_s1 + $0x1540] sm:$0xff] %v25530_v59  ;;  %v25540_v5 = vld [vmem:[%s33417_s0 + $0x150] sm:$0xff]   ;;  %20946 = vst [vmem:[%s33418_s1 + $0x1550] sm:$0xff] %v25539_v4 }
  0x64   :  { %20914 = vst [vmem:[%s33418_s1 + $0x2140] sm:$0xff] %v25531_v60  ;;  %v25541_v6 = vld [vmem:[%s33417_s0 + $0x2160] sm:$0xff]   ;;  %20950 = vst [vmem:[%s33418_s1 + $0x2150] sm:$0xff] %v25540_v5  ;;  %v25550_v15 = vld [vmem:[%s33417_s0 + $0x2170] sm:$0xff]  }
  0x65   :  { %v25542_v7 = vld [vmem:[%s33417_s0 + $0x1560] sm:$0xff]   ;;  %20954 = vst [vmem:[%s33418_s1 + $0x160] sm:$0xff] %v25541_v6  ;;  %v25551_v16 = vld [vmem:[%s33417_s0 + $0x1570] sm:$0xff]   ;;  %20990 = vst [vmem:[%s33418_s1 + $0x170] sm:$0xff] %v25550_v15 }
  0x66   :  { %v25543_v8 = vld [vmem:[%s33417_s0 + $0x960] sm:$0xff]   ;;  %20958 = vst [vmem:[%s33418_s1 + $0xd60] sm:$0xff] %v25542_v7  ;;  %v25552_v17 = vld [vmem:[%s33417_s0 + $0x970] sm:$0xff]   ;;  %20994 = vst [vmem:[%s33418_s1 + $0xd70] sm:$0xff] %v25551_v16 }
  0x67   :  { %v25544_v9 = vld [vmem:[%s33417_s0 + $0x1d60] sm:$0xff]   ;;  %20962 = vst [vmem:[%s33418_s1 + $0x1960] sm:$0xff] %v25543_v8  ;;  %v25553_v18 = vld [vmem:[%s33417_s0 + $0x1d70] sm:$0xff]   ;;  %20998 = vst [vmem:[%s33418_s1 + $0x1970] sm:$0xff] %v25552_v17 }
  0x68   :  { %v25545_v10 = vld [vmem:[%s33417_s0 + $0x1160] sm:$0xff]   ;;  %20966 = vst [vmem:[%s33418_s1 + $0x560] sm:$0xff] %v25544_v9  ;;  %v25554_v19 = vld [vmem:[%s33417_s0 + $0x1170] sm:$0xff]   ;;  %21002 = vst [vmem:[%s33418_s1 + $0x570] sm:$0xff] %v25553_v18 }
  0x69   :  { %v25546_v11 = vld [vmem:[%s33417_s0 + $0x560] sm:$0xff]   ;;  %20970 = vst [vmem:[%s33418_s1 + $0x1160] sm:$0xff] %v25545_v10  ;;  %v25555_v20 = vld [vmem:[%s33417_s0 + $0x570] sm:$0xff]   ;;  %21006 = vst [vmem:[%s33418_s1 + $0x1170] sm:$0xff] %v25554_v19 }
  0x6a   :  { %v25547_v12 = vld [vmem:[%s33417_s0 + $0x1960] sm:$0xff]   ;;  %20974 = vst [vmem:[%s33418_s1 + $0x1d60] sm:$0xff] %v25546_v11  ;;  %v25556_v21 = vld [vmem:[%s33417_s0 + $0x1970] sm:$0xff]   ;;  %21010 = vst [vmem:[%s33418_s1 + $0x1d70] sm:$0xff] %v25555_v20 }
  0x6b   :  { %v25548_v13 = vld [vmem:[%s33417_s0 + $0xd60] sm:$0xff]   ;;  %20978 = vst [vmem:[%s33418_s1 + $0x960] sm:$0xff] %v25547_v12  ;;  %v25557_v22 = vld [vmem:[%s33417_s0 + $0xd70] sm:$0xff]   ;;  %21014 = vst [vmem:[%s33418_s1 + $0x970] sm:$0xff] %v25556_v21 }
  0x6c   :  { %v25549_v14 = vld [vmem:[%s33417_s0 + $0x160] sm:$0xff]   ;;  %20982 = vst [vmem:[%s33418_s1 + $0x1560] sm:$0xff] %v25548_v13  ;;  %v25558_v23 = vld [vmem:[%s33417_s0 + $0x170] sm:$0xff]   ;;  %21018 = vst [vmem:[%s33418_s1 + $0x1570] sm:$0xff] %v25557_v22 }
  0x6d   :  { %20986 = vst [vmem:[%s33418_s1 + $0x2160] sm:$0xff] %v25549_v14  ;;  %v25559_v24 = vld [vmem:[%s33417_s0 + $0x2180] sm:$0xff]   ;;  %21022 = vst [vmem:[%s33418_s1 + $0x2170] sm:$0xff] %v25558_v23  ;;  %v25568_v33 = vld [vmem:[%s33417_s0 + $0x2190] sm:$0xff]  }
  0x6e   :  { %v25560_v25 = vld [vmem:[%s33417_s0 + $0x1580] sm:$0xff]   ;;  %21026 = vst [vmem:[%s33418_s1 + $0x180] sm:$0xff] %v25559_v24  ;;  %v25569_v34 = vld [vmem:[%s33417_s0 + $0x1590] sm:$0xff]   ;;  %21062 = vst [vmem:[%s33418_s1 + $0x190] sm:$0xff] %v25568_v33 }
  0x6f   :  { %v25561_v26 = vld [vmem:[%s33417_s0 + $0x980] sm:$0xff]   ;;  %21030 = vst [vmem:[%s33418_s1 + $0xd80] sm:$0xff] %v25560_v25  ;;  %v25570_v35 = vld [vmem:[%s33417_s0 + $0x990] sm:$0xff]   ;;  %21066 = vst [vmem:[%s33418_s1 + $0xd90] sm:$0xff] %v25569_v34 }
  0x70   :  { %v25562_v27 = vld [vmem:[%s33417_s0 + $0x1d80] sm:$0xff]   ;;  %21034 = vst [vmem:[%s33418_s1 + $0x1980] sm:$0xff] %v25561_v26  ;;  %v25571_v36 = vld [vmem:[%s33417_s0 + $0x1d90] sm:$0xff]   ;;  %21070 = vst [vmem:[%s33418_s1 + $0x1990] sm:$0xff] %v25570_v35 }
  0x71   :  { %v25563_v28 = vld [vmem:[%s33417_s0 + $0x1180] sm:$0xff]   ;;  %21038 = vst [vmem:[%s33418_s1 + $0x580] sm:$0xff] %v25562_v27  ;;  %v25572_v37 = vld [vmem:[%s33417_s0 + $0x1190] sm:$0xff]   ;;  %21074 = vst [vmem:[%s33418_s1 + $0x590] sm:$0xff] %v25571_v36 }
  0x72   :  { %v25564_v29 = vld [vmem:[%s33417_s0 + $0x580] sm:$0xff]   ;;  %21042 = vst [vmem:[%s33418_s1 + $0x1180] sm:$0xff] %v25563_v28  ;;  %v25573_v38 = vld [vmem:[%s33417_s0 + $0x590] sm:$0xff]   ;;  %21078 = vst [vmem:[%s33418_s1 + $0x1190] sm:$0xff] %v25572_v37 }
  0x73   :  { %v25565_v30 = vld [vmem:[%s33417_s0 + $0x1980] sm:$0xff]   ;;  %21046 = vst [vmem:[%s33418_s1 + $0x1d80] sm:$0xff] %v25564_v29  ;;  %v25574_v39 = vld [vmem:[%s33417_s0 + $0x1990] sm:$0xff]   ;;  %21082 = vst [vmem:[%s33418_s1 + $0x1d90] sm:$0xff] %v25573_v38 }
  0x74   :  { %v25566_v31 = vld [vmem:[%s33417_s0 + $0xd80] sm:$0xff]   ;;  %21050 = vst [vmem:[%s33418_s1 + $0x980] sm:$0xff] %v25565_v30  ;;  %v25575_v40 = vld [vmem:[%s33417_s0 + $0xd90] sm:$0xff]   ;;  %21086 = vst [vmem:[%s33418_s1 + $0x990] sm:$0xff] %v25574_v39 }
  0x75   :  { %v25567_v32 = vld [vmem:[%s33417_s0 + $0x180] sm:$0xff]   ;;  %21054 = vst [vmem:[%s33418_s1 + $0x1580] sm:$0xff] %v25566_v31  ;;  %v25576_v41 = vld [vmem:[%s33417_s0 + $0x190] sm:$0xff]   ;;  %21090 = vst [vmem:[%s33418_s1 + $0x1590] sm:$0xff] %v25575_v40 }
  0x76   :  { %21058 = vst [vmem:[%s33418_s1 + $0x2180] sm:$0xff] %v25567_v32  ;;  %v25577_v42 = vld [vmem:[%s33417_s0 + $0x21a0] sm:$0xff]   ;;  %21094 = vst [vmem:[%s33418_s1 + $0x2190] sm:$0xff] %v25576_v41  ;;  %v25586_v51 = vld [vmem:[%s33417_s0 + $0x21b0] sm:$0xff]  }
  0x77   :  { %v25578_v43 = vld [vmem:[%s33417_s0 + $0x15a0] sm:$0xff]   ;;  %21098 = vst [vmem:[%s33418_s1 + $0x1a0] sm:$0xff] %v25577_v42  ;;  %v25587_v52 = vld [vmem:[%s33417_s0 + $0x15b0] sm:$0xff]   ;;  %21134 = vst [vmem:[%s33418_s1 + $0x1b0] sm:$0xff] %v25586_v51 }
  0x78   :  { %v25579_v44 = vld [vmem:[%s33417_s0 + $0x9a0] sm:$0xff]   ;;  %21102 = vst [vmem:[%s33418_s1 + $0xda0] sm:$0xff] %v25578_v43  ;;  %v25588_v53 = vld [vmem:[%s33417_s0 + $0x9b0] sm:$0xff]   ;;  %21138 = vst [vmem:[%s33418_s1 + $0xdb0] sm:$0xff] %v25587_v52 }
  0x79   :  { %v25580_v45 = vld [vmem:[%s33417_s0 + $0x1da0] sm:$0xff]   ;;  %21106 = vst [vmem:[%s33418_s1 + $0x19a0] sm:$0xff] %v25579_v44  ;;  %v25589_v54 = vld [vmem:[%s33417_s0 + $0x1db0] sm:$0xff]   ;;  %21142 = vst [vmem:[%s33418_s1 + $0x19b0] sm:$0xff] %v25588_v53 }
  0x7a   :  { %v25581_v46 = vld [vmem:[%s33417_s0 + $0x11a0] sm:$0xff]   ;;  %21110 = vst [vmem:[%s33418_s1 + $0x5a0] sm:$0xff] %v25580_v45  ;;  %v25590_v55 = vld [vmem:[%s33417_s0 + $0x11b0] sm:$0xff]   ;;  %21146 = vst [vmem:[%s33418_s1 + $0x5b0] sm:$0xff] %v25589_v54 }
  0x7b   :  { %v25582_v47 = vld [vmem:[%s33417_s0 + $0x5a0] sm:$0xff]   ;;  %21114 = vst [vmem:[%s33418_s1 + $0x11a0] sm:$0xff] %v25581_v46  ;;  %v25591_v56 = vld [vmem:[%s33417_s0 + $0x5b0] sm:$0xff]   ;;  %21150 = vst [vmem:[%s33418_s1 + $0x11b0] sm:$0xff] %v25590_v55 }
  0x7c   :  { %v25583_v48 = vld [vmem:[%s33417_s0 + $0x19a0] sm:$0xff]   ;;  %21118 = vst [vmem:[%s33418_s1 + $0x1da0] sm:$0xff] %v25582_v47  ;;  %v25592_v57 = vld [vmem:[%s33417_s0 + $0x19b0] sm:$0xff]   ;;  %21154 = vst [vmem:[%s33418_s1 + $0x1db0] sm:$0xff] %v25591_v56 }
  0x7d   :  { %v25584_v49 = vld [vmem:[%s33417_s0 + $0xda0] sm:$0xff]   ;;  %21122 = vst [vmem:[%s33418_s1 + $0x9a0] sm:$0xff] %v25583_v48  ;;  %v25593_v58 = vld [vmem:[%s33417_s0 + $0xdb0] sm:$0xff]   ;;  %21158 = vst [vmem:[%s33418_s1 + $0x9b0] sm:$0xff] %v25592_v57 }
  0x7e   :  { %v25585_v50 = vld [vmem:[%s33417_s0 + $0x1a0] sm:$0xff]   ;;  %21126 = vst [vmem:[%s33418_s1 + $0x15a0] sm:$0xff] %v25584_v49  ;;  %v25594_v59 = vld [vmem:[%s33417_s0 + $0x1b0] sm:$0xff]   ;;  %21162 = vst [vmem:[%s33418_s1 + $0x15b0] sm:$0xff] %v25593_v58 }
  0x7f   :  { %21130 = vst [vmem:[%s33418_s1 + $0x21a0] sm:$0xff] %v25585_v50  ;;  %v25595_v60 = vld [vmem:[%s33417_s0 + $0x21c0] sm:$0xff]   ;;  %21166 = vst [vmem:[%s33418_s1 + $0x21b0] sm:$0xff] %v25594_v59  ;;  %v25604_v5 = vld [vmem:[%s33417_s0 + $0x21d0] sm:$0xff]  }
  0x80   :  { %v25596_v61 = vld [vmem:[%s33417_s0 + $0x15c0] sm:$0xff]   ;;  %21170 = vst [vmem:[%s33418_s1 + $0x1c0] sm:$0xff] %v25595_v60  ;;  %v25605_v6 = vld [vmem:[%s33417_s0 + $0x15d0] sm:$0xff]   ;;  %21206 = vst [vmem:[%s33418_s1 + $0x1d0] sm:$0xff] %v25604_v5 }
  0x81   :  { %v25597_v62 = vld [vmem:[%s33417_s0 + $0x9c0] sm:$0xff]   ;;  %21174 = vst [vmem:[%s33418_s1 + $0xdc0] sm:$0xff] %v25596_v61  ;;  %v25606_v7 = vld [vmem:[%s33417_s0 + $0x9d0] sm:$0xff]   ;;  %21210 = vst [vmem:[%s33418_s1 + $0xdd0] sm:$0xff] %v25605_v6 }
  0x82   :  { %v25598_v63 = vld [vmem:[%s33417_s0 + $0x1dc0] sm:$0xff]   ;;  %21178 = vst [vmem:[%s33418_s1 + $0x19c0] sm:$0xff] %v25597_v62  ;;  %v25607_v8 = vld [vmem:[%s33417_s0 + $0x1dd0] sm:$0xff]   ;;  %21214 = vst [vmem:[%s33418_s1 + $0x19d0] sm:$0xff] %v25606_v7 }
  0x83   :  { %v25599_v0 = vld [vmem:[%s33417_s0 + $0x11c0] sm:$0xff]   ;;  %21182 = vst [vmem:[%s33418_s1 + $0x5c0] sm:$0xff] %v25598_v63  ;;  %v25608_v9 = vld [vmem:[%s33417_s0 + $0x11d0] sm:$0xff]   ;;  %21218 = vst [vmem:[%s33418_s1 + $0x5d0] sm:$0xff] %v25607_v8 }
  0x84   :  { %v25600_v1 = vld [vmem:[%s33417_s0 + $0x5c0] sm:$0xff]   ;;  %21186 = vst [vmem:[%s33418_s1 + $0x11c0] sm:$0xff] %v25599_v0  ;;  %v25609_v10 = vld [vmem:[%s33417_s0 + $0x5d0] sm:$0xff]   ;;  %21222 = vst [vmem:[%s33418_s1 + $0x11d0] sm:$0xff] %v25608_v9 }
  0x85   :  { %v25601_v2 = vld [vmem:[%s33417_s0 + $0x19c0] sm:$0xff]   ;;  %21190 = vst [vmem:[%s33418_s1 + $0x1dc0] sm:$0xff] %v25600_v1  ;;  %v25610_v11 = vld [vmem:[%s33417_s0 + $0x19d0] sm:$0xff]   ;;  %21226 = vst [vmem:[%s33418_s1 + $0x1dd0] sm:$0xff] %v25609_v10 }
  0x86   :  { %v25602_v3 = vld [vmem:[%s33417_s0 + $0xdc0] sm:$0xff]   ;;  %21194 = vst [vmem:[%s33418_s1 + $0x9c0] sm:$0xff] %v25601_v2  ;;  %v25611_v12 = vld [vmem:[%s33417_s0 + $0xdd0] sm:$0xff]   ;;  %21230 = vst [vmem:[%s33418_s1 + $0x9d0] sm:$0xff] %v25610_v11 }
  0x87   :  { %v25603_v4 = vld [vmem:[%s33417_s0 + $0x1c0] sm:$0xff]   ;;  %21198 = vst [vmem:[%s33418_s1 + $0x15c0] sm:$0xff] %v25602_v3  ;;  %v25612_v13 = vld [vmem:[%s33417_s0 + $0x1d0] sm:$0xff]   ;;  %21234 = vst [vmem:[%s33418_s1 + $0x15d0] sm:$0xff] %v25611_v12 }
  0x88   :  { %21202 = vst [vmem:[%s33418_s1 + $0x21c0] sm:$0xff] %v25603_v4  ;;  %v25613_v14 = vld [vmem:[%s33417_s0 + $0x21e0] sm:$0xff]   ;;  %21238 = vst [vmem:[%s33418_s1 + $0x21d0] sm:$0xff] %v25612_v13  ;;  %v25622_v23 = vld [vmem:[%s33417_s0 + $0x21f0] sm:$0xff]  }
  0x89   :  { %v25614_v15 = vld [vmem:[%s33417_s0 + $0x15e0] sm:$0xff]   ;;  %21242 = vst [vmem:[%s33418_s1 + $0x1e0] sm:$0xff] %v25613_v14  ;;  %v25623_v24 = vld [vmem:[%s33417_s0 + $0x15f0] sm:$0xff]   ;;  %21278 = vst [vmem:[%s33418_s1 + $0x1f0] sm:$0xff] %v25622_v23 }
  0x8a   :  { %v25615_v16 = vld [vmem:[%s33417_s0 + $0x9e0] sm:$0xff]   ;;  %21246 = vst [vmem:[%s33418_s1 + $0xde0] sm:$0xff] %v25614_v15  ;;  %v25624_v25 = vld [vmem:[%s33417_s0 + $0x9f0] sm:$0xff]   ;;  %21282 = vst [vmem:[%s33418_s1 + $0xdf0] sm:$0xff] %v25623_v24 }
  0x8b   :  { %v25616_v17 = vld [vmem:[%s33417_s0 + $0x1de0] sm:$0xff]   ;;  %21250 = vst [vmem:[%s33418_s1 + $0x19e0] sm:$0xff] %v25615_v16  ;;  %v25625_v26 = vld [vmem:[%s33417_s0 + $0x1df0] sm:$0xff]   ;;  %21286 = vst [vmem:[%s33418_s1 + $0x19f0] sm:$0xff] %v25624_v25 }
  0x8c   :  { %v25617_v18 = vld [vmem:[%s33417_s0 + $0x11e0] sm:$0xff]   ;;  %21254 = vst [vmem:[%s33418_s1 + $0x5e0] sm:$0xff] %v25616_v17  ;;  %v25626_v27 = vld [vmem:[%s33417_s0 + $0x11f0] sm:$0xff]   ;;  %21290 = vst [vmem:[%s33418_s1 + $0x5f0] sm:$0xff] %v25625_v26 }
  0x8d   :  { %v25618_v19 = vld [vmem:[%s33417_s0 + $0x5e0] sm:$0xff]   ;;  %21258 = vst [vmem:[%s33418_s1 + $0x11e0] sm:$0xff] %v25617_v18  ;;  %v25627_v28 = vld [vmem:[%s33417_s0 + $0x5f0] sm:$0xff]   ;;  %21294 = vst [vmem:[%s33418_s1 + $0x11f0] sm:$0xff] %v25626_v27 }
  0x8e   :  { %v25619_v20 = vld [vmem:[%s33417_s0 + $0x19e0] sm:$0xff]   ;;  %21262 = vst [vmem:[%s33418_s1 + $0x1de0] sm:$0xff] %v25618_v19  ;;  %v25628_v29 = vld [vmem:[%s33417_s0 + $0x19f0] sm:$0xff]   ;;  %21298 = vst [vmem:[%s33418_s1 + $0x1df0] sm:$0xff] %v25627_v28 }
  0x8f   :  { %v25620_v21 = vld [vmem:[%s33417_s0 + $0xde0] sm:$0xff]   ;;  %21266 = vst [vmem:[%s33418_s1 + $0x9e0] sm:$0xff] %v25619_v20  ;;  %v25629_v30 = vld [vmem:[%s33417_s0 + $0xdf0] sm:$0xff]   ;;  %21302 = vst [vmem:[%s33418_s1 + $0x9f0] sm:$0xff] %v25628_v29 }
  0x90   :  { %v25621_v22 = vld [vmem:[%s33417_s0 + $0x1e0] sm:$0xff]   ;;  %21270 = vst [vmem:[%s33418_s1 + $0x15e0] sm:$0xff] %v25620_v21  ;;  %v25630_v31 = vld [vmem:[%s33417_s0 + $0x1f0] sm:$0xff]   ;;  %21306 = vst [vmem:[%s33418_s1 + $0x15f0] sm:$0xff] %v25629_v30 }
  0x91   :  { %21274 = vst [vmem:[%s33418_s1 + $0x21e0] sm:$0xff] %v25621_v22  ;;  %v25631_v32 = vld [vmem:[%s33417_s0 + $0x2200] sm:$0xff]   ;;  %21310 = vst [vmem:[%s33418_s1 + $0x21f0] sm:$0xff] %v25630_v31  ;;  %v25640_v41 = vld [vmem:[%s33417_s0 + $0x2210] sm:$0xff]  }
  0x92   :  { %v25632_v33 = vld [vmem:[%s33417_s0 + $0x1600] sm:$0xff]   ;;  %21314 = vst [vmem:[%s33418_s1 + $0x200] sm:$0xff] %v25631_v32  ;;  %v25641_v42 = vld [vmem:[%s33417_s0 + $0x1610] sm:$0xff]   ;;  %21350 = vst [vmem:[%s33418_s1 + $0x210] sm:$0xff] %v25640_v41 }
  0x93   :  { %v25633_v34 = vld [vmem:[%s33417_s0 + $0xa00] sm:$0xff]   ;;  %21318 = vst [vmem:[%s33418_s1 + $0xe00] sm:$0xff] %v25632_v33  ;;  %v25642_v43 = vld [vmem:[%s33417_s0 + $0xa10] sm:$0xff]   ;;  %21354 = vst [vmem:[%s33418_s1 + $0xe10] sm:$0xff] %v25641_v42 }
  0x94   :  { %v25634_v35 = vld [vmem:[%s33417_s0 + $0x1e00] sm:$0xff]   ;;  %21322 = vst [vmem:[%s33418_s1 + $0x1a00] sm:$0xff] %v25633_v34  ;;  %v25643_v44 = vld [vmem:[%s33417_s0 + $0x1e10] sm:$0xff]   ;;  %21358 = vst [vmem:[%s33418_s1 + $0x1a10] sm:$0xff] %v25642_v43 }
  0x95   :  { %v25635_v36 = vld [vmem:[%s33417_s0 + $0x1200] sm:$0xff]   ;;  %21326 = vst [vmem:[%s33418_s1 + $0x600] sm:$0xff] %v25634_v35  ;;  %v25644_v45 = vld [vmem:[%s33417_s0 + $0x1210] sm:$0xff]   ;;  %21362 = vst [vmem:[%s33418_s1 + $0x610] sm:$0xff] %v25643_v44 }
  0x96   :  { %v25636_v37 = vld [vmem:[%s33417_s0 + $0x600] sm:$0xff]   ;;  %21330 = vst [vmem:[%s33418_s1 + $0x1200] sm:$0xff] %v25635_v36  ;;  %v25645_v46 = vld [vmem:[%s33417_s0 + $0x610] sm:$0xff]   ;;  %21366 = vst [vmem:[%s33418_s1 + $0x1210] sm:$0xff] %v25644_v45 }
  0x97   :  { %v25637_v38 = vld [vmem:[%s33417_s0 + $0x1a00] sm:$0xff]   ;;  %21334 = vst [vmem:[%s33418_s1 + $0x1e00] sm:$0xff] %v25636_v37  ;;  %v25646_v47 = vld [vmem:[%s33417_s0 + $0x1a10] sm:$0xff]   ;;  %21370 = vst [vmem:[%s33418_s1 + $0x1e10] sm:$0xff] %v25645_v46 }
  0x98   :  { %v25638_v39 = vld [vmem:[%s33417_s0 + $0xe00] sm:$0xff]   ;;  %21338 = vst [vmem:[%s33418_s1 + $0xa00] sm:$0xff] %v25637_v38  ;;  %v25647_v48 = vld [vmem:[%s33417_s0 + $0xe10] sm:$0xff]   ;;  %21374 = vst [vmem:[%s33418_s1 + $0xa10] sm:$0xff] %v25646_v47 }
  0x99   :  { %v25639_v40 = vld [vmem:[%s33417_s0 + $0x200] sm:$0xff]   ;;  %21342 = vst [vmem:[%s33418_s1 + $0x1600] sm:$0xff] %v25638_v39  ;;  %v25648_v49 = vld [vmem:[%s33417_s0 + $0x210] sm:$0xff]   ;;  %21378 = vst [vmem:[%s33418_s1 + $0x1610] sm:$0xff] %v25647_v48 }
  0x9a   :  { %21346 = vst [vmem:[%s33418_s1 + $0x2200] sm:$0xff] %v25639_v40  ;;  %v25649_v50 = vld [vmem:[%s33417_s0 + $0x2220] sm:$0xff]   ;;  %21382 = vst [vmem:[%s33418_s1 + $0x2210] sm:$0xff] %v25648_v49  ;;  %v25658_v59 = vld [vmem:[%s33417_s0 + $0x2230] sm:$0xff]  }
  0x9b   :  { %v25650_v51 = vld [vmem:[%s33417_s0 + $0x1620] sm:$0xff]   ;;  %21386 = vst [vmem:[%s33418_s1 + $0x220] sm:$0xff] %v25649_v50  ;;  %v25659_v60 = vld [vmem:[%s33417_s0 + $0x1630] sm:$0xff]   ;;  %21422 = vst [vmem:[%s33418_s1 + $0x230] sm:$0xff] %v25658_v59 }
  0x9c   :  { %v25651_v52 = vld [vmem:[%s33417_s0 + $0xa20] sm:$0xff]   ;;  %21390 = vst [vmem:[%s33418_s1 + $0xe20] sm:$0xff] %v25650_v51  ;;  %v25660_v61 = vld [vmem:[%s33417_s0 + $0xa30] sm:$0xff]   ;;  %21426 = vst [vmem:[%s33418_s1 + $0xe30] sm:$0xff] %v25659_v60 }
  0x9d   :  { %v25652_v53 = vld [vmem:[%s33417_s0 + $0x1e20] sm:$0xff]   ;;  %21394 = vst [vmem:[%s33418_s1 + $0x1a20] sm:$0xff] %v25651_v52  ;;  %v25661_v62 = vld [vmem:[%s33417_s0 + $0x1e30] sm:$0xff]   ;;  %21430 = vst [vmem:[%s33418_s1 + $0x1a30] sm:$0xff] %v25660_v61 }
  0x9e   :  { %v25653_v54 = vld [vmem:[%s33417_s0 + $0x1220] sm:$0xff]   ;;  %21398 = vst [vmem:[%s33418_s1 + $0x620] sm:$0xff] %v25652_v53  ;;  %v25662_v63 = vld [vmem:[%s33417_s0 + $0x1230] sm:$0xff]   ;;  %21434 = vst [vmem:[%s33418_s1 + $0x630] sm:$0xff] %v25661_v62 }
  0x9f   :  { %v25654_v55 = vld [vmem:[%s33417_s0 + $0x620] sm:$0xff]   ;;  %21402 = vst [vmem:[%s33418_s1 + $0x1220] sm:$0xff] %v25653_v54  ;;  %v25663_v0 = vld [vmem:[%s33417_s0 + $0x630] sm:$0xff]   ;;  %21438 = vst [vmem:[%s33418_s1 + $0x1230] sm:$0xff] %v25662_v63 }
  0xa0   :  { %v25655_v56 = vld [vmem:[%s33417_s0 + $0x1a20] sm:$0xff]   ;;  %21406 = vst [vmem:[%s33418_s1 + $0x1e20] sm:$0xff] %v25654_v55  ;;  %v25664_v1 = vld [vmem:[%s33417_s0 + $0x1a30] sm:$0xff]   ;;  %21442 = vst [vmem:[%s33418_s1 + $0x1e30] sm:$0xff] %v25663_v0 }
  0xa1   :  { %v25656_v57 = vld [vmem:[%s33417_s0 + $0xe20] sm:$0xff]   ;;  %21410 = vst [vmem:[%s33418_s1 + $0xa20] sm:$0xff] %v25655_v56  ;;  %v25665_v2 = vld [vmem:[%s33417_s0 + $0xe30] sm:$0xff]   ;;  %21446 = vst [vmem:[%s33418_s1 + $0xa30] sm:$0xff] %v25664_v1 }
  0xa2   :  { %v25657_v58 = vld [vmem:[%s33417_s0 + $0x220] sm:$0xff]   ;;  %21414 = vst [vmem:[%s33418_s1 + $0x1620] sm:$0xff] %v25656_v57  ;;  %v25666_v3 = vld [vmem:[%s33417_s0 + $0x230] sm:$0xff]   ;;  %21450 = vst [vmem:[%s33418_s1 + $0x1630] sm:$0xff] %v25665_v2 }
  0xa3   :  { %21418 = vst [vmem:[%s33418_s1 + $0x2220] sm:$0xff] %v25657_v58  ;;  %v25667_v4 = vld [vmem:[%s33417_s0 + $0x2240] sm:$0xff]   ;;  %21454 = vst [vmem:[%s33418_s1 + $0x2230] sm:$0xff] %v25666_v3  ;;  %v25676_v13 = vld [vmem:[%s33417_s0 + $0x2250] sm:$0xff]  }
  0xa4   :  { %v25668_v5 = vld [vmem:[%s33417_s0 + $0x1640] sm:$0xff]   ;;  %21458 = vst [vmem:[%s33418_s1 + $0x240] sm:$0xff] %v25667_v4  ;;  %v25677_v14 = vld [vmem:[%s33417_s0 + $0x1650] sm:$0xff]   ;;  %21494 = vst [vmem:[%s33418_s1 + $0x250] sm:$0xff] %v25676_v13 }
  0xa5   :  { %v25669_v6 = vld [vmem:[%s33417_s0 + $0xa40] sm:$0xff]   ;;  %21462 = vst [vmem:[%s33418_s1 + $0xe40] sm:$0xff] %v25668_v5  ;;  %v25678_v15 = vld [vmem:[%s33417_s0 + $0xa50] sm:$0xff]   ;;  %21498 = vst [vmem:[%s33418_s1 + $0xe50] sm:$0xff] %v25677_v14 }
  0xa6   :  { %v25670_v7 = vld [vmem:[%s33417_s0 + $0x1e40] sm:$0xff]   ;;  %21466 = vst [vmem:[%s33418_s1 + $0x1a40] sm:$0xff] %v25669_v6  ;;  %v25679_v16 = vld [vmem:[%s33417_s0 + $0x1e50] sm:$0xff]   ;;  %21502 = vst [vmem:[%s33418_s1 + $0x1a50] sm:$0xff] %v25678_v15 }
  0xa7   :  { %v25671_v8 = vld [vmem:[%s33417_s0 + $0x1240] sm:$0xff]   ;;  %21470 = vst [vmem:[%s33418_s1 + $0x640] sm:$0xff] %v25670_v7  ;;  %v25680_v17 = vld [vmem:[%s33417_s0 + $0x1250] sm:$0xff]   ;;  %21506 = vst [vmem:[%s33418_s1 + $0x650] sm:$0xff] %v25679_v16 }
  0xa8   :  { %v25672_v9 = vld [vmem:[%s33417_s0 + $0x640] sm:$0xff]   ;;  %21474 = vst [vmem:[%s33418_s1 + $0x1240] sm:$0xff] %v25671_v8  ;;  %v25681_v18 = vld [vmem:[%s33417_s0 + $0x650] sm:$0xff]   ;;  %21510 = vst [vmem:[%s33418_s1 + $0x1250] sm:$0xff] %v25680_v17 }
  0xa9   :  { %v25673_v10 = vld [vmem:[%s33417_s0 + $0x1a40] sm:$0xff]   ;;  %21478 = vst [vmem:[%s33418_s1 + $0x1e40] sm:$0xff] %v25672_v9  ;;  %v25682_v19 = vld [vmem:[%s33417_s0 + $0x1a50] sm:$0xff]   ;;  %21514 = vst [vmem:[%s33418_s1 + $0x1e50] sm:$0xff] %v25681_v18 }
  0xaa   :  { %v25674_v11 = vld [vmem:[%s33417_s0 + $0xe40] sm:$0xff]   ;;  %21482 = vst [vmem:[%s33418_s1 + $0xa40] sm:$0xff] %v25673_v10  ;;  %v25683_v20 = vld [vmem:[%s33417_s0 + $0xe50] sm:$0xff]   ;;  %21518 = vst [vmem:[%s33418_s1 + $0xa50] sm:$0xff] %v25682_v19 }
  0xab   :  { %v25675_v12 = vld [vmem:[%s33417_s0 + $0x240] sm:$0xff]   ;;  %21486 = vst [vmem:[%s33418_s1 + $0x1640] sm:$0xff] %v25674_v11  ;;  %v25684_v21 = vld [vmem:[%s33417_s0 + $0x250] sm:$0xff]   ;;  %21522 = vst [vmem:[%s33418_s1 + $0x1650] sm:$0xff] %v25683_v20 }
  0xac   :  { %21490 = vst [vmem:[%s33418_s1 + $0x2240] sm:$0xff] %v25675_v12  ;;  %v25685_v22 = vld [vmem:[%s33417_s0 + $0x2260] sm:$0xff]   ;;  %21526 = vst [vmem:[%s33418_s1 + $0x2250] sm:$0xff] %v25684_v21  ;;  %v25694_v31 = vld [vmem:[%s33417_s0 + $0x2270] sm:$0xff]  }
  0xad   :  { %v25686_v23 = vld [vmem:[%s33417_s0 + $0x1660] sm:$0xff]   ;;  %21530 = vst [vmem:[%s33418_s1 + $0x260] sm:$0xff] %v25685_v22  ;;  %v25695_v32 = vld [vmem:[%s33417_s0 + $0x1670] sm:$0xff]   ;;  %21566 = vst [vmem:[%s33418_s1 + $0x270] sm:$0xff] %v25694_v31 }
  0xae   :  { %v25687_v24 = vld [vmem:[%s33417_s0 + $0xa60] sm:$0xff]   ;;  %21534 = vst [vmem:[%s33418_s1 + $0xe60] sm:$0xff] %v25686_v23  ;;  %v25696_v33 = vld [vmem:[%s33417_s0 + $0xa70] sm:$0xff]   ;;  %21570 = vst [vmem:[%s33418_s1 + $0xe70] sm:$0xff] %v25695_v32 }
  0xaf   :  { %v25688_v25 = vld [vmem:[%s33417_s0 + $0x1e60] sm:$0xff]   ;;  %21538 = vst [vmem:[%s33418_s1 + $0x1a60] sm:$0xff] %v25687_v24  ;;  %v25697_v34 = vld [vmem:[%s33417_s0 + $0x1e70] sm:$0xff]   ;;  %21574 = vst [vmem:[%s33418_s1 + $0x1a70] sm:$0xff] %v25696_v33 }
  0xb0   :  { %v25689_v26 = vld [vmem:[%s33417_s0 + $0x1260] sm:$0xff]   ;;  %21542 = vst [vmem:[%s33418_s1 + $0x660] sm:$0xff] %v25688_v25  ;;  %v25698_v35 = vld [vmem:[%s33417_s0 + $0x1270] sm:$0xff]   ;;  %21578 = vst [vmem:[%s33418_s1 + $0x670] sm:$0xff] %v25697_v34 }
  0xb1   :  { %v25690_v27 = vld [vmem:[%s33417_s0 + $0x660] sm:$0xff]   ;;  %21546 = vst [vmem:[%s33418_s1 + $0x1260] sm:$0xff] %v25689_v26  ;;  %v25699_v36 = vld [vmem:[%s33417_s0 + $0x670] sm:$0xff]   ;;  %21582 = vst [vmem:[%s33418_s1 + $0x1270] sm:$0xff] %v25698_v35 }
  0xb2   :  { %v25691_v28 = vld [vmem:[%s33417_s0 + $0x1a60] sm:$0xff]   ;;  %21550 = vst [vmem:[%s33418_s1 + $0x1e60] sm:$0xff] %v25690_v27  ;;  %v25700_v37 = vld [vmem:[%s33417_s0 + $0x1a70] sm:$0xff]   ;;  %21586 = vst [vmem:[%s33418_s1 + $0x1e70] sm:$0xff] %v25699_v36 }
  0xb3   :  { %v25692_v29 = vld [vmem:[%s33417_s0 + $0xe60] sm:$0xff]   ;;  %21554 = vst [vmem:[%s33418_s1 + $0xa60] sm:$0xff] %v25691_v28  ;;  %v25701_v38 = vld [vmem:[%s33417_s0 + $0xe70] sm:$0xff]   ;;  %21590 = vst [vmem:[%s33418_s1 + $0xa70] sm:$0xff] %v25700_v37 }
  0xb4   :  { %v25693_v30 = vld [vmem:[%s33417_s0 + $0x260] sm:$0xff]   ;;  %21558 = vst [vmem:[%s33418_s1 + $0x1660] sm:$0xff] %v25692_v29  ;;  %v25702_v39 = vld [vmem:[%s33417_s0 + $0x270] sm:$0xff]   ;;  %21594 = vst [vmem:[%s33418_s1 + $0x1670] sm:$0xff] %v25701_v38 }
  0xb5   :  { %21562 = vst [vmem:[%s33418_s1 + $0x2260] sm:$0xff] %v25693_v30  ;;  %v25703_v40 = vld [vmem:[%s33417_s0 + $0x2280] sm:$0xff]   ;;  %21598 = vst [vmem:[%s33418_s1 + $0x2270] sm:$0xff] %v25702_v39  ;;  %v25712_v49 = vld [vmem:[%s33417_s0 + $0x2290] sm:$0xff]  }
  0xb6   :  { %v25704_v41 = vld [vmem:[%s33417_s0 + $0x1680] sm:$0xff]   ;;  %21602 = vst [vmem:[%s33418_s1 + $0x280] sm:$0xff] %v25703_v40  ;;  %v25713_v50 = vld [vmem:[%s33417_s0 + $0x1690] sm:$0xff]   ;;  %21638 = vst [vmem:[%s33418_s1 + $0x290] sm:$0xff] %v25712_v49 }
  0xb7   :  { %v25705_v42 = vld [vmem:[%s33417_s0 + $0xa80] sm:$0xff]   ;;  %21606 = vst [vmem:[%s33418_s1 + $0xe80] sm:$0xff] %v25704_v41  ;;  %v25714_v51 = vld [vmem:[%s33417_s0 + $0xa90] sm:$0xff]   ;;  %21642 = vst [vmem:[%s33418_s1 + $0xe90] sm:$0xff] %v25713_v50 }
  0xb8   :  { %v25706_v43 = vld [vmem:[%s33417_s0 + $0x1e80] sm:$0xff]   ;;  %21610 = vst [vmem:[%s33418_s1 + $0x1a80] sm:$0xff] %v25705_v42  ;;  %v25715_v52 = vld [vmem:[%s33417_s0 + $0x1e90] sm:$0xff]   ;;  %21646 = vst [vmem:[%s33418_s1 + $0x1a90] sm:$0xff] %v25714_v51 }
  0xb9   :  { %v25707_v44 = vld [vmem:[%s33417_s0 + $0x1280] sm:$0xff]   ;;  %21614 = vst [vmem:[%s33418_s1 + $0x680] sm:$0xff] %v25706_v43  ;;  %v25716_v53 = vld [vmem:[%s33417_s0 + $0x1290] sm:$0xff]   ;;  %21650 = vst [vmem:[%s33418_s1 + $0x690] sm:$0xff] %v25715_v52 }
  0xba   :  { %v25708_v45 = vld [vmem:[%s33417_s0 + $0x680] sm:$0xff]   ;;  %21618 = vst [vmem:[%s33418_s1 + $0x1280] sm:$0xff] %v25707_v44  ;;  %v25717_v54 = vld [vmem:[%s33417_s0 + $0x690] sm:$0xff]   ;;  %21654 = vst [vmem:[%s33418_s1 + $0x1290] sm:$0xff] %v25716_v53 }
  0xbb   :  { %v25709_v46 = vld [vmem:[%s33417_s0 + $0x1a80] sm:$0xff]   ;;  %21622 = vst [vmem:[%s33418_s1 + $0x1e80] sm:$0xff] %v25708_v45  ;;  %v25718_v55 = vld [vmem:[%s33417_s0 + $0x1a90] sm:$0xff]   ;;  %21658 = vst [vmem:[%s33418_s1 + $0x1e90] sm:$0xff] %v25717_v54 }
  0xbc   :  { %v25710_v47 = vld [vmem:[%s33417_s0 + $0xe80] sm:$0xff]   ;;  %21626 = vst [vmem:[%s33418_s1 + $0xa80] sm:$0xff] %v25709_v46  ;;  %v25719_v56 = vld [vmem:[%s33417_s0 + $0xe90] sm:$0xff]   ;;  %21662 = vst [vmem:[%s33418_s1 + $0xa90] sm:$0xff] %v25718_v55 }
  0xbd   :  { %v25711_v48 = vld [vmem:[%s33417_s0 + $0x280] sm:$0xff]   ;;  %21630 = vst [vmem:[%s33418_s1 + $0x1680] sm:$0xff] %v25710_v47  ;;  %v25720_v57 = vld [vmem:[%s33417_s0 + $0x290] sm:$0xff]   ;;  %21666 = vst [vmem:[%s33418_s1 + $0x1690] sm:$0xff] %v25719_v56 }
  0xbe   :  { %21634 = vst [vmem:[%s33418_s1 + $0x2280] sm:$0xff] %v25711_v48  ;;  %v25721_v58 = vld [vmem:[%s33417_s0 + $0x22a0] sm:$0xff]   ;;  %21670 = vst [vmem:[%s33418_s1 + $0x2290] sm:$0xff] %v25720_v57  ;;  %v25730_v3 = vld [vmem:[%s33417_s0 + $0x22b0] sm:$0xff]  }
  0xbf   :  { %v25722_v59 = vld [vmem:[%s33417_s0 + $0x16a0] sm:$0xff]   ;;  %21674 = vst [vmem:[%s33418_s1 + $0x2a0] sm:$0xff] %v25721_v58  ;;  %v25731_v4 = vld [vmem:[%s33417_s0 + $0x16b0] sm:$0xff]   ;;  %21710 = vst [vmem:[%s33418_s1 + $0x2b0] sm:$0xff] %v25730_v3 }
  0xc0   :  { %v25723_v60 = vld [vmem:[%s33417_s0 + $0xaa0] sm:$0xff]   ;;  %21678 = vst [vmem:[%s33418_s1 + $0xea0] sm:$0xff] %v25722_v59  ;;  %v25732_v5 = vld [vmem:[%s33417_s0 + $0xab0] sm:$0xff]   ;;  %21714 = vst [vmem:[%s33418_s1 + $0xeb0] sm:$0xff] %v25731_v4 }
  0xc1   :  { %v25724_v61 = vld [vmem:[%s33417_s0 + $0x1ea0] sm:$0xff]   ;;  %21682 = vst [vmem:[%s33418_s1 + $0x1aa0] sm:$0xff] %v25723_v60  ;;  %v25733_v6 = vld [vmem:[%s33417_s0 + $0x1eb0] sm:$0xff]   ;;  %21718 = vst [vmem:[%s33418_s1 + $0x1ab0] sm:$0xff] %v25732_v5 }
  0xc2   :  { %v25725_v62 = vld [vmem:[%s33417_s0 + $0x12a0] sm:$0xff]   ;;  %21686 = vst [vmem:[%s33418_s1 + $0x6a0] sm:$0xff] %v25724_v61  ;;  %v25734_v7 = vld [vmem:[%s33417_s0 + $0x12b0] sm:$0xff]   ;;  %21722 = vst [vmem:[%s33418_s1 + $0x6b0] sm:$0xff] %v25733_v6 }
  0xc3   :  { %v25726_v63 = vld [vmem:[%s33417_s0 + $0x6a0] sm:$0xff]   ;;  %21690 = vst [vmem:[%s33418_s1 + $0x12a0] sm:$0xff] %v25725_v62  ;;  %v25735_v8 = vld [vmem:[%s33417_s0 + $0x6b0] sm:$0xff]   ;;  %21726 = vst [vmem:[%s33418_s1 + $0x12b0] sm:$0xff] %v25734_v7 }
  0xc4   :  { %v25727_v0 = vld [vmem:[%s33417_s0 + $0x1aa0] sm:$0xff]   ;;  %21694 = vst [vmem:[%s33418_s1 + $0x1ea0] sm:$0xff] %v25726_v63  ;;  %v25736_v9 = vld [vmem:[%s33417_s0 + $0x1ab0] sm:$0xff]   ;;  %21730 = vst [vmem:[%s33418_s1 + $0x1eb0] sm:$0xff] %v25735_v8 }
  0xc5   :  { %v25728_v1 = vld [vmem:[%s33417_s0 + $0xea0] sm:$0xff]   ;;  %21698 = vst [vmem:[%s33418_s1 + $0xaa0] sm:$0xff] %v25727_v0  ;;  %v25737_v10 = vld [vmem:[%s33417_s0 + $0xeb0] sm:$0xff]   ;;  %21734 = vst [vmem:[%s33418_s1 + $0xab0] sm:$0xff] %v25736_v9 }
  0xc6   :  { %v25729_v2 = vld [vmem:[%s33417_s0 + $0x2a0] sm:$0xff]   ;;  %21702 = vst [vmem:[%s33418_s1 + $0x16a0] sm:$0xff] %v25728_v1  ;;  %v25738_v11 = vld [vmem:[%s33417_s0 + $0x2b0] sm:$0xff]   ;;  %21738 = vst [vmem:[%s33418_s1 + $0x16b0] sm:$0xff] %v25737_v10 }
  0xc7   :  { %21706 = vst [vmem:[%s33418_s1 + $0x22a0] sm:$0xff] %v25729_v2  ;;  %v25739_v12 = vld [vmem:[%s33417_s0 + $0x22c0] sm:$0xff]   ;;  %21742 = vst [vmem:[%s33418_s1 + $0x22b0] sm:$0xff] %v25738_v11  ;;  %v25748_v21 = vld [vmem:[%s33417_s0 + $0x22d0] sm:$0xff]  }
  0xc8   :  { %v25740_v13 = vld [vmem:[%s33417_s0 + $0x16c0] sm:$0xff]   ;;  %21746 = vst [vmem:[%s33418_s1 + $0x2c0] sm:$0xff] %v25739_v12  ;;  %v25749_v22 = vld [vmem:[%s33417_s0 + $0x16d0] sm:$0xff]   ;;  %21782 = vst [vmem:[%s33418_s1 + $0x2d0] sm:$0xff] %v25748_v21 }
  0xc9   :  { %v25741_v14 = vld [vmem:[%s33417_s0 + $0xac0] sm:$0xff]   ;;  %21750 = vst [vmem:[%s33418_s1 + $0xec0] sm:$0xff] %v25740_v13  ;;  %v25750_v23 = vld [vmem:[%s33417_s0 + $0xad0] sm:$0xff]   ;;  %21786 = vst [vmem:[%s33418_s1 + $0xed0] sm:$0xff] %v25749_v22 }
  0xca   :  { %v25742_v15 = vld [vmem:[%s33417_s0 + $0x1ec0] sm:$0xff]   ;;  %21754 = vst [vmem:[%s33418_s1 + $0x1ac0] sm:$0xff] %v25741_v14  ;;  %v25751_v24 = vld [vmem:[%s33417_s0 + $0x1ed0] sm:$0xff]   ;;  %21790 = vst [vmem:[%s33418_s1 + $0x1ad0] sm:$0xff] %v25750_v23 }
  0xcb   :  { %v25743_v16 = vld [vmem:[%s33417_s0 + $0x12c0] sm:$0xff]   ;;  %21758 = vst [vmem:[%s33418_s1 + $0x6c0] sm:$0xff] %v25742_v15  ;;  %v25752_v25 = vld [vmem:[%s33417_s0 + $0x12d0] sm:$0xff]   ;;  %21794 = vst [vmem:[%s33418_s1 + $0x6d0] sm:$0xff] %v25751_v24 }
  0xcc   :  { %v25744_v17 = vld [vmem:[%s33417_s0 + $0x6c0] sm:$0xff]   ;;  %21762 = vst [vmem:[%s33418_s1 + $0x12c0] sm:$0xff] %v25743_v16  ;;  %v25753_v26 = vld [vmem:[%s33417_s0 + $0x6d0] sm:$0xff]   ;;  %21798 = vst [vmem:[%s33418_s1 + $0x12d0] sm:$0xff] %v25752_v25 }
  0xcd   :  { %v25745_v18 = vld [vmem:[%s33417_s0 + $0x1ac0] sm:$0xff]   ;;  %21766 = vst [vmem:[%s33418_s1 + $0x1ec0] sm:$0xff] %v25744_v17  ;;  %v25754_v27 = vld [vmem:[%s33417_s0 + $0x1ad0] sm:$0xff]   ;;  %21802 = vst [vmem:[%s33418_s1 + $0x1ed0] sm:$0xff] %v25753_v26 }
  0xce   :  { %v25746_v19 = vld [vmem:[%s33417_s0 + $0xec0] sm:$0xff]   ;;  %21770 = vst [vmem:[%s33418_s1 + $0xac0] sm:$0xff] %v25745_v18  ;;  %v25755_v28 = vld [vmem:[%s33417_s0 + $0xed0] sm:$0xff]   ;;  %21806 = vst [vmem:[%s33418_s1 + $0xad0] sm:$0xff] %v25754_v27 }
  0xcf   :  { %v25747_v20 = vld [vmem:[%s33417_s0 + $0x2c0] sm:$0xff]   ;;  %21774 = vst [vmem:[%s33418_s1 + $0x16c0] sm:$0xff] %v25746_v19  ;;  %v25756_v29 = vld [vmem:[%s33417_s0 + $0x2d0] sm:$0xff]   ;;  %21810 = vst [vmem:[%s33418_s1 + $0x16d0] sm:$0xff] %v25755_v28 }
  0xd0   :  { %21778 = vst [vmem:[%s33418_s1 + $0x22c0] sm:$0xff] %v25747_v20  ;;  %v25757_v30 = vld [vmem:[%s33417_s0 + $0x22e0] sm:$0xff]   ;;  %21814 = vst [vmem:[%s33418_s1 + $0x22d0] sm:$0xff] %v25756_v29  ;;  %v25766_v39 = vld [vmem:[%s33417_s0 + $0x22f0] sm:$0xff]  }
  0xd1   :  { %v25758_v31 = vld [vmem:[%s33417_s0 + $0x16e0] sm:$0xff]   ;;  %21818 = vst [vmem:[%s33418_s1 + $0x2e0] sm:$0xff] %v25757_v30  ;;  %v25767_v40 = vld [vmem:[%s33417_s0 + $0x16f0] sm:$0xff]   ;;  %21854 = vst [vmem:[%s33418_s1 + $0x2f0] sm:$0xff] %v25766_v39 }
  0xd2   :  { %v25759_v32 = vld [vmem:[%s33417_s0 + $0xae0] sm:$0xff]   ;;  %21822 = vst [vmem:[%s33418_s1 + $0xee0] sm:$0xff] %v25758_v31  ;;  %v25768_v41 = vld [vmem:[%s33417_s0 + $0xaf0] sm:$0xff]   ;;  %21858 = vst [vmem:[%s33418_s1 + $0xef0] sm:$0xff] %v25767_v40 }
  0xd3   :  { %v25760_v33 = vld [vmem:[%s33417_s0 + $0x1ee0] sm:$0xff]   ;;  %21826 = vst [vmem:[%s33418_s1 + $0x1ae0] sm:$0xff] %v25759_v32  ;;  %v25769_v42 = vld [vmem:[%s33417_s0 + $0x1ef0] sm:$0xff]   ;;  %21862 = vst [vmem:[%s33418_s1 + $0x1af0] sm:$0xff] %v25768_v41 }
  0xd4   :  { %v25761_v34 = vld [vmem:[%s33417_s0 + $0x12e0] sm:$0xff]   ;;  %21830 = vst [vmem:[%s33418_s1 + $0x6e0] sm:$0xff] %v25760_v33  ;;  %v25770_v43 = vld [vmem:[%s33417_s0 + $0x12f0] sm:$0xff]   ;;  %21866 = vst [vmem:[%s33418_s1 + $0x6f0] sm:$0xff] %v25769_v42 }
  0xd5   :  { %v25762_v35 = vld [vmem:[%s33417_s0 + $0x6e0] sm:$0xff]   ;;  %21834 = vst [vmem:[%s33418_s1 + $0x12e0] sm:$0xff] %v25761_v34  ;;  %v25771_v44 = vld [vmem:[%s33417_s0 + $0x6f0] sm:$0xff]   ;;  %21870 = vst [vmem:[%s33418_s1 + $0x12f0] sm:$0xff] %v25770_v43 }
  0xd6   :  { %v25763_v36 = vld [vmem:[%s33417_s0 + $0x1ae0] sm:$0xff]   ;;  %21838 = vst [vmem:[%s33418_s1 + $0x1ee0] sm:$0xff] %v25762_v35  ;;  %v25772_v45 = vld [vmem:[%s33417_s0 + $0x1af0] sm:$0xff]   ;;  %21874 = vst [vmem:[%s33418_s1 + $0x1ef0] sm:$0xff] %v25771_v44 }
  0xd7   :  { %v25764_v37 = vld [vmem:[%s33417_s0 + $0xee0] sm:$0xff]   ;;  %21842 = vst [vmem:[%s33418_s1 + $0xae0] sm:$0xff] %v25763_v36  ;;  %v25773_v46 = vld [vmem:[%s33417_s0 + $0xef0] sm:$0xff]   ;;  %21878 = vst [vmem:[%s33418_s1 + $0xaf0] sm:$0xff] %v25772_v45 }
  0xd8   :  { %v25765_v38 = vld [vmem:[%s33417_s0 + $0x2e0] sm:$0xff]   ;;  %21846 = vst [vmem:[%s33418_s1 + $0x16e0] sm:$0xff] %v25764_v37  ;;  %v25774_v47 = vld [vmem:[%s33417_s0 + $0x2f0] sm:$0xff]   ;;  %21882 = vst [vmem:[%s33418_s1 + $0x16f0] sm:$0xff] %v25773_v46 }
  0xd9   :  { %21850 = vst [vmem:[%s33418_s1 + $0x22e0] sm:$0xff] %v25765_v38  ;;  %v25775_v48 = vld [vmem:[%s33417_s0 + $0x2300] sm:$0xff]   ;;  %21886 = vst [vmem:[%s33418_s1 + $0x22f0] sm:$0xff] %v25774_v47  ;;  %v25784_v57 = vld [vmem:[%s33417_s0 + $0x2310] sm:$0xff]  }
  0xda   :  { %v25776_v49 = vld [vmem:[%s33417_s0 + $0x1700] sm:$0xff]   ;;  %21890 = vst [vmem:[%s33418_s1 + $0x300] sm:$0xff] %v25775_v48  ;;  %v25785_v58 = vld [vmem:[%s33417_s0 + $0x1710] sm:$0xff]   ;;  %21926 = vst [vmem:[%s33418_s1 + $0x310] sm:$0xff] %v25784_v57 }
  0xdb   :  { %v25777_v50 = vld [vmem:[%s33417_s0 + $0xb00] sm:$0xff]   ;;  %21894 = vst [vmem:[%s33418_s1 + $0xf00] sm:$0xff] %v25776_v49  ;;  %v25786_v59 = vld [vmem:[%s33417_s0 + $0xb10] sm:$0xff]   ;;  %21930 = vst [vmem:[%s33418_s1 + $0xf10] sm:$0xff] %v25785_v58 }
  0xdc   :  { %v25778_v51 = vld [vmem:[%s33417_s0 + $0x1f00] sm:$0xff]   ;;  %21898 = vst [vmem:[%s33418_s1 + $0x1b00] sm:$0xff] %v25777_v50  ;;  %v25787_v60 = vld [vmem:[%s33417_s0 + $0x1f10] sm:$0xff]   ;;  %21934 = vst [vmem:[%s33418_s1 + $0x1b10] sm:$0xff] %v25786_v59 }
  0xdd   :  { %v25779_v52 = vld [vmem:[%s33417_s0 + $0x1300] sm:$0xff]   ;;  %21902 = vst [vmem:[%s33418_s1 + $0x700] sm:$0xff] %v25778_v51  ;;  %v25788_v61 = vld [vmem:[%s33417_s0 + $0x1310] sm:$0xff]   ;;  %21938 = vst [vmem:[%s33418_s1 + $0x710] sm:$0xff] %v25787_v60 }
  0xde   :  { %v25780_v53 = vld [vmem:[%s33417_s0 + $0x700] sm:$0xff]   ;;  %21906 = vst [vmem:[%s33418_s1 + $0x1300] sm:$0xff] %v25779_v52  ;;  %v25789_v62 = vld [vmem:[%s33417_s0 + $0x710] sm:$0xff]   ;;  %21942 = vst [vmem:[%s33418_s1 + $0x1310] sm:$0xff] %v25788_v61 }
  0xdf   :  { %v25781_v54 = vld [vmem:[%s33417_s0 + $0x1b00] sm:$0xff]   ;;  %21910 = vst [vmem:[%s33418_s1 + $0x1f00] sm:$0xff] %v25780_v53  ;;  %v25790_v63 = vld [vmem:[%s33417_s0 + $0x1b10] sm:$0xff]   ;;  %21946 = vst [vmem:[%s33418_s1 + $0x1f10] sm:$0xff] %v25789_v62 }
  0xe0   :  { %v25782_v55 = vld [vmem:[%s33417_s0 + $0xf00] sm:$0xff]   ;;  %21914 = vst [vmem:[%s33418_s1 + $0xb00] sm:$0xff] %v25781_v54  ;;  %v25791_v0 = vld [vmem:[%s33417_s0 + $0xf10] sm:$0xff]   ;;  %21950 = vst [vmem:[%s33418_s1 + $0xb10] sm:$0xff] %v25790_v63 }
  0xe1   :  { %v25783_v56 = vld [vmem:[%s33417_s0 + $0x300] sm:$0xff]   ;;  %21918 = vst [vmem:[%s33418_s1 + $0x1700] sm:$0xff] %v25782_v55  ;;  %v25792_v1 = vld [vmem:[%s33417_s0 + $0x310] sm:$0xff]   ;;  %21954 = vst [vmem:[%s33418_s1 + $0x1710] sm:$0xff] %v25791_v0 }
  0xe2   :  { %21922 = vst [vmem:[%s33418_s1 + $0x2300] sm:$0xff] %v25783_v56  ;;  %v25793_v2 = vld [vmem:[%s33417_s0 + $0x2320] sm:$0xff]   ;;  %21958 = vst [vmem:[%s33418_s1 + $0x2310] sm:$0xff] %v25792_v1  ;;  %v25802_v11 = vld [vmem:[%s33417_s0 + $0x2330] sm:$0xff]  }
  0xe3   :  { %v25794_v3 = vld [vmem:[%s33417_s0 + $0x1720] sm:$0xff]   ;;  %21962 = vst [vmem:[%s33418_s1 + $0x320] sm:$0xff] %v25793_v2  ;;  %v25803_v12 = vld [vmem:[%s33417_s0 + $0x1730] sm:$0xff]   ;;  %21998 = vst [vmem:[%s33418_s1 + $0x330] sm:$0xff] %v25802_v11 }
  0xe4   :  { %v25795_v4 = vld [vmem:[%s33417_s0 + $0xb20] sm:$0xff]   ;;  %21966 = vst [vmem:[%s33418_s1 + $0xf20] sm:$0xff] %v25794_v3  ;;  %v25804_v13 = vld [vmem:[%s33417_s0 + $0xb30] sm:$0xff]   ;;  %22002 = vst [vmem:[%s33418_s1 + $0xf30] sm:$0xff] %v25803_v12 }
  0xe5   :  { %v25796_v5 = vld [vmem:[%s33417_s0 + $0x1f20] sm:$0xff]   ;;  %21970 = vst [vmem:[%s33418_s1 + $0x1b20] sm:$0xff] %v25795_v4  ;;  %v25805_v14 = vld [vmem:[%s33417_s0 + $0x1f30] sm:$0xff]   ;;  %22006 = vst [vmem:[%s33418_s1 + $0x1b30] sm:$0xff] %v25804_v13 }
  0xe6   :  { %v25797_v6 = vld [vmem:[%s33417_s0 + $0x1320] sm:$0xff]   ;;  %21974 = vst [vmem:[%s33418_s1 + $0x720] sm:$0xff] %v25796_v5  ;;  %v25806_v15 = vld [vmem:[%s33417_s0 + $0x1330] sm:$0xff]   ;;  %22010 = vst [vmem:[%s33418_s1 + $0x730] sm:$0xff] %v25805_v14 }
  0xe7   :  { %v25798_v7 = vld [vmem:[%s33417_s0 + $0x720] sm:$0xff]   ;;  %21978 = vst [vmem:[%s33418_s1 + $0x1320] sm:$0xff] %v25797_v6  ;;  %v25807_v16 = vld [vmem:[%s33417_s0 + $0x730] sm:$0xff]   ;;  %22014 = vst [vmem:[%s33418_s1 + $0x1330] sm:$0xff] %v25806_v15 }
  0xe8   :  { %v25799_v8 = vld [vmem:[%s33417_s0 + $0x1b20] sm:$0xff]   ;;  %21982 = vst [vmem:[%s33418_s1 + $0x1f20] sm:$0xff] %v25798_v7  ;;  %v25808_v17 = vld [vmem:[%s33417_s0 + $0x1b30] sm:$0xff]   ;;  %22018 = vst [vmem:[%s33418_s1 + $0x1f30] sm:$0xff] %v25807_v16 }
  0xe9   :  { %v25800_v9 = vld [vmem:[%s33417_s0 + $0xf20] sm:$0xff]   ;;  %21986 = vst [vmem:[%s33418_s1 + $0xb20] sm:$0xff] %v25799_v8  ;;  %v25809_v18 = vld [vmem:[%s33417_s0 + $0xf30] sm:$0xff]   ;;  %22022 = vst [vmem:[%s33418_s1 + $0xb30] sm:$0xff] %v25808_v17 }
  0xea   :  { %v25801_v10 = vld [vmem:[%s33417_s0 + $0x320] sm:$0xff]   ;;  %21990 = vst [vmem:[%s33418_s1 + $0x1720] sm:$0xff] %v25800_v9  ;;  %v25810_v19 = vld [vmem:[%s33417_s0 + $0x330] sm:$0xff]   ;;  %22026 = vst [vmem:[%s33418_s1 + $0x1730] sm:$0xff] %v25809_v18 }
  0xeb   :  { %21994 = vst [vmem:[%s33418_s1 + $0x2320] sm:$0xff] %v25801_v10  ;;  %v25811_v20 = vld [vmem:[%s33417_s0 + $0x2340] sm:$0xff]   ;;  %22030 = vst [vmem:[%s33418_s1 + $0x2330] sm:$0xff] %v25810_v19  ;;  %v25820_v29 = vld [vmem:[%s33417_s0 + $0x2350] sm:$0xff]  }
  0xec   :  { %v25812_v21 = vld [vmem:[%s33417_s0 + $0x1740] sm:$0xff]   ;;  %22034 = vst [vmem:[%s33418_s1 + $0x340] sm:$0xff] %v25811_v20  ;;  %v25821_v30 = vld [vmem:[%s33417_s0 + $0x1750] sm:$0xff]   ;;  %22070 = vst [vmem:[%s33418_s1 + $0x350] sm:$0xff] %v25820_v29 }
  0xed   :  { %v25813_v22 = vld [vmem:[%s33417_s0 + $0xb40] sm:$0xff]   ;;  %22038 = vst [vmem:[%s33418_s1 + $0xf40] sm:$0xff] %v25812_v21  ;;  %v25822_v31 = vld [vmem:[%s33417_s0 + $0xb50] sm:$0xff]   ;;  %22074 = vst [vmem:[%s33418_s1 + $0xf50] sm:$0xff] %v25821_v30 }
  0xee   :  { %v25814_v23 = vld [vmem:[%s33417_s0 + $0x1f40] sm:$0xff]   ;;  %22042 = vst [vmem:[%s33418_s1 + $0x1b40] sm:$0xff] %v25813_v22  ;;  %v25823_v32 = vld [vmem:[%s33417_s0 + $0x1f50] sm:$0xff]   ;;  %22078 = vst [vmem:[%s33418_s1 + $0x1b50] sm:$0xff] %v25822_v31 }
  0xef   :  { %v25815_v24 = vld [vmem:[%s33417_s0 + $0x1340] sm:$0xff]   ;;  %22046 = vst [vmem:[%s33418_s1 + $0x740] sm:$0xff] %v25814_v23  ;;  %v25824_v33 = vld [vmem:[%s33417_s0 + $0x1350] sm:$0xff]   ;;  %22082 = vst [vmem:[%s33418_s1 + $0x750] sm:$0xff] %v25823_v32 }
  0xf0   :  { %v25816_v25 = vld [vmem:[%s33417_s0 + $0x740] sm:$0xff]   ;;  %22050 = vst [vmem:[%s33418_s1 + $0x1340] sm:$0xff] %v25815_v24  ;;  %v25825_v34 = vld [vmem:[%s33417_s0 + $0x750] sm:$0xff]   ;;  %22086 = vst [vmem:[%s33418_s1 + $0x1350] sm:$0xff] %v25824_v33 }
  0xf1   :  { %v25817_v26 = vld [vmem:[%s33417_s0 + $0x1b40] sm:$0xff]   ;;  %22054 = vst [vmem:[%s33418_s1 + $0x1f40] sm:$0xff] %v25816_v25  ;;  %v25826_v35 = vld [vmem:[%s33417_s0 + $0x1b50] sm:$0xff]   ;;  %22090 = vst [vmem:[%s33418_s1 + $0x1f50] sm:$0xff] %v25825_v34 }
  0xf2   :  { %v25818_v27 = vld [vmem:[%s33417_s0 + $0xf40] sm:$0xff]   ;;  %22058 = vst [vmem:[%s33418_s1 + $0xb40] sm:$0xff] %v25817_v26  ;;  %v25827_v36 = vld [vmem:[%s33417_s0 + $0xf50] sm:$0xff]   ;;  %22094 = vst [vmem:[%s33418_s1 + $0xb50] sm:$0xff] %v25826_v35 }
  0xf3   :  { %v25819_v28 = vld [vmem:[%s33417_s0 + $0x340] sm:$0xff]   ;;  %22062 = vst [vmem:[%s33418_s1 + $0x1740] sm:$0xff] %v25818_v27  ;;  %v25828_v37 = vld [vmem:[%s33417_s0 + $0x350] sm:$0xff]   ;;  %22098 = vst [vmem:[%s33418_s1 + $0x1750] sm:$0xff] %v25827_v36 }
  0xf4   :  { %22066 = vst [vmem:[%s33418_s1 + $0x2340] sm:$0xff] %v25819_v28  ;;  %v25829_v38 = vld [vmem:[%s33417_s0 + $0x2360] sm:$0xff]   ;;  %22102 = vst [vmem:[%s33418_s1 + $0x2350] sm:$0xff] %v25828_v37  ;;  %v25838_v47 = vld [vmem:[%s33417_s0 + $0x2370] sm:$0xff]  }
  0xf5   :  { %v25830_v39 = vld [vmem:[%s33417_s0 + $0x1760] sm:$0xff]   ;;  %22106 = vst [vmem:[%s33418_s1 + $0x360] sm:$0xff] %v25829_v38  ;;  %v25839_v48 = vld [vmem:[%s33417_s0 + $0x1770] sm:$0xff]   ;;  %22142 = vst [vmem:[%s33418_s1 + $0x370] sm:$0xff] %v25838_v47 }
  0xf6   :  { %v25831_v40 = vld [vmem:[%s33417_s0 + $0xb60] sm:$0xff]   ;;  %22110 = vst [vmem:[%s33418_s1 + $0xf60] sm:$0xff] %v25830_v39  ;;  %v25840_v49 = vld [vmem:[%s33417_s0 + $0xb70] sm:$0xff]   ;;  %22146 = vst [vmem:[%s33418_s1 + $0xf70] sm:$0xff] %v25839_v48 }
  0xf7   :  { %v25832_v41 = vld [vmem:[%s33417_s0 + $0x1f60] sm:$0xff]   ;;  %22114 = vst [vmem:[%s33418_s1 + $0x1b60] sm:$0xff] %v25831_v40  ;;  %v25841_v50 = vld [vmem:[%s33417_s0 + $0x1f70] sm:$0xff]   ;;  %22150 = vst [vmem:[%s33418_s1 + $0x1b70] sm:$0xff] %v25840_v49 }
  0xf8   :  { %v25833_v42 = vld [vmem:[%s33417_s0 + $0x1360] sm:$0xff]   ;;  %22118 = vst [vmem:[%s33418_s1 + $0x760] sm:$0xff] %v25832_v41  ;;  %v25842_v51 = vld [vmem:[%s33417_s0 + $0x1370] sm:$0xff]   ;;  %22154 = vst [vmem:[%s33418_s1 + $0x770] sm:$0xff] %v25841_v50 }
  0xf9   :  { %v25834_v43 = vld [vmem:[%s33417_s0 + $0x760] sm:$0xff]   ;;  %22122 = vst [vmem:[%s33418_s1 + $0x1360] sm:$0xff] %v25833_v42  ;;  %v25843_v52 = vld [vmem:[%s33417_s0 + $0x770] sm:$0xff]   ;;  %22158 = vst [vmem:[%s33418_s1 + $0x1370] sm:$0xff] %v25842_v51 }
  0xfa   :  { %v25835_v44 = vld [vmem:[%s33417_s0 + $0x1b60] sm:$0xff]   ;;  %22126 = vst [vmem:[%s33418_s1 + $0x1f60] sm:$0xff] %v25834_v43  ;;  %v25844_v53 = vld [vmem:[%s33417_s0 + $0x1b70] sm:$0xff]   ;;  %22162 = vst [vmem:[%s33418_s1 + $0x1f70] sm:$0xff] %v25843_v52 }
  0xfb   :  { %v25836_v45 = vld [vmem:[%s33417_s0 + $0xf60] sm:$0xff]   ;;  %22130 = vst [vmem:[%s33418_s1 + $0xb60] sm:$0xff] %v25835_v44  ;;  %v25845_v54 = vld [vmem:[%s33417_s0 + $0xf70] sm:$0xff]   ;;  %22166 = vst [vmem:[%s33418_s1 + $0xb70] sm:$0xff] %v25844_v53 }
  0xfc   :  { %v25837_v46 = vld [vmem:[%s33417_s0 + $0x360] sm:$0xff]   ;;  %22134 = vst [vmem:[%s33418_s1 + $0x1760] sm:$0xff] %v25836_v45  ;;  %v25846_v55 = vld [vmem:[%s33417_s0 + $0x370] sm:$0xff]   ;;  %22170 = vst [vmem:[%s33418_s1 + $0x1770] sm:$0xff] %v25845_v54 }
  0xfd   :  { %22138 = vst [vmem:[%s33418_s1 + $0x2360] sm:$0xff] %v25837_v46  ;;  %v25847_v56 = vld [vmem:[%s33417_s0 + $0x2380] sm:$0xff]   ;;  %22174 = vst [vmem:[%s33418_s1 + $0x2370] sm:$0xff] %v25846_v55  ;;  %v25856_v1 = vld [vmem:[%s33417_s0 + $0x2390] sm:$0xff]  }
  0xfe   :  { %v25848_v57 = vld [vmem:[%s33417_s0 + $0x1780] sm:$0xff]   ;;  %22178 = vst [vmem:[%s33418_s1 + $0x380] sm:$0xff] %v25847_v56  ;;  %v25857_v2 = vld [vmem:[%s33417_s0 + $0x1790] sm:$0xff]   ;;  %22214 = vst [vmem:[%s33418_s1 + $0x390] sm:$0xff] %v25856_v1 }
  0xff   :  { %v25849_v58 = vld [vmem:[%s33417_s0 + $0xb80] sm:$0xff]   ;;  %22182 = vst [vmem:[%s33418_s1 + $0xf80] sm:$0xff] %v25848_v57  ;;  %v25858_v3 = vld [vmem:[%s33417_s0 + $0xb90] sm:$0xff]   ;;  %22218 = vst [vmem:[%s33418_s1 + $0xf90] sm:$0xff] %v25857_v2 }
 0x100   :  { %v25850_v59 = vld [vmem:[%s33417_s0 + $0x1f80] sm:$0xff]   ;;  %22186 = vst [vmem:[%s33418_s1 + $0x1b80] sm:$0xff] %v25849_v58  ;;  %v25859_v4 = vld [vmem:[%s33417_s0 + $0x1f90] sm:$0xff]   ;;  %22222 = vst [vmem:[%s33418_s1 + $0x1b90] sm:$0xff] %v25858_v3 }
 0x101   :  { %v25851_v60 = vld [vmem:[%s33417_s0 + $0x1380] sm:$0xff]   ;;  %22190 = vst [vmem:[%s33418_s1 + $0x780] sm:$0xff] %v25850_v59  ;;  %v25860_v5 = vld [vmem:[%s33417_s0 + $0x1390] sm:$0xff]   ;;  %22226 = vst [vmem:[%s33418_s1 + $0x790] sm:$0xff] %v25859_v4 }
 0x102   :  { %v25852_v61 = vld [vmem:[%s33417_s0 + $0x780] sm:$0xff]   ;;  %22194 = vst [vmem:[%s33418_s1 + $0x1380] sm:$0xff] %v25851_v60  ;;  %v25861_v6 = vld [vmem:[%s33417_s0 + $0x790] sm:$0xff]   ;;  %22230 = vst [vmem:[%s33418_s1 + $0x1390] sm:$0xff] %v25860_v5 }
 0x103   :  { %v25853_v62 = vld [vmem:[%s33417_s0 + $0x1b80] sm:$0xff]   ;;  %22198 = vst [vmem:[%s33418_s1 + $0x1f80] sm:$0xff] %v25852_v61  ;;  %v25862_v7 = vld [vmem:[%s33417_s0 + $0x1b90] sm:$0xff]   ;;  %22234 = vst [vmem:[%s33418_s1 + $0x1f90] sm:$0xff] %v25861_v6 }
 0x104   :  { %v25854_v63 = vld [vmem:[%s33417_s0 + $0xf80] sm:$0xff]   ;;  %22202 = vst [vmem:[%s33418_s1 + $0xb80] sm:$0xff] %v25853_v62  ;;  %v25863_v8 = vld [vmem:[%s33417_s0 + $0xf90] sm:$0xff]   ;;  %22238 = vst [vmem:[%s33418_s1 + $0xb90] sm:$0xff] %v25862_v7 }
 0x105   :  { %v25855_v0 = vld [vmem:[%s33417_s0 + $0x380] sm:$0xff]   ;;  %22206 = vst [vmem:[%s33418_s1 + $0x1780] sm:$0xff] %v25854_v63  ;;  %v25864_v9 = vld [vmem:[%s33417_s0 + $0x390] sm:$0xff]   ;;  %22242 = vst [vmem:[%s33418_s1 + $0x1790] sm:$0xff] %v25863_v8 }
 0x106   :  { %22210 = vst [vmem:[%s33418_s1 + $0x2380] sm:$0xff] %v25855_v0  ;;  %v25865_v10 = vld [vmem:[%s33417_s0 + $0x23a0] sm:$0xff]   ;;  %22246 = vst [vmem:[%s33418_s1 + $0x2390] sm:$0xff] %v25864_v9  ;;  %v25874_v19 = vld [vmem:[%s33417_s0 + $0x23b0] sm:$0xff]  }
 0x107   :  { %v25866_v11 = vld [vmem:[%s33417_s0 + $0x17a0] sm:$0xff]   ;;  %22250 = vst [vmem:[%s33418_s1 + $0x3a0] sm:$0xff] %v25865_v10  ;;  %v25875_v20 = vld [vmem:[%s33417_s0 + $0x17b0] sm:$0xff]   ;;  %22286 = vst [vmem:[%s33418_s1 + $0x3b0] sm:$0xff] %v25874_v19 }
 0x108   :  { %v25867_v12 = vld [vmem:[%s33417_s0 + $0xba0] sm:$0xff]   ;;  %22254 = vst [vmem:[%s33418_s1 + $0xfa0] sm:$0xff] %v25866_v11  ;;  %v25876_v21 = vld [vmem:[%s33417_s0 + $0xbb0] sm:$0xff]   ;;  %22290 = vst [vmem:[%s33418_s1 + $0xfb0] sm:$0xff] %v25875_v20 }
 0x109   :  { %v25868_v13 = vld [vmem:[%s33417_s0 + $0x1fa0] sm:$0xff]   ;;  %22258 = vst [vmem:[%s33418_s1 + $0x1ba0] sm:$0xff] %v25867_v12  ;;  %v25877_v22 = vld [vmem:[%s33417_s0 + $0x1fb0] sm:$0xff]   ;;  %22294 = vst [vmem:[%s33418_s1 + $0x1bb0] sm:$0xff] %v25876_v21 }
 0x10a   :  { %v25869_v14 = vld [vmem:[%s33417_s0 + $0x13a0] sm:$0xff]   ;;  %22262 = vst [vmem:[%s33418_s1 + $0x7a0] sm:$0xff] %v25868_v13  ;;  %v25878_v23 = vld [vmem:[%s33417_s0 + $0x13b0] sm:$0xff]   ;;  %22298 = vst [vmem:[%s33418_s1 + $0x7b0] sm:$0xff] %v25877_v22 }
 0x10b   :  { %v25870_v15 = vld [vmem:[%s33417_s0 + $0x7a0] sm:$0xff]   ;;  %22266 = vst [vmem:[%s33418_s1 + $0x13a0] sm:$0xff] %v25869_v14  ;;  %v25879_v24 = vld [vmem:[%s33417_s0 + $0x7b0] sm:$0xff]   ;;  %22302 = vst [vmem:[%s33418_s1 + $0x13b0] sm:$0xff] %v25878_v23 }
 0x10c   :  { %v25871_v16 = vld [vmem:[%s33417_s0 + $0x1ba0] sm:$0xff]   ;;  %22270 = vst [vmem:[%s33418_s1 + $0x1fa0] sm:$0xff] %v25870_v15  ;;  %v25880_v25 = vld [vmem:[%s33417_s0 + $0x1bb0] sm:$0xff]   ;;  %22306 = vst [vmem:[%s33418_s1 + $0x1fb0] sm:$0xff] %v25879_v24 }
 0x10d   :  { %v25872_v17 = vld [vmem:[%s33417_s0 + $0xfa0] sm:$0xff]   ;;  %22274 = vst [vmem:[%s33418_s1 + $0xba0] sm:$0xff] %v25871_v16  ;;  %v25881_v26 = vld [vmem:[%s33417_s0 + $0xfb0] sm:$0xff]   ;;  %22310 = vst [vmem:[%s33418_s1 + $0xbb0] sm:$0xff] %v25880_v25 }
 0x10e   :  { %v25873_v18 = vld [vmem:[%s33417_s0 + $0x3a0] sm:$0xff]   ;;  %22278 = vst [vmem:[%s33418_s1 + $0x17a0] sm:$0xff] %v25872_v17  ;;  %v25882_v27 = vld [vmem:[%s33417_s0 + $0x3b0] sm:$0xff]   ;;  %22314 = vst [vmem:[%s33418_s1 + $0x17b0] sm:$0xff] %v25881_v26 }
 0x10f   :  { %22282 = vst [vmem:[%s33418_s1 + $0x23a0] sm:$0xff] %v25873_v18  ;;  %v25883_v28 = vld [vmem:[%s33417_s0 + $0x23c0] sm:$0xff]   ;;  %22318 = vst [vmem:[%s33418_s1 + $0x23b0] sm:$0xff] %v25882_v27  ;;  %v25892_v37 = vld [vmem:[%s33417_s0 + $0x23d0] sm:$0xff]  }
 0x110   :  { %v25884_v29 = vld [vmem:[%s33417_s0 + $0x17c0] sm:$0xff]   ;;  %22322 = vst [vmem:[%s33418_s1 + $0x3c0] sm:$0xff] %v25883_v28  ;;  %v25893_v38 = vld [vmem:[%s33417_s0 + $0x17d0] sm:$0xff]   ;;  %22358 = vst [vmem:[%s33418_s1 + $0x3d0] sm:$0xff] %v25892_v37 }
 0x111   :  { %v25885_v30 = vld [vmem:[%s33417_s0 + $0xbc0] sm:$0xff]   ;;  %22326 = vst [vmem:[%s33418_s1 + $0xfc0] sm:$0xff] %v25884_v29  ;;  %v25894_v39 = vld [vmem:[%s33417_s0 + $0xbd0] sm:$0xff]   ;;  %22362 = vst [vmem:[%s33418_s1 + $0xfd0] sm:$0xff] %v25893_v38 }
 0x112   :  { %v25886_v31 = vld [vmem:[%s33417_s0 + $0x1fc0] sm:$0xff]   ;;  %22330 = vst [vmem:[%s33418_s1 + $0x1bc0] sm:$0xff] %v25885_v30  ;;  %v25895_v40 = vld [vmem:[%s33417_s0 + $0x1fd0] sm:$0xff]   ;;  %22366 = vst [vmem:[%s33418_s1 + $0x1bd0] sm:$0xff] %v25894_v39 }
 0x113   :  { %v25887_v32 = vld [vmem:[%s33417_s0 + $0x13c0] sm:$0xff]   ;;  %22334 = vst [vmem:[%s33418_s1 + $0x7c0] sm:$0xff] %v25886_v31  ;;  %v25896_v41 = vld [vmem:[%s33417_s0 + $0x13d0] sm:$0xff]   ;;  %22370 = vst [vmem:[%s33418_s1 + $0x7d0] sm:$0xff] %v25895_v40 }
 0x114   :  { %v25888_v33 = vld [vmem:[%s33417_s0 + $0x7c0] sm:$0xff]   ;;  %22338 = vst [vmem:[%s33418_s1 + $0x13c0] sm:$0xff] %v25887_v32  ;;  %v25897_v42 = vld [vmem:[%s33417_s0 + $0x7d0] sm:$0xff]   ;;  %22374 = vst [vmem:[%s33418_s1 + $0x13d0] sm:$0xff] %v25896_v41 }
 0x115   :  { %v25889_v34 = vld [vmem:[%s33417_s0 + $0x1bc0] sm:$0xff]   ;;  %22342 = vst [vmem:[%s33418_s1 + $0x1fc0] sm:$0xff] %v25888_v33  ;;  %v25898_v43 = vld [vmem:[%s33417_s0 + $0x1bd0] sm:$0xff]   ;;  %22378 = vst [vmem:[%s33418_s1 + $0x1fd0] sm:$0xff] %v25897_v42 }
 0x116   :  { %v25890_v35 = vld [vmem:[%s33417_s0 + $0xfc0] sm:$0xff]   ;;  %22346 = vst [vmem:[%s33418_s1 + $0xbc0] sm:$0xff] %v25889_v34  ;;  %v25899_v44 = vld [vmem:[%s33417_s0 + $0xfd0] sm:$0xff]   ;;  %22382 = vst [vmem:[%s33418_s1 + $0xbd0] sm:$0xff] %v25898_v43 }
 0x117   :  { %v25891_v36 = vld [vmem:[%s33417_s0 + $0x3c0] sm:$0xff]   ;;  %22350 = vst [vmem:[%s33418_s1 + $0x17c0] sm:$0xff] %v25890_v35  ;;  %v25900_v45 = vld [vmem:[%s33417_s0 + $0x3d0] sm:$0xff]   ;;  %22386 = vst [vmem:[%s33418_s1 + $0x17d0] sm:$0xff] %v25899_v44 }
 0x118   :  { %22354 = vst [vmem:[%s33418_s1 + $0x23c0] sm:$0xff] %v25891_v36  ;;  %v25901_v46 = vld [vmem:[%s33417_s0 + $0x23e0] sm:$0xff]   ;;  %22390 = vst [vmem:[%s33418_s1 + $0x23d0] sm:$0xff] %v25900_v45  ;;  %v25910_v55 = vld [vmem:[%s33417_s0 + $0x23f0] sm:$0xff]  }
 0x119   :  { %v25902_v47 = vld [vmem:[%s33417_s0 + $0x17e0] sm:$0xff]   ;;  %22394 = vst [vmem:[%s33418_s1 + $0x3e0] sm:$0xff] %v25901_v46  ;;  %v25911_v56 = vld [vmem:[%s33417_s0 + $0x17f0] sm:$0xff]   ;;  %22430 = vst [vmem:[%s33418_s1 + $0x3f0] sm:$0xff] %v25910_v55 }
 0x11a   :  { %v25903_v48 = vld [vmem:[%s33417_s0 + $0xbe0] sm:$0xff]   ;;  %22398 = vst [vmem:[%s33418_s1 + $0xfe0] sm:$0xff] %v25902_v47  ;;  %v25912_v57 = vld [vmem:[%s33417_s0 + $0xbf0] sm:$0xff]   ;;  %22434 = vst [vmem:[%s33418_s1 + $0xff0] sm:$0xff] %v25911_v56 }
 0x11b   :  { %v25904_v49 = vld [vmem:[%s33417_s0 + $0x1fe0] sm:$0xff]   ;;  %22402 = vst [vmem:[%s33418_s1 + $0x1be0] sm:$0xff] %v25903_v48  ;;  %v25913_v58 = vld [vmem:[%s33417_s0 + $0x1ff0] sm:$0xff]   ;;  %22438 = vst [vmem:[%s33418_s1 + $0x1bf0] sm:$0xff] %v25912_v57 }
 0x11c   :  { %v25905_v50 = vld [vmem:[%s33417_s0 + $0x13e0] sm:$0xff]   ;;  %22406 = vst [vmem:[%s33418_s1 + $0x7e0] sm:$0xff] %v25904_v49  ;;  %v25914_v59 = vld [vmem:[%s33417_s0 + $0x13f0] sm:$0xff]   ;;  %22442 = vst [vmem:[%s33418_s1 + $0x7f0] sm:$0xff] %v25913_v58 }
 0x11d   :  { %v25906_v51 = vld [vmem:[%s33417_s0 + $0x7e0] sm:$0xff]   ;;  %22410 = vst [vmem:[%s33418_s1 + $0x13e0] sm:$0xff] %v25905_v50  ;;  %v25915_v60 = vld [vmem:[%s33417_s0 + $0x7f0] sm:$0xff]   ;;  %22446 = vst [vmem:[%s33418_s1 + $0x13f0] sm:$0xff] %v25914_v59 }
 0x11e   :  { %v25907_v52 = vld [vmem:[%s33417_s0 + $0x1be0] sm:$0xff]   ;;  %22414 = vst [vmem:[%s33418_s1 + $0x1fe0] sm:$0xff] %v25906_v51  ;;  %v25916_v61 = vld [vmem:[%s33417_s0 + $0x1bf0] sm:$0xff]   ;;  %22450 = vst [vmem:[%s33418_s1 + $0x1ff0] sm:$0xff] %v25915_v60 }
 0x11f   :  { %v25908_v53 = vld [vmem:[%s33417_s0 + $0xfe0] sm:$0xff]   ;;  %22418 = vst [vmem:[%s33418_s1 + $0xbe0] sm:$0xff] %v25907_v52  ;;  %v25917_v62 = vld [vmem:[%s33417_s0 + $0xff0] sm:$0xff]   ;;  %22454 = vst [vmem:[%s33418_s1 + $0xbf0] sm:$0xff] %v25916_v61 }
 0x120   :  { %v25909_v54 = vld [vmem:[%s33417_s0 + $0x3e0] sm:$0xff]   ;;  %22422 = vst [vmem:[%s33418_s1 + $0x17e0] sm:$0xff] %v25908_v53  ;;  %v25918_v63 = vld [vmem:[%s33417_s0 + $0x3f0] sm:$0xff]   ;;  %22458 = vst [vmem:[%s33418_s1 + $0x17f0] sm:$0xff] %v25917_v62 }
 0x121   :  { %22426 = vst [vmem:[%s33418_s1 + $0x23e0] sm:$0xff] %v25909_v54  ;;  %22462 = vst [vmem:[%s33418_s1 + $0x23f0] sm:$0xff] %v25918_v63  ;;  %v25919_v0 = vld [vmem:[%s33417_s0 + $0x2008] sm:$0xff]   ;;  %v25928_v9 = vld [vmem:[%s33417_s0 + $0x2018] sm:$0xff]  }
 0x122   :  { %v25920_v1 = vld [vmem:[%s33417_s0 + $0x1408] sm:$0xff]   ;;  %23042 = vst [vmem:[%s33418_s1 + $0x8] sm:$0xff] %v25919_v0  ;;  %v25929_v10 = vld [vmem:[%s33417_s0 + $0x1418] sm:$0xff]   ;;  %23078 = vst [vmem:[%s33418_s1 + $0x18] sm:$0xff] %v25928_v9 }
 0x123   :  { %v25921_v2 = vld [vmem:[%s33417_s0 + $0x808] sm:$0xff]   ;;  %23046 = vst [vmem:[%s33418_s1 + $0xc08] sm:$0xff] %v25920_v1  ;;  %v25930_v11 = vld [vmem:[%s33417_s0 + $0x818] sm:$0xff]   ;;  %23082 = vst [vmem:[%s33418_s1 + $0xc18] sm:$0xff] %v25929_v10 }
 0x124   :  { %v25922_v3 = vld [vmem:[%s33417_s0 + $0x1c08] sm:$0xff]   ;;  %23050 = vst [vmem:[%s33418_s1 + $0x1808] sm:$0xff] %v25921_v2  ;;  %v25931_v12 = vld [vmem:[%s33417_s0 + $0x1c18] sm:$0xff]   ;;  %23086 = vst [vmem:[%s33418_s1 + $0x1818] sm:$0xff] %v25930_v11 }
 0x125   :  { %v25923_v4 = vld [vmem:[%s33417_s0 + $0x1008] sm:$0xff]   ;;  %23054 = vst [vmem:[%s33418_s1 + $0x408] sm:$0xff] %v25922_v3  ;;  %v25932_v13 = vld [vmem:[%s33417_s0 + $0x1018] sm:$0xff]   ;;  %23090 = vst [vmem:[%s33418_s1 + $0x418] sm:$0xff] %v25931_v12 }
 0x126   :  { %v25924_v5 = vld [vmem:[%s33417_s0 + $0x408] sm:$0xff]   ;;  %23058 = vst [vmem:[%s33418_s1 + $0x1008] sm:$0xff] %v25923_v4  ;;  %v25933_v14 = vld [vmem:[%s33417_s0 + $0x418] sm:$0xff]   ;;  %23094 = vst [vmem:[%s33418_s1 + $0x1018] sm:$0xff] %v25932_v13 }
 0x127   :  { %v25925_v6 = vld [vmem:[%s33417_s0 + $0x1808] sm:$0xff]   ;;  %23062 = vst [vmem:[%s33418_s1 + $0x1c08] sm:$0xff] %v25924_v5  ;;  %v25934_v15 = vld [vmem:[%s33417_s0 + $0x1818] sm:$0xff]   ;;  %23098 = vst [vmem:[%s33418_s1 + $0x1c18] sm:$0xff] %v25933_v14 }
 0x128   :  { %v25926_v7 = vld [vmem:[%s33417_s0 + $0xc08] sm:$0xff]   ;;  %23066 = vst [vmem:[%s33418_s1 + $0x808] sm:$0xff] %v25925_v6  ;;  %v25935_v16 = vld [vmem:[%s33417_s0 + $0xc18] sm:$0xff]   ;;  %23102 = vst [vmem:[%s33418_s1 + $0x818] sm:$0xff] %v25934_v15 }
 0x129   :  { %v25927_v8 = vld [vmem:[%s33417_s0 + $0x8] sm:$0xff]   ;;  %23070 = vst [vmem:[%s33418_s1 + $0x1408] sm:$0xff] %v25926_v7  ;;  %v25936_v17 = vld [vmem:[%s33417_s0 + $0x18] sm:$0xff]   ;;  %23106 = vst [vmem:[%s33418_s1 + $0x1418] sm:$0xff] %v25935_v16 }
 0x12a   :  { %23074 = vst [vmem:[%s33418_s1 + $0x2008] sm:$0xff] %v25927_v8  ;;  %v25937_v18 = vld [vmem:[%s33417_s0 + $0x2028] sm:$0xff]   ;;  %23110 = vst [vmem:[%s33418_s1 + $0x2018] sm:$0xff] %v25936_v17  ;;  %v25946_v27 = vld [vmem:[%s33417_s0 + $0x2038] sm:$0xff]  }
 0x12b   :  { %v25938_v19 = vld [vmem:[%s33417_s0 + $0x1428] sm:$0xff]   ;;  %23114 = vst [vmem:[%s33418_s1 + $0x28] sm:$0xff] %v25937_v18  ;;  %v25947_v28 = vld [vmem:[%s33417_s0 + $0x1438] sm:$0xff]   ;;  %23150 = vst [vmem:[%s33418_s1 + $0x38] sm:$0xff] %v25946_v27 }
 0x12c   :  { %v25939_v20 = vld [vmem:[%s33417_s0 + $0x828] sm:$0xff]   ;;  %23118 = vst [vmem:[%s33418_s1 + $0xc28] sm:$0xff] %v25938_v19  ;;  %v25948_v29 = vld [vmem:[%s33417_s0 + $0x838] sm:$0xff]   ;;  %23154 = vst [vmem:[%s33418_s1 + $0xc38] sm:$0xff] %v25947_v28 }
 0x12d   :  { %v25940_v21 = vld [vmem:[%s33417_s0 + $0x1c28] sm:$0xff]   ;;  %23122 = vst [vmem:[%s33418_s1 + $0x1828] sm:$0xff] %v25939_v20  ;;  %v25949_v30 = vld [vmem:[%s33417_s0 + $0x1c38] sm:$0xff]   ;;  %23158 = vst [vmem:[%s33418_s1 + $0x1838] sm:$0xff] %v25948_v29 }
 0x12e   :  { %v25941_v22 = vld [vmem:[%s33417_s0 + $0x1028] sm:$0xff]   ;;  %23126 = vst [vmem:[%s33418_s1 + $0x428] sm:$0xff] %v25940_v21  ;;  %v25950_v31 = vld [vmem:[%s33417_s0 + $0x1038] sm:$0xff]   ;;  %23162 = vst [vmem:[%s33418_s1 + $0x438] sm:$0xff] %v25949_v30 }
 0x12f   :  { %v25942_v23 = vld [vmem:[%s33417_s0 + $0x428] sm:$0xff]   ;;  %23130 = vst [vmem:[%s33418_s1 + $0x1028] sm:$0xff] %v25941_v22  ;;  %v25951_v32 = vld [vmem:[%s33417_s0 + $0x438] sm:$0xff]   ;;  %23166 = vst [vmem:[%s33418_s1 + $0x1038] sm:$0xff] %v25950_v31 }
 0x130   :  { %v25943_v24 = vld [vmem:[%s33417_s0 + $0x1828] sm:$0xff]   ;;  %23134 = vst [vmem:[%s33418_s1 + $0x1c28] sm:$0xff] %v25942_v23  ;;  %v25952_v33 = vld [vmem:[%s33417_s0 + $0x1838] sm:$0xff]   ;;  %23170 = vst [vmem:[%s33418_s1 + $0x1c38] sm:$0xff] %v25951_v32 }
 0x131   :  { %v25944_v25 = vld [vmem:[%s33417_s0 + $0xc28] sm:$0xff]   ;;  %23138 = vst [vmem:[%s33418_s1 + $0x828] sm:$0xff] %v25943_v24  ;;  %v25953_v34 = vld [vmem:[%s33417_s0 + $0xc38] sm:$0xff]   ;;  %23174 = vst [vmem:[%s33418_s1 + $0x838] sm:$0xff] %v25952_v33 }
 0x132   :  { %v25945_v26 = vld [vmem:[%s33417_s0 + $0x28] sm:$0xff]   ;;  %23142 = vst [vmem:[%s33418_s1 + $0x1428] sm:$0xff] %v25944_v25  ;;  %v25954_v35 = vld [vmem:[%s33417_s0 + $0x38] sm:$0xff]   ;;  %23178 = vst [vmem:[%s33418_s1 + $0x1438] sm:$0xff] %v25953_v34 }
 0x133   :  { %23146 = vst [vmem:[%s33418_s1 + $0x2028] sm:$0xff] %v25945_v26  ;;  %v25955_v36 = vld [vmem:[%s33417_s0 + $0x2048] sm:$0xff]   ;;  %23182 = vst [vmem:[%s33418_s1 + $0x2038] sm:$0xff] %v25954_v35  ;;  %v25964_v45 = vld [vmem:[%s33417_s0 + $0x2058] sm:$0xff]  }
 0x134   :  { %v25956_v37 = vld [vmem:[%s33417_s0 + $0x1448] sm:$0xff]   ;;  %23186 = vst [vmem:[%s33418_s1 + $0x48] sm:$0xff] %v25955_v36  ;;  %v25965_v46 = vld [vmem:[%s33417_s0 + $0x1458] sm:$0xff]   ;;  %23222 = vst [vmem:[%s33418_s1 + $0x58] sm:$0xff] %v25964_v45 }
 0x135   :  { %v25957_v38 = vld [vmem:[%s33417_s0 + $0x848] sm:$0xff]   ;;  %23190 = vst [vmem:[%s33418_s1 + $0xc48] sm:$0xff] %v25956_v37  ;;  %v25966_v47 = vld [vmem:[%s33417_s0 + $0x858] sm:$0xff]   ;;  %23226 = vst [vmem:[%s33418_s1 + $0xc58] sm:$0xff] %v25965_v46 }
 0x136   :  { %v25958_v39 = vld [vmem:[%s33417_s0 + $0x1c48] sm:$0xff]   ;;  %23194 = vst [vmem:[%s33418_s1 + $0x1848] sm:$0xff] %v25957_v38  ;;  %v25967_v48 = vld [vmem:[%s33417_s0 + $0x1c58] sm:$0xff]   ;;  %23230 = vst [vmem:[%s33418_s1 + $0x1858] sm:$0xff] %v25966_v47 }
 0x137   :  { %v25959_v40 = vld [vmem:[%s33417_s0 + $0x1048] sm:$0xff]   ;;  %23198 = vst [vmem:[%s33418_s1 + $0x448] sm:$0xff] %v25958_v39  ;;  %v25968_v49 = vld [vmem:[%s33417_s0 + $0x1058] sm:$0xff]   ;;  %23234 = vst [vmem:[%s33418_s1 + $0x458] sm:$0xff] %v25967_v48 }
 0x138   :  { %v25960_v41 = vld [vmem:[%s33417_s0 + $0x448] sm:$0xff]   ;;  %23202 = vst [vmem:[%s33418_s1 + $0x1048] sm:$0xff] %v25959_v40  ;;  %v25969_v50 = vld [vmem:[%s33417_s0 + $0x458] sm:$0xff]   ;;  %23238 = vst [vmem:[%s33418_s1 + $0x1058] sm:$0xff] %v25968_v49 }
 0x139   :  { %v25961_v42 = vld [vmem:[%s33417_s0 + $0x1848] sm:$0xff]   ;;  %23206 = vst [vmem:[%s33418_s1 + $0x1c48] sm:$0xff] %v25960_v41  ;;  %v25970_v51 = vld [vmem:[%s33417_s0 + $0x1858] sm:$0xff]   ;;  %23242 = vst [vmem:[%s33418_s1 + $0x1c58] sm:$0xff] %v25969_v50 }
 0x13a   :  { %v25962_v43 = vld [vmem:[%s33417_s0 + $0xc48] sm:$0xff]   ;;  %23210 = vst [vmem:[%s33418_s1 + $0x848] sm:$0xff] %v25961_v42  ;;  %v25971_v52 = vld [vmem:[%s33417_s0 + $0xc58] sm:$0xff]   ;;  %23246 = vst [vmem:[%s33418_s1 + $0x858] sm:$0xff] %v25970_v51 }
 0x13b   :  { %v25963_v44 = vld [vmem:[%s33417_s0 + $0x48] sm:$0xff]   ;;  %23214 = vst [vmem:[%s33418_s1 + $0x1448] sm:$0xff] %v25962_v43  ;;  %v25972_v53 = vld [vmem:[%s33417_s0 + $0x58] sm:$0xff]   ;;  %23250 = vst [vmem:[%s33418_s1 + $0x1458] sm:$0xff] %v25971_v52 }
 0x13c   :  { %23218 = vst [vmem:[%s33418_s1 + $0x2048] sm:$0xff] %v25963_v44  ;;  %v25973_v54 = vld [vmem:[%s33417_s0 + $0x2068] sm:$0xff]   ;;  %23254 = vst [vmem:[%s33418_s1 + $0x2058] sm:$0xff] %v25972_v53  ;;  %v25982_v63 = vld [vmem:[%s33417_s0 + $0x2078] sm:$0xff]  }
 0x13d   :  { %v25974_v55 = vld [vmem:[%s33417_s0 + $0x1468] sm:$0xff]   ;;  %23258 = vst [vmem:[%s33418_s1 + $0x68] sm:$0xff] %v25973_v54  ;;  %v25983_v0 = vld [vmem:[%s33417_s0 + $0x1478] sm:$0xff]   ;;  %23294 = vst [vmem:[%s33418_s1 + $0x78] sm:$0xff] %v25982_v63 }
 0x13e   :  { %v25975_v56 = vld [vmem:[%s33417_s0 + $0x868] sm:$0xff]   ;;  %23262 = vst [vmem:[%s33418_s1 + $0xc68] sm:$0xff] %v25974_v55  ;;  %v25984_v1 = vld [vmem:[%s33417_s0 + $0x878] sm:$0xff]   ;;  %23298 = vst [vmem:[%s33418_s1 + $0xc78] sm:$0xff] %v25983_v0 }
 0x13f   :  { %v25976_v57 = vld [vmem:[%s33417_s0 + $0x1c68] sm:$0xff]   ;;  %23266 = vst [vmem:[%s33418_s1 + $0x1868] sm:$0xff] %v25975_v56  ;;  %v25985_v2 = vld [vmem:[%s33417_s0 + $0x1c78] sm:$0xff]   ;;  %23302 = vst [vmem:[%s33418_s1 + $0x1878] sm:$0xff] %v25984_v1 }
 0x140   :  { %v25977_v58 = vld [vmem:[%s33417_s0 + $0x1068] sm:$0xff]   ;;  %23270 = vst [vmem:[%s33418_s1 + $0x468] sm:$0xff] %v25976_v57  ;;  %v25986_v3 = vld [vmem:[%s33417_s0 + $0x1078] sm:$0xff]   ;;  %23306 = vst [vmem:[%s33418_s1 + $0x478] sm:$0xff] %v25985_v2 }
 0x141   :  { %v25978_v59 = vld [vmem:[%s33417_s0 + $0x468] sm:$0xff]   ;;  %23274 = vst [vmem:[%s33418_s1 + $0x1068] sm:$0xff] %v25977_v58  ;;  %v25987_v4 = vld [vmem:[%s33417_s0 + $0x478] sm:$0xff]   ;;  %23310 = vst [vmem:[%s33418_s1 + $0x1078] sm:$0xff] %v25986_v3 }
 0x142   :  { %v25979_v60 = vld [vmem:[%s33417_s0 + $0x1868] sm:$0xff]   ;;  %23278 = vst [vmem:[%s33418_s1 + $0x1c68] sm:$0xff] %v25978_v59  ;;  %v25988_v5 = vld [vmem:[%s33417_s0 + $0x1878] sm:$0xff]   ;;  %23314 = vst [vmem:[%s33418_s1 + $0x1c78] sm:$0xff] %v25987_v4 }
 0x143   :  { %v25980_v61 = vld [vmem:[%s33417_s0 + $0xc68] sm:$0xff]   ;;  %23282 = vst [vmem:[%s33418_s1 + $0x868] sm:$0xff] %v25979_v60  ;;  %v25989_v6 = vld [vmem:[%s33417_s0 + $0xc78] sm:$0xff]   ;;  %23318 = vst [vmem:[%s33418_s1 + $0x878] sm:$0xff] %v25988_v5 }
 0x144   :  { %v25981_v62 = vld [vmem:[%s33417_s0 + $0x68] sm:$0xff]   ;;  %23286 = vst [vmem:[%s33418_s1 + $0x1468] sm:$0xff] %v25980_v61  ;;  %v25990_v7 = vld [vmem:[%s33417_s0 + $0x78] sm:$0xff]   ;;  %23322 = vst [vmem:[%s33418_s1 + $0x1478] sm:$0xff] %v25989_v6 }
 0x145   :  { %23290 = vst [vmem:[%s33418_s1 + $0x2068] sm:$0xff] %v25981_v62  ;;  %v25991_v8 = vld [vmem:[%s33417_s0 + $0x2088] sm:$0xff]   ;;  %23326 = vst [vmem:[%s33418_s1 + $0x2078] sm:$0xff] %v25990_v7  ;;  %v26000_v17 = vld [vmem:[%s33417_s0 + $0x2098] sm:$0xff]  }
 0x146   :  { %v25992_v9 = vld [vmem:[%s33417_s0 + $0x1488] sm:$0xff]   ;;  %23330 = vst [vmem:[%s33418_s1 + $0x88] sm:$0xff] %v25991_v8  ;;  %v26001_v18 = vld [vmem:[%s33417_s0 + $0x1498] sm:$0xff]   ;;  %23366 = vst [vmem:[%s33418_s1 + $0x98] sm:$0xff] %v26000_v17 }
 0x147   :  { %v25993_v10 = vld [vmem:[%s33417_s0 + $0x888] sm:$0xff]   ;;  %23334 = vst [vmem:[%s33418_s1 + $0xc88] sm:$0xff] %v25992_v9  ;;  %v26002_v19 = vld [vmem:[%s33417_s0 + $0x898] sm:$0xff]   ;;  %23370 = vst [vmem:[%s33418_s1 + $0xc98] sm:$0xff] %v26001_v18 }
 0x148   :  { %v25994_v11 = vld [vmem:[%s33417_s0 + $0x1c88] sm:$0xff]   ;;  %23338 = vst [vmem:[%s33418_s1 + $0x1888] sm:$0xff] %v25993_v10  ;;  %v26003_v20 = vld [vmem:[%s33417_s0 + $0x1c98] sm:$0xff]   ;;  %23374 = vst [vmem:[%s33418_s1 + $0x1898] sm:$0xff] %v26002_v19 }
 0x149   :  { %v25995_v12 = vld [vmem:[%s33417_s0 + $0x1088] sm:$0xff]   ;;  %23342 = vst [vmem:[%s33418_s1 + $0x488] sm:$0xff] %v25994_v11  ;;  %v26004_v21 = vld [vmem:[%s33417_s0 + $0x1098] sm:$0xff]   ;;  %23378 = vst [vmem:[%s33418_s1 + $0x498] sm:$0xff] %v26003_v20 }
 0x14a   :  { %v25996_v13 = vld [vmem:[%s33417_s0 + $0x488] sm:$0xff]   ;;  %23346 = vst [vmem:[%s33418_s1 + $0x1088] sm:$0xff] %v25995_v12  ;;  %v26005_v22 = vld [vmem:[%s33417_s0 + $0x498] sm:$0xff]   ;;  %23382 = vst [vmem:[%s33418_s1 + $0x1098] sm:$0xff] %v26004_v21 }
 0x14b   :  { %v25997_v14 = vld [vmem:[%s33417_s0 + $0x1888] sm:$0xff]   ;;  %23350 = vst [vmem:[%s33418_s1 + $0x1c88] sm:$0xff] %v25996_v13  ;;  %v26006_v23 = vld [vmem:[%s33417_s0 + $0x1898] sm:$0xff]   ;;  %23386 = vst [vmem:[%s33418_s1 + $0x1c98] sm:$0xff] %v26005_v22 }
 0x14c   :  { %v25998_v15 = vld [vmem:[%s33417_s0 + $0xc88] sm:$0xff]   ;;  %23354 = vst [vmem:[%s33418_s1 + $0x888] sm:$0xff] %v25997_v14  ;;  %v26007_v24 = vld [vmem:[%s33417_s0 + $0xc98] sm:$0xff]   ;;  %23390 = vst [vmem:[%s33418_s1 + $0x898] sm:$0xff] %v26006_v23 }
 0x14d   :  { %v25999_v16 = vld [vmem:[%s33417_s0 + $0x88] sm:$0xff]   ;;  %23358 = vst [vmem:[%s33418_s1 + $0x1488] sm:$0xff] %v25998_v15  ;;  %v26008_v25 = vld [vmem:[%s33417_s0 + $0x98] sm:$0xff]   ;;  %23394 = vst [vmem:[%s33418_s1 + $0x1498] sm:$0xff] %v26007_v24 }
 0x14e   :  { %23362 = vst [vmem:[%s33418_s1 + $0x2088] sm:$0xff] %v25999_v16  ;;  %v26009_v26 = vld [vmem:[%s33417_s0 + $0x20a8] sm:$0xff]   ;;  %23398 = vst [vmem:[%s33418_s1 + $0x2098] sm:$0xff] %v26008_v25  ;;  %v26018_v35 = vld [vmem:[%s33417_s0 + $0x20b8] sm:$0xff]  }
 0x14f   :  { %v26010_v27 = vld [vmem:[%s33417_s0 + $0x14a8] sm:$0xff]   ;;  %23402 = vst [vmem:[%s33418_s1 + $0xa8] sm:$0xff] %v26009_v26  ;;  %v26019_v36 = vld [vmem:[%s33417_s0 + $0x14b8] sm:$0xff]   ;;  %23438 = vst [vmem:[%s33418_s1 + $0xb8] sm:$0xff] %v26018_v35 }
 0x150   :  { %v26011_v28 = vld [vmem:[%s33417_s0 + $0x8a8] sm:$0xff]   ;;  %23406 = vst [vmem:[%s33418_s1 + $0xca8] sm:$0xff] %v26010_v27  ;;  %v26020_v37 = vld [vmem:[%s33417_s0 + $0x8b8] sm:$0xff]   ;;  %23442 = vst [vmem:[%s33418_s1 + $0xcb8] sm:$0xff] %v26019_v36 }
 0x151   :  { %v26012_v29 = vld [vmem:[%s33417_s0 + $0x1ca8] sm:$0xff]   ;;  %23410 = vst [vmem:[%s33418_s1 + $0x18a8] sm:$0xff] %v26011_v28  ;;  %v26021_v38 = vld [vmem:[%s33417_s0 + $0x1cb8] sm:$0xff]   ;;  %23446 = vst [vmem:[%s33418_s1 + $0x18b8] sm:$0xff] %v26020_v37 }
 0x152   :  { %v26013_v30 = vld [vmem:[%s33417_s0 + $0x10a8] sm:$0xff]   ;;  %23414 = vst [vmem:[%s33418_s1 + $0x4a8] sm:$0xff] %v26012_v29  ;;  %v26022_v39 = vld [vmem:[%s33417_s0 + $0x10b8] sm:$0xff]   ;;  %23450 = vst [vmem:[%s33418_s1 + $0x4b8] sm:$0xff] %v26021_v38 }
 0x153   :  { %v26014_v31 = vld [vmem:[%s33417_s0 + $0x4a8] sm:$0xff]   ;;  %23418 = vst [vmem:[%s33418_s1 + $0x10a8] sm:$0xff] %v26013_v30  ;;  %v26023_v40 = vld [vmem:[%s33417_s0 + $0x4b8] sm:$0xff]   ;;  %23454 = vst [vmem:[%s33418_s1 + $0x10b8] sm:$0xff] %v26022_v39 }
 0x154   :  { %v26015_v32 = vld [vmem:[%s33417_s0 + $0x18a8] sm:$0xff]   ;;  %23422 = vst [vmem:[%s33418_s1 + $0x1ca8] sm:$0xff] %v26014_v31  ;;  %v26024_v41 = vld [vmem:[%s33417_s0 + $0x18b8] sm:$0xff]   ;;  %23458 = vst [vmem:[%s33418_s1 + $0x1cb8] sm:$0xff] %v26023_v40 }
 0x155   :  { %v26016_v33 = vld [vmem:[%s33417_s0 + $0xca8] sm:$0xff]   ;;  %23426 = vst [vmem:[%s33418_s1 + $0x8a8] sm:$0xff] %v26015_v32  ;;  %v26025_v42 = vld [vmem:[%s33417_s0 + $0xcb8] sm:$0xff]   ;;  %23462 = vst [vmem:[%s33418_s1 + $0x8b8] sm:$0xff] %v26024_v41 }
 0x156   :  { %v26017_v34 = vld [vmem:[%s33417_s0 + $0xa8] sm:$0xff]   ;;  %23430 = vst [vmem:[%s33418_s1 + $0x14a8] sm:$0xff] %v26016_v33  ;;  %v26026_v43 = vld [vmem:[%s33417_s0 + $0xb8] sm:$0xff]   ;;  %23466 = vst [vmem:[%s33418_s1 + $0x14b8] sm:$0xff] %v26025_v42 }
 0x157   :  { %23434 = vst [vmem:[%s33418_s1 + $0x20a8] sm:$0xff] %v26017_v34  ;;  %v26027_v44 = vld [vmem:[%s33417_s0 + $0x20c8] sm:$0xff]   ;;  %23470 = vst [vmem:[%s33418_s1 + $0x20b8] sm:$0xff] %v26026_v43  ;;  %v26036_v53 = vld [vmem:[%s33417_s0 + $0x20d8] sm:$0xff]  }
 0x158   :  { %v26028_v45 = vld [vmem:[%s33417_s0 + $0x14c8] sm:$0xff]   ;;  %23474 = vst [vmem:[%s33418_s1 + $0xc8] sm:$0xff] %v26027_v44  ;;  %v26037_v54 = vld [vmem:[%s33417_s0 + $0x14d8] sm:$0xff]   ;;  %23510 = vst [vmem:[%s33418_s1 + $0xd8] sm:$0xff] %v26036_v53 }
 0x159   :  { %v26029_v46 = vld [vmem:[%s33417_s0 + $0x8c8] sm:$0xff]   ;;  %23478 = vst [vmem:[%s33418_s1 + $0xcc8] sm:$0xff] %v26028_v45  ;;  %v26038_v55 = vld [vmem:[%s33417_s0 + $0x8d8] sm:$0xff]   ;;  %23514 = vst [vmem:[%s33418_s1 + $0xcd8] sm:$0xff] %v26037_v54 }
 0x15a   :  { %v26030_v47 = vld [vmem:[%s33417_s0 + $0x1cc8] sm:$0xff]   ;;  %23482 = vst [vmem:[%s33418_s1 + $0x18c8] sm:$0xff] %v26029_v46  ;;  %v26039_v56 = vld [vmem:[%s33417_s0 + $0x1cd8] sm:$0xff]   ;;  %23518 = vst [vmem:[%s33418_s1 + $0x18d8] sm:$0xff] %v26038_v55 }
 0x15b   :  { %v26031_v48 = vld [vmem:[%s33417_s0 + $0x10c8] sm:$0xff]   ;;  %23486 = vst [vmem:[%s33418_s1 + $0x4c8] sm:$0xff] %v26030_v47  ;;  %v26040_v57 = vld [vmem:[%s33417_s0 + $0x10d8] sm:$0xff]   ;;  %23522 = vst [vmem:[%s33418_s1 + $0x4d8] sm:$0xff] %v26039_v56 }
 0x15c   :  { %v26032_v49 = vld [vmem:[%s33417_s0 + $0x4c8] sm:$0xff]   ;;  %23490 = vst [vmem:[%s33418_s1 + $0x10c8] sm:$0xff] %v26031_v48  ;;  %v26041_v58 = vld [vmem:[%s33417_s0 + $0x4d8] sm:$0xff]   ;;  %23526 = vst [vmem:[%s33418_s1 + $0x10d8] sm:$0xff] %v26040_v57 }
 0x15d   :  { %v26033_v50 = vld [vmem:[%s33417_s0 + $0x18c8] sm:$0xff]   ;;  %23494 = vst [vmem:[%s33418_s1 + $0x1cc8] sm:$0xff] %v26032_v49  ;;  %v26042_v59 = vld [vmem:[%s33417_s0 + $0x18d8] sm:$0xff]   ;;  %23530 = vst [vmem:[%s33418_s1 + $0x1cd8] sm:$0xff] %v26041_v58 }
 0x15e   :  { %v26034_v51 = vld [vmem:[%s33417_s0 + $0xcc8] sm:$0xff]   ;;  %23498 = vst [vmem:[%s33418_s1 + $0x8c8] sm:$0xff] %v26033_v50  ;;  %v26043_v60 = vld [vmem:[%s33417_s0 + $0xcd8] sm:$0xff]   ;;  %23534 = vst [vmem:[%s33418_s1 + $0x8d8] sm:$0xff] %v26042_v59 }
 0x15f   :  { %v26035_v52 = vld [vmem:[%s33417_s0 + $0xc8] sm:$0xff]   ;;  %23502 = vst [vmem:[%s33418_s1 + $0x14c8] sm:$0xff] %v26034_v51  ;;  %v26044_v61 = vld [vmem:[%s33417_s0 + $0xd8] sm:$0xff]   ;;  %23538 = vst [vmem:[%s33418_s1 + $0x14d8] sm:$0xff] %v26043_v60 }
 0x160   :  { %23506 = vst [vmem:[%s33418_s1 + $0x20c8] sm:$0xff] %v26035_v52  ;;  %v26045_v62 = vld [vmem:[%s33417_s0 + $0x20e8] sm:$0xff]   ;;  %23542 = vst [vmem:[%s33418_s1 + $0x20d8] sm:$0xff] %v26044_v61  ;;  %v26054_v7 = vld [vmem:[%s33417_s0 + $0x20f8] sm:$0xff]  }
 0x161   :  { %v26046_v63 = vld [vmem:[%s33417_s0 + $0x14e8] sm:$0xff]   ;;  %23546 = vst [vmem:[%s33418_s1 + $0xe8] sm:$0xff] %v26045_v62  ;;  %v26055_v8 = vld [vmem:[%s33417_s0 + $0x14f8] sm:$0xff]   ;;  %23582 = vst [vmem:[%s33418_s1 + $0xf8] sm:$0xff] %v26054_v7 }
 0x162   :  { %v26047_v0 = vld [vmem:[%s33417_s0 + $0x8e8] sm:$0xff]   ;;  %23550 = vst [vmem:[%s33418_s1 + $0xce8] sm:$0xff] %v26046_v63  ;;  %v26056_v9 = vld [vmem:[%s33417_s0 + $0x8f8] sm:$0xff]   ;;  %23586 = vst [vmem:[%s33418_s1 + $0xcf8] sm:$0xff] %v26055_v8 }
 0x163   :  { %v26048_v1 = vld [vmem:[%s33417_s0 + $0x1ce8] sm:$0xff]   ;;  %23554 = vst [vmem:[%s33418_s1 + $0x18e8] sm:$0xff] %v26047_v0  ;;  %v26057_v10 = vld [vmem:[%s33417_s0 + $0x1cf8] sm:$0xff]   ;;  %23590 = vst [vmem:[%s33418_s1 + $0x18f8] sm:$0xff] %v26056_v9 }
 0x164   :  { %v26049_v2 = vld [vmem:[%s33417_s0 + $0x10e8] sm:$0xff]   ;;  %23558 = vst [vmem:[%s33418_s1 + $0x4e8] sm:$0xff] %v26048_v1  ;;  %v26058_v11 = vld [vmem:[%s33417_s0 + $0x10f8] sm:$0xff]   ;;  %23594 = vst [vmem:[%s33418_s1 + $0x4f8] sm:$0xff] %v26057_v10 }
 0x165   :  { %v26050_v3 = vld [vmem:[%s33417_s0 + $0x4e8] sm:$0xff]   ;;  %23562 = vst [vmem:[%s33418_s1 + $0x10e8] sm:$0xff] %v26049_v2  ;;  %v26059_v12 = vld [vmem:[%s33417_s0 + $0x4f8] sm:$0xff]   ;;  %23598 = vst [vmem:[%s33418_s1 + $0x10f8] sm:$0xff] %v26058_v11 }
 0x166   :  { %v26051_v4 = vld [vmem:[%s33417_s0 + $0x18e8] sm:$0xff]   ;;  %23566 = vst [vmem:[%s33418_s1 + $0x1ce8] sm:$0xff] %v26050_v3  ;;  %v26060_v13 = vld [vmem:[%s33417_s0 + $0x18f8] sm:$0xff]   ;;  %23602 = vst [vmem:[%s33418_s1 + $0x1cf8] sm:$0xff] %v26059_v12 }
 0x167   :  { %v26052_v5 = vld [vmem:[%s33417_s0 + $0xce8] sm:$0xff]   ;;  %23570 = vst [vmem:[%s33418_s1 + $0x8e8] sm:$0xff] %v26051_v4  ;;  %v26061_v14 = vld [vmem:[%s33417_s0 + $0xcf8] sm:$0xff]   ;;  %23606 = vst [vmem:[%s33418_s1 + $0x8f8] sm:$0xff] %v26060_v13 }
 0x168   :  { %v26053_v6 = vld [vmem:[%s33417_s0 + $0xe8] sm:$0xff]   ;;  %23574 = vst [vmem:[%s33418_s1 + $0x14e8] sm:$0xff] %v26052_v5  ;;  %v26062_v15 = vld [vmem:[%s33417_s0 + $0xf8] sm:$0xff]   ;;  %23610 = vst [vmem:[%s33418_s1 + $0x14f8] sm:$0xff] %v26061_v14 }
 0x169   :  { %23578 = vst [vmem:[%s33418_s1 + $0x20e8] sm:$0xff] %v26053_v6  ;;  %v26063_v16 = vld [vmem:[%s33417_s0 + $0x2108] sm:$0xff]   ;;  %23614 = vst [vmem:[%s33418_s1 + $0x20f8] sm:$0xff] %v26062_v15  ;;  %v26072_v25 = vld [vmem:[%s33417_s0 + $0x2118] sm:$0xff]  }
 0x16a   :  { %v26064_v17 = vld [vmem:[%s33417_s0 + $0x1508] sm:$0xff]   ;;  %23618 = vst [vmem:[%s33418_s1 + $0x108] sm:$0xff] %v26063_v16  ;;  %v26073_v26 = vld [vmem:[%s33417_s0 + $0x1518] sm:$0xff]   ;;  %23654 = vst [vmem:[%s33418_s1 + $0x118] sm:$0xff] %v26072_v25 }
 0x16b   :  { %v26065_v18 = vld [vmem:[%s33417_s0 + $0x908] sm:$0xff]   ;;  %23622 = vst [vmem:[%s33418_s1 + $0xd08] sm:$0xff] %v26064_v17  ;;  %v26074_v27 = vld [vmem:[%s33417_s0 + $0x918] sm:$0xff]   ;;  %23658 = vst [vmem:[%s33418_s1 + $0xd18] sm:$0xff] %v26073_v26 }
 0x16c   :  { %v26066_v19 = vld [vmem:[%s33417_s0 + $0x1d08] sm:$0xff]   ;;  %23626 = vst [vmem:[%s33418_s1 + $0x1908] sm:$0xff] %v26065_v18  ;;  %v26075_v28 = vld [vmem:[%s33417_s0 + $0x1d18] sm:$0xff]   ;;  %23662 = vst [vmem:[%s33418_s1 + $0x1918] sm:$0xff] %v26074_v27 }
 0x16d   :  { %v26067_v20 = vld [vmem:[%s33417_s0 + $0x1108] sm:$0xff]   ;;  %23630 = vst [vmem:[%s33418_s1 + $0x508] sm:$0xff] %v26066_v19  ;;  %v26076_v29 = vld [vmem:[%s33417_s0 + $0x1118] sm:$0xff]   ;;  %23666 = vst [vmem:[%s33418_s1 + $0x518] sm:$0xff] %v26075_v28 }
 0x16e   :  { %v26068_v21 = vld [vmem:[%s33417_s0 + $0x508] sm:$0xff]   ;;  %23634 = vst [vmem:[%s33418_s1 + $0x1108] sm:$0xff] %v26067_v20  ;;  %v26077_v30 = vld [vmem:[%s33417_s0 + $0x518] sm:$0xff]   ;;  %23670 = vst [vmem:[%s33418_s1 + $0x1118] sm:$0xff] %v26076_v29 }
 0x16f   :  { %v26069_v22 = vld [vmem:[%s33417_s0 + $0x1908] sm:$0xff]   ;;  %23638 = vst [vmem:[%s33418_s1 + $0x1d08] sm:$0xff] %v26068_v21  ;;  %v26078_v31 = vld [vmem:[%s33417_s0 + $0x1918] sm:$0xff]   ;;  %23674 = vst [vmem:[%s33418_s1 + $0x1d18] sm:$0xff] %v26077_v30 }
 0x170   :  { %v26070_v23 = vld [vmem:[%s33417_s0 + $0xd08] sm:$0xff]   ;;  %23642 = vst [vmem:[%s33418_s1 + $0x908] sm:$0xff] %v26069_v22  ;;  %v26079_v32 = vld [vmem:[%s33417_s0 + $0xd18] sm:$0xff]   ;;  %23678 = vst [vmem:[%s33418_s1 + $0x918] sm:$0xff] %v26078_v31 }
 0x171   :  { %v26071_v24 = vld [vmem:[%s33417_s0 + $0x108] sm:$0xff]   ;;  %23646 = vst [vmem:[%s33418_s1 + $0x1508] sm:$0xff] %v26070_v23  ;;  %v26080_v33 = vld [vmem:[%s33417_s0 + $0x118] sm:$0xff]   ;;  %23682 = vst [vmem:[%s33418_s1 + $0x1518] sm:$0xff] %v26079_v32 }
 0x172   :  { %23650 = vst [vmem:[%s33418_s1 + $0x2108] sm:$0xff] %v26071_v24  ;;  %v26081_v34 = vld [vmem:[%s33417_s0 + $0x2128] sm:$0xff]   ;;  %23686 = vst [vmem:[%s33418_s1 + $0x2118] sm:$0xff] %v26080_v33  ;;  %v26090_v43 = vld [vmem:[%s33417_s0 + $0x2138] sm:$0xff]  }
 0x173   :  { %v26082_v35 = vld [vmem:[%s33417_s0 + $0x1528] sm:$0xff]   ;;  %23690 = vst [vmem:[%s33418_s1 + $0x128] sm:$0xff] %v26081_v34  ;;  %v26091_v44 = vld [vmem:[%s33417_s0 + $0x1538] sm:$0xff]   ;;  %23726 = vst [vmem:[%s33418_s1 + $0x138] sm:$0xff] %v26090_v43 }
 0x174   :  { %v26083_v36 = vld [vmem:[%s33417_s0 + $0x928] sm:$0xff]   ;;  %23694 = vst [vmem:[%s33418_s1 + $0xd28] sm:$0xff] %v26082_v35  ;;  %v26092_v45 = vld [vmem:[%s33417_s0 + $0x938] sm:$0xff]   ;;  %23730 = vst [vmem:[%s33418_s1 + $0xd38] sm:$0xff] %v26091_v44 }
 0x175   :  { %v26084_v37 = vld [vmem:[%s33417_s0 + $0x1d28] sm:$0xff]   ;;  %23698 = vst [vmem:[%s33418_s1 + $0x1928] sm:$0xff] %v26083_v36  ;;  %v26093_v46 = vld [vmem:[%s33417_s0 + $0x1d38] sm:$0xff]   ;;  %23734 = vst [vmem:[%s33418_s1 + $0x1938] sm:$0xff] %v26092_v45 }
 0x176   :  { %v26085_v38 = vld [vmem:[%s33417_s0 + $0x1128] sm:$0xff]   ;;  %23702 = vst [vmem:[%s33418_s1 + $0x528] sm:$0xff] %v26084_v37  ;;  %v26094_v47 = vld [vmem:[%s33417_s0 + $0x1138] sm:$0xff]   ;;  %23738 = vst [vmem:[%s33418_s1 + $0x538] sm:$0xff] %v26093_v46 }
 0x177   :  { %v26086_v39 = vld [vmem:[%s33417_s0 + $0x528] sm:$0xff]   ;;  %23706 = vst [vmem:[%s33418_s1 + $0x1128] sm:$0xff] %v26085_v38  ;;  %v26095_v48 = vld [vmem:[%s33417_s0 + $0x538] sm:$0xff]   ;;  %23742 = vst [vmem:[%s33418_s1 + $0x1138] sm:$0xff] %v26094_v47 }
 0x178   :  { %v26087_v40 = vld [vmem:[%s33417_s0 + $0x1928] sm:$0xff]   ;;  %23710 = vst [vmem:[%s33418_s1 + $0x1d28] sm:$0xff] %v26086_v39  ;;  %v26096_v49 = vld [vmem:[%s33417_s0 + $0x1938] sm:$0xff]   ;;  %23746 = vst [vmem:[%s33418_s1 + $0x1d38] sm:$0xff] %v26095_v48 }
 0x179   :  { %v26088_v41 = vld [vmem:[%s33417_s0 + $0xd28] sm:$0xff]   ;;  %23714 = vst [vmem:[%s33418_s1 + $0x928] sm:$0xff] %v26087_v40  ;;  %v26097_v50 = vld [vmem:[%s33417_s0 + $0xd38] sm:$0xff]   ;;  %23750 = vst [vmem:[%s33418_s1 + $0x938] sm:$0xff] %v26096_v49 }
 0x17a   :  { %v26089_v42 = vld [vmem:[%s33417_s0 + $0x128] sm:$0xff]   ;;  %23718 = vst [vmem:[%s33418_s1 + $0x1528] sm:$0xff] %v26088_v41  ;;  %v26098_v51 = vld [vmem:[%s33417_s0 + $0x138] sm:$0xff]   ;;  %23754 = vst [vmem:[%s33418_s1 + $0x1538] sm:$0xff] %v26097_v50 }
 0x17b   :  { %23722 = vst [vmem:[%s33418_s1 + $0x2128] sm:$0xff] %v26089_v42  ;;  %v26099_v52 = vld [vmem:[%s33417_s0 + $0x2148] sm:$0xff]   ;;  %23758 = vst [vmem:[%s33418_s1 + $0x2138] sm:$0xff] %v26098_v51  ;;  %v26108_v61 = vld [vmem:[%s33417_s0 + $0x2158] sm:$0xff]  }
 0x17c   :  { %v26100_v53 = vld [vmem:[%s33417_s0 + $0x1548] sm:$0xff]   ;;  %23762 = vst [vmem:[%s33418_s1 + $0x148] sm:$0xff] %v26099_v52  ;;  %v26109_v62 = vld [vmem:[%s33417_s0 + $0x1558] sm:$0xff]   ;;  %23798 = vst [vmem:[%s33418_s1 + $0x158] sm:$0xff] %v26108_v61 }
 0x17d   :  { %v26101_v54 = vld [vmem:[%s33417_s0 + $0x948] sm:$0xff]   ;;  %23766 = vst [vmem:[%s33418_s1 + $0xd48] sm:$0xff] %v26100_v53  ;;  %v26110_v63 = vld [vmem:[%s33417_s0 + $0x958] sm:$0xff]   ;;  %23802 = vst [vmem:[%s33418_s1 + $0xd58] sm:$0xff] %v26109_v62 }
 0x17e   :  { %v26102_v55 = vld [vmem:[%s33417_s0 + $0x1d48] sm:$0xff]   ;;  %23770 = vst [vmem:[%s33418_s1 + $0x1948] sm:$0xff] %v26101_v54  ;;  %v26111_v0 = vld [vmem:[%s33417_s0 + $0x1d58] sm:$0xff]   ;;  %23806 = vst [vmem:[%s33418_s1 + $0x1958] sm:$0xff] %v26110_v63 }
 0x17f   :  { %v26103_v56 = vld [vmem:[%s33417_s0 + $0x1148] sm:$0xff]   ;;  %23774 = vst [vmem:[%s33418_s1 + $0x548] sm:$0xff] %v26102_v55  ;;  %v26112_v1 = vld [vmem:[%s33417_s0 + $0x1158] sm:$0xff]   ;;  %23810 = vst [vmem:[%s33418_s1 + $0x558] sm:$0xff] %v26111_v0 }
 0x180   :  { %v26104_v57 = vld [vmem:[%s33417_s0 + $0x548] sm:$0xff]   ;;  %23778 = vst [vmem:[%s33418_s1 + $0x1148] sm:$0xff] %v26103_v56  ;;  %v26113_v2 = vld [vmem:[%s33417_s0 + $0x558] sm:$0xff]   ;;  %23814 = vst [vmem:[%s33418_s1 + $0x1158] sm:$0xff] %v26112_v1 }
 0x181   :  { %v26105_v58 = vld [vmem:[%s33417_s0 + $0x1948] sm:$0xff]   ;;  %23782 = vst [vmem:[%s33418_s1 + $0x1d48] sm:$0xff] %v26104_v57  ;;  %v26114_v3 = vld [vmem:[%s33417_s0 + $0x1958] sm:$0xff]   ;;  %23818 = vst [vmem:[%s33418_s1 + $0x1d58] sm:$0xff] %v26113_v2 }
 0x182   :  { %v26106_v59 = vld [vmem:[%s33417_s0 + $0xd48] sm:$0xff]   ;;  %23786 = vst [vmem:[%s33418_s1 + $0x948] sm:$0xff] %v26105_v58  ;;  %v26115_v4 = vld [vmem:[%s33417_s0 + $0xd58] sm:$0xff]   ;;  %23822 = vst [vmem:[%s33418_s1 + $0x958] sm:$0xff] %v26114_v3 }
 0x183   :  { %v26107_v60 = vld [vmem:[%s33417_s0 + $0x148] sm:$0xff]   ;;  %23790 = vst [vmem:[%s33418_s1 + $0x1548] sm:$0xff] %v26106_v59  ;;  %v26116_v5 = vld [vmem:[%s33417_s0 + $0x158] sm:$0xff]   ;;  %23826 = vst [vmem:[%s33418_s1 + $0x1558] sm:$0xff] %v26115_v4 }
 0x184   :  { %23794 = vst [vmem:[%s33418_s1 + $0x2148] sm:$0xff] %v26107_v60  ;;  %v26117_v6 = vld [vmem:[%s33417_s0 + $0x2168] sm:$0xff]   ;;  %23830 = vst [vmem:[%s33418_s1 + $0x2158] sm:$0xff] %v26116_v5  ;;  %v26126_v15 = vld [vmem:[%s33417_s0 + $0x2178] sm:$0xff]  }
 0x185   :  { %v26118_v7 = vld [vmem:[%s33417_s0 + $0x1568] sm:$0xff]   ;;  %23834 = vst [vmem:[%s33418_s1 + $0x168] sm:$0xff] %v26117_v6  ;;  %v26127_v16 = vld [vmem:[%s33417_s0 + $0x1578] sm:$0xff]   ;;  %23870 = vst [vmem:[%s33418_s1 + $0x178] sm:$0xff] %v26126_v15 }
 0x186   :  { %v26119_v8 = vld [vmem:[%s33417_s0 + $0x968] sm:$0xff]   ;;  %23838 = vst [vmem:[%s33418_s1 + $0xd68] sm:$0xff] %v26118_v7  ;;  %v26128_v17 = vld [vmem:[%s33417_s0 + $0x978] sm:$0xff]   ;;  %23874 = vst [vmem:[%s33418_s1 + $0xd78] sm:$0xff] %v26127_v16 }
 0x187   :  { %v26120_v9 = vld [vmem:[%s33417_s0 + $0x1d68] sm:$0xff]   ;;  %23842 = vst [vmem:[%s33418_s1 + $0x1968] sm:$0xff] %v26119_v8  ;;  %v26129_v18 = vld [vmem:[%s33417_s0 + $0x1d78] sm:$0xff]   ;;  %23878 = vst [vmem:[%s33418_s1 + $0x1978] sm:$0xff] %v26128_v17 }
 0x188   :  { %v26121_v10 = vld [vmem:[%s33417_s0 + $0x1168] sm:$0xff]   ;;  %23846 = vst [vmem:[%s33418_s1 + $0x568] sm:$0xff] %v26120_v9  ;;  %v26130_v19 = vld [vmem:[%s33417_s0 + $0x1178] sm:$0xff]   ;;  %23882 = vst [vmem:[%s33418_s1 + $0x578] sm:$0xff] %v26129_v18 }
 0x189   :  { %v26122_v11 = vld [vmem:[%s33417_s0 + $0x568] sm:$0xff]   ;;  %23850 = vst [vmem:[%s33418_s1 + $0x1168] sm:$0xff] %v26121_v10  ;;  %v26131_v20 = vld [vmem:[%s33417_s0 + $0x578] sm:$0xff]   ;;  %23886 = vst [vmem:[%s33418_s1 + $0x1178] sm:$0xff] %v26130_v19 }
 0x18a   :  { %v26123_v12 = vld [vmem:[%s33417_s0 + $0x1968] sm:$0xff]   ;;  %23854 = vst [vmem:[%s33418_s1 + $0x1d68] sm:$0xff] %v26122_v11  ;;  %v26132_v21 = vld [vmem:[%s33417_s0 + $0x1978] sm:$0xff]   ;;  %23890 = vst [vmem:[%s33418_s1 + $0x1d78] sm:$0xff] %v26131_v20 }
 0x18b   :  { %v26124_v13 = vld [vmem:[%s33417_s0 + $0xd68] sm:$0xff]   ;;  %23858 = vst [vmem:[%s33418_s1 + $0x968] sm:$0xff] %v26123_v12  ;;  %v26133_v22 = vld [vmem:[%s33417_s0 + $0xd78] sm:$0xff]   ;;  %23894 = vst [vmem:[%s33418_s1 + $0x978] sm:$0xff] %v26132_v21 }
 0x18c   :  { %v26125_v14 = vld [vmem:[%s33417_s0 + $0x168] sm:$0xff]   ;;  %23862 = vst [vmem:[%s33418_s1 + $0x1568] sm:$0xff] %v26124_v13  ;;  %v26134_v23 = vld [vmem:[%s33417_s0 + $0x178] sm:$0xff]   ;;  %23898 = vst [vmem:[%s33418_s1 + $0x1578] sm:$0xff] %v26133_v22 }
 0x18d   :  { %23866 = vst [vmem:[%s33418_s1 + $0x2168] sm:$0xff] %v26125_v14  ;;  %v26135_v24 = vld [vmem:[%s33417_s0 + $0x2188] sm:$0xff]   ;;  %23902 = vst [vmem:[%s33418_s1 + $0x2178] sm:$0xff] %v26134_v23  ;;  %v26144_v33 = vld [vmem:[%s33417_s0 + $0x2198] sm:$0xff]  }
 0x18e   :  { %v26136_v25 = vld [vmem:[%s33417_s0 + $0x1588] sm:$0xff]   ;;  %23906 = vst [vmem:[%s33418_s1 + $0x188] sm:$0xff] %v26135_v24  ;;  %v26145_v34 = vld [vmem:[%s33417_s0 + $0x1598] sm:$0xff]   ;;  %23942 = vst [vmem:[%s33418_s1 + $0x198] sm:$0xff] %v26144_v33 }
 0x18f   :  { %v26137_v26 = vld [vmem:[%s33417_s0 + $0x988] sm:$0xff]   ;;  %23910 = vst [vmem:[%s33418_s1 + $0xd88] sm:$0xff] %v26136_v25  ;;  %v26146_v35 = vld [vmem:[%s33417_s0 + $0x998] sm:$0xff]   ;;  %23946 = vst [vmem:[%s33418_s1 + $0xd98] sm:$0xff] %v26145_v34 }
 0x190   :  { %v26138_v27 = vld [vmem:[%s33417_s0 + $0x1d88] sm:$0xff]   ;;  %23914 = vst [vmem:[%s33418_s1 + $0x1988] sm:$0xff] %v26137_v26  ;;  %v26147_v36 = vld [vmem:[%s33417_s0 + $0x1d98] sm:$0xff]   ;;  %23950 = vst [vmem:[%s33418_s1 + $0x1998] sm:$0xff] %v26146_v35 }
 0x191   :  { %v26139_v28 = vld [vmem:[%s33417_s0 + $0x1188] sm:$0xff]   ;;  %23918 = vst [vmem:[%s33418_s1 + $0x588] sm:$0xff] %v26138_v27  ;;  %v26148_v37 = vld [vmem:[%s33417_s0 + $0x1198] sm:$0xff]   ;;  %23954 = vst [vmem:[%s33418_s1 + $0x598] sm:$0xff] %v26147_v36 }
 0x192   :  { %v26140_v29 = vld [vmem:[%s33417_s0 + $0x588] sm:$0xff]   ;;  %23922 = vst [vmem:[%s33418_s1 + $0x1188] sm:$0xff] %v26139_v28  ;;  %v26149_v38 = vld [vmem:[%s33417_s0 + $0x598] sm:$0xff]   ;;  %23958 = vst [vmem:[%s33418_s1 + $0x1198] sm:$0xff] %v26148_v37 }
 0x193   :  { %v26141_v30 = vld [vmem:[%s33417_s0 + $0x1988] sm:$0xff]   ;;  %23926 = vst [vmem:[%s33418_s1 + $0x1d88] sm:$0xff] %v26140_v29  ;;  %v26150_v39 = vld [vmem:[%s33417_s0 + $0x1998] sm:$0xff]   ;;  %23962 = vst [vmem:[%s33418_s1 + $0x1d98] sm:$0xff] %v26149_v38 }
 0x194   :  { %v26142_v31 = vld [vmem:[%s33417_s0 + $0xd88] sm:$0xff]   ;;  %23930 = vst [vmem:[%s33418_s1 + $0x988] sm:$0xff] %v26141_v30  ;;  %v26151_v40 = vld [vmem:[%s33417_s0 + $0xd98] sm:$0xff]   ;;  %23966 = vst [vmem:[%s33418_s1 + $0x998] sm:$0xff] %v26150_v39 }
 0x195   :  { %v26143_v32 = vld [vmem:[%s33417_s0 + $0x188] sm:$0xff]   ;;  %23934 = vst [vmem:[%s33418_s1 + $0x1588] sm:$0xff] %v26142_v31  ;;  %v26152_v41 = vld [vmem:[%s33417_s0 + $0x198] sm:$0xff]   ;;  %23970 = vst [vmem:[%s33418_s1 + $0x1598] sm:$0xff] %v26151_v40 }
 0x196   :  { %23938 = vst [vmem:[%s33418_s1 + $0x2188] sm:$0xff] %v26143_v32  ;;  %v26153_v42 = vld [vmem:[%s33417_s0 + $0x21a8] sm:$0xff]   ;;  %23974 = vst [vmem:[%s33418_s1 + $0x2198] sm:$0xff] %v26152_v41  ;;  %v26162_v51 = vld [vmem:[%s33417_s0 + $0x21b8] sm:$0xff]  }
 0x197   :  { %v26154_v43 = vld [vmem:[%s33417_s0 + $0x15a8] sm:$0xff]   ;;  %23978 = vst [vmem:[%s33418_s1 + $0x1a8] sm:$0xff] %v26153_v42  ;;  %v26163_v52 = vld [vmem:[%s33417_s0 + $0x15b8] sm:$0xff]   ;;  %24014 = vst [vmem:[%s33418_s1 + $0x1b8] sm:$0xff] %v26162_v51 }
 0x198   :  { %v26155_v44 = vld [vmem:[%s33417_s0 + $0x9a8] sm:$0xff]   ;;  %23982 = vst [vmem:[%s33418_s1 + $0xda8] sm:$0xff] %v26154_v43  ;;  %v26164_v53 = vld [vmem:[%s33417_s0 + $0x9b8] sm:$0xff]   ;;  %24018 = vst [vmem:[%s33418_s1 + $0xdb8] sm:$0xff] %v26163_v52 }
 0x199   :  { %v26156_v45 = vld [vmem:[%s33417_s0 + $0x1da8] sm:$0xff]   ;;  %23986 = vst [vmem:[%s33418_s1 + $0x19a8] sm:$0xff] %v26155_v44  ;;  %v26165_v54 = vld [vmem:[%s33417_s0 + $0x1db8] sm:$0xff]   ;;  %24022 = vst [vmem:[%s33418_s1 + $0x19b8] sm:$0xff] %v26164_v53 }
 0x19a   :  { %v26157_v46 = vld [vmem:[%s33417_s0 + $0x11a8] sm:$0xff]   ;;  %23990 = vst [vmem:[%s33418_s1 + $0x5a8] sm:$0xff] %v26156_v45  ;;  %v26166_v55 = vld [vmem:[%s33417_s0 + $0x11b8] sm:$0xff]   ;;  %24026 = vst [vmem:[%s33418_s1 + $0x5b8] sm:$0xff] %v26165_v54 }
 0x19b   :  { %v26158_v47 = vld [vmem:[%s33417_s0 + $0x5a8] sm:$0xff]   ;;  %23994 = vst [vmem:[%s33418_s1 + $0x11a8] sm:$0xff] %v26157_v46  ;;  %v26167_v56 = vld [vmem:[%s33417_s0 + $0x5b8] sm:$0xff]   ;;  %24030 = vst [vmem:[%s33418_s1 + $0x11b8] sm:$0xff] %v26166_v55 }
 0x19c   :  { %v26159_v48 = vld [vmem:[%s33417_s0 + $0x19a8] sm:$0xff]   ;;  %23998 = vst [vmem:[%s33418_s1 + $0x1da8] sm:$0xff] %v26158_v47  ;;  %v26168_v57 = vld [vmem:[%s33417_s0 + $0x19b8] sm:$0xff]   ;;  %24034 = vst [vmem:[%s33418_s1 + $0x1db8] sm:$0xff] %v26167_v56 }
 0x19d   :  { %v26160_v49 = vld [vmem:[%s33417_s0 + $0xda8] sm:$0xff]   ;;  %24002 = vst [vmem:[%s33418_s1 + $0x9a8] sm:$0xff] %v26159_v48  ;;  %v26169_v58 = vld [vmem:[%s33417_s0 + $0xdb8] sm:$0xff]   ;;  %24038 = vst [vmem:[%s33418_s1 + $0x9b8] sm:$0xff] %v26168_v57 }
 0x19e   :  { %v26161_v50 = vld [vmem:[%s33417_s0 + $0x1a8] sm:$0xff]   ;;  %24006 = vst [vmem:[%s33418_s1 + $0x15a8] sm:$0xff] %v26160_v49  ;;  %v26170_v59 = vld [vmem:[%s33417_s0 + $0x1b8] sm:$0xff]   ;;  %24042 = vst [vmem:[%s33418_s1 + $0x15b8] sm:$0xff] %v26169_v58 }
 0x19f   :  { %24010 = vst [vmem:[%s33418_s1 + $0x21a8] sm:$0xff] %v26161_v50  ;;  %v26171_v60 = vld [vmem:[%s33417_s0 + $0x21c8] sm:$0xff]   ;;  %24046 = vst [vmem:[%s33418_s1 + $0x21b8] sm:$0xff] %v26170_v59  ;;  %v26180_v5 = vld [vmem:[%s33417_s0 + $0x21d8] sm:$0xff]  }
 0x1a0   :  { %v26172_v61 = vld [vmem:[%s33417_s0 + $0x15c8] sm:$0xff]   ;;  %24050 = vst [vmem:[%s33418_s1 + $0x1c8] sm:$0xff] %v26171_v60  ;;  %v26181_v6 = vld [vmem:[%s33417_s0 + $0x15d8] sm:$0xff]   ;;  %24086 = vst [vmem:[%s33418_s1 + $0x1d8] sm:$0xff] %v26180_v5 }
 0x1a1   :  { %v26173_v62 = vld [vmem:[%s33417_s0 + $0x9c8] sm:$0xff]   ;;  %24054 = vst [vmem:[%s33418_s1 + $0xdc8] sm:$0xff] %v26172_v61  ;;  %v26182_v7 = vld [vmem:[%s33417_s0 + $0x9d8] sm:$0xff]   ;;  %24090 = vst [vmem:[%s33418_s1 + $0xdd8] sm:$0xff] %v26181_v6 }
 0x1a2   :  { %v26174_v63 = vld [vmem:[%s33417_s0 + $0x1dc8] sm:$0xff]   ;;  %24058 = vst [vmem:[%s33418_s1 + $0x19c8] sm:$0xff] %v26173_v62  ;;  %v26183_v8 = vld [vmem:[%s33417_s0 + $0x1dd8] sm:$0xff]   ;;  %24094 = vst [vmem:[%s33418_s1 + $0x19d8] sm:$0xff] %v26182_v7 }
 0x1a3   :  { %v26175_v0 = vld [vmem:[%s33417_s0 + $0x11c8] sm:$0xff]   ;;  %24062 = vst [vmem:[%s33418_s1 + $0x5c8] sm:$0xff] %v26174_v63  ;;  %v26184_v9 = vld [vmem:[%s33417_s0 + $0x11d8] sm:$0xff]   ;;  %24098 = vst [vmem:[%s33418_s1 + $0x5d8] sm:$0xff] %v26183_v8 }
 0x1a4   :  { %v26176_v1 = vld [vmem:[%s33417_s0 + $0x5c8] sm:$0xff]   ;;  %24066 = vst [vmem:[%s33418_s1 + $0x11c8] sm:$0xff] %v26175_v0  ;;  %v26185_v10 = vld [vmem:[%s33417_s0 + $0x5d8] sm:$0xff]   ;;  %24102 = vst [vmem:[%s33418_s1 + $0x11d8] sm:$0xff] %v26184_v9 }
 0x1a5   :  { %v26177_v2 = vld [vmem:[%s33417_s0 + $0x19c8] sm:$0xff]   ;;  %24070 = vst [vmem:[%s33418_s1 + $0x1dc8] sm:$0xff] %v26176_v1  ;;  %v26186_v11 = vld [vmem:[%s33417_s0 + $0x19d8] sm:$0xff]   ;;  %24106 = vst [vmem:[%s33418_s1 + $0x1dd8] sm:$0xff] %v26185_v10 }
 0x1a6   :  { %v26178_v3 = vld [vmem:[%s33417_s0 + $0xdc8] sm:$0xff]   ;;  %24074 = vst [vmem:[%s33418_s1 + $0x9c8] sm:$0xff] %v26177_v2  ;;  %v26187_v12 = vld [vmem:[%s33417_s0 + $0xdd8] sm:$0xff]   ;;  %24110 = vst [vmem:[%s33418_s1 + $0x9d8] sm:$0xff] %v26186_v11 }
 0x1a7   :  { %v26179_v4 = vld [vmem:[%s33417_s0 + $0x1c8] sm:$0xff]   ;;  %24078 = vst [vmem:[%s33418_s1 + $0x15c8] sm:$0xff] %v26178_v3  ;;  %v26188_v13 = vld [vmem:[%s33417_s0 + $0x1d8] sm:$0xff]   ;;  %24114 = vst [vmem:[%s33418_s1 + $0x15d8] sm:$0xff] %v26187_v12 }
 0x1a8   :  { %24082 = vst [vmem:[%s33418_s1 + $0x21c8] sm:$0xff] %v26179_v4  ;;  %v26189_v14 = vld [vmem:[%s33417_s0 + $0x21e8] sm:$0xff]   ;;  %24118 = vst [vmem:[%s33418_s1 + $0x21d8] sm:$0xff] %v26188_v13  ;;  %v26198_v23 = vld [vmem:[%s33417_s0 + $0x21f8] sm:$0xff]  }
 0x1a9   :  { %v26190_v15 = vld [vmem:[%s33417_s0 + $0x15e8] sm:$0xff]   ;;  %24122 = vst [vmem:[%s33418_s1 + $0x1e8] sm:$0xff] %v26189_v14  ;;  %v26199_v24 = vld [vmem:[%s33417_s0 + $0x15f8] sm:$0xff]   ;;  %24158 = vst [vmem:[%s33418_s1 + $0x1f8] sm:$0xff] %v26198_v23 }
 0x1aa   :  { %v26191_v16 = vld [vmem:[%s33417_s0 + $0x9e8] sm:$0xff]   ;;  %24126 = vst [vmem:[%s33418_s1 + $0xde8] sm:$0xff] %v26190_v15  ;;  %v26200_v25 = vld [vmem:[%s33417_s0 + $0x9f8] sm:$0xff]   ;;  %24162 = vst [vmem:[%s33418_s1 + $0xdf8] sm:$0xff] %v26199_v24 }
 0x1ab   :  { %v26192_v17 = vld [vmem:[%s33417_s0 + $0x1de8] sm:$0xff]   ;;  %24130 = vst [vmem:[%s33418_s1 + $0x19e8] sm:$0xff] %v26191_v16  ;;  %v26201_v26 = vld [vmem:[%s33417_s0 + $0x1df8] sm:$0xff]   ;;  %24166 = vst [vmem:[%s33418_s1 + $0x19f8] sm:$0xff] %v26200_v25 }
 0x1ac   :  { %v26193_v18 = vld [vmem:[%s33417_s0 + $0x11e8] sm:$0xff]   ;;  %24134 = vst [vmem:[%s33418_s1 + $0x5e8] sm:$0xff] %v26192_v17  ;;  %v26202_v27 = vld [vmem:[%s33417_s0 + $0x11f8] sm:$0xff]   ;;  %24170 = vst [vmem:[%s33418_s1 + $0x5f8] sm:$0xff] %v26201_v26 }
 0x1ad   :  { %v26194_v19 = vld [vmem:[%s33417_s0 + $0x5e8] sm:$0xff]   ;;  %24138 = vst [vmem:[%s33418_s1 + $0x11e8] sm:$0xff] %v26193_v18  ;;  %v26203_v28 = vld [vmem:[%s33417_s0 + $0x5f8] sm:$0xff]   ;;  %24174 = vst [vmem:[%s33418_s1 + $0x11f8] sm:$0xff] %v26202_v27 }
 0x1ae   :  { %v26195_v20 = vld [vmem:[%s33417_s0 + $0x19e8] sm:$0xff]   ;;  %24142 = vst [vmem:[%s33418_s1 + $0x1de8] sm:$0xff] %v26194_v19  ;;  %v26204_v29 = vld [vmem:[%s33417_s0 + $0x19f8] sm:$0xff]   ;;  %24178 = vst [vmem:[%s33418_s1 + $0x1df8] sm:$0xff] %v26203_v28 }
 0x1af   :  { %v26196_v21 = vld [vmem:[%s33417_s0 + $0xde8] sm:$0xff]   ;;  %24146 = vst [vmem:[%s33418_s1 + $0x9e8] sm:$0xff] %v26195_v20  ;;  %v26205_v30 = vld [vmem:[%s33417_s0 + $0xdf8] sm:$0xff]   ;;  %24182 = vst [vmem:[%s33418_s1 + $0x9f8] sm:$0xff] %v26204_v29 }
 0x1b0   :  { %v26197_v22 = vld [vmem:[%s33417_s0 + $0x1e8] sm:$0xff]   ;;  %24150 = vst [vmem:[%s33418_s1 + $0x15e8] sm:$0xff] %v26196_v21  ;;  %v26206_v31 = vld [vmem:[%s33417_s0 + $0x1f8] sm:$0xff]   ;;  %24186 = vst [vmem:[%s33418_s1 + $0x15f8] sm:$0xff] %v26205_v30 }
 0x1b1   :  { %24154 = vst [vmem:[%s33418_s1 + $0x21e8] sm:$0xff] %v26197_v22  ;;  %v26207_v32 = vld [vmem:[%s33417_s0 + $0x2208] sm:$0xff]   ;;  %24190 = vst [vmem:[%s33418_s1 + $0x21f8] sm:$0xff] %v26206_v31  ;;  %v26216_v41 = vld [vmem:[%s33417_s0 + $0x2218] sm:$0xff]  }
 0x1b2   :  { %v26208_v33 = vld [vmem:[%s33417_s0 + $0x1608] sm:$0xff]   ;;  %24194 = vst [vmem:[%s33418_s1 + $0x208] sm:$0xff] %v26207_v32  ;;  %v26217_v42 = vld [vmem:[%s33417_s0 + $0x1618] sm:$0xff]   ;;  %24230 = vst [vmem:[%s33418_s1 + $0x218] sm:$0xff] %v26216_v41 }
 0x1b3   :  { %v26209_v34 = vld [vmem:[%s33417_s0 + $0xa08] sm:$0xff]   ;;  %24198 = vst [vmem:[%s33418_s1 + $0xe08] sm:$0xff] %v26208_v33  ;;  %v26218_v43 = vld [vmem:[%s33417_s0 + $0xa18] sm:$0xff]   ;;  %24234 = vst [vmem:[%s33418_s1 + $0xe18] sm:$0xff] %v26217_v42 }
 0x1b4   :  { %v26210_v35 = vld [vmem:[%s33417_s0 + $0x1e08] sm:$0xff]   ;;  %24202 = vst [vmem:[%s33418_s1 + $0x1a08] sm:$0xff] %v26209_v34  ;;  %v26219_v44 = vld [vmem:[%s33417_s0 + $0x1e18] sm:$0xff]   ;;  %24238 = vst [vmem:[%s33418_s1 + $0x1a18] sm:$0xff] %v26218_v43 }
 0x1b5   :  { %v26211_v36 = vld [vmem:[%s33417_s0 + $0x1208] sm:$0xff]   ;;  %24206 = vst [vmem:[%s33418_s1 + $0x608] sm:$0xff] %v26210_v35  ;;  %v26220_v45 = vld [vmem:[%s33417_s0 + $0x1218] sm:$0xff]   ;;  %24242 = vst [vmem:[%s33418_s1 + $0x618] sm:$0xff] %v26219_v44 }
 0x1b6   :  { %v26212_v37 = vld [vmem:[%s33417_s0 + $0x608] sm:$0xff]   ;;  %24210 = vst [vmem:[%s33418_s1 + $0x1208] sm:$0xff] %v26211_v36  ;;  %v26221_v46 = vld [vmem:[%s33417_s0 + $0x618] sm:$0xff]   ;;  %24246 = vst [vmem:[%s33418_s1 + $0x1218] sm:$0xff] %v26220_v45 }
 0x1b7   :  { %v26213_v38 = vld [vmem:[%s33417_s0 + $0x1a08] sm:$0xff]   ;;  %24214 = vst [vmem:[%s33418_s1 + $0x1e08] sm:$0xff] %v26212_v37  ;;  %v26222_v47 = vld [vmem:[%s33417_s0 + $0x1a18] sm:$0xff]   ;;  %24250 = vst [vmem:[%s33418_s1 + $0x1e18] sm:$0xff] %v26221_v46 }
 0x1b8   :  { %v26214_v39 = vld [vmem:[%s33417_s0 + $0xe08] sm:$0xff]   ;;  %24218 = vst [vmem:[%s33418_s1 + $0xa08] sm:$0xff] %v26213_v38  ;;  %v26223_v48 = vld [vmem:[%s33417_s0 + $0xe18] sm:$0xff]   ;;  %24254 = vst [vmem:[%s33418_s1 + $0xa18] sm:$0xff] %v26222_v47 }
 0x1b9   :  { %v26215_v40 = vld [vmem:[%s33417_s0 + $0x208] sm:$0xff]   ;;  %24222 = vst [vmem:[%s33418_s1 + $0x1608] sm:$0xff] %v26214_v39  ;;  %v26224_v49 = vld [vmem:[%s33417_s0 + $0x218] sm:$0xff]   ;;  %24258 = vst [vmem:[%s33418_s1 + $0x1618] sm:$0xff] %v26223_v48 }
 0x1ba   :  { %24226 = vst [vmem:[%s33418_s1 + $0x2208] sm:$0xff] %v26215_v40  ;;  %v26225_v50 = vld [vmem:[%s33417_s0 + $0x2228] sm:$0xff]   ;;  %24262 = vst [vmem:[%s33418_s1 + $0x2218] sm:$0xff] %v26224_v49  ;;  %v26234_v59 = vld [vmem:[%s33417_s0 + $0x2238] sm:$0xff]  }
 0x1bb   :  { %v26226_v51 = vld [vmem:[%s33417_s0 + $0x1628] sm:$0xff]   ;;  %24266 = vst [vmem:[%s33418_s1 + $0x228] sm:$0xff] %v26225_v50  ;;  %v26235_v60 = vld [vmem:[%s33417_s0 + $0x1638] sm:$0xff]   ;;  %24302 = vst [vmem:[%s33418_s1 + $0x238] sm:$0xff] %v26234_v59 }
 0x1bc   :  { %v26227_v52 = vld [vmem:[%s33417_s0 + $0xa28] sm:$0xff]   ;;  %24270 = vst [vmem:[%s33418_s1 + $0xe28] sm:$0xff] %v26226_v51  ;;  %v26236_v61 = vld [vmem:[%s33417_s0 + $0xa38] sm:$0xff]   ;;  %24306 = vst [vmem:[%s33418_s1 + $0xe38] sm:$0xff] %v26235_v60 }
 0x1bd   :  { %v26228_v53 = vld [vmem:[%s33417_s0 + $0x1e28] sm:$0xff]   ;;  %24274 = vst [vmem:[%s33418_s1 + $0x1a28] sm:$0xff] %v26227_v52  ;;  %v26237_v62 = vld [vmem:[%s33417_s0 + $0x1e38] sm:$0xff]   ;;  %24310 = vst [vmem:[%s33418_s1 + $0x1a38] sm:$0xff] %v26236_v61 }
 0x1be   :  { %v26229_v54 = vld [vmem:[%s33417_s0 + $0x1228] sm:$0xff]   ;;  %24278 = vst [vmem:[%s33418_s1 + $0x628] sm:$0xff] %v26228_v53  ;;  %v26238_v63 = vld [vmem:[%s33417_s0 + $0x1238] sm:$0xff]   ;;  %24314 = vst [vmem:[%s33418_s1 + $0x638] sm:$0xff] %v26237_v62 }
 0x1bf   :  { %v26230_v55 = vld [vmem:[%s33417_s0 + $0x628] sm:$0xff]   ;;  %24282 = vst [vmem:[%s33418_s1 + $0x1228] sm:$0xff] %v26229_v54  ;;  %v26239_v0 = vld [vmem:[%s33417_s0 + $0x638] sm:$0xff]   ;;  %24318 = vst [vmem:[%s33418_s1 + $0x1238] sm:$0xff] %v26238_v63 }
 0x1c0   :  { %v26231_v56 = vld [vmem:[%s33417_s0 + $0x1a28] sm:$0xff]   ;;  %24286 = vst [vmem:[%s33418_s1 + $0x1e28] sm:$0xff] %v26230_v55  ;;  %v26240_v1 = vld [vmem:[%s33417_s0 + $0x1a38] sm:$0xff]   ;;  %24322 = vst [vmem:[%s33418_s1 + $0x1e38] sm:$0xff] %v26239_v0 }
 0x1c1   :  { %v26232_v57 = vld [vmem:[%s33417_s0 + $0xe28] sm:$0xff]   ;;  %24290 = vst [vmem:[%s33418_s1 + $0xa28] sm:$0xff] %v26231_v56  ;;  %v26241_v2 = vld [vmem:[%s33417_s0 + $0xe38] sm:$0xff]   ;;  %24326 = vst [vmem:[%s33418_s1 + $0xa38] sm:$0xff] %v26240_v1 }
 0x1c2   :  { %v26233_v58 = vld [vmem:[%s33417_s0 + $0x228] sm:$0xff]   ;;  %24294 = vst [vmem:[%s33418_s1 + $0x1628] sm:$0xff] %v26232_v57  ;;  %v26242_v3 = vld [vmem:[%s33417_s0 + $0x238] sm:$0xff]   ;;  %24330 = vst [vmem:[%s33418_s1 + $0x1638] sm:$0xff] %v26241_v2 }
 0x1c3   :  { %24298 = vst [vmem:[%s33418_s1 + $0x2228] sm:$0xff] %v26233_v58  ;;  %v26243_v4 = vld [vmem:[%s33417_s0 + $0x2248] sm:$0xff]   ;;  %24334 = vst [vmem:[%s33418_s1 + $0x2238] sm:$0xff] %v26242_v3  ;;  %v26252_v13 = vld [vmem:[%s33417_s0 + $0x2258] sm:$0xff]  }
 0x1c4   :  { %v26244_v5 = vld [vmem:[%s33417_s0 + $0x1648] sm:$0xff]   ;;  %24338 = vst [vmem:[%s33418_s1 + $0x248] sm:$0xff] %v26243_v4  ;;  %v26253_v14 = vld [vmem:[%s33417_s0 + $0x1658] sm:$0xff]   ;;  %24374 = vst [vmem:[%s33418_s1 + $0x258] sm:$0xff] %v26252_v13 }
 0x1c5   :  { %v26245_v6 = vld [vmem:[%s33417_s0 + $0xa48] sm:$0xff]   ;;  %24342 = vst [vmem:[%s33418_s1 + $0xe48] sm:$0xff] %v26244_v5  ;;  %v26254_v15 = vld [vmem:[%s33417_s0 + $0xa58] sm:$0xff]   ;;  %24378 = vst [vmem:[%s33418_s1 + $0xe58] sm:$0xff] %v26253_v14 }
 0x1c6   :  { %v26246_v7 = vld [vmem:[%s33417_s0 + $0x1e48] sm:$0xff]   ;;  %24346 = vst [vmem:[%s33418_s1 + $0x1a48] sm:$0xff] %v26245_v6  ;;  %v26255_v16 = vld [vmem:[%s33417_s0 + $0x1e58] sm:$0xff]   ;;  %24382 = vst [vmem:[%s33418_s1 + $0x1a58] sm:$0xff] %v26254_v15 }
 0x1c7   :  { %v26247_v8 = vld [vmem:[%s33417_s0 + $0x1248] sm:$0xff]   ;;  %24350 = vst [vmem:[%s33418_s1 + $0x648] sm:$0xff] %v26246_v7  ;;  %v26256_v17 = vld [vmem:[%s33417_s0 + $0x1258] sm:$0xff]   ;;  %24386 = vst [vmem:[%s33418_s1 + $0x658] sm:$0xff] %v26255_v16 }
 0x1c8   :  { %v26248_v9 = vld [vmem:[%s33417_s0 + $0x648] sm:$0xff]   ;;  %24354 = vst [vmem:[%s33418_s1 + $0x1248] sm:$0xff] %v26247_v8  ;;  %v26257_v18 = vld [vmem:[%s33417_s0 + $0x658] sm:$0xff]   ;;  %24390 = vst [vmem:[%s33418_s1 + $0x1258] sm:$0xff] %v26256_v17 }
 0x1c9   :  { %v26249_v10 = vld [vmem:[%s33417_s0 + $0x1a48] sm:$0xff]   ;;  %24358 = vst [vmem:[%s33418_s1 + $0x1e48] sm:$0xff] %v26248_v9  ;;  %v26258_v19 = vld [vmem:[%s33417_s0 + $0x1a58] sm:$0xff]   ;;  %24394 = vst [vmem:[%s33418_s1 + $0x1e58] sm:$0xff] %v26257_v18 }
 0x1ca   :  { %v26250_v11 = vld [vmem:[%s33417_s0 + $0xe48] sm:$0xff]   ;;  %24362 = vst [vmem:[%s33418_s1 + $0xa48] sm:$0xff] %v26249_v10  ;;  %v26259_v20 = vld [vmem:[%s33417_s0 + $0xe58] sm:$0xff]   ;;  %24398 = vst [vmem:[%s33418_s1 + $0xa58] sm:$0xff] %v26258_v19 }
 0x1cb   :  { %v26251_v12 = vld [vmem:[%s33417_s0 + $0x248] sm:$0xff]   ;;  %24366 = vst [vmem:[%s33418_s1 + $0x1648] sm:$0xff] %v26250_v11  ;;  %v26260_v21 = vld [vmem:[%s33417_s0 + $0x258] sm:$0xff]   ;;  %24402 = vst [vmem:[%s33418_s1 + $0x1658] sm:$0xff] %v26259_v20 }
 0x1cc   :  { %24370 = vst [vmem:[%s33418_s1 + $0x2248] sm:$0xff] %v26251_v12  ;;  %v26261_v22 = vld [vmem:[%s33417_s0 + $0x2268] sm:$0xff]   ;;  %24406 = vst [vmem:[%s33418_s1 + $0x2258] sm:$0xff] %v26260_v21  ;;  %v26270_v31 = vld [vmem:[%s33417_s0 + $0x2278] sm:$0xff]  }
 0x1cd   :  { %v26262_v23 = vld [vmem:[%s33417_s0 + $0x1668] sm:$0xff]   ;;  %24410 = vst [vmem:[%s33418_s1 + $0x268] sm:$0xff] %v26261_v22  ;;  %v26271_v32 = vld [vmem:[%s33417_s0 + $0x1678] sm:$0xff]   ;;  %24446 = vst [vmem:[%s33418_s1 + $0x278] sm:$0xff] %v26270_v31 }
 0x1ce   :  { %v26263_v24 = vld [vmem:[%s33417_s0 + $0xa68] sm:$0xff]   ;;  %24414 = vst [vmem:[%s33418_s1 + $0xe68] sm:$0xff] %v26262_v23  ;;  %v26272_v33 = vld [vmem:[%s33417_s0 + $0xa78] sm:$0xff]   ;;  %24450 = vst [vmem:[%s33418_s1 + $0xe78] sm:$0xff] %v26271_v32 }
 0x1cf   :  { %v26264_v25 = vld [vmem:[%s33417_s0 + $0x1e68] sm:$0xff]   ;;  %24418 = vst [vmem:[%s33418_s1 + $0x1a68] sm:$0xff] %v26263_v24  ;;  %v26273_v34 = vld [vmem:[%s33417_s0 + $0x1e78] sm:$0xff]   ;;  %24454 = vst [vmem:[%s33418_s1 + $0x1a78] sm:$0xff] %v26272_v33 }
 0x1d0   :  { %v26265_v26 = vld [vmem:[%s33417_s0 + $0x1268] sm:$0xff]   ;;  %24422 = vst [vmem:[%s33418_s1 + $0x668] sm:$0xff] %v26264_v25  ;;  %v26274_v35 = vld [vmem:[%s33417_s0 + $0x1278] sm:$0xff]   ;;  %24458 = vst [vmem:[%s33418_s1 + $0x678] sm:$0xff] %v26273_v34 }
 0x1d1   :  { %v26266_v27 = vld [vmem:[%s33417_s0 + $0x668] sm:$0xff]   ;;  %24426 = vst [vmem:[%s33418_s1 + $0x1268] sm:$0xff] %v26265_v26  ;;  %v26275_v36 = vld [vmem:[%s33417_s0 + $0x678] sm:$0xff]   ;;  %24462 = vst [vmem:[%s33418_s1 + $0x1278] sm:$0xff] %v26274_v35 }
 0x1d2   :  { %v26267_v28 = vld [vmem:[%s33417_s0 + $0x1a68] sm:$0xff]   ;;  %24430 = vst [vmem:[%s33418_s1 + $0x1e68] sm:$0xff] %v26266_v27  ;;  %v26276_v37 = vld [vmem:[%s33417_s0 + $0x1a78] sm:$0xff]   ;;  %24466 = vst [vmem:[%s33418_s1 + $0x1e78] sm:$0xff] %v26275_v36 }
 0x1d3   :  { %v26268_v29 = vld [vmem:[%s33417_s0 + $0xe68] sm:$0xff]   ;;  %24434 = vst [vmem:[%s33418_s1 + $0xa68] sm:$0xff] %v26267_v28  ;;  %v26277_v38 = vld [vmem:[%s33417_s0 + $0xe78] sm:$0xff]   ;;  %24470 = vst [vmem:[%s33418_s1 + $0xa78] sm:$0xff] %v26276_v37 }
 0x1d4   :  { %v26269_v30 = vld [vmem:[%s33417_s0 + $0x268] sm:$0xff]   ;;  %24438 = vst [vmem:[%s33418_s1 + $0x1668] sm:$0xff] %v26268_v29  ;;  %v26278_v39 = vld [vmem:[%s33417_s0 + $0x278] sm:$0xff]   ;;  %24474 = vst [vmem:[%s33418_s1 + $0x1678] sm:$0xff] %v26277_v38 }
 0x1d5   :  { %24442 = vst [vmem:[%s33418_s1 + $0x2268] sm:$0xff] %v26269_v30  ;;  %v26279_v40 = vld [vmem:[%s33417_s0 + $0x2288] sm:$0xff]   ;;  %24478 = vst [vmem:[%s33418_s1 + $0x2278] sm:$0xff] %v26278_v39  ;;  %v26288_v49 = vld [vmem:[%s33417_s0 + $0x2298] sm:$0xff]  }
 0x1d6   :  { %v26280_v41 = vld [vmem:[%s33417_s0 + $0x1688] sm:$0xff]   ;;  %24482 = vst [vmem:[%s33418_s1 + $0x288] sm:$0xff] %v26279_v40  ;;  %v26289_v50 = vld [vmem:[%s33417_s0 + $0x1698] sm:$0xff]   ;;  %24518 = vst [vmem:[%s33418_s1 + $0x298] sm:$0xff] %v26288_v49 }
 0x1d7   :  { %v26281_v42 = vld [vmem:[%s33417_s0 + $0xa88] sm:$0xff]   ;;  %24486 = vst [vmem:[%s33418_s1 + $0xe88] sm:$0xff] %v26280_v41  ;;  %v26290_v51 = vld [vmem:[%s33417_s0 + $0xa98] sm:$0xff]   ;;  %24522 = vst [vmem:[%s33418_s1 + $0xe98] sm:$0xff] %v26289_v50 }
 0x1d8   :  { %v26282_v43 = vld [vmem:[%s33417_s0 + $0x1e88] sm:$0xff]   ;;  %24490 = vst [vmem:[%s33418_s1 + $0x1a88] sm:$0xff] %v26281_v42  ;;  %v26291_v52 = vld [vmem:[%s33417_s0 + $0x1e98] sm:$0xff]   ;;  %24526 = vst [vmem:[%s33418_s1 + $0x1a98] sm:$0xff] %v26290_v51 }
 0x1d9   :  { %v26283_v44 = vld [vmem:[%s33417_s0 + $0x1288] sm:$0xff]   ;;  %24494 = vst [vmem:[%s33418_s1 + $0x688] sm:$0xff] %v26282_v43  ;;  %v26292_v53 = vld [vmem:[%s33417_s0 + $0x1298] sm:$0xff]   ;;  %24530 = vst [vmem:[%s33418_s1 + $0x698] sm:$0xff] %v26291_v52 }
 0x1da   :  { %v26284_v45 = vld [vmem:[%s33417_s0 + $0x688] sm:$0xff]   ;;  %24498 = vst [vmem:[%s33418_s1 + $0x1288] sm:$0xff] %v26283_v44  ;;  %v26293_v54 = vld [vmem:[%s33417_s0 + $0x698] sm:$0xff]   ;;  %24534 = vst [vmem:[%s33418_s1 + $0x1298] sm:$0xff] %v26292_v53 }
 0x1db   :  { %v26285_v46 = vld [vmem:[%s33417_s0 + $0x1a88] sm:$0xff]   ;;  %24502 = vst [vmem:[%s33418_s1 + $0x1e88] sm:$0xff] %v26284_v45  ;;  %v26294_v55 = vld [vmem:[%s33417_s0 + $0x1a98] sm:$0xff]   ;;  %24538 = vst [vmem:[%s33418_s1 + $0x1e98] sm:$0xff] %v26293_v54 }
 0x1dc   :  { %v26286_v47 = vld [vmem:[%s33417_s0 + $0xe88] sm:$0xff]   ;;  %24506 = vst [vmem:[%s33418_s1 + $0xa88] sm:$0xff] %v26285_v46  ;;  %v26295_v56 = vld [vmem:[%s33417_s0 + $0xe98] sm:$0xff]   ;;  %24542 = vst [vmem:[%s33418_s1 + $0xa98] sm:$0xff] %v26294_v55 }
 0x1dd   :  { %v26287_v48 = vld [vmem:[%s33417_s0 + $0x288] sm:$0xff]   ;;  %24510 = vst [vmem:[%s33418_s1 + $0x1688] sm:$0xff] %v26286_v47  ;;  %v26296_v57 = vld [vmem:[%s33417_s0 + $0x298] sm:$0xff]   ;;  %24546 = vst [vmem:[%s33418_s1 + $0x1698] sm:$0xff] %v26295_v56 }
 0x1de   :  { %24514 = vst [vmem:[%s33418_s1 + $0x2288] sm:$0xff] %v26287_v48  ;;  %v26297_v58 = vld [vmem:[%s33417_s0 + $0x22a8] sm:$0xff]   ;;  %24550 = vst [vmem:[%s33418_s1 + $0x2298] sm:$0xff] %v26296_v57  ;;  %v26306_v3 = vld [vmem:[%s33417_s0 + $0x22b8] sm:$0xff]  }
 0x1df   :  { %v26298_v59 = vld [vmem:[%s33417_s0 + $0x16a8] sm:$0xff]   ;;  %24554 = vst [vmem:[%s33418_s1 + $0x2a8] sm:$0xff] %v26297_v58  ;;  %v26307_v4 = vld [vmem:[%s33417_s0 + $0x16b8] sm:$0xff]   ;;  %24590 = vst [vmem:[%s33418_s1 + $0x2b8] sm:$0xff] %v26306_v3 }
 0x1e0   :  { %v26299_v60 = vld [vmem:[%s33417_s0 + $0xaa8] sm:$0xff]   ;;  %24558 = vst [vmem:[%s33418_s1 + $0xea8] sm:$0xff] %v26298_v59  ;;  %v26308_v5 = vld [vmem:[%s33417_s0 + $0xab8] sm:$0xff]   ;;  %24594 = vst [vmem:[%s33418_s1 + $0xeb8] sm:$0xff] %v26307_v4 }
 0x1e1   :  { %v26300_v61 = vld [vmem:[%s33417_s0 + $0x1ea8] sm:$0xff]   ;;  %24562 = vst [vmem:[%s33418_s1 + $0x1aa8] sm:$0xff] %v26299_v60  ;;  %v26309_v6 = vld [vmem:[%s33417_s0 + $0x1eb8] sm:$0xff]   ;;  %24598 = vst [vmem:[%s33418_s1 + $0x1ab8] sm:$0xff] %v26308_v5 }
 0x1e2   :  { %v26301_v62 = vld [vmem:[%s33417_s0 + $0x12a8] sm:$0xff]   ;;  %24566 = vst [vmem:[%s33418_s1 + $0x6a8] sm:$0xff] %v26300_v61  ;;  %v26310_v7 = vld [vmem:[%s33417_s0 + $0x12b8] sm:$0xff]   ;;  %24602 = vst [vmem:[%s33418_s1 + $0x6b8] sm:$0xff] %v26309_v6 }
 0x1e3   :  { %v26302_v63 = vld [vmem:[%s33417_s0 + $0x6a8] sm:$0xff]   ;;  %24570 = vst [vmem:[%s33418_s1 + $0x12a8] sm:$0xff] %v26301_v62  ;;  %v26311_v8 = vld [vmem:[%s33417_s0 + $0x6b8] sm:$0xff]   ;;  %24606 = vst [vmem:[%s33418_s1 + $0x12b8] sm:$0xff] %v26310_v7 }
 0x1e4   :  { %v26303_v0 = vld [vmem:[%s33417_s0 + $0x1aa8] sm:$0xff]   ;;  %24574 = vst [vmem:[%s33418_s1 + $0x1ea8] sm:$0xff] %v26302_v63  ;;  %v26312_v9 = vld [vmem:[%s33417_s0 + $0x1ab8] sm:$0xff]   ;;  %24610 = vst [vmem:[%s33418_s1 + $0x1eb8] sm:$0xff] %v26311_v8 }
 0x1e5   :  { %v26304_v1 = vld [vmem:[%s33417_s0 + $0xea8] sm:$0xff]   ;;  %24578 = vst [vmem:[%s33418_s1 + $0xaa8] sm:$0xff] %v26303_v0  ;;  %v26313_v10 = vld [vmem:[%s33417_s0 + $0xeb8] sm:$0xff]   ;;  %24614 = vst [vmem:[%s33418_s1 + $0xab8] sm:$0xff] %v26312_v9 }
 0x1e6   :  { %v26305_v2 = vld [vmem:[%s33417_s0 + $0x2a8] sm:$0xff]   ;;  %24582 = vst [vmem:[%s33418_s1 + $0x16a8] sm:$0xff] %v26304_v1  ;;  %v26314_v11 = vld [vmem:[%s33417_s0 + $0x2b8] sm:$0xff]   ;;  %24618 = vst [vmem:[%s33418_s1 + $0x16b8] sm:$0xff] %v26313_v10 }
 0x1e7   :  { %24586 = vst [vmem:[%s33418_s1 + $0x22a8] sm:$0xff] %v26305_v2  ;;  %v26315_v12 = vld [vmem:[%s33417_s0 + $0x22c8] sm:$0xff]   ;;  %24622 = vst [vmem:[%s33418_s1 + $0x22b8] sm:$0xff] %v26314_v11  ;;  %v26324_v21 = vld [vmem:[%s33417_s0 + $0x22d8] sm:$0xff]  }
 0x1e8   :  { %v26316_v13 = vld [vmem:[%s33417_s0 + $0x16c8] sm:$0xff]   ;;  %24626 = vst [vmem:[%s33418_s1 + $0x2c8] sm:$0xff] %v26315_v12  ;;  %v26325_v22 = vld [vmem:[%s33417_s0 + $0x16d8] sm:$0xff]   ;;  %24662 = vst [vmem:[%s33418_s1 + $0x2d8] sm:$0xff] %v26324_v21 }
 0x1e9   :  { %v26317_v14 = vld [vmem:[%s33417_s0 + $0xac8] sm:$0xff]   ;;  %24630 = vst [vmem:[%s33418_s1 + $0xec8] sm:$0xff] %v26316_v13  ;;  %v26326_v23 = vld [vmem:[%s33417_s0 + $0xad8] sm:$0xff]   ;;  %24666 = vst [vmem:[%s33418_s1 + $0xed8] sm:$0xff] %v26325_v22 }
 0x1ea   :  { %v26318_v15 = vld [vmem:[%s33417_s0 + $0x1ec8] sm:$0xff]   ;;  %24634 = vst [vmem:[%s33418_s1 + $0x1ac8] sm:$0xff] %v26317_v14  ;;  %v26327_v24 = vld [vmem:[%s33417_s0 + $0x1ed8] sm:$0xff]   ;;  %24670 = vst [vmem:[%s33418_s1 + $0x1ad8] sm:$0xff] %v26326_v23 }
 0x1eb   :  { %v26319_v16 = vld [vmem:[%s33417_s0 + $0x12c8] sm:$0xff]   ;;  %24638 = vst [vmem:[%s33418_s1 + $0x6c8] sm:$0xff] %v26318_v15  ;;  %v26328_v25 = vld [vmem:[%s33417_s0 + $0x12d8] sm:$0xff]   ;;  %24674 = vst [vmem:[%s33418_s1 + $0x6d8] sm:$0xff] %v26327_v24 }
 0x1ec   :  { %v26320_v17 = vld [vmem:[%s33417_s0 + $0x6c8] sm:$0xff]   ;;  %24642 = vst [vmem:[%s33418_s1 + $0x12c8] sm:$0xff] %v26319_v16  ;;  %v26329_v26 = vld [vmem:[%s33417_s0 + $0x6d8] sm:$0xff]   ;;  %24678 = vst [vmem:[%s33418_s1 + $0x12d8] sm:$0xff] %v26328_v25 }
 0x1ed   :  { %v26321_v18 = vld [vmem:[%s33417_s0 + $0x1ac8] sm:$0xff]   ;;  %24646 = vst [vmem:[%s33418_s1 + $0x1ec8] sm:$0xff] %v26320_v17  ;;  %v26330_v27 = vld [vmem:[%s33417_s0 + $0x1ad8] sm:$0xff]   ;;  %24682 = vst [vmem:[%s33418_s1 + $0x1ed8] sm:$0xff] %v26329_v26 }
 0x1ee   :  { %v26322_v19 = vld [vmem:[%s33417_s0 + $0xec8] sm:$0xff]   ;;  %24650 = vst [vmem:[%s33418_s1 + $0xac8] sm:$0xff] %v26321_v18  ;;  %v26331_v28 = vld [vmem:[%s33417_s0 + $0xed8] sm:$0xff]   ;;  %24686 = vst [vmem:[%s33418_s1 + $0xad8] sm:$0xff] %v26330_v27 }
 0x1ef   :  { %v26323_v20 = vld [vmem:[%s33417_s0 + $0x2c8] sm:$0xff]   ;;  %24654 = vst [vmem:[%s33418_s1 + $0x16c8] sm:$0xff] %v26322_v19  ;;  %v26332_v29 = vld [vmem:[%s33417_s0 + $0x2d8] sm:$0xff]   ;;  %24690 = vst [vmem:[%s33418_s1 + $0x16d8] sm:$0xff] %v26331_v28 }
 0x1f0   :  { %24658 = vst [vmem:[%s33418_s1 + $0x22c8] sm:$0xff] %v26323_v20  ;;  %v26333_v30 = vld [vmem:[%s33417_s0 + $0x22e8] sm:$0xff]   ;;  %24694 = vst [vmem:[%s33418_s1 + $0x22d8] sm:$0xff] %v26332_v29  ;;  %v26342_v39 = vld [vmem:[%s33417_s0 + $0x22f8] sm:$0xff]  }
 0x1f1   :  { %v26334_v31 = vld [vmem:[%s33417_s0 + $0x16e8] sm:$0xff]   ;;  %24698 = vst [vmem:[%s33418_s1 + $0x2e8] sm:$0xff] %v26333_v30  ;;  %v26343_v40 = vld [vmem:[%s33417_s0 + $0x16f8] sm:$0xff]   ;;  %24734 = vst [vmem:[%s33418_s1 + $0x2f8] sm:$0xff] %v26342_v39 }
 0x1f2   :  { %v26335_v32 = vld [vmem:[%s33417_s0 + $0xae8] sm:$0xff]   ;;  %24702 = vst [vmem:[%s33418_s1 + $0xee8] sm:$0xff] %v26334_v31  ;;  %v26344_v41 = vld [vmem:[%s33417_s0 + $0xaf8] sm:$0xff]   ;;  %24738 = vst [vmem:[%s33418_s1 + $0xef8] sm:$0xff] %v26343_v40 }
 0x1f3   :  { %v26336_v33 = vld [vmem:[%s33417_s0 + $0x1ee8] sm:$0xff]   ;;  %24706 = vst [vmem:[%s33418_s1 + $0x1ae8] sm:$0xff] %v26335_v32  ;;  %v26345_v42 = vld [vmem:[%s33417_s0 + $0x1ef8] sm:$0xff]   ;;  %24742 = vst [vmem:[%s33418_s1 + $0x1af8] sm:$0xff] %v26344_v41 }
 0x1f4   :  { %v26337_v34 = vld [vmem:[%s33417_s0 + $0x12e8] sm:$0xff]   ;;  %24710 = vst [vmem:[%s33418_s1 + $0x6e8] sm:$0xff] %v26336_v33  ;;  %v26346_v43 = vld [vmem:[%s33417_s0 + $0x12f8] sm:$0xff]   ;;  %24746 = vst [vmem:[%s33418_s1 + $0x6f8] sm:$0xff] %v26345_v42 }
 0x1f5   :  { %v26338_v35 = vld [vmem:[%s33417_s0 + $0x6e8] sm:$0xff]   ;;  %24714 = vst [vmem:[%s33418_s1 + $0x12e8] sm:$0xff] %v26337_v34  ;;  %v26347_v44 = vld [vmem:[%s33417_s0 + $0x6f8] sm:$0xff]   ;;  %24750 = vst [vmem:[%s33418_s1 + $0x12f8] sm:$0xff] %v26346_v43 }
 0x1f6   :  { %v26339_v36 = vld [vmem:[%s33417_s0 + $0x1ae8] sm:$0xff]   ;;  %24718 = vst [vmem:[%s33418_s1 + $0x1ee8] sm:$0xff] %v26338_v35  ;;  %v26348_v45 = vld [vmem:[%s33417_s0 + $0x1af8] sm:$0xff]   ;;  %24754 = vst [vmem:[%s33418_s1 + $0x1ef8] sm:$0xff] %v26347_v44 }
 0x1f7   :  { %v26340_v37 = vld [vmem:[%s33417_s0 + $0xee8] sm:$0xff]   ;;  %24722 = vst [vmem:[%s33418_s1 + $0xae8] sm:$0xff] %v26339_v36  ;;  %v26349_v46 = vld [vmem:[%s33417_s0 + $0xef8] sm:$0xff]   ;;  %24758 = vst [vmem:[%s33418_s1 + $0xaf8] sm:$0xff] %v26348_v45 }
 0x1f8   :  { %v26341_v38 = vld [vmem:[%s33417_s0 + $0x2e8] sm:$0xff]   ;;  %24726 = vst [vmem:[%s33418_s1 + $0x16e8] sm:$0xff] %v26340_v37  ;;  %v26350_v47 = vld [vmem:[%s33417_s0 + $0x2f8] sm:$0xff]   ;;  %24762 = vst [vmem:[%s33418_s1 + $0x16f8] sm:$0xff] %v26349_v46 }
 0x1f9   :  { %24730 = vst [vmem:[%s33418_s1 + $0x22e8] sm:$0xff] %v26341_v38  ;;  %v26351_v48 = vld [vmem:[%s33417_s0 + $0x2308] sm:$0xff]   ;;  %24766 = vst [vmem:[%s33418_s1 + $0x22f8] sm:$0xff] %v26350_v47  ;;  %v26360_v57 = vld [vmem:[%s33417_s0 + $0x2318] sm:$0xff]  }
 0x1fa   :  { %v26352_v49 = vld [vmem:[%s33417_s0 + $0x1708] sm:$0xff]   ;;  %24770 = vst [vmem:[%s33418_s1 + $0x308] sm:$0xff] %v26351_v48  ;;  %v26361_v58 = vld [vmem:[%s33417_s0 + $0x1718] sm:$0xff]   ;;  %24806 = vst [vmem:[%s33418_s1 + $0x318] sm:$0xff] %v26360_v57 }
 0x1fb   :  { %v26353_v50 = vld [vmem:[%s33417_s0 + $0xb08] sm:$0xff]   ;;  %24774 = vst [vmem:[%s33418_s1 + $0xf08] sm:$0xff] %v26352_v49  ;;  %v26362_v59 = vld [vmem:[%s33417_s0 + $0xb18] sm:$0xff]   ;;  %24810 = vst [vmem:[%s33418_s1 + $0xf18] sm:$0xff] %v26361_v58 }
 0x1fc   :  { %v26354_v51 = vld [vmem:[%s33417_s0 + $0x1f08] sm:$0xff]   ;;  %24778 = vst [vmem:[%s33418_s1 + $0x1b08] sm:$0xff] %v26353_v50  ;;  %v26363_v60 = vld [vmem:[%s33417_s0 + $0x1f18] sm:$0xff]   ;;  %24814 = vst [vmem:[%s33418_s1 + $0x1b18] sm:$0xff] %v26362_v59 }
 0x1fd   :  { %v26355_v52 = vld [vmem:[%s33417_s0 + $0x1308] sm:$0xff]   ;;  %24782 = vst [vmem:[%s33418_s1 + $0x708] sm:$0xff] %v26354_v51  ;;  %v26364_v61 = vld [vmem:[%s33417_s0 + $0x1318] sm:$0xff]   ;;  %24818 = vst [vmem:[%s33418_s1 + $0x718] sm:$0xff] %v26363_v60 }
 0x1fe   :  { %v26356_v53 = vld [vmem:[%s33417_s0 + $0x708] sm:$0xff]   ;;  %24786 = vst [vmem:[%s33418_s1 + $0x1308] sm:$0xff] %v26355_v52  ;;  %v26365_v62 = vld [vmem:[%s33417_s0 + $0x718] sm:$0xff]   ;;  %24822 = vst [vmem:[%s33418_s1 + $0x1318] sm:$0xff] %v26364_v61 }
 0x1ff   :  { %v26357_v54 = vld [vmem:[%s33417_s0 + $0x1b08] sm:$0xff]   ;;  %24790 = vst [vmem:[%s33418_s1 + $0x1f08] sm:$0xff] %v26356_v53  ;;  %v26366_v63 = vld [vmem:[%s33417_s0 + $0x1b18] sm:$0xff]   ;;  %24826 = vst [vmem:[%s33418_s1 + $0x1f18] sm:$0xff] %v26365_v62 }
 0x200   :  { %v26358_v55 = vld [vmem:[%s33417_s0 + $0xf08] sm:$0xff]   ;;  %24794 = vst [vmem:[%s33418_s1 + $0xb08] sm:$0xff] %v26357_v54  ;;  %v26367_v0 = vld [vmem:[%s33417_s0 + $0xf18] sm:$0xff]   ;;  %24830 = vst [vmem:[%s33418_s1 + $0xb18] sm:$0xff] %v26366_v63 }
 0x201   :  { %v26359_v56 = vld [vmem:[%s33417_s0 + $0x308] sm:$0xff]   ;;  %24798 = vst [vmem:[%s33418_s1 + $0x1708] sm:$0xff] %v26358_v55  ;;  %v26368_v1 = vld [vmem:[%s33417_s0 + $0x318] sm:$0xff]   ;;  %24834 = vst [vmem:[%s33418_s1 + $0x1718] sm:$0xff] %v26367_v0 }
 0x202   :  { %24802 = vst [vmem:[%s33418_s1 + $0x2308] sm:$0xff] %v26359_v56  ;;  %v26369_v2 = vld [vmem:[%s33417_s0 + $0x2328] sm:$0xff]   ;;  %24838 = vst [vmem:[%s33418_s1 + $0x2318] sm:$0xff] %v26368_v1  ;;  %v26378_v11 = vld [vmem:[%s33417_s0 + $0x2338] sm:$0xff]  }
 0x203   :  { %v26370_v3 = vld [vmem:[%s33417_s0 + $0x1728] sm:$0xff]   ;;  %24842 = vst [vmem:[%s33418_s1 + $0x328] sm:$0xff] %v26369_v2  ;;  %v26379_v12 = vld [vmem:[%s33417_s0 + $0x1738] sm:$0xff]   ;;  %24878 = vst [vmem:[%s33418_s1 + $0x338] sm:$0xff] %v26378_v11 }
 0x204   :  { %v26371_v4 = vld [vmem:[%s33417_s0 + $0xb28] sm:$0xff]   ;;  %24846 = vst [vmem:[%s33418_s1 + $0xf28] sm:$0xff] %v26370_v3  ;;  %v26380_v13 = vld [vmem:[%s33417_s0 + $0xb38] sm:$0xff]   ;;  %24882 = vst [vmem:[%s33418_s1 + $0xf38] sm:$0xff] %v26379_v12 }
 0x205   :  { %v26372_v5 = vld [vmem:[%s33417_s0 + $0x1f28] sm:$0xff]   ;;  %24850 = vst [vmem:[%s33418_s1 + $0x1b28] sm:$0xff] %v26371_v4  ;;  %v26381_v14 = vld [vmem:[%s33417_s0 + $0x1f38] sm:$0xff]   ;;  %24886 = vst [vmem:[%s33418_s1 + $0x1b38] sm:$0xff] %v26380_v13 }
 0x206   :  { %v26373_v6 = vld [vmem:[%s33417_s0 + $0x1328] sm:$0xff]   ;;  %24854 = vst [vmem:[%s33418_s1 + $0x728] sm:$0xff] %v26372_v5  ;;  %v26382_v15 = vld [vmem:[%s33417_s0 + $0x1338] sm:$0xff]   ;;  %24890 = vst [vmem:[%s33418_s1 + $0x738] sm:$0xff] %v26381_v14 }
 0x207   :  { %v26374_v7 = vld [vmem:[%s33417_s0 + $0x728] sm:$0xff]   ;;  %24858 = vst [vmem:[%s33418_s1 + $0x1328] sm:$0xff] %v26373_v6  ;;  %v26383_v16 = vld [vmem:[%s33417_s0 + $0x738] sm:$0xff]   ;;  %24894 = vst [vmem:[%s33418_s1 + $0x1338] sm:$0xff] %v26382_v15 }
 0x208   :  { %v26375_v8 = vld [vmem:[%s33417_s0 + $0x1b28] sm:$0xff]   ;;  %24862 = vst [vmem:[%s33418_s1 + $0x1f28] sm:$0xff] %v26374_v7  ;;  %v26384_v17 = vld [vmem:[%s33417_s0 + $0x1b38] sm:$0xff]   ;;  %24898 = vst [vmem:[%s33418_s1 + $0x1f38] sm:$0xff] %v26383_v16 }
 0x209   :  { %v26376_v9 = vld [vmem:[%s33417_s0 + $0xf28] sm:$0xff]   ;;  %24866 = vst [vmem:[%s33418_s1 + $0xb28] sm:$0xff] %v26375_v8  ;;  %v26385_v18 = vld [vmem:[%s33417_s0 + $0xf38] sm:$0xff]   ;;  %24902 = vst [vmem:[%s33418_s1 + $0xb38] sm:$0xff] %v26384_v17 }
 0x20a   :  { %v26377_v10 = vld [vmem:[%s33417_s0 + $0x328] sm:$0xff]   ;;  %24870 = vst [vmem:[%s33418_s1 + $0x1728] sm:$0xff] %v26376_v9  ;;  %v26386_v19 = vld [vmem:[%s33417_s0 + $0x338] sm:$0xff]   ;;  %24906 = vst [vmem:[%s33418_s1 + $0x1738] sm:$0xff] %v26385_v18 }
 0x20b   :  { %24874 = vst [vmem:[%s33418_s1 + $0x2328] sm:$0xff] %v26377_v10  ;;  %v26387_v20 = vld [vmem:[%s33417_s0 + $0x2348] sm:$0xff]   ;;  %24910 = vst [vmem:[%s33418_s1 + $0x2338] sm:$0xff] %v26386_v19  ;;  %v26396_v29 = vld [vmem:[%s33417_s0 + $0x2358] sm:$0xff]  }
 0x20c   :  { %v26388_v21 = vld [vmem:[%s33417_s0 + $0x1748] sm:$0xff]   ;;  %24914 = vst [vmem:[%s33418_s1 + $0x348] sm:$0xff] %v26387_v20  ;;  %v26397_v30 = vld [vmem:[%s33417_s0 + $0x1758] sm:$0xff]   ;;  %24950 = vst [vmem:[%s33418_s1 + $0x358] sm:$0xff] %v26396_v29 }
 0x20d   :  { %v26389_v22 = vld [vmem:[%s33417_s0 + $0xb48] sm:$0xff]   ;;  %24918 = vst [vmem:[%s33418_s1 + $0xf48] sm:$0xff] %v26388_v21  ;;  %v26398_v31 = vld [vmem:[%s33417_s0 + $0xb58] sm:$0xff]   ;;  %24954 = vst [vmem:[%s33418_s1 + $0xf58] sm:$0xff] %v26397_v30 }
 0x20e   :  { %v26390_v23 = vld [vmem:[%s33417_s0 + $0x1f48] sm:$0xff]   ;;  %24922 = vst [vmem:[%s33418_s1 + $0x1b48] sm:$0xff] %v26389_v22  ;;  %v26399_v32 = vld [vmem:[%s33417_s0 + $0x1f58] sm:$0xff]   ;;  %24958 = vst [vmem:[%s33418_s1 + $0x1b58] sm:$0xff] %v26398_v31 }
 0x20f   :  { %v26391_v24 = vld [vmem:[%s33417_s0 + $0x1348] sm:$0xff]   ;;  %24926 = vst [vmem:[%s33418_s1 + $0x748] sm:$0xff] %v26390_v23  ;;  %v26400_v33 = vld [vmem:[%s33417_s0 + $0x1358] sm:$0xff]   ;;  %24962 = vst [vmem:[%s33418_s1 + $0x758] sm:$0xff] %v26399_v32 }
 0x210   :  { %v26392_v25 = vld [vmem:[%s33417_s0 + $0x748] sm:$0xff]   ;;  %24930 = vst [vmem:[%s33418_s1 + $0x1348] sm:$0xff] %v26391_v24  ;;  %v26401_v34 = vld [vmem:[%s33417_s0 + $0x758] sm:$0xff]   ;;  %24966 = vst [vmem:[%s33418_s1 + $0x1358] sm:$0xff] %v26400_v33 }
 0x211   :  { %v26393_v26 = vld [vmem:[%s33417_s0 + $0x1b48] sm:$0xff]   ;;  %24934 = vst [vmem:[%s33418_s1 + $0x1f48] sm:$0xff] %v26392_v25  ;;  %v26402_v35 = vld [vmem:[%s33417_s0 + $0x1b58] sm:$0xff]   ;;  %24970 = vst [vmem:[%s33418_s1 + $0x1f58] sm:$0xff] %v26401_v34 }
 0x212   :  { %v26394_v27 = vld [vmem:[%s33417_s0 + $0xf48] sm:$0xff]   ;;  %24938 = vst [vmem:[%s33418_s1 + $0xb48] sm:$0xff] %v26393_v26  ;;  %v26403_v36 = vld [vmem:[%s33417_s0 + $0xf58] sm:$0xff]   ;;  %24974 = vst [vmem:[%s33418_s1 + $0xb58] sm:$0xff] %v26402_v35 }
 0x213   :  { %v26395_v28 = vld [vmem:[%s33417_s0 + $0x348] sm:$0xff]   ;;  %24942 = vst [vmem:[%s33418_s1 + $0x1748] sm:$0xff] %v26394_v27  ;;  %v26404_v37 = vld [vmem:[%s33417_s0 + $0x358] sm:$0xff]   ;;  %24978 = vst [vmem:[%s33418_s1 + $0x1758] sm:$0xff] %v26403_v36 }
 0x214   :  { %24946 = vst [vmem:[%s33418_s1 + $0x2348] sm:$0xff] %v26395_v28  ;;  %v26405_v38 = vld [vmem:[%s33417_s0 + $0x2368] sm:$0xff]   ;;  %24982 = vst [vmem:[%s33418_s1 + $0x2358] sm:$0xff] %v26404_v37  ;;  %v26414_v47 = vld [vmem:[%s33417_s0 + $0x2378] sm:$0xff]  }
 0x215   :  { %v26406_v39 = vld [vmem:[%s33417_s0 + $0x1768] sm:$0xff]   ;;  %24986 = vst [vmem:[%s33418_s1 + $0x368] sm:$0xff] %v26405_v38  ;;  %v26415_v48 = vld [vmem:[%s33417_s0 + $0x1778] sm:$0xff]   ;;  %25022 = vst [vmem:[%s33418_s1 + $0x378] sm:$0xff] %v26414_v47 }
 0x216   :  { %v26407_v40 = vld [vmem:[%s33417_s0 + $0xb68] sm:$0xff]   ;;  %24990 = vst [vmem:[%s33418_s1 + $0xf68] sm:$0xff] %v26406_v39  ;;  %v26416_v49 = vld [vmem:[%s33417_s0 + $0xb78] sm:$0xff]   ;;  %25026 = vst [vmem:[%s33418_s1 + $0xf78] sm:$0xff] %v26415_v48 }
 0x217   :  { %v26408_v41 = vld [vmem:[%s33417_s0 + $0x1f68] sm:$0xff]   ;;  %24994 = vst [vmem:[%s33418_s1 + $0x1b68] sm:$0xff] %v26407_v40  ;;  %v26417_v50 = vld [vmem:[%s33417_s0 + $0x1f78] sm:$0xff]   ;;  %25030 = vst [vmem:[%s33418_s1 + $0x1b78] sm:$0xff] %v26416_v49 }
 0x218   :  { %v26409_v42 = vld [vmem:[%s33417_s0 + $0x1368] sm:$0xff]   ;;  %24998 = vst [vmem:[%s33418_s1 + $0x768] sm:$0xff] %v26408_v41  ;;  %v26418_v51 = vld [vmem:[%s33417_s0 + $0x1378] sm:$0xff]   ;;  %25034 = vst [vmem:[%s33418_s1 + $0x778] sm:$0xff] %v26417_v50 }
 0x219   :  { %v26410_v43 = vld [vmem:[%s33417_s0 + $0x768] sm:$0xff]   ;;  %25002 = vst [vmem:[%s33418_s1 + $0x1368] sm:$0xff] %v26409_v42  ;;  %v26419_v52 = vld [vmem:[%s33417_s0 + $0x778] sm:$0xff]   ;;  %25038 = vst [vmem:[%s33418_s1 + $0x1378] sm:$0xff] %v26418_v51 }
 0x21a   :  { %v26411_v44 = vld [vmem:[%s33417_s0 + $0x1b68] sm:$0xff]   ;;  %25006 = vst [vmem:[%s33418_s1 + $0x1f68] sm:$0xff] %v26410_v43  ;;  %v26420_v53 = vld [vmem:[%s33417_s0 + $0x1b78] sm:$0xff]   ;;  %25042 = vst [vmem:[%s33418_s1 + $0x1f78] sm:$0xff] %v26419_v52 }
 0x21b   :  { %v26412_v45 = vld [vmem:[%s33417_s0 + $0xf68] sm:$0xff]   ;;  %25010 = vst [vmem:[%s33418_s1 + $0xb68] sm:$0xff] %v26411_v44  ;;  %v26421_v54 = vld [vmem:[%s33417_s0 + $0xf78] sm:$0xff]   ;;  %25046 = vst [vmem:[%s33418_s1 + $0xb78] sm:$0xff] %v26420_v53 }
 0x21c   :  { %v26413_v46 = vld [vmem:[%s33417_s0 + $0x368] sm:$0xff]   ;;  %25014 = vst [vmem:[%s33418_s1 + $0x1768] sm:$0xff] %v26412_v45  ;;  %v26422_v55 = vld [vmem:[%s33417_s0 + $0x378] sm:$0xff]   ;;  %25050 = vst [vmem:[%s33418_s1 + $0x1778] sm:$0xff] %v26421_v54 }
 0x21d   :  { %25018 = vst [vmem:[%s33418_s1 + $0x2368] sm:$0xff] %v26413_v46  ;;  %v26423_v56 = vld [vmem:[%s33417_s0 + $0x2388] sm:$0xff]   ;;  %25054 = vst [vmem:[%s33418_s1 + $0x2378] sm:$0xff] %v26422_v55  ;;  %v26432_v1 = vld [vmem:[%s33417_s0 + $0x2398] sm:$0xff]  }
 0x21e   :  { %v26424_v57 = vld [vmem:[%s33417_s0 + $0x1788] sm:$0xff]   ;;  %25058 = vst [vmem:[%s33418_s1 + $0x388] sm:$0xff] %v26423_v56  ;;  %v26433_v2 = vld [vmem:[%s33417_s0 + $0x1798] sm:$0xff]   ;;  %25094 = vst [vmem:[%s33418_s1 + $0x398] sm:$0xff] %v26432_v1 }
 0x21f   :  { %v26425_v58 = vld [vmem:[%s33417_s0 + $0xb88] sm:$0xff]   ;;  %25062 = vst [vmem:[%s33418_s1 + $0xf88] sm:$0xff] %v26424_v57  ;;  %v26434_v3 = vld [vmem:[%s33417_s0 + $0xb98] sm:$0xff]   ;;  %25098 = vst [vmem:[%s33418_s1 + $0xf98] sm:$0xff] %v26433_v2 }
 0x220   :  { %v26426_v59 = vld [vmem:[%s33417_s0 + $0x1f88] sm:$0xff]   ;;  %25066 = vst [vmem:[%s33418_s1 + $0x1b88] sm:$0xff] %v26425_v58  ;;  %v26435_v4 = vld [vmem:[%s33417_s0 + $0x1f98] sm:$0xff]   ;;  %25102 = vst [vmem:[%s33418_s1 + $0x1b98] sm:$0xff] %v26434_v3 }
 0x221   :  { %v26427_v60 = vld [vmem:[%s33417_s0 + $0x1388] sm:$0xff]   ;;  %25070 = vst [vmem:[%s33418_s1 + $0x788] sm:$0xff] %v26426_v59  ;;  %v26436_v5 = vld [vmem:[%s33417_s0 + $0x1398] sm:$0xff]   ;;  %25106 = vst [vmem:[%s33418_s1 + $0x798] sm:$0xff] %v26435_v4 }
 0x222   :  { %v26428_v61 = vld [vmem:[%s33417_s0 + $0x788] sm:$0xff]   ;;  %25074 = vst [vmem:[%s33418_s1 + $0x1388] sm:$0xff] %v26427_v60  ;;  %v26437_v6 = vld [vmem:[%s33417_s0 + $0x798] sm:$0xff]   ;;  %25110 = vst [vmem:[%s33418_s1 + $0x1398] sm:$0xff] %v26436_v5 }
 0x223   :  { %v26429_v62 = vld [vmem:[%s33417_s0 + $0x1b88] sm:$0xff]   ;;  %25078 = vst [vmem:[%s33418_s1 + $0x1f88] sm:$0xff] %v26428_v61  ;;  %v26438_v7 = vld [vmem:[%s33417_s0 + $0x1b98] sm:$0xff]   ;;  %25114 = vst [vmem:[%s33418_s1 + $0x1f98] sm:$0xff] %v26437_v6 }
 0x224   :  { %v26430_v63 = vld [vmem:[%s33417_s0 + $0xf88] sm:$0xff]   ;;  %25082 = vst [vmem:[%s33418_s1 + $0xb88] sm:$0xff] %v26429_v62  ;;  %v26439_v8 = vld [vmem:[%s33417_s0 + $0xf98] sm:$0xff]   ;;  %25118 = vst [vmem:[%s33418_s1 + $0xb98] sm:$0xff] %v26438_v7 }
 0x225   :  { %v26431_v0 = vld [vmem:[%s33417_s0 + $0x388] sm:$0xff]   ;;  %25086 = vst [vmem:[%s33418_s1 + $0x1788] sm:$0xff] %v26430_v63  ;;  %v26440_v9 = vld [vmem:[%s33417_s0 + $0x398] sm:$0xff]   ;;  %25122 = vst [vmem:[%s33418_s1 + $0x1798] sm:$0xff] %v26439_v8 }
 0x226   :  { %25090 = vst [vmem:[%s33418_s1 + $0x2388] sm:$0xff] %v26431_v0  ;;  %v26441_v10 = vld [vmem:[%s33417_s0 + $0x23a8] sm:$0xff]   ;;  %25126 = vst [vmem:[%s33418_s1 + $0x2398] sm:$0xff] %v26440_v9  ;;  %v26450_v19 = vld [vmem:[%s33417_s0 + $0x23b8] sm:$0xff]  }
 0x227   :  { %v26442_v11 = vld [vmem:[%s33417_s0 + $0x17a8] sm:$0xff]   ;;  %25130 = vst [vmem:[%s33418_s1 + $0x3a8] sm:$0xff] %v26441_v10  ;;  %v26451_v20 = vld [vmem:[%s33417_s0 + $0x17b8] sm:$0xff]   ;;  %25166 = vst [vmem:[%s33418_s1 + $0x3b8] sm:$0xff] %v26450_v19 }
 0x228   :  { %v26443_v12 = vld [vmem:[%s33417_s0 + $0xba8] sm:$0xff]   ;;  %25134 = vst [vmem:[%s33418_s1 + $0xfa8] sm:$0xff] %v26442_v11  ;;  %v26452_v21 = vld [vmem:[%s33417_s0 + $0xbb8] sm:$0xff]   ;;  %25170 = vst [vmem:[%s33418_s1 + $0xfb8] sm:$0xff] %v26451_v20 }
 0x229   :  { %v26444_v13 = vld [vmem:[%s33417_s0 + $0x1fa8] sm:$0xff]   ;;  %25138 = vst [vmem:[%s33418_s1 + $0x1ba8] sm:$0xff] %v26443_v12  ;;  %v26453_v22 = vld [vmem:[%s33417_s0 + $0x1fb8] sm:$0xff]   ;;  %25174 = vst [vmem:[%s33418_s1 + $0x1bb8] sm:$0xff] %v26452_v21 }
 0x22a   :  { %v26445_v14 = vld [vmem:[%s33417_s0 + $0x13a8] sm:$0xff]   ;;  %25142 = vst [vmem:[%s33418_s1 + $0x7a8] sm:$0xff] %v26444_v13  ;;  %v26454_v23 = vld [vmem:[%s33417_s0 + $0x13b8] sm:$0xff]   ;;  %25178 = vst [vmem:[%s33418_s1 + $0x7b8] sm:$0xff] %v26453_v22 }
 0x22b   :  { %v26446_v15 = vld [vmem:[%s33417_s0 + $0x7a8] sm:$0xff]   ;;  %25146 = vst [vmem:[%s33418_s1 + $0x13a8] sm:$0xff] %v26445_v14  ;;  %v26455_v24 = vld [vmem:[%s33417_s0 + $0x7b8] sm:$0xff]   ;;  %25182 = vst [vmem:[%s33418_s1 + $0x13b8] sm:$0xff] %v26454_v23 }
 0x22c   :  { %v26447_v16 = vld [vmem:[%s33417_s0 + $0x1ba8] sm:$0xff]   ;;  %25150 = vst [vmem:[%s33418_s1 + $0x1fa8] sm:$0xff] %v26446_v15  ;;  %v26456_v25 = vld [vmem:[%s33417_s0 + $0x1bb8] sm:$0xff]   ;;  %25186 = vst [vmem:[%s33418_s1 + $0x1fb8] sm:$0xff] %v26455_v24 }
 0x22d   :  { %v26448_v17 = vld [vmem:[%s33417_s0 + $0xfa8] sm:$0xff]   ;;  %25154 = vst [vmem:[%s33418_s1 + $0xba8] sm:$0xff] %v26447_v16  ;;  %v26457_v26 = vld [vmem:[%s33417_s0 + $0xfb8] sm:$0xff]   ;;  %25190 = vst [vmem:[%s33418_s1 + $0xbb8] sm:$0xff] %v26456_v25 }
 0x22e   :  { %v26449_v18 = vld [vmem:[%s33417_s0 + $0x3a8] sm:$0xff]   ;;  %25158 = vst [vmem:[%s33418_s1 + $0x17a8] sm:$0xff] %v26448_v17  ;;  %v26458_v27 = vld [vmem:[%s33417_s0 + $0x3b8] sm:$0xff]   ;;  %25194 = vst [vmem:[%s33418_s1 + $0x17b8] sm:$0xff] %v26457_v26 }
 0x22f   :  { %25162 = vst [vmem:[%s33418_s1 + $0x23a8] sm:$0xff] %v26449_v18  ;;  %v26459_v28 = vld [vmem:[%s33417_s0 + $0x23c8] sm:$0xff]   ;;  %25198 = vst [vmem:[%s33418_s1 + $0x23b8] sm:$0xff] %v26458_v27  ;;  %v26468_v37 = vld [vmem:[%s33417_s0 + $0x23d8] sm:$0xff]  }
 0x230   :  { %v26460_v29 = vld [vmem:[%s33417_s0 + $0x17c8] sm:$0xff]   ;;  %25202 = vst [vmem:[%s33418_s1 + $0x3c8] sm:$0xff] %v26459_v28  ;;  %v26469_v38 = vld [vmem:[%s33417_s0 + $0x17d8] sm:$0xff]   ;;  %25238 = vst [vmem:[%s33418_s1 + $0x3d8] sm:$0xff] %v26468_v37 }
 0x231   :  { %v26461_v30 = vld [vmem:[%s33417_s0 + $0xbc8] sm:$0xff]   ;;  %25206 = vst [vmem:[%s33418_s1 + $0xfc8] sm:$0xff] %v26460_v29  ;;  %v26470_v39 = vld [vmem:[%s33417_s0 + $0xbd8] sm:$0xff]   ;;  %25242 = vst [vmem:[%s33418_s1 + $0xfd8] sm:$0xff] %v26469_v38 }
 0x232   :  { %v26462_v31 = vld [vmem:[%s33417_s0 + $0x1fc8] sm:$0xff]   ;;  %25210 = vst [vmem:[%s33418_s1 + $0x1bc8] sm:$0xff] %v26461_v30  ;;  %v26471_v40 = vld [vmem:[%s33417_s0 + $0x1fd8] sm:$0xff]   ;;  %25246 = vst [vmem:[%s33418_s1 + $0x1bd8] sm:$0xff] %v26470_v39 }
 0x233   :  { %v26463_v32 = vld [vmem:[%s33417_s0 + $0x13c8] sm:$0xff]   ;;  %25214 = vst [vmem:[%s33418_s1 + $0x7c8] sm:$0xff] %v26462_v31  ;;  %v26472_v41 = vld [vmem:[%s33417_s0 + $0x13d8] sm:$0xff]   ;;  %25250 = vst [vmem:[%s33418_s1 + $0x7d8] sm:$0xff] %v26471_v40 }
 0x234   :  { %v26464_v33 = vld [vmem:[%s33417_s0 + $0x7c8] sm:$0xff]   ;;  %25218 = vst [vmem:[%s33418_s1 + $0x13c8] sm:$0xff] %v26463_v32  ;;  %v26473_v42 = vld [vmem:[%s33417_s0 + $0x7d8] sm:$0xff]   ;;  %25254 = vst [vmem:[%s33418_s1 + $0x13d8] sm:$0xff] %v26472_v41 }
 0x235   :  { %v26465_v34 = vld [vmem:[%s33417_s0 + $0x1bc8] sm:$0xff]   ;;  %25222 = vst [vmem:[%s33418_s1 + $0x1fc8] sm:$0xff] %v26464_v33  ;;  %v26474_v43 = vld [vmem:[%s33417_s0 + $0x1bd8] sm:$0xff]   ;;  %25258 = vst [vmem:[%s33418_s1 + $0x1fd8] sm:$0xff] %v26473_v42 }
 0x236   :  { %v26466_v35 = vld [vmem:[%s33417_s0 + $0xfc8] sm:$0xff]   ;;  %25226 = vst [vmem:[%s33418_s1 + $0xbc8] sm:$0xff] %v26465_v34  ;;  %v26475_v44 = vld [vmem:[%s33417_s0 + $0xfd8] sm:$0xff]   ;;  %25262 = vst [vmem:[%s33418_s1 + $0xbd8] sm:$0xff] %v26474_v43 }
 0x237   :  { %v26467_v36 = vld [vmem:[%s33417_s0 + $0x3c8] sm:$0xff]   ;;  %25230 = vst [vmem:[%s33418_s1 + $0x17c8] sm:$0xff] %v26466_v35  ;;  %v26476_v45 = vld [vmem:[%s33417_s0 + $0x3d8] sm:$0xff]   ;;  %25266 = vst [vmem:[%s33418_s1 + $0x17d8] sm:$0xff] %v26475_v44 }
 0x238   :  { %25234 = vst [vmem:[%s33418_s1 + $0x23c8] sm:$0xff] %v26467_v36  ;;  %v26477_v46 = vld [vmem:[%s33417_s0 + $0x23e8] sm:$0xff]   ;;  %25270 = vst [vmem:[%s33418_s1 + $0x23d8] sm:$0xff] %v26476_v45  ;;  %v26486_v55 = vld [vmem:[%s33417_s0 + $0x23f8] sm:$0xff]  }
 0x239   :  { %v26478_v47 = vld [vmem:[%s33417_s0 + $0x17e8] sm:$0xff]   ;;  %25274 = vst [vmem:[%s33418_s1 + $0x3e8] sm:$0xff] %v26477_v46  ;;  %v26487_v56 = vld [vmem:[%s33417_s0 + $0x17f8] sm:$0xff]   ;;  %25310 = vst [vmem:[%s33418_s1 + $0x3f8] sm:$0xff] %v26486_v55 }
 0x23a   :  { %v26479_v48 = vld [vmem:[%s33417_s0 + $0xbe8] sm:$0xff]   ;;  %25278 = vst [vmem:[%s33418_s1 + $0xfe8] sm:$0xff] %v26478_v47  ;;  %v26488_v57 = vld [vmem:[%s33417_s0 + $0xbf8] sm:$0xff]   ;;  %25314 = vst [vmem:[%s33418_s1 + $0xff8] sm:$0xff] %v26487_v56 }
 0x23b   :  { %v26480_v49 = vld [vmem:[%s33417_s0 + $0x1fe8] sm:$0xff]   ;;  %25282 = vst [vmem:[%s33418_s1 + $0x1be8] sm:$0xff] %v26479_v48  ;;  %v26489_v58 = vld [vmem:[%s33417_s0 + $0x1ff8] sm:$0xff]   ;;  %25318 = vst [vmem:[%s33418_s1 + $0x1bf8] sm:$0xff] %v26488_v57 }
 0x23c   :  { %v26481_v50 = vld [vmem:[%s33417_s0 + $0x13e8] sm:$0xff]   ;;  %25286 = vst [vmem:[%s33418_s1 + $0x7e8] sm:$0xff] %v26480_v49  ;;  %v26490_v59 = vld [vmem:[%s33417_s0 + $0x13f8] sm:$0xff]   ;;  %25322 = vst [vmem:[%s33418_s1 + $0x7f8] sm:$0xff] %v26489_v58 }
 0x23d   :  { %v26482_v51 = vld [vmem:[%s33417_s0 + $0x7e8] sm:$0xff]   ;;  %25290 = vst [vmem:[%s33418_s1 + $0x13e8] sm:$0xff] %v26481_v50  ;;  %v26491_v60 = vld [vmem:[%s33417_s0 + $0x7f8] sm:$0xff]   ;;  %25326 = vst [vmem:[%s33418_s1 + $0x13f8] sm:$0xff] %v26490_v59 }
 0x23e   :  { %v26483_v52 = vld [vmem:[%s33417_s0 + $0x1be8] sm:$0xff]   ;;  %25294 = vst [vmem:[%s33418_s1 + $0x1fe8] sm:$0xff] %v26482_v51  ;;  %v26492_v61 = vld [vmem:[%s33417_s0 + $0x1bf8] sm:$0xff]   ;;  %25330 = vst [vmem:[%s33418_s1 + $0x1ff8] sm:$0xff] %v26491_v60 }
 0x23f   :  { %v26484_v53 = vld [vmem:[%s33417_s0 + $0xfe8] sm:$0xff]   ;;  %25298 = vst [vmem:[%s33418_s1 + $0xbe8] sm:$0xff] %v26483_v52  ;;  %v26493_v62 = vld [vmem:[%s33417_s0 + $0xff8] sm:$0xff]   ;;  %25334 = vst [vmem:[%s33418_s1 + $0xbf8] sm:$0xff] %v26492_v61 }
 0x240   :  { %v26485_v54 = vld [vmem:[%s33417_s0 + $0x3e8] sm:$0xff]   ;;  %25302 = vst [vmem:[%s33418_s1 + $0x17e8] sm:$0xff] %v26484_v53  ;;  %v26494_v63 = vld [vmem:[%s33417_s0 + $0x3f8] sm:$0xff]   ;;  %25338 = vst [vmem:[%s33418_s1 + $0x17f8] sm:$0xff] %v26493_v62 }
 0x241   :  { %25306 = vst [vmem:[%s33418_s1 + $0x23e8] sm:$0xff] %v26485_v54  ;;  %25342 = vst [vmem:[%s33418_s1 + $0x23f8] sm:$0xff] %v26494_v63 }

// kernel: model2_forward.1
= control target key start
LH: loop header
LB: loop body
LE: loop exit
PB: predicated region body
PF: predicated region fallthrough
CT: control target
= control target key end

     0   :  { %vm309_vm0 = vcmask 1043456   ;;  %vm1986_vm1 = vcmask 1041409   ;;  %vm1988_vm2 = vcmask 1042434   ;;  %vm1990_vm3 = vcmask 1043459   ;;  %s6279_s1 = inlined_call_operand.vmem [shape: bf16[2048,256], index: 1, kind: input, shape index: {}]   ;;  %s6280_s0 = inlined_call_operand.vmem [shape: bf16[8,4,2048], index: 0, kind: input, shape index: {}]   ;;  %s6281_s2 = inlined_call_operand.vmem [shape: f32[1,256], index: 2, kind: input, shape index: {}]   ;;  %s6282_s3 = inlined_call_operand.vmem [shape: bf16[256,128], index: 3, kind: input, shape index: {}]   ;;  %s6283_s4 = inlined_call_operand.vmem [shape: f32[1,128], index: 4, kind: input, shape index: {}]   ;;  %s6284_s5 = inlined_call_operand.vmem [shape: f32[8,128], index: 5, kind: output, shape index: {}]  }
   0x1   :  { %v4224_v0 = vld [vmem:[%s6279_s1 + $0x74] ss:$8 sps:$4 sm:$0xff]   ;;  %v4228_v2 = vld [vmem:[%s6279_s1 + $0x70] ss:$8 sps:$4 sm:$0xff]   ;;  %v4230_v4 = vld [vmem:[%s6279_s1 + $0x64] ss:$8 sps:$4 sm:$0xff]  }
   0x2   :  { %v4226_v1 = vld [vmem:[%s6279_s1 + $0x174] ss:$8 sps:$4 sm:$0xff]   ;;  %3417 = vmatprep.subr.bf16.mxu0 %v4224_v0  ;;  %v4229_v3 = vld [vmem:[%s6279_s1 + $0x170] ss:$8 sps:$4 sm:$0xff]   ;;  %v4232_v5 = vld [vmem:[%s6279_s1 + $0x164] ss:$8 sps:$4 sm:$0xff]  }
   0x3   :  { %3458 = vmatprep.subr.bf16.mxu1 %v4226_v1  ;;  %3418 = vmatpush1.bf16.msra.mxu0 %v4228_v2  ;;  %v4234_v6 = vld [vmem:[%s6279_s1 + $0x60] ss:$8 sps:$4 sm:$0xff]   ;;  %v4236_v8 = vld [vmem:[%s6279_s1 + $0x54] ss:$8 sps:$4 sm:$0xff]   ;;  %v4240_v10 = vld [vmem:[%s6279_s1 + $0x50] ss:$8 sps:$4 sm:$0xff]  }
   0x4   :  { %3459 = vmatpush1.bf16.msra.mxu1 %v4229_v3  ;;  %3419 = vmatprep.subr.bf16.mxu0 %v4230_v4  ;;  %v4235_v7 = vld [vmem:[%s6279_s1 + $0x160] ss:$8 sps:$4 sm:$0xff]   ;;  %v4238_v9 = vld [vmem:[%s6279_s1 + $0x154] ss:$8 sps:$4 sm:$0xff]   ;;  %v4241_v11 = vld [vmem:[%s6279_s1 + $0x150] ss:$8 sps:$4 sm:$0xff]  }
   0x5   :  { %3460 = vmatprep.subr.bf16.mxu1 %v4232_v5  ;;  %v4242_v12 = vld [vmem:[%s6279_s1 + $0x44] ss:$8 sps:$4 sm:$0xff]   ;;  %v4246_v14 = vld [vmem:[%s6279_s1 + $0x40] ss:$8 sps:$4 sm:$0xff]   ;;  %v4248_v16 = vld [vmem:[%s6279_s1 + $0x34] ss:$8 sps:$4 sm:$0xff]  }
   0x6   :  { %v4244_v13 = vld [vmem:[%s6279_s1 + $0x144] ss:$8 sps:$4 sm:$0xff]   ;;  %v4247_v15 = vld [vmem:[%s6279_s1 + $0x140] ss:$8 sps:$4 sm:$0xff]   ;;  %v4250_v17 = vld [vmem:[%s6279_s1 + $0x134] ss:$8 sps:$4 sm:$0xff]  }
   0x7   :  { %3420 = vmatpush1.bf16.msra.mxu0 %v4234_v6  ;;  %v4252_v18 = vld [vmem:[%s6279_s1 + $0x30] ss:$8 sps:$4 sm:$0xff]   ;;  %v4254_v20 = vld [vmem:[%s6279_s1 + $0x24] ss:$8 sps:$4 sm:$0xff]   ;;  %v4258_v22 = vld [vmem:[%s6279_s1 + $0x20] ss:$8 sps:$4 sm:$0xff]  }
   0x8   :  { %3461 = vmatpush1.bf16.msra.mxu1 %v4235_v7  ;;  %3421 = vmatprep.subr.bf16.mxu0 %v4236_v8  ;;  %v4253_v19 = vld [vmem:[%s6279_s1 + $0x130] ss:$8 sps:$4 sm:$0xff]   ;;  %v4256_v21 = vld [vmem:[%s6279_s1 + $0x124] ss:$8 sps:$4 sm:$0xff]   ;;  %v4259_v23 = vld [vmem:[%s6279_s1 + $0x120] ss:$8 sps:$4 sm:$0xff]  }
   0x9   :  { %3462 = vmatprep.subr.bf16.mxu1 %v4238_v9  ;;  %v4260_v24 = vld [vmem:[%s6279_s1 + $0x14] ss:$8 sps:$4 sm:$0xff]   ;;  %v4264_v26 = vld [vmem:[%s6279_s1 + $0x10] ss:$8 sps:$4 sm:$0xff]   ;;  %v4266_v28 = vld [vmem:[%s6279_s1 + $0x4] ss:$8 sps:$4 sm:$0xff]  }
   0xa   :  { %v4262_v25 = vld [vmem:[%s6279_s1 + $0x114] ss:$8 sps:$4 sm:$0xff]   ;;  %v4265_v27 = vld [vmem:[%s6279_s1 + $0x110] ss:$8 sps:$4 sm:$0xff]   ;;  %v4268_v29 = vld [vmem:[%s6279_s1 + $0x104] ss:$8 sps:$4 sm:$0xff]  }
   0xb   :  { %3422 = vmatpush1.bf16.msra.mxu0 %v4240_v10  ;;  %v4270_v30 = vld [vmem:[%s6279_s1] ss:$8 sps:$4 sm:$0xff]   ;;  %v4272_v32 = vld [vmem:[%s6279_s1 + $0xf4] ss:$8 sps:$4 sm:$0xff]   ;;  %v4276_v34 = vld [vmem:[%s6279_s1 + $0xf0] ss:$8 sps:$4 sm:$0xff]  }
   0xc   :  { %3463 = vmatpush1.bf16.msra.mxu1 %v4241_v11  ;;  %3423 = vmatprep.subr.bf16.mxu0 %v4242_v12  ;;  %v4271_v31 = vld [vmem:[%s6279_s1 + $0x100] ss:$8 sps:$4 sm:$0xff]   ;;  %v4274_v33 = vld [vmem:[%s6279_s1 + $0x1f4] ss:$8 sps:$4 sm:$0xff]   ;;  %v4277_v35 = vld [vmem:[%s6279_s1 + $0x1f0] ss:$8 sps:$4 sm:$0xff]  }
   0xd   :  { %3464 = vmatprep.subr.bf16.mxu1 %v4244_v13  ;;  %v4278_v36 = vld [vmem:[%s6279_s1 + $0xe4] ss:$8 sps:$4 sm:$0xff]   ;;  %v4282_v38 = vld [vmem:[%s6279_s1 + $0xe0] ss:$8 sps:$4 sm:$0xff]   ;;  %v4284_v40 = vld [vmem:[%s6279_s1 + $0xd4] ss:$8 sps:$4 sm:$0xff]  }
   0xe   :  { %v4280_v37 = vld [vmem:[%s6279_s1 + $0x1e4] ss:$8 sps:$4 sm:$0xff]   ;;  %v4283_v39 = vld [vmem:[%s6279_s1 + $0x1e0] ss:$8 sps:$4 sm:$0xff]   ;;  %v4286_v41 = vld [vmem:[%s6279_s1 + $0x1d4] ss:$8 sps:$4 sm:$0xff]  }
   0xf   :  { %3424 = vmatpush1.bf16.msra.mxu0 %v4246_v14  ;;  %v4288_v42 = vld [vmem:[%s6279_s1 + $0xd0] ss:$8 sps:$4 sm:$0xff]   ;;  %v4290_v44 = vld [vmem:[%s6279_s1 + $0xc4] ss:$8 sps:$4 sm:$0xff]   ;;  %v4294_v46 = vld [vmem:[%s6279_s1 + $0xc0] ss:$8 sps:$4 sm:$0xff]  }
  0x10   :  { %3465 = vmatpush1.bf16.msra.mxu1 %v4247_v15  ;;  %3425 = vmatprep.subr.bf16.mxu0 %v4248_v16  ;;  %v4289_v43 = vld [vmem:[%s6279_s1 + $0x1d0] ss:$8 sps:$4 sm:$0xff]   ;;  %v4292_v45 = vld [vmem:[%s6279_s1 + $0x1c4] ss:$8 sps:$4 sm:$0xff]   ;;  %v4295_v47 = vld [vmem:[%s6279_s1 + $0x1c0] ss:$8 sps:$4 sm:$0xff]  }
  0x11   :  { %3466 = vmatprep.subr.bf16.mxu1 %v4250_v17  ;;  %v21_v48 = vld [vmem:[%s6280_s0] sm:$0xff]  ;;  %v4296_v49 = vld [vmem:[%s6279_s1 + $0xb4] ss:$8 sps:$4 sm:$0xff]   ;;  %v4300_v4 = vld [vmem:[%s6279_s1 + $0xb0] ss:$8 sps:$4 sm:$0xff]   ;;  %vm1992_vm4 = vcmask 1044484  }
  0x12   :  { %v4298_v50 = vld [vmem:[%s6279_s1 + $0x1b4] ss:$8 sps:$4 sm:$0xff]   ;;  %v25_v51 = vld [vmem:[%s6280_s0 + $0x20] sm:$0xff]  ;;  %v4820_v54 = vunpack.c.l.bf16 %v21_v48  ;;  %v4822_v55 = vunpack.c.h.bf16 %v21_v48  ;;  %v4301_v9 = vld [vmem:[%s6279_s1 + $0x1b0] ss:$8 sps:$4 sm:$0xff]   ;;  %vm1994_vm5 = vcmask 1045509  }
  0x13   :  { %3426 = vmatpush1.bf16.msra.mxu0 %v4252_v18  ;;  %v4813_v52 = vld [vmem:[%s6280_s0 + $0x40] sm:$0xff]  ;;  %v4839_v59 = vunpack.c.l.bf16 %v25_v51  ;;  %v4847_v62 = vunpack.c.h.bf16 %v25_v51  ;;  %v4312_v48 = vld [vmem:[%s6279_s1 + $0x90] ss:$8 sps:$4 sm:$0xff]   ;;  %vm1996_vm6 = vcmask 1046534   ;;  %vm1998_vm7 = vcmask 1047559  }
  0x14   :  { %3467 = vmatpush1.bf16.msra.mxu1 %v4253_v19  ;;  %3427 = vmatprep.subr.bf16.mxu0 %v4254_v20  ;;  %v4818_v53 = vld [vmem:[%s6280_s0 + $0x60] sm:$0xff]  ;;  %v4842_v60 = vunpack.c.l.bf16 %v4813_v52  ;;  %v181_v3 = vcombine.high %v4820_v54, %v4820_v54 }
  0x15   :  { %3468 = vmatprep.subr.bf16.mxu1 %v4256_v21  ;;  %v4827_v56 = vld [vmem:[%s6280_s0 + $0x80] sm:$0xff]  ;;  %v4845_v61 = vunpack.c.l.bf16 %v4818_v53  ;;  %v189_v6 = vcombine.high %v4839_v59, %v4839_v59 }
  0x16   :  { %v4832_v57 = vld [vmem:[%s6280_s0 + $0xa0] sm:$0xff]  ;;  %v4855_v0 = vunpack.c.l.bf16 %v4827_v56  ;;  %v197_v7 = vcombine.high %v4842_v60, %v4842_v60  ;;  %v317_v14 = vsel %vm309_vm0, %v181_v3, 0.0 }
  0x17   :  { %3428 = vmatpush1.bf16.msra.mxu0 %v4258_v22  ;;  %v4837_v58 = vld [vmem:[%s6280_s0 + $0xc0] sm:$0xff]  ;;  %v4858_v1 = vunpack.c.l.bf16 %v4832_v57  ;;  %v205_v8 = vcombine.high %v4845_v61, %v4845_v61  ;;  %v318_v16 = vrot.slane %v317_v14, 4  ;;  %v429_v17 = vsel %vm309_vm0, %v189_v6, 0.0 }
  0x18   :  { %3469 = vmatpush1.bf16.msra.mxu1 %v4259_v23  ;;  %3429 = vmatprep.subr.bf16.mxu0 %v4260_v24  ;;  %v4852_v63 = vld [vmem:[%s6280_s0 + $0xe0] sm:$0xff]  ;;  %v4861_v2 = vunpack.c.l.bf16 %v4837_v58  ;;  %v213_v11 = vcombine.high %v4855_v0, %v4855_v0  ;;  %v541_v18 = vsel %vm309_vm0, %v197_v7, 0.0  ;;  %v430_v20 = vrot.slane %v429_v17, 4 }
  0x19   :  { %3470 = vmatprep.subr.bf16.mxu1 %v4262_v25  ;;  %v4869_v5 = vunpack.c.l.bf16 %v4852_v63  ;;  %v4302_v10 = vld [vmem:[%s6279_s1 + $0xa4] ss:$8 sps:$4 sm:$0xff]   ;;  %v221_v12 = vcombine.high %v4858_v1, %v4858_v1  ;;  %v542_v21 = vrot.slane %v541_v18, 4  ;;  %v653_v22 = vsel %vm309_vm0, %v205_v8, 0.0 }
  0x1a   :  { %v229_v13 = vcombine.high %v4861_v2, %v4861_v2  ;;  %v4304_v19 = vld [vmem:[%s6279_s1 + $0x1a4] ss:$8 sps:$4 sm:$0xff]   ;;  %v765_v23 = vsel %vm309_vm0, %v213_v11, 0.0  ;;  %v319_v24 = vadd.f32 %v318_v16, %v317_v14  ;;  %v654_v25 = vrot.slane %v653_v22, 4 }
  0x1b   :  { %3430 = vmatpush1.bf16.msra.mxu0 %v4264_v26  ;;  %v237_v15 = vcombine.high %v4869_v5, %v4869_v5  ;;  %v766_v26 = vrot.slane %v765_v23, 4  ;;  %v4314_v6 = vld [vmem:[%s6279_s1 + $0x84] ss:$8 sps:$4 sm:$0xff]  }
  0x1c   :  { %3471 = vmatpush1.bf16.msra.mxu1 %v4265_v27  ;;  %3431 = vmatprep.subr.bf16.mxu0 %v4266_v28  ;;  %v877_v27 = vsel %vm309_vm0, %v221_v12, 0.0  ;;  %v4306_v28 = vld [vmem:[%s6279_s1 + $0xa0] ss:$8 sps:$4 sm:$0xff]   ;;  %v4316_v11 = vld [vmem:[%s6279_s1 + $0x184] ss:$8 sps:$4 sm:$0xff]  }
  0x1d   :  { %3472 = vmatprep.subr.bf16.mxu1 %v4268_v29  ;;  %v4307_v29 = vld [vmem:[%s6279_s1 + $0x1a0] ss:$8 sps:$4 sm:$0xff]  }
  0x1f   :  { %3432 = vmatpush1.bf16.msra.mxu0 %v4270_v30  ;;  %v431_v30 = vadd.f32 %v430_v20, %v429_v17  ;;  %v4318_v20 = vld [vmem:[%s6279_s1 + $0x80] ss:$8 sps:$4 sm:$0xff]  }
  0x20   :  { %3473 = vmatpush1.bf16.msra.mxu1 %v4271_v31  ;;  %3433 = vmatprep.subr.bf16.mxu0 %v4272_v32  ;;  %v543_v31 = vadd.f32 %v542_v21, %v541_v18  ;;  %v878_v32 = vrot.slane %v877_v27, 4 }
  0x21   :  { %3474 = vmatprep.subr.bf16.mxu1 %v4274_v33  ;;  %v989_v33 = vsel %vm309_vm0, %v229_v13, 0.0 }
  0x23   :  { %3434 = vmatpush2.bf16.msra.mxu0 %v4276_v34  ;;  %v4308_v34 = vld [vmem:[%s6279_s1 + $0x94] ss:$8 sps:$4 sm:$0xff]  }
  0x24   :  { %3475 = vmatpush2.bf16.msra.mxu1 %v4277_v35  ;;  %3435 = vmatprep.subr.bf16.mxu0 %v4278_v36  ;;  %v320_v35 = vrot.slane %v319_v24, 2  ;;  %v655_v36 = vadd.f32 %v654_v25, %v653_v22  ;;  %v4319_v25 = vld [vmem:[%s6279_s1 + $0x180] ss:$8 sps:$4 sm:$0xff]  }
  0x25   :  { %3476 = vmatprep.subr.bf16.mxu1 %v4280_v37  ;;  %v767_v37 = vadd.f32 %v766_v26, %v765_v23 }
  0x27   :  { %3436 = vmatpush2.bf16.msra.mxu0 %v4282_v38  ;;  %v990_v38 = vrot.slane %v989_v33, 4 }
  0x28   :  { %3477 = vmatpush2.bf16.msra.mxu1 %v4283_v39  ;;  %3437 = vmatprep.subr.bf16.mxu0 %v4284_v40  ;;  %v4310_v39 = vld [vmem:[%s6279_s1 + $0x194] ss:$8 sps:$4 sm:$0xff]   ;;  %v432_v40 = vrot.slane %v431_v30, 2 }
  0x29   :  { %3478 = vmatprep.subr.bf16.mxu1 %v4286_v41  ;;  %v544_v41 = vrot.slane %v543_v31, 2 }
  0x2b   :  { %3438 = vmatpush2.bf16.msra.mxu0 %v4288_v42  ;;  %v879_v42 = vadd.f32 %v878_v32, %v877_v27 }
  0x2c   :  { %3479 = vmatpush2.bf16.msra.mxu1 %v4289_v43  ;;  %3439 = vmatprep.subr.bf16.mxu0 %v4290_v44  ;;  %v1101_v43 = vsel %vm309_vm0, %v237_v15, 0.0  ;;  %v321_v44 = vadd.f32 %v320_v35, %v319_v24  ;;  %v4325_v35 = vld [vmem:[%s6279_s1 + $0x374] ss:$8 sps:$4 sm:$0xff]  }
  0x2d   :  { %3480 = vmatprep.subr.bf16.mxu1 %v4292_v45  ;;  %v656_v45 = vrot.slane %v655_v36, 2  ;;  %v880_v51 = vrot.slane %v879_v42, 2  ;;  %v1102_v3 = vrot.slane %v1101_v43, 4 }
  0x2e   :  { %v322_v7 = vrot.slane %v321_v44, 1 }
  0x2f   :  { %3440 = vmatpush2.bf16.msra.mxu0 %v4294_v46  ;;  %v768_v46 = vrot.slane %v767_v37, 2  ;;  %v657_v8 = vadd.f32 %v656_v45, %v655_v36  ;;  %v881_v14 = vadd.f32 %v880_v51, %v879_v42  ;;  %v1103_v15 = vadd.f32 %v1102_v3, %v1101_v43 }
  0x30   :  { %3481 = vmatpush2.bf16.msra.mxu1 %v4295_v47  ;;  %3441 = vmatprep.subr.bf16.mxu0 %v4296_v49  ;;  %v991_v47 = vadd.f32 %v990_v38, %v989_v33  ;;  %v433_v49 = vadd.f32 %v432_v40, %v431_v30  ;;  %v323_v16 = vadd.f32 %v322_v7, %v321_v44  ;;  %v4322_v30 = vld [vmem:[%s6279_s1 + $0x274] ss:$8 sps:$4 sm:$0xff]  }
  0x31   :  { %3482 = vmatprep.subr.bf16.mxu1 %v4298_v50  ;;  %v545_v50 = vadd.f32 %v544_v41, %v543_v31  ;;  %v658_v17 = vrot.slane %v657_v8, 1  ;;  %v882_v23 = vrot.slane %v881_v14, 1  ;;  %v1104_v24 = vrot.slane %v1103_v15, 2 }
  0x32   :  { %v434_v12 = vrot.slane %v433_v49, 1 }
  0x33   :  { %3442 = vmatpush2.bf16.msra.mxu0 %v4300_v4  ;;  %v4313_v4 = vld [vmem:[%s6279_s1 + $0x190] ss:$8 sps:$4 sm:$0xff]   ;;  %v546_v13 = vrot.slane %v545_v50, 1  ;;  %v659_v26 = vadd.f32 %v658_v17, %v657_v8  ;;  %v883_v31 = vadd.f32 %v882_v23, %v881_v14  ;;  %v1105_v32 = vadd.f32 %v1104_v24, %v1103_v15 }
  0x34   :  { %3483 = vmatpush2.bf16.msra.mxu1 %v4301_v9  ;;  %3443 = vmatprep.subr.bf16.mxu0 %v4302_v10  ;;  %v769_v9 = vadd.f32 %v768_v46, %v767_v37  ;;  %v992_v10 = vrot.slane %v991_v47, 2  ;;  %v435_v21 = vadd.f32 %v434_v12, %v433_v49 }
  0x35   :  { %3484 = vmatprep.subr.bf16.mxu1 %v4304_v19  ;;  %v547_v22 = vadd.f32 %v546_v13, %v545_v50  ;;  %v1383_v38 = vpack.c.bf16 %v659_v26, %v659_v26  ;;  %v1106_v40 = vrot.slane %v1105_v32, 1  ;;  %v1415_v41 = vpack.c.bf16 %v883_v31, %v883_v31 }
  0x36   :  { %v770_v18 = vrot.slane %v769_v9, 1  ;;  %v993_v19 = vadd.f32 %v992_v10, %v991_v47  ;;  %v1351_v33 = vpack.c.bf16 %v435_v21, %v435_v21  ;;  %v4943_v50 = vunpack.c.h.bf16 %v4818_v53 }
  0x37   :  { %3444 = vmatpush2.bf16.msra.mxu0 %v4306_v28  ;;  %v1367_v37 = vpack.c.bf16 %v547_v22, %v547_v22  ;;  %v1907_v46 = vunpack.c.l.b16 %v1383_v38  ;;  %v4957_v53 = vunpack.c.h.bf16 %v4852_v63 }
  0x38   :  { %3485 = vmatpush2.bf16.msra.mxu1 %v4307_v29  ;;  %3445 = vmatprep.subr.bf16.mxu0 %v4308_v34  ;;  %v771_v27 = vadd.f32 %v770_v18, %v769_v9  ;;  %v994_v28 = vrot.slane %v993_v19, 1  ;;  %v1335_v29 = vpack.c.bf16 %v323_v16, %v323_v16  ;;  %v4936_v34 = vunpack.c.h.bf16 %v4813_v52 }
  0x39   :  { %3486 = vmatprep.subr.bf16.mxu1 %v4310_v39  ;;  %v1875_v43 = vunpack.c.l.b16 %v1351_v33  ;;  %v1891_v45 = vunpack.c.l.b16 %v1367_v37  ;;  %v1107_v52 = vadd.f32 %v1106_v40, %v1105_v32  ;;  %v4954_v9 = vunpack.c.h.bf16 %v4837_v58 }
  0x3a   :  { %v995_v36 = vadd.f32 %v994_v28, %v993_v19  ;;  %v1399_v39 = vpack.c.bf16 %v771_v27, %v771_v27  ;;  %v1859_v42 = vunpack.c.l.b16 %v1335_v29  ;;  %v206_v58 = vcombine.high %v4943_v50, %v4943_v50 }
  0x3b   :  { %3446 = vmatpush2.bf16.msra.mxu0 %v4312_v48  ;;  %v1939_v48 = vunpack.c.l.b16 %v1415_v41  ;;  %v1447_v7 = vpack.c.bf16 %v1107_v52, %v1107_v52  ;;  %v230_v16 = vcombine.high %v4954_v9, %v4954_v9  ;;  %v238_v17 = vcombine.high %v4957_v53, %v4957_v53 }
  0x3c   :  { %3487 = vmatpush2.bf16.msra.mxu1 %v4313_v4  ;;  %3447 = vmatprep.subr.bf16.mxu0 %v4314_v6  ;;  %v1431_v44 = vpack.c.bf16 %v995_v36, %v995_v36  ;;  %v1923_v47 = vunpack.c.l.b16 %v1399_v39  ;;  %v2000_v49 = vsel %vm1986_vm1, %v1875_v43, %v1859_v42  ;;  %v4947_v4 = vunpack.c.h.bf16 %v4827_v56 }
  0x3d   :  { %3488 = vmatprep.subr.bf16.mxu1 %v4316_v11  ;;  %v2001_v3 = vsel %vm1988_vm2, %v1891_v45, %v2000_v49  ;;  %v4950_v6 = vunpack.c.h.bf16 %v4832_v57  ;;  %v182_v11 = vcombine.high %v4822_v55, %v4822_v55  ;;  %v190_v56 = vcombine.high %v4847_v62, %v4847_v62 }
  0x3e   :  { %v1955_v51 = vunpack.c.l.b16 %v1431_v44  ;;  %v2002_v8 = vsel %vm1990_vm3, %v1907_v46, %v2001_v3  ;;  %v198_v57 = vcombine.high %v4936_v34, %v4936_v34  ;;  %v1971_v12 = vunpack.c.l.b16 %v1447_v7 }
  0x3f   :  { %3448 = vmatpush2.bf16.msra.mxu0 %v4318_v20  ;;  %v2003_v10 = vsel %vm1992_vm4, %v1923_v47, %v2002_v8  ;;  %v214_v63 = vcombine.high %v4947_v4, %v4947_v4  ;;  %v222_v15 = vcombine.high %v4950_v6, %v4950_v6  ;;  %v331_v19 = vsel %vm309_vm0, %v182_v11, 0.0 }
  0x40   :  { %3489 = vmatpush2.bf16.msra.mxu1 %v4319_v25  ;;  %3499 = vmatprep.subr.bf16.mxu0 %v4322_v30  ;;  %v2004_v13 = vsel %vm1994_vm5, %v1939_v48, %v2003_v10  ;;  %v443_v20 = vsel %vm309_vm0, %v190_v56, 0.0  ;;  %v555_v21 = vsel %vm309_vm0, %v198_v57, 0.0  ;;  %v332_v23 = vrot.slane %v331_v19, 4 }
  0x41   :  { %3540 = vmatprep.subr.bf16.mxu1 %v4325_v35  ;;  %v2005_v14 = vsel %vm1996_vm6, %v1955_v51, %v2004_v13  ;;  %v444_v24 = vrot.slane %v443_v20, 4  ;;  %v556_v25 = vrot.slane %v555_v21, 4  ;;  %v667_v26 = vsel %vm309_vm0, %v206_v58, 0.0 }
  0x42   :  { %v2006_v18 = vsel %vm1998_vm7, %v1971_v12, %v2005_v14  ;;  %v779_v27 = vsel %vm309_vm0, %v214_v63, 0.0  ;;  %v891_v28 = vsel %vm309_vm0, %v222_v15, 0.0  ;;  %v1003_v29 = vsel %vm309_vm0, %v230_v16, 0.0 }
  0x43   :  { %v2106_v22 = vpack.c.b16 %v2006_v18, %v2006_v18  ;;  %v333_v30 = vadd.f32 %v332_v23, %v331_v19  ;;  %v445_v31 = vadd.f32 %v444_v24, %v443_v20  ;;  %v557_v32 = vadd.f32 %v556_v25, %v555_v21 }
  0x44   :  { %v668_v33 = vrot.slane %v667_v26, 4  ;;  %v780_v35 = vrot.slane %v779_v27, 4  ;;  %v892_v36 = vrot.slane %v891_v28, 4  ;;  %v1004_v37 = vrot.slane %v1003_v29, 4 }
  0x45   :  { %3449 = vmatprep.mubr.bf16.mxu0 %v2106_v22  ;;  %v1115_v38 = vsel %vm309_vm0, %v238_v17, 0.0  ;;  %v334_v39 = vrot.slane %v333_v30, 2  ;;  %v446_v40 = vrot.slane %v445_v31, 2  ;;  %v558_v41 = vrot.slane %v557_v32, 2 }
  0x46   :  { %v669_v42 = vadd.f32 %v668_v33, %v667_v26  ;;  %v781_v43 = vadd.f32 %v780_v35, %v779_v27  ;;  %v893_v44 = vadd.f32 %v892_v36, %v891_v28  ;;  %v1005_v45 = vadd.f32 %v1004_v37, %v1003_v29 }
  0x47   :  { %v1116_v46 = vrot.slane %v1115_v38, 4  ;;  %v335_v47 = vadd.f32 %v334_v39, %v333_v30  ;;  %v447_v52 = vadd.f32 %v446_v40, %v445_v31  ;;  %v559_v48 = vadd.f32 %v558_v41, %v557_v32 }
  0x48   :  { %v670_v49 = vrot.slane %v669_v42, 2  ;;  %v782_v51 = vrot.slane %v781_v43, 2  ;;  %v894_v3 = vrot.slane %v893_v44, 2  ;;  %v1006_v7 = vrot.slane %v1005_v45, 2 }
  0x49   :  { %v1117_v8 = vadd.f32 %v1116_v46, %v1115_v38  ;;  %v336_v10 = vrot.slane %v335_v47, 1  ;;  %v448_v11 = vrot.slane %v447_v52, 1  ;;  %v560_v56 = vrot.slane %v559_v48, 1 }
  0x4a   :  { %v671_v57 = vadd.f32 %v670_v49, %v669_v42  ;;  %v783_v12 = vadd.f32 %v782_v51, %v781_v43  ;;  %v895_v13 = vadd.f32 %v894_v3, %v893_v44  ;;  %v1007_v58 = vadd.f32 %v1006_v7, %v1005_v45 }
  0x4b   :  { %v1118_v63 = vrot.slane %v1117_v8, 2  ;;  %v337_v14 = vadd.f32 %v336_v10, %v335_v47  ;;  %v449_v15 = vadd.f32 %v448_v11, %v447_v52  ;;  %v561_v16 = vadd.f32 %v560_v56, %v559_v48 }
  0x4c   :  { %v672_v17 = vrot.slane %v671_v57, 1  ;;  %v784_v18 = vrot.slane %v783_v12, 1  ;;  %v896_v19 = vrot.slane %v895_v13, 1  ;;  %v1008_v20 = vrot.slane %v1007_v58, 1 }
  0x4d   :  { %v1119_v21 = vadd.f32 %v1118_v63, %v1117_v8  ;;  %v1337_v23 = vpack.c.bf16 %v337_v14, %v337_v14  ;;  %v1353_v24 = vpack.c.bf16 %v449_v15, %v449_v15  ;;  %v1369_v25 = vpack.c.bf16 %v561_v16, %v561_v16 }
  0x4e   :  { %v673_v22 = vadd.f32 %v672_v17, %v671_v57  ;;  %v785_v26 = vadd.f32 %v784_v18, %v783_v12  ;;  %v897_v27 = vadd.f32 %v896_v19, %v895_v13  ;;  %v1009_v28 = vadd.f32 %v1008_v20, %v1007_v58 }
  0x4f   :  { %v1120_v29 = vrot.slane %v1119_v21, 1  ;;  %v1861_v31 = vunpack.c.l.b16 %v1337_v23  ;;  %v1877_v32 = vunpack.c.l.b16 %v1353_v24  ;;  %v1893_v33 = vunpack.c.l.b16 %v1369_v25 }
  0x50   :  { %v1385_v30 = vpack.c.bf16 %v673_v22, %v673_v22  ;;  %v1401_v36 = vpack.c.bf16 %v785_v26, %v785_v26  ;;  %v1417_v37 = vpack.c.bf16 %v897_v27, %v897_v27  ;;  %v1433_v38 = vpack.c.bf16 %v1009_v28, %v1009_v28 }
  0x51   :  { %v1121_v35 = vadd.f32 %v1120_v29, %v1119_v21  ;;  %v2014_v40 = vsel %vm1986_vm1, %v1877_v32, %v1861_v31  ;;  %v310_v41 = vsel %vm309_vm0, %v4820_v54, 0.0  ;;  %v422_v42 = vsel %vm309_vm0, %v4839_v59, 0.0 }
  0x52   :  { %v1909_v39 = vunpack.c.l.b16 %v1385_v30  ;;  %v1925_v44 = vunpack.c.l.b16 %v1401_v36  ;;  %v1941_v45 = vunpack.c.l.b16 %v1417_v37  ;;  %v1957_v46 = vunpack.c.l.b16 %v1433_v38 }
  0x53   :  { %v1449_v43 = vpack.c.bf16 %v1121_v35, %v1121_v35  ;;  %v2015_v47 = vsel %vm1988_vm2, %v1893_v33, %v2014_v40  ;;  %v311_v52 = vrot.slane %v310_v41, 4  ;;  %v423_v48 = vrot.slane %v422_v42, 4 }
  0x54   :  { %v534_v49 = vsel %vm309_vm0, %v4842_v60, 0.0  ;;  %v2016_v3 = vsel %vm1990_vm3, %v1909_v39, %v2015_v47  ;;  %v646_v54 = vsel %vm309_vm0, %v4845_v61, 0.0  ;;  %v758_v12 = vsel %vm309_vm0, %v4855_v0, 0.0 }
  0x55   :  { %v1973_v51 = vunpack.c.l.b16 %v1449_v43  ;;  %v535_v7 = vrot.slane %v534_v49, 4  ;;  %v2017_v59 = vsel %vm1992_vm4, %v1925_v44, %v2016_v3  ;;  %v312_v8 = vadd.f32 %v311_v52, %v310_v41 }
  0x56   :  { %v424_v10 = vadd.f32 %v423_v48, %v422_v42  ;;  %v647_v11 = vrot.slane %v646_v54, 4  ;;  %v2018_v56 = vsel %vm1994_vm5, %v1941_v45, %v2017_v59  ;;  %v870_v60 = vsel %vm309_vm0, %v4858_v1, 0.0 }
  0x57   :  { %v536_v57 = vadd.f32 %v535_v7, %v534_v49  ;;  %v2019_v13 = vsel %vm1996_vm6, %v1957_v46, %v2018_v56  ;;  %v313_v58 = vrot.slane %v312_v8, 2  ;;  %v759_v16 = vrot.slane %v758_v12, 4 }
  0x58   :  { %v425_v63 = vrot.slane %v424_v10, 2  ;;  %v648_v14 = vadd.f32 %v647_v11, %v646_v54  ;;  %v2020_v61 = vsel %vm1998_vm7, %v1973_v51, %v2019_v13  ;;  %v871_v17 = vrot.slane %v870_v60, 4 }
  0x59   :  { %v537_v15 = vrot.slane %v536_v57, 2  ;;  %v2108_v18 = vpack.c.b16 %v2020_v61, %v2020_v61  ;;  %v314_v19 = vadd.f32 %v313_v58, %v312_v8  ;;  %v760_v23 = vadd.f32 %v759_v16, %v758_v12 }
  0x5a   :  { %v426_v20 = vadd.f32 %v425_v63, %v424_v10  ;;  %v649_v21 = vrot.slane %v648_v14, 2  ;;  %v872_v0 = vadd.f32 %v871_v17, %v870_v60  ;;  %v982_v1 = vsel %vm309_vm0, %v4861_v2, 0.0 }
  0x5b   :  { %v538_v22 = vadd.f32 %v537_v15, %v536_v57  ;;  %3490 = vmatprep.mubr.bf16.mxu1 %v2108_v18  ;;  %v315_v24 = vrot.slane %v314_v19, 1  ;;  %v983_v27 = vrot.slane %v982_v1, 4  ;;  %v761_v29 = vrot.slane %v760_v23, 2 }
  0x5c   :  { %v427_v25 = vrot.slane %v426_v20, 1  ;;  %v650_v26 = vadd.f32 %v649_v21, %v648_v14  ;;  %v873_v30 = vrot.slane %v872_v0, 2  ;;  %v1094_v31 = vsel %vm309_vm0, %v4869_v5, 0.0 }
  0x5d   :  { %v539_v28 = vrot.slane %v538_v22, 1  ;;  %v316_v32 = vadd.f32 %v315_v24, %v314_v19  ;;  %v984_v36 = vadd.f32 %v983_v27, %v982_v1  ;;  %v762_v38 = vadd.f32 %v761_v29, %v760_v23 }
  0x5e   :  { %v428_v33 = vadd.f32 %v427_v25, %v426_v20  ;;  %v651_v35 = vrot.slane %v650_v26, 1  ;;  %v874_v39 = vadd.f32 %v873_v30, %v872_v0  ;;  %v1095_v40 = vrot.slane %v1094_v31, 4 }
  0x5f   :  { %v540_v37 = vadd.f32 %v539_v28, %v538_v22  ;;  %v985_v41 = vrot.slane %v984_v36, 2  ;;  %v1334_v42 = vpack.c.bf16 %v316_v32, %v316_v32  ;;  %v763_v44 = vrot.slane %v762_v38, 1 }
  0x60   :  { %v652_v2 = vadd.f32 %v651_v35, %v650_v26  ;;  %v1350_v43 = vpack.c.bf16 %v428_v33, %v428_v33  ;;  %v875_v45 = vrot.slane %v874_v39, 1  ;;  %v1096_v46 = vadd.f32 %v1095_v40, %v1094_v31 }
  0x61   :  { %v1366_v47 = vpack.c.bf16 %v540_v37, %v540_v37  ;;  %v986_v52 = vadd.f32 %v985_v41, %v984_v36  ;;  %v1858_v49 = vunpack.c.l.b16 %v1334_v42  ;;  %v764_v51 = vadd.f32 %v763_v44, %v762_v38 }
  0x62   :  { %v1382_v48 = vpack.c.bf16 %v652_v2, %v652_v2  ;;  %v1874_v5 = vunpack.c.l.b16 %v1350_v43  ;;  %v876_v3 = vadd.f32 %v875_v45, %v874_v39  ;;  %v1097_v7 = vrot.slane %v1096_v46, 2  ;;  %v4320_v43 = vld [vmem:[%s6279_s1 + $0x270] ss:$8 sps:$4 sm:$0xff]  }
  0x63   :  { %v1890_v54 = vunpack.c.l.b16 %v1366_v47  ;;  %v987_v59 = vrot.slane %v986_v52, 1  ;;  %v324_v11 = vsel %vm309_vm0, %v4822_v55, 0.0  ;;  %v1398_v57 = vpack.c.bf16 %v764_v51, %v764_v51 }
  0x64   :  { %v1906_v8 = vunpack.c.l.b16 %v1382_v48  ;;  %v1987_v10 = vsel %vm1986_vm1, %v1874_v5, %v1858_v49  ;;  %v1098_v56 = vadd.f32 %v1097_v7, %v1096_v46  ;;  %v1414_v12 = vpack.c.bf16 %v876_v3, %v876_v3 }
  0x65   :  { %v1989_v60 = vsel %vm1988_vm2, %v1890_v54, %v1987_v10  ;;  %v988_v13 = vadd.f32 %v987_v59, %v986_v52  ;;  %v325_v63 = vrot.slane %v324_v11, 4  ;;  %v436_v14 = vsel %vm309_vm0, %v4847_v62, 0.0  ;;  %v4326_v54 = vld [vmem:[%s6279_s1 + $0x260] ss:$8 sps:$4 sm:$0xff]  }
  0x66   :  { %v1991_v58 = vsel %vm1990_vm3, %v1906_v8, %v1989_v60  ;;  %v1099_v61 = vrot.slane %v1098_v56, 1  ;;  %v1922_v15 = vunpack.c.l.b16 %v1398_v57  ;;  %v1938_v16 = vunpack.c.l.b16 %v1414_v12  ;;  %v5048_v57 = vld [vmem:[%s6280_s0 + $0x8] sm:$0xff] }
  0x67   :  { %v437_v17 = vrot.slane %v436_v14, 4  ;;  %v1430_v18 = vpack.c.bf16 %v988_v13, %v988_v13  ;;  %v326_v19 = vadd.f32 %v325_v63, %v324_v11  ;;  %v548_v55 = vsel %vm309_vm0, %v4936_v34, 0.0 }
  0x68   :  { %v660_v20 = vsel %vm309_vm0, %v4943_v50, 0.0  ;;  %v1100_v21 = vadd.f32 %v1099_v61, %v1098_v56  ;;  %v1993_v22 = vsel %vm1992_vm4, %v1922_v15, %v1991_v58  ;;  %v549_v0 = vrot.slane %v548_v55, 4  ;;  %v4334_v56 = vld [vmem:[%s6279_s1 + $0x254] ss:$8 sps:$4 sm:$0xff]  }
  0x69   :  { %v438_v23 = vadd.f32 %v437_v17, %v436_v14  ;;  %v1954_v1 = vunpack.c.l.b16 %v1430_v18  ;;  %v1995_v62 = vsel %vm1994_vm5, %v1938_v16, %v1993_v22  ;;  %v327_v24 = vrot.slane %v326_v19, 2  ;;  %v4332_v16 = vld [vmem:[%s6279_s1 + $0x250] ss:$8 sps:$4 sm:$0xff]   ;;  %v5074_v22 = vld [vmem:[%s6280_s0 + $0x88] sm:$0xff] }
  0x6a   :  { %v661_v25 = vrot.slane %v660_v20, 4  ;;  %v1446_v26 = vpack.c.bf16 %v1100_v21, %v1100_v21  ;;  %v550_v28 = vadd.f32 %v549_v0, %v548_v55  ;;  %v772_v29 = vsel %vm309_vm0, %v4947_v4, 0.0  ;;  %v4340_v55 = vld [vmem:[%s6279_s1 + $0x244] ss:$8 sps:$4 sm:$0xff]  }
  0x6b   :  { %v439_v27 = vrot.slane %v438_v23, 2  ;;  %v1997_v34 = vsel %vm1996_vm6, %v1954_v1, %v1995_v62  ;;  %v328_v30 = vadd.f32 %v327_v24, %v326_v19  ;;  %v773_v31 = vrot.slane %v772_v29, 4  ;;  %v5069_v21 = vld [vmem:[%s6280_s0 + $0x68] sm:$0xff] }
  0x6c   :  { %v662_v50 = vadd.f32 %v661_v25, %v660_v20  ;;  %v1970_v32 = vunpack.c.l.b16 %v1446_v26  ;;  %v551_v35 = vrot.slane %v550_v28, 2  ;;  %v884_v36 = vsel %vm309_vm0, %v4950_v6, 0.0  ;;  %v4328_v6 = vld [vmem:[%s6279_s1 + $0x264] ss:$8 sps:$4 sm:$0xff]  }
  0x6d   :  { %v440_v33 = vadd.f32 %v439_v27, %v438_v23  ;;  %v329_v37 = vrot.slane %v328_v30, 1  ;;  %v774_v39 = vadd.f32 %v773_v31, %v772_v29  ;;  %v885_v40 = vrot.slane %v884_v36, 4  ;;  %v5064_v20 = vld [vmem:[%s6280_s0 + $0x48] sm:$0xff] }
  0x6e   :  { %v663_v38 = vrot.slane %v662_v50, 2  ;;  %v1999_v2 = vsel %vm1998_vm7, %v1970_v32, %v1997_v34  ;;  %v552_v42 = vadd.f32 %v551_v35, %v550_v28  ;;  %v996_v4 = vsel %vm309_vm0, %v4954_v9, 0.0  ;;  %v5082_v25 = vld [vmem:[%s6280_s0 + $0xa8] sm:$0xff] }
  0x6f   :  { %v441_v41 = vrot.slane %v440_v33, 1  ;;  %v2105_v44 = vpack.c.b16 %v1999_v2, %v1999_v2  ;;  %v330_v45 = vadd.f32 %v329_v37, %v328_v30  ;;  %v775_v47 = vrot.slane %v774_v39, 2  ;;  %v5087_v26 = vld [vmem:[%s6280_s0 + $0xc8] sm:$0xff] }
  0x70   :  { %v664_v46 = vadd.f32 %v663_v38, %v662_v50  ;;  %v553_v48 = vrot.slane %v552_v42, 1  ;;  %v886_v49 = vadd.f32 %v885_v40, %v884_v36  ;;  %v997_v5 = vrot.slane %v996_v4, 4  ;;  %v5092_v27 = vld [vmem:[%s6280_s0 + $0xe8] sm:$0xff] }
  0x71   :  { %v442_v52 = vadd.f32 %v441_v41, %v440_v33  ;;  %3450 = vmatmul.mubr.bf16.vlgmr.msra.gmra.mxu0 %v2105_v44  ;;  %v776_v3 = vadd.f32 %v775_v47, %v774_v39  ;;  %v1108_v9 = vsel %vm309_vm0, %v4957_v53, 0.0  ;;  %v1336_v7 = vpack.c.bf16 %v330_v45, %v330_v45  ;;  %v5053_v53 = vld [vmem:[%s6280_s0 + $0x28] sm:$0xff] }
  0x72   :  { %v665_v51 = vrot.slane %v664_v46, 1  ;;  %v554_v59 = vadd.f32 %v553_v48, %v552_v42  ;;  %v887_v8 = vrot.slane %v886_v49, 2  ;;  %v998_v10 = vadd.f32 %v997_v5, %v996_v4  ;;  %3500 = vmatpush1.bf16.msra.mxu0 %v4320_v43  ;;  %v4338_v37 = vld [vmem:[%s6279_s1 + $0x240] ss:$8 sps:$4 sm:$0xff]   ;;  %v4346_v42 = vld [vmem:[%s6279_s1 + $0x234] ss:$8 sps:$4 sm:$0xff]  }
  0x73   :  { %v1109_v11 = vrot.slane %v1108_v9, 4  ;;  %v777_v60 = vrot.slane %v776_v3, 1  ;;  %v1352_v13 = vpack.c.bf16 %v442_v52, %v442_v52  ;;  %v1860_v58 = vunpack.c.l.b16 %v1336_v7  ;;  %3501 = vmatprep.subr.bf16.mxu0 %v4328_v6 }
  0x74   :  { %v666_v12 = vadd.f32 %v665_v51, %v664_v46  ;;  %v888_v63 = vadd.f32 %v887_v8, %v886_v49  ;;  %v999_v14 = vrot.slane %v998_v10, 2  ;;  %v1368_v15 = vpack.c.bf16 %v554_v59, %v554_v59  ;;  %v4344_v49 = vld [vmem:[%s6279_s1 + $0x230] ss:$8 sps:$4 sm:$0xff]   ;;  %v4352_v8 = vld [vmem:[%s6279_s1 + $0x224] ss:$8 sps:$4 sm:$0xff]  }
  0x75   :  { %v1110_v61 = vadd.f32 %v1109_v11, %v1108_v9  ;;  %v778_v17 = vadd.f32 %v777_v60, %v776_v3  ;;  %v1876_v19 = vunpack.c.l.b16 %v1352_v13  ;;  %v5077_v23 = vunpack.c.l.bf16 %v5048_v57 }
  0x76   :  { %v1384_v18 = vpack.c.bf16 %v666_v12, %v666_v12  ;;  %v889_v0 = vrot.slane %v888_v63, 1  ;;  %v1000_v1 = vadd.f32 %v999_v14, %v998_v10  ;;  %v1892_v24 = vunpack.c.l.b16 %v1368_v15  ;;  %3502 = vmatpush1.bf16.msra.mxu0 %v4326_v54 }
  0x77   :  { %v1111_v62 = vrot.slane %v1110_v61, 2  ;;  %v1400_v28 = vpack.c.bf16 %v778_v17, %v778_v17  ;;  %v2007_v34 = vsel %vm1986_vm1, %v1876_v19, %v1860_v58  ;;  %3503 = vmatprep.subr.bf16.mxu0 %v4334_v56  ;;  %v5096_v30 = vunpack.c.l.bf16 %v5053_v53 }
  0x78   :  { %v1908_v29 = vunpack.c.l.b16 %v1384_v18  ;;  %v890_v50 = vadd.f32 %v889_v0, %v888_v63  ;;  %v1001_v31 = vrot.slane %v1000_v1, 1  ;;  %v2008_v33 = vsel %vm1988_vm2, %v1892_v24, %v2007_v34  ;;  %v4350_v0 = vld [vmem:[%s6279_s1 + $0x220] ss:$8 sps:$4 sm:$0xff]  }
  0x79   :  { %v1112_v32 = vadd.f32 %v1111_v62, %v1110_v61  ;;  %v1924_v35 = vunpack.c.l.b16 %v1400_v28  ;;  %v5104_v38 = vunpack.c.l.bf16 %v5064_v20  ;;  %v5107_v39 = vunpack.c.l.bf16 %v5069_v21  ;;  %v4323_v61 = vld [vmem:[%s6279_s1 + $0x370] ss:$8 sps:$4 sm:$0xff]  }
  0x7a   :  { %v2009_v36 = vsel %vm1990_vm3, %v1908_v29, %v2008_v33  ;;  %v1002_v40 = vadd.f32 %v1001_v31, %v1000_v1  ;;  %v1416_v41 = vpack.c.bf16 %v890_v50, %v890_v50  ;;  %3504 = vmatpush1.bf16.msra.mxu0 %v4332_v16  ;;  %v5113_v4 = vunpack.c.l.bf16 %v5074_v22  ;;  %v4358_v29 = vld [vmem:[%s6279_s1 + $0x214] ss:$8 sps:$4 sm:$0xff]  }
  0x7b   :  { %v1113_v2 = vrot.slane %v1112_v32, 1  ;;  %v2010_v43 = vsel %vm1992_vm4, %v1924_v35, %v2009_v36  ;;  %3505 = vmatprep.subr.bf16.mxu0 %v4340_v55  ;;  %v5117_v44 = vunpack.c.l.bf16 %v5082_v25  ;;  %v5120_v45 = vunpack.c.l.bf16 %v5087_v26  ;;  %v4331_v55 = vld [vmem:[%s6279_s1 + $0x364] ss:$8 sps:$4 sm:$0xff]  }
  0x7c   :  { %v5123_v46 = vunpack.c.l.bf16 %v5092_v27  ;;  %v1432_v6 = vpack.c.bf16 %v1002_v40, %v1002_v40  ;;  %v1940_v52 = vunpack.c.l.b16 %v1416_v41  ;;  %v183_v48 = vcombine.high %v5077_v23, %v5077_v23  ;;  %v4337_v40 = vld [vmem:[%s6279_s1 + $0x354] ss:$8 sps:$4 sm:$0xff]  }
  0x7d   :  { %v1114_v47 = vadd.f32 %v1113_v2, %v1112_v32  ;;  %v191_v5 = vcombine.high %v5096_v30, %v5096_v30  ;;  %v199_v51 = vcombine.high %v5104_v38, %v5104_v38  ;;  %v207_v3 = vcombine.high %v5107_v39, %v5107_v39 }
  0x7e   :  { %v215_v9 = vcombine.high %v5113_v4, %v5113_v4  ;;  %v1956_v54 = vunpack.c.l.b16 %v1432_v6  ;;  %v2011_v59 = vsel %vm1994_vm5, %v1940_v52, %v2010_v43  ;;  %3506 = vmatpush1.bf16.msra.mxu0 %v4338_v37  ;;  %v223_v10 = vcombine.high %v5117_v44, %v5117_v44  ;;  %v4329_v37 = vld [vmem:[%s6279_s1 + $0x360] ss:$8 sps:$4 sm:$0xff]   ;;  %v4364_v6 = vld [vmem:[%s6279_s1 + $0x204] ss:$8 sps:$4 sm:$0xff]  }
  0x7f   :  { %v1448_v7 = vpack.c.bf16 %v1114_v47, %v1114_v47  ;;  %3507 = vmatprep.subr.bf16.mxu0 %v4346_v42  ;;  %v231_v11 = vcombine.high %v5120_v45, %v5120_v45  ;;  %v239_v56 = vcombine.high %v5123_v46, %v5123_v46  ;;  %v345_v12 = vsel %vm309_vm0, %v183_v48, 0.0  ;;  %v4356_v47 = vld [vmem:[%s6279_s1 + $0x210] ss:$8 sps:$4 sm:$0xff]  }
  0x80   :  { %v457_v60 = vsel %vm309_vm0, %v191_v5, 0.0  ;;  %v2012_v58 = vsel %vm1996_vm6, %v1956_v54, %v2011_v59  ;;  %v346_v63 = vrot.slane %v345_v12, 4  ;;  %v569_v15 = vsel %vm309_vm0, %v199_v51, 0.0 }
  0x81   :  { %v1972_v13 = vunpack.c.l.b16 %v1448_v7  ;;  %v458_v14 = vrot.slane %v457_v60, 4  ;;  %v681_v16 = vsel %vm309_vm0, %v207_v3, 0.0  ;;  %v793_v17 = vsel %vm309_vm0, %v215_v9, 0.0 }
  0x82   :  { %v905_v18 = vsel %vm309_vm0, %v223_v10, 0.0  ;;  %3508 = vmatpush1.bf16.msra.mxu0 %v4344_v49  ;;  %v347_v1 = vadd.f32 %v346_v63, %v345_v12  ;;  %v570_v24 = vrot.slane %v569_v15, 4  ;;  %v682_v34 = vrot.slane %v681_v16, 4  ;;  %v4343_v12 = vld [vmem:[%s6279_s1 + $0x344] ss:$8 sps:$4 sm:$0xff]  }
  0x83   :  { %v2013_v19 = vsel %vm1998_vm7, %v1972_v13, %v2012_v58  ;;  %v459_v62 = vadd.f32 %v458_v14, %v457_v60  ;;  %3509 = vmatprep.subr.bf16.mxu0 %v4352_v8  ;;  %v794_v50 = vrot.slane %v793_v17, 4  ;;  %v906_v31 = vrot.slane %v905_v18, 4  ;;  %v4362_v63 = vld [vmem:[%s6279_s1 + $0x200] ss:$8 sps:$4 sm:$0xff]   ;;  %v4370_v14 = vld [vmem:[%s6279_s1 + $0x2f4] ss:$8 sps:$4 sm:$0xff]  }
  0x84   :  { %v2107_v28 = vpack.c.b16 %v2013_v19, %v2013_v19  ;;  %v348_v32 = vrot.slane %v347_v1, 2  ;;  %v571_v35 = vadd.f32 %v570_v24, %v569_v15  ;;  %v1017_v36 = vsel %vm309_vm0, %v231_v11, 0.0  ;;  %v4335_v11 = vld [vmem:[%s6279_s1 + $0x350] ss:$8 sps:$4 sm:$0xff]  }
  0x85   :  { %v460_v33 = vrot.slane %v459_v62, 2  ;;  %v683_v2 = vadd.f32 %v682_v34, %v681_v16  ;;  %v795_v41 = vadd.f32 %v794_v50, %v793_v17  ;;  %v907_v42 = vadd.f32 %v906_v31, %v905_v18  ;;  %v4349_v34 = vld [vmem:[%s6279_s1 + $0x334] ss:$8 sps:$4 sm:$0xff]  }
  0x86   :  { %3491 = vmatmul.mubr.bf16.vlgmr.msra.gmra.mxu1 %v2107_v28  ;;  %v1018_v43 = vrot.slane %v1017_v36, 4  ;;  %3510 = vmatpush1.bf16.msra.mxu0 %v4350_v0  ;;  %v349_v52 = vadd.f32 %v348_v32, %v347_v1  ;;  %v572_v49 = vrot.slane %v571_v35, 2  ;;  %v1129_v5 = vsel %vm309_vm0, %v239_v56, 0.0 }
  0x87   :  { %3541 = vmatpush1.bf16.msra.mxu1 %v4323_v61  ;;  %v461_v48 = vadd.f32 %v460_v33, %v459_v62  ;;  %3511 = vmatprep.subr.bf16.mxu0 %v4358_v29  ;;  %v684_v51 = vrot.slane %v683_v2, 2  ;;  %v796_v3 = vrot.slane %v795_v41, 2  ;;  %v908_v9 = vrot.slane %v907_v42, 2  ;;  %v4341_v29 = vld [vmem:[%s6279_s1 + $0x340] ss:$8 sps:$4 sm:$0xff]  }
  0x88   :  { %3542 = vmatprep.subr.bf16.mxu1 %v4331_v55  ;;  %v1019_v7 = vadd.f32 %v1018_v43, %v1017_v36  ;;  %v350_v54 = vrot.slane %v349_v52, 1  ;;  %v573_v8 = vadd.f32 %v572_v49, %v571_v35  ;;  %v1130_v10 = vrot.slane %v1129_v5, 4  ;;  %v4368_v35 = vld [vmem:[%s6279_s1 + $0x2f0] ss:$8 sps:$4 sm:$0xff]   ;;  %v4376_v36 = vld [vmem:[%s6279_s1 + $0x2e4] ss:$8 sps:$4 sm:$0xff]  }
  0x89   :  { %v462_v59 = vrot.slane %v461_v48, 1  ;;  %v685_v60 = vadd.f32 %v684_v51, %v683_v2  ;;  %v797_v56 = vadd.f32 %v796_v3, %v795_v41  ;;  %v909_v13 = vadd.f32 %v908_v9, %v907_v42  ;;  %v4347_v51 = vld [vmem:[%s6279_s1 + $0x330] ss:$8 sps:$4 sm:$0xff]   ;;  %v4355_v3 = vld [vmem:[%s6279_s1 + $0x324] ss:$8 sps:$4 sm:$0xff]  }
  0x8a   :  { %v1020_v58 = vrot.slane %v1019_v7, 2  ;;  %3512 = vmatpush1.bf16.msra.mxu0 %v4356_v47  ;;  %v351_v61 = vadd.f32 %v350_v54, %v349_v52  ;;  %v574_v16 = vrot.slane %v573_v8, 1  ;;  %v1131_v17 = vadd.f32 %v1130_v10, %v1129_v5  ;;  %v4374_v9 = vld [vmem:[%s6279_s1 + $0x2e0] ss:$8 sps:$4 sm:$0xff]  }
  0x8b   :  { %3543 = vmatpush1.bf16.msra.mxu1 %v4329_v37  ;;  %v463_v15 = vadd.f32 %v462_v59, %v461_v48  ;;  %3513 = vmatprep.subr.bf16.mxu0 %v4364_v6  ;;  %v686_v18 = vrot.slane %v685_v60, 1  ;;  %v798_v19 = vrot.slane %v797_v56, 1  ;;  %v910_v55 = vrot.slane %v909_v13, 1 }
  0x8c   :  { %3544 = vmatprep.subr.bf16.mxu1 %v4337_v40  ;;  %v1021_v0 = vadd.f32 %v1020_v58, %v1019_v7  ;;  %v575_v1 = vadd.f32 %v574_v16, %v573_v8  ;;  %v1132_v62 = vrot.slane %v1131_v17, 2  ;;  %v1339_v24 = vpack.c.bf16 %v351_v61, %v351_v61  ;;  %v4382_v8 = vld [vmem:[%s6279_s1 + $0x2d4] ss:$8 sps:$4 sm:$0xff]  }
  0x8d   :  { %v1355_v28 = vpack.c.bf16 %v463_v15, %v463_v15  ;;  %v687_v50 = vadd.f32 %v686_v18, %v685_v60  ;;  %v799_v31 = vadd.f32 %v798_v19, %v797_v56  ;;  %v911_v32 = vadd.f32 %v910_v55, %v909_v13  ;;  %v4353_v15 = vld [vmem:[%s6279_s1 + $0x320] ss:$8 sps:$4 sm:$0xff]   ;;  %v4388_v18 = vld [vmem:[%s6279_s1 + $0x2c4] ss:$8 sps:$4 sm:$0xff]  }
  0x8e   :  { %v1022_v33 = vrot.slane %v1021_v0, 1  ;;  %3514 = vmatpush1.bf16.msra.mxu0 %v4362_v63  ;;  %v1133_v37 = vadd.f32 %v1132_v62, %v1131_v17  ;;  %v1371_v40 = vpack.c.bf16 %v575_v1, %v575_v1  ;;  %v1863_v2 = vunpack.c.l.b16 %v1339_v24 }
  0x8f   :  { %3545 = vmatpush1.bf16.msra.mxu1 %v4335_v11  ;;  %v1879_v41 = vunpack.c.l.b16 %v1355_v28  ;;  %3515 = vmatprep.subr.bf16.mxu0 %v4370_v14  ;;  %v1387_v43 = vpack.c.bf16 %v687_v50, %v687_v50  ;;  %v1403_v47 = vpack.c.bf16 %v799_v31, %v799_v31  ;;  %v5207_v6 = vunpack.c.h.bf16 %v5048_v57 }
  0x90   :  { %3546 = vmatprep.subr.bf16.mxu1 %v4343_v12  ;;  %v1023_v42 = vadd.f32 %v1022_v33, %v1021_v0  ;;  %v1134_v52 = vrot.slane %v1133_v37, 1  ;;  %v1419_v48 = vpack.c.bf16 %v911_v32, %v911_v32  ;;  %v1895_v49 = vunpack.c.l.b16 %v1371_v40 }
  0x91   :  { %v2028_v5 = vsel %vm1986_vm1, %v1879_v41, %v1863_v2  ;;  %v1911_v57 = vunpack.c.l.b16 %v1387_v43  ;;  %v1927_v54 = vunpack.c.l.b16 %v1403_v47  ;;  %v5220_v59 = vunpack.c.h.bf16 %v5053_v53 }
  0x92   :  { %v1435_v7 = vpack.c.bf16 %v1023_v42, %v1023_v42  ;;  %3516 = vmatpush2.bf16.msra.mxu0 %v4368_v35  ;;  %v1135_v10 = vadd.f32 %v1134_v52, %v1133_v37  ;;  %v1943_v11 = vunpack.c.l.b16 %v1419_v48  ;;  %v2029_v12 = vsel %vm1988_vm2, %v1895_v49, %v2028_v5  ;;  %v4367_v35 = vld [vmem:[%s6279_s1 + $0x304] ss:$8 sps:$4 sm:$0xff]  }
  0x93   :  { %3547 = vmatpush1.bf16.msra.mxu1 %v4341_v29  ;;  %v5227_v60 = vunpack.c.h.bf16 %v5064_v20  ;;  %3517 = vmatprep.subr.bf16.mxu0 %v4376_v36  ;;  %v2030_v13 = vsel %vm1990_vm3, %v1911_v57, %v2029_v12  ;;  %v5231_v53 = vunpack.c.h.bf16 %v5069_v21  ;;  %v5234_v58 = vunpack.c.h.bf16 %v5074_v22  ;;  %v4361_v21 = vld [vmem:[%s6279_s1 + $0x314] ss:$8 sps:$4 sm:$0xff]   ;;  %v4380_v22 = vld [vmem:[%s6279_s1 + $0x2d0] ss:$8 sps:$4 sm:$0xff]  }
  0x94   :  { %3548 = vmatprep.subr.bf16.mxu1 %v4349_v34  ;;  %v1959_v56 = vunpack.c.l.b16 %v1435_v7  ;;  %v1451_v63 = vpack.c.bf16 %v1135_v10, %v1135_v10  ;;  %v2031_v14 = vsel %vm1992_vm4, %v1927_v54, %v2030_v13  ;;  %v5238_v61 = vunpack.c.h.bf16 %v5082_v25  ;;  %v4359_v29 = vld [vmem:[%s6279_s1 + $0x310] ss:$8 sps:$4 sm:$0xff]   ;;  %v4386_v34 = vld [vmem:[%s6279_s1 + $0x2c0] ss:$8 sps:$4 sm:$0xff]   ;;  %v4394_v36 = vld [vmem:[%s6279_s1 + $0x2b4] ss:$8 sps:$4 sm:$0xff]  }
  0x95   :  { %v5241_v20 = vunpack.c.h.bf16 %v5087_v26  ;;  %v2032_v16 = vsel %vm1994_vm5, %v1943_v11, %v2031_v14  ;;  %v5254_v25 = vunpack.c.h.bf16 %v5092_v27  ;;  %v184_v26 = vcombine.high %v5207_v6, %v5207_v6  ;;  %v4373_v10 = vld [vmem:[%s6279_s1 + $0x3f4] ss:$8 sps:$4 sm:$0xff]   ;;  %v4400_v11 = vld [vmem:[%s6279_s1 + $0x2a4] ss:$8 sps:$4 sm:$0xff]  }
  0x96   :  { %v192_v17 = vcombine.high %v5220_v59, %v5220_v59  ;;  %3518 = vmatpush2.bf16.msra.mxu0 %v4374_v9  ;;  %v1975_v19 = vunpack.c.l.b16 %v1451_v63  ;;  %v2033_v55 = vsel %vm1996_vm6, %v1959_v56, %v2032_v16  ;;  %v200_v0 = vcombine.high %v5227_v60, %v5227_v60  ;;  %v4392_v9 = vld [vmem:[%s6279_s1 + $0x2b0] ss:$8 sps:$4 sm:$0xff]  }
  0x97   :  { %3549 = vmatpush1.bf16.msra.mxu1 %v4347_v51  ;;  %v208_v27 = vcombine.high %v5231_v53, %v5231_v53  ;;  %3519 = vmatprep.subr.bf16.mxu0 %v4382_v8  ;;  %v216_v1 = vcombine.high %v5234_v58, %v5234_v58  ;;  %v224_v62 = vcombine.high %v5238_v61, %v5238_v61  ;;  %v359_v28 = vsel %vm309_vm0, %v184_v26, 0.0 }
  0x98   :  { %3550 = vmatprep.subr.bf16.mxu1 %v4355_v3  ;;  %v232_v24 = vcombine.high %v5241_v20, %v5241_v20  ;;  %v2034_v50 = vsel %vm1998_vm7, %v1975_v19, %v2033_v55  ;;  %v240_v31 = vcombine.high %v5254_v25, %v5254_v25  ;;  %v360_v32 = vrot.slane %v359_v28, 4  ;;  %v4365_v3 = vld [vmem:[%s6279_s1 + $0x300] ss:$8 sps:$4 sm:$0xff]  }
  0x99   :  { %v471_v33 = vsel %vm309_vm0, %v192_v17, 0.0  ;;  %v2110_v37 = vpack.c.b16 %v2034_v50, %v2034_v50  ;;  %v583_v2 = vsel %vm309_vm0, %v200_v0, 0.0  ;;  %v695_v41 = vsel %vm309_vm0, %v208_v27, 0.0 }
  0x9a   :  { %v472_v40 = vrot.slane %v471_v33, 4  ;;  %3520 = vmatpush2.bf16.msra.mxu0 %v4380_v22  ;;  %v361_v42 = vadd.f32 %v360_v32, %v359_v28  ;;  %v584_v43 = vrot.slane %v583_v2, 4  ;;  %v696_v47 = vrot.slane %v695_v41, 4 }
  0x9b   :  { %3551 = vmatpush1.bf16.msra.mxu1 %v4353_v15  ;;  %v807_v52 = vsel %vm309_vm0, %v216_v1, 0.0  ;;  %3521 = vmatprep.subr.bf16.mxu0 %v4388_v18  ;;  %v919_v5 = vsel %vm309_vm0, %v224_v62, 0.0  ;;  %v1031_v51 = vsel %vm309_vm0, %v232_v24, 0.0  ;;  %v1143_v63 = vsel %vm309_vm0, %v240_v31, 0.0 }
  0x9c   :  { %3552 = vmatprep.subr.bf16.mxu1 %v4361_v21  ;;  %v473_v48 = vadd.f32 %v472_v40, %v471_v33  ;;  %v808_v49 = vrot.slane %v807_v52, 4  ;;  %3531 = vmatprep.mubr.bf16.mxu0 %v2110_v37  ;;  %v362_v7 = vrot.slane %v361_v42, 2  ;;  %v585_v57 = vadd.f32 %v584_v43, %v583_v2 }
  0x9d   :  { %v697_v54 = vadd.f32 %v696_v47, %v695_v41  ;;  %v920_v8 = vrot.slane %v919_v5, 4  ;;  %v1032_v13 = vrot.slane %v1031_v51, 4  ;;  %v1144_v18 = vrot.slane %v1143_v63, 4 }
  0x9e   :  { %v474_v12 = vrot.slane %v473_v48, 2  ;;  %v809_v56 = vadd.f32 %v808_v49, %v807_v52  ;;  %3522 = vmatpush2.bf16.msra.mxu0 %v4386_v34  ;;  %v363_v14 = vadd.f32 %v362_v7, %v361_v42  ;;  %v586_v15 = vrot.slane %v585_v57, 2  ;;  %v4398_v34 = vld [vmem:[%s6279_s1 + $0x2a0] ss:$8 sps:$4 sm:$0xff]  }
  0x9f   :  { %3553 = vmatpush1.bf16.msra.mxu1 %v4359_v29  ;;  %v698_v21 = vrot.slane %v697_v54, 2  ;;  %v921_v22 = vadd.f32 %v920_v8, %v919_v5  ;;  %3523 = vmatprep.subr.bf16.mxu0 %v4394_v36  ;;  %v1033_v17 = vadd.f32 %v1032_v13, %v1031_v51  ;;  %v1145_v28 = vadd.f32 %v1144_v18, %v1143_v63  ;;  %v4371_v29 = vld [vmem:[%s6279_s1 + $0x3f0] ss:$8 sps:$4 sm:$0xff]   ;;  %v4406_v36 = vld [vmem:[%s6279_s1 + $0x294] ss:$8 sps:$4 sm:$0xff]  }
  0xa0   :  { %3554 = vmatprep.subr.bf16.mxu1 %v4367_v35  ;;  %v475_v16 = vadd.f32 %v474_v12, %v473_v48  ;;  %v810_v26 = vrot.slane %v809_v56, 2  ;;  %v364_v19 = vrot.slane %v363_v14, 1  ;;  %v587_v55 = vadd.f32 %v586_v15, %v585_v57  ;;  %v4379_v35 = vld [vmem:[%s6279_s1 + $0x3e4] ss:$8 sps:$4 sm:$0xff]  }
  0xa1   :  { %v699_v0 = vadd.f32 %v698_v21, %v697_v54  ;;  %v922_v27 = vrot.slane %v921_v22, 2  ;;  %v1034_v24 = vrot.slane %v1033_v17, 2  ;;  %v1146_v41 = vrot.slane %v1145_v28, 2 }
  0xa2   :  { %v476_v1 = vrot.slane %v475_v16, 1  ;;  %v811_v62 = vadd.f32 %v810_v26, %v809_v56  ;;  %3524 = vmatpush2.bf16.msra.mxu0 %v4392_v9  ;;  %v365_v50 = vadd.f32 %v364_v19, %v363_v14  ;;  %v588_v31 = vrot.slane %v587_v55, 1  ;;  %v4404_v9 = vld [vmem:[%s6279_s1 + $0x290] ss:$8 sps:$4 sm:$0xff]  }
  0xa3   :  { %3555 = vmatpush1.bf16.msra.mxu1 %v4365_v3  ;;  %v700_v32 = vrot.slane %v699_v0, 1  ;;  %v923_v33 = vadd.f32 %v922_v27, %v921_v22  ;;  %3525 = vmatprep.subr.bf16.mxu0 %v4400_v11  ;;  %v1035_v2 = vadd.f32 %v1034_v24, %v1033_v17  ;;  %v1147_v5 = vadd.f32 %v1146_v41, %v1145_v28  ;;  %v4377_v3 = vld [vmem:[%s6279_s1 + $0x3e0] ss:$8 sps:$4 sm:$0xff]   ;;  %v4412_v11 = vld [vmem:[%s6279_s1 + $0x284] ss:$8 sps:$4 sm:$0xff]  }
  0xa4   :  { %3556 = vmatprep.subr.bf16.mxu1 %v4373_v10  ;;  %v477_v37 = vadd.f32 %v476_v1, %v475_v16  ;;  %v812_v40 = vrot.slane %v811_v62, 1  ;;  %v589_v42 = vadd.f32 %v588_v31, %v587_v55  ;;  %v1341_v52 = vpack.c.bf16 %v365_v50, %v365_v50  ;;  %v4385_v10 = vld [vmem:[%s6279_s1 + $0x3d4] ss:$8 sps:$4 sm:$0xff]   ;;  %v4383_v19 = vld [vmem:[%s6279_s1 + $0x3d0] ss:$8 sps:$4 sm:$0xff]  }
  0xa5   :  { %v701_v43 = vadd.f32 %v700_v32, %v699_v0  ;;  %v924_v47 = vrot.slane %v923_v33, 1  ;;  %v1036_v49 = vrot.slane %v1035_v2, 1  ;;  %v1148_v56 = vrot.slane %v1147_v5, 1  ;;  %v4410_v55 = vld [vmem:[%s6279_s1 + $0x280] ss:$8 sps:$4 sm:$0xff]  }
  0xa6   :  { %v813_v48 = vadd.f32 %v812_v40, %v811_v62  ;;  %v1357_v51 = vpack.c.bf16 %v477_v37, %v477_v37  ;;  %3526 = vmatpush2.bf16.msra.mxu0 %v4398_v34  ;;  %v1373_v57 = vpack.c.bf16 %v589_v42, %v589_v42  ;;  %v1865_v8 = vunpack.c.l.b16 %v1341_v52  ;;  %v4391_v62 = vld [vmem:[%s6279_s1 + $0x3c4] ss:$8 sps:$4 sm:$0xff]   ;;  %v4418_v50 = vld [vmem:[%s6279_s1 + $0x474] ss:$8 sps:$4 sm:$0xff]  }
  0xa7   :  { %3557 = vmatpush2.bf16.msra.mxu1 %v4371_v29  ;;  %v925_v7 = vadd.f32 %v924_v47, %v923_v33  ;;  %v1389_v54 = vpack.c.bf16 %v701_v43, %v701_v43  ;;  %3527 = vmatprep.subr.bf16.mxu0 %v4406_v36  ;;  %v1037_v12 = vadd.f32 %v1036_v49, %v1035_v2  ;;  %v338_v22 = vsel %vm309_vm0, %v5077_v23, 0.0  ;;  %v4389_v2 = vld [vmem:[%s6279_s1 + $0x3c0] ss:$8 sps:$4 sm:$0xff]  }
  0xa8   :  { %3558 = vmatprep.subr.bf16.mxu1 %v4379_v35  ;;  %v1405_v13 = vpack.c.bf16 %v813_v48, %v813_v48  ;;  %v1881_v63 = vunpack.c.l.b16 %v1357_v51  ;;  %v1897_v15 = vunpack.c.l.b16 %v1373_v57  ;;  %v1149_v16 = vadd.f32 %v1148_v56, %v1147_v5 }
  0xa9   :  { %v1421_v14 = vpack.c.bf16 %v925_v7, %v925_v7  ;;  %v1913_v21 = vunpack.c.l.b16 %v1389_v54  ;;  %v1437_v26 = vpack.c.bf16 %v1037_v12, %v1037_v12  ;;  %v339_v1 = vrot.slane %v338_v22, 4 }
  0xaa   :  { %v1929_v17 = vunpack.c.l.b16 %v1405_v13  ;;  %v2042_v18 = vsel %vm1986_vm1, %v1881_v63, %v1865_v8  ;;  %3528 = vmatpush2.bf16.msra.mxu0 %v4404_v9  ;;  %v450_v23 = vsel %vm309_vm0, %v5096_v30, 0.0  ;;  %v1453_v24 = vpack.c.bf16 %v1149_v16, %v1149_v16  ;;  %v4395_v8 = vld [vmem:[%s6279_s1 + $0x3b0] ss:$8 sps:$4 sm:$0xff]  }
  0xab   :  { %3559 = vmatpush2.bf16.msra.mxu1 %v4377_v3  ;;  %v1945_v0 = vunpack.c.l.b16 %v1421_v14  ;;  %v2043_v27 = vsel %vm1988_vm2, %v1897_v15, %v2042_v18  ;;  %3529 = vmatprep.subr.bf16.mxu0 %v4412_v11  ;;  %v1961_v28 = vunpack.c.l.b16 %v1437_v26  ;;  %v451_v34 = vrot.slane %v450_v23, 4 }
  0xac   :  { %3560 = vmatprep.subr.bf16.mxu1 %v4385_v10  ;;  %v2044_v29 = vsel %vm1990_vm3, %v1913_v21, %v2043_v27  ;;  %v340_v32 = vadd.f32 %v339_v1, %v338_v22  ;;  %v562_v30 = vsel %vm309_vm0, %v5104_v38, 0.0  ;;  %v674_v33 = vsel %vm309_vm0, %v5107_v39, 0.0  ;;  %v4397_v39 = vld [vmem:[%s6279_s1 + $0x3b4] ss:$8 sps:$4 sm:$0xff]  }
  0xad   :  { %v2045_v31 = vsel %vm1992_vm4, %v1929_v17, %v2044_v29  ;;  %v1977_v35 = vunpack.c.l.b16 %v1453_v24  ;;  %v452_v37 = vadd.f32 %v451_v34, %v450_v23  ;;  %v563_v40 = vrot.slane %v562_v30, 4  ;;  %v4409_v23 = vld [vmem:[%s6279_s1 + $0x394] ss:$8 sps:$4 sm:$0xff]  }
  0xae   :  { %v2046_v36 = vsel %vm1994_vm5, %v1945_v0, %v2045_v31  ;;  %3530 = vmatpush2.bf16.msra.mxu0 %v4410_v55  ;;  %v341_v42 = vrot.slane %v340_v32, 2  ;;  %v675_v43 = vrot.slane %v674_v33, 4  ;;  %v786_v38 = vsel %vm309_vm0, %v5113_v4, 0.0 }
  0xaf   :  { %3561 = vmatpush2.bf16.msra.mxu1 %v4383_v19  ;;  %v2047_v41 = vsel %vm1996_vm6, %v1961_v28, %v2046_v36  ;;  %v453_v52 = vrot.slane %v452_v37, 2  ;;  %v564_v48 = vadd.f32 %v563_v40, %v562_v30  ;;  %v787_v49 = vrot.slane %v786_v38, 4  ;;  %3581 = vmatprep.subr.bf16.mxu0 %v4418_v50 }
  0xb0   :  { %3562 = vmatprep.subr.bf16.mxu1 %v4391_v62  ;;  %v2048_v47 = vsel %vm1998_vm7, %v1977_v35, %v2047_v41  ;;  %v342_v51 = vadd.f32 %v341_v42, %v340_v32  ;;  %v676_v3 = vadd.f32 %v675_v43, %v674_v33  ;;  %v898_v9 = vsel %vm309_vm0, %v5117_v44, 0.0  ;;  %v4403_v44 = vld [vmem:[%s6279_s1 + $0x3a4] ss:$8 sps:$4 sm:$0xff]  }
  0xb1   :  { %v2112_v5 = vpack.c.b16 %v2048_v47, %v2048_v47  ;;  %v454_v7 = vadd.f32 %v453_v52, %v452_v37  ;;  %v565_v57 = vrot.slane %v564_v48, 2  ;;  %v788_v4 = vadd.f32 %v787_v49, %v786_v38  ;;  %v4407_v37 = vld [vmem:[%s6279_s1 + $0x390] ss:$8 sps:$4 sm:$0xff]   ;;  %v4415_v43 = vld [vmem:[%s6279_s1 + $0x384] ss:$8 sps:$4 sm:$0xff]  }
  0xb2   :  { %v899_v54 = vrot.slane %v898_v9, 4  ;;  %v343_v10 = vrot.slane %v342_v51, 1  ;;  %v677_v11 = vrot.slane %v676_v3, 2  ;;  %v1010_v12 = vsel %vm309_vm0, %v5120_v45, 0.0 }
  0xb3   :  { %3563 = vmatpush2.bf16.msra.mxu1 %v4389_v2  ;;  %3572 = vmatprep.mubr.bf16.mxu1 %v2112_v5  ;;  %v1122_v56 = vsel %vm309_vm0, %v5123_v46, 0.0  ;;  %v455_v13 = vrot.slane %v454_v7, 1  ;;  %v566_v63 = vadd.f32 %v565_v57, %v564_v48  ;;  %v789_v14 = vrot.slane %v788_v4, 2  ;;  %v4401_v46 = vld [vmem:[%s6279_s1 + $0x3a0] ss:$8 sps:$4 sm:$0xff]  }
  0xb4   :  { %3564 = vmatprep.subr.bf16.mxu1 %v4397_v39  ;;  %v900_v15 = vadd.f32 %v899_v54, %v898_v9  ;;  %v344_v21 = vadd.f32 %v343_v10, %v342_v51  ;;  %v678_v22 = vadd.f32 %v677_v11, %v676_v3  ;;  %v1011_v16 = vrot.slane %v1010_v12, 4  ;;  %v4413_v57 = vld [vmem:[%s6279_s1 + $0x380] ss:$8 sps:$4 sm:$0xff]  }
  0xb5   :  { %v1123_v26 = vrot.slane %v1122_v56, 4  ;;  %v456_v17 = vadd.f32 %v455_v13, %v454_v7  ;;  %v567_v18 = vrot.slane %v566_v63, 1  ;;  %v790_v19 = vadd.f32 %v789_v14, %v788_v4 }
  0xb6   :  { %v901_v45 = vrot.slane %v900_v15, 2  ;;  %v679_v55 = vrot.slane %v678_v22, 1  ;;  %v1012_v0 = vadd.f32 %v1011_v16, %v1010_v12  ;;  %v1338_v1 = vpack.c.bf16 %v344_v21, %v344_v21 }
  0xb7   :  { %3565 = vmatpush2.bf16.msra.mxu1 %v4395_v8  ;;  %v1124_v27 = vadd.f32 %v1123_v26, %v1122_v56  ;;  %v568_v62 = vadd.f32 %v567_v18, %v566_v63  ;;  %v791_v24 = vrot.slane %v790_v19, 1  ;;  %v1354_v29 = vpack.c.bf16 %v456_v17, %v456_v17 }
  0xb8   :  { %3566 = vmatprep.subr.bf16.mxu1 %v4403_v44  ;;  %v902_v28 = vadd.f32 %v901_v45, %v900_v15  ;;  %v680_v34 = vadd.f32 %v679_v55, %v678_v22  ;;  %v1013_v50 = vrot.slane %v1012_v0, 2  ;;  %v1862_v32 = vunpack.c.l.b16 %v1338_v1 }
  0xb9   :  { %v1125_v31 = vrot.slane %v1124_v27, 2  ;;  %v792_v30 = vadd.f32 %v791_v24, %v790_v19  ;;  %v1370_v35 = vpack.c.bf16 %v568_v62, %v568_v62  ;;  %v1878_v36 = vunpack.c.l.b16 %v1354_v29  ;;  %v4416_v29 = vld [vmem:[%s6279_s1 + $0x470] ss:$8 sps:$4 sm:$0xff]  }
  0xba   :  { %v903_v33 = vrot.slane %v902_v28, 1  ;;  %v1014_v40 = vadd.f32 %v1013_v50, %v1012_v0  ;;  %v1386_v41 = vpack.c.bf16 %v680_v34, %v680_v34  ;;  %v352_v42 = vsel %vm309_vm0, %v5207_v6, 0.0 }
  0xbb   :  { %3567 = vmatpush2.bf16.msra.mxu1 %v4401_v46  ;;  %v1126_v2 = vadd.f32 %v1125_v31, %v1124_v27  ;;  %v1402_v39 = vpack.c.bf16 %v792_v30, %v792_v30  ;;  %v1894_v47 = vunpack.c.l.b16 %v1370_v35  ;;  %v2021_v52 = vsel %vm1986_vm1, %v1878_v36, %v1862_v32 }
  0xbc   :  { %3568 = vmatprep.subr.bf16.mxu1 %v4409_v23  ;;  %v904_v38 = vadd.f32 %v903_v33, %v902_v28  ;;  %v1015_v48 = vrot.slane %v1014_v40, 1  ;;  %v1910_v5 = vunpack.c.l.b16 %v1386_v41  ;;  %v353_v51 = vrot.slane %v352_v42, 4 }
  0xbd   :  { %v1127_v49 = vrot.slane %v1126_v2, 1  ;;  %v1926_v9 = vunpack.c.l.b16 %v1402_v39  ;;  %v2022_v7 = vsel %vm1988_vm2, %v1894_v47, %v2021_v52  ;;  %v464_v6 = vsel %vm309_vm0, %v5220_v59, 0.0  ;;  %v4421_v59 = vld [vmem:[%s6279_s1 + $0x574] ss:$8 sps:$4 sm:$0xff]   ;;  %v4422_v47 = vld [vmem:[%s6279_s1 + $0x460] ss:$8 sps:$4 sm:$0xff]  }
  0xbe   :  { %v1418_v3 = vpack.c.bf16 %v904_v38, %v904_v38  ;;  %v1016_v4 = vadd.f32 %v1015_v48, %v1014_v40  ;;  %v2023_v8 = vsel %vm1990_vm3, %v1910_v5, %v2022_v7  ;;  %v354_v10 = vadd.f32 %v353_v51, %v352_v42  ;;  %v4430_v5 = vld [vmem:[%s6279_s1 + $0x454] ss:$8 sps:$4 sm:$0xff]  }
  0xbf   :  { %3569 = vmatpush2.bf16.msra.mxu1 %v4407_v37  ;;  %v1128_v54 = vadd.f32 %v1127_v49, %v1126_v2  ;;  %v2024_v12 = vsel %vm1992_vm4, %v1926_v9, %v2023_v8  ;;  %v465_v56 = vrot.slane %v464_v6, 4  ;;  %v576_v44 = vsel %vm309_vm0, %v5227_v60, 0.0  ;;  %v5436_v7 = vld [vmem:[%s6280_s0 + $0x10] sm:$0xff] }
  0xc0   :  { %3570 = vmatprep.subr.bf16.mxu1 %v4415_v43  ;;  %v1942_v11 = vunpack.c.l.b16 %v1418_v3  ;;  %v1434_v13 = vpack.c.bf16 %v1016_v4, %v1016_v4  ;;  %v355_v14 = vrot.slane %v354_v10, 2  ;;  %v577_v15 = vrot.slane %v576_v44, 4 }
  0xc1   :  { %v1450_v63 = vpack.c.bf16 %v1128_v54, %v1128_v54  ;;  %v466_v22 = vadd.f32 %v465_v56, %v464_v6  ;;  %v688_v16 = vsel %vm309_vm0, %v5231_v53, 0.0  ;;  %v800_v26 = vsel %vm309_vm0, %v5234_v58, 0.0  ;;  %v4428_v56 = vld [vmem:[%s6279_s1 + $0x450] ss:$8 sps:$4 sm:$0xff]  }
  0xc2   :  { %v2025_v21 = vsel %vm1994_vm5, %v1942_v11, %v2024_v12  ;;  %v1958_v17 = vunpack.c.l.b16 %v1434_v13  ;;  %v356_v18 = vadd.f32 %v355_v14, %v354_v10  ;;  %v578_v19 = vadd.f32 %v577_v15, %v576_v44  ;;  %v5444_v44 = vld [vmem:[%s6280_s0 + $0x30] sm:$0xff]  ;;  %v4436_v14 = vld [vmem:[%s6279_s1 + $0x444] ss:$8 sps:$4 sm:$0xff]  }
  0xc3   :  { %3571 = vmatpush2.bf16.msra.mxu1 %v4413_v57  ;;  %v1974_v60 = vunpack.c.l.b16 %v1450_v63  ;;  %v467_v45 = vrot.slane %v466_v22, 2  ;;  %v689_v46 = vrot.slane %v688_v16, 4  ;;  %v801_v55 = vrot.slane %v800_v26, 4  ;;  %v5452_v15 = vld [vmem:[%s6280_s0 + $0x50] sm:$0xff] }
  0xc4   :  { %v912_v0 = vsel %vm309_vm0, %v5238_v61, 0.0  ;;  %3622 = vmatprep.subr.bf16.mxu1 %v4421_v59  ;;  %v2026_v27 = vsel %vm1996_vm6, %v1958_v17, %v2025_v21  ;;  %v357_v1 = vrot.slane %v356_v18, 1  ;;  %v579_v23 = vrot.slane %v578_v19, 2  ;;  %v4424_v61 = vld [vmem:[%s6279_s1 + $0x464] ss:$8 sps:$4 sm:$0xff]  }
  0xc5   :  { %v913_v53 = vrot.slane %v912_v0, 4  ;;  %v2027_v62 = vsel %vm1998_vm7, %v1974_v60, %v2026_v27  ;;  %v468_v58 = vadd.f32 %v467_v45, %v466_v22  ;;  %v690_v24 = vadd.f32 %v689_v46, %v688_v16  ;;  %v5461_v60 = vld [vmem:[%s6280_s0 + $0x70] sm:$0xff] }
  0xc6   :  { %v802_v28 = vadd.f32 %v801_v55, %v800_v26  ;;  %v2109_v34 = vpack.c.b16 %v2027_v62, %v2027_v62  ;;  %v358_v50 = vadd.f32 %v357_v1, %v356_v18  ;;  %v580_v31 = vadd.f32 %v579_v23, %v578_v19  ;;  %v5466_v18 = vld [vmem:[%s6280_s0 + $0x90] sm:$0xff]  ;;  %v4434_v62 = vld [vmem:[%s6279_s1 + $0x440] ss:$8 sps:$4 sm:$0xff]  }
  0xc7   :  { %v914_v32 = vadd.f32 %v913_v53, %v912_v0  ;;  %v469_v30 = vrot.slane %v468_v58, 1  ;;  %v691_v33 = vrot.slane %v690_v24, 2  ;;  %v1024_v36 = vsel %vm309_vm0, %v5241_v20, 0.0  ;;  %v5472_v55 = vld [vmem:[%s6280_s0 + $0xb0] sm:$0xff] }
  0xc8   :  { %v803_v35 = vrot.slane %v802_v28, 2  ;;  %3532 = vmatmul.mubr.bf16.vlgmr.msra.gmra.mxu0 %v2109_v34  ;;  %v581_v37 = vrot.slane %v580_v31, 1  ;;  %v1025_v2 = vrot.slane %v1024_v36, 4  ;;  %v1136_v41 = vsel %vm309_vm0, %v5254_v25, 0.0  ;;  %v5477_v0 = vld [vmem:[%s6280_s0 + $0xd0] sm:$0xff] }
  0xc9   :  { %v915_v40 = vrot.slane %v914_v32, 2  ;;  %v470_v42 = vadd.f32 %v469_v30, %v468_v58  ;;  %v692_v43 = vadd.f32 %v691_v33, %v690_v24  ;;  %v1137_v39 = vrot.slane %v1136_v41, 4  ;;  %3582 = vmatpush1.bf16.msra.mxu0 %v4416_v29  ;;  %v5488_v58 = vld [vmem:[%s6280_s0 + $0xf0] sm:$0xff] }
  0xca   :  { %v804_v38 = vadd.f32 %v803_v35, %v802_v28  ;;  %v582_v52 = vadd.f32 %v581_v37, %v580_v31  ;;  %v1026_v49 = vadd.f32 %v1025_v2, %v1024_v36  ;;  %v1340_v20 = vpack.c.bf16 %v358_v50, %v358_v50  ;;  %3583 = vmatprep.subr.bf16.mxu0 %v4424_v61  ;;  %v4442_v34 = vld [vmem:[%s6279_s1 + $0x434] ss:$8 sps:$4 sm:$0xff]  }
  0xcb   :  { %v916_v48 = vadd.f32 %v915_v40, %v914_v32  ;;  %v693_v51 = vrot.slane %v692_v43, 1  ;;  %v1138_v3 = vadd.f32 %v1137_v39, %v1136_v41  ;;  %v1356_v9 = vpack.c.bf16 %v470_v42, %v470_v42  ;;  %v4440_v42 = vld [vmem:[%s6279_s1 + $0x430] ss:$8 sps:$4 sm:$0xff]  }
  0xcc   :  { %v805_v25 = vrot.slane %v804_v38, 1  ;;  %v1027_v57 = vrot.slane %v1026_v49, 2  ;;  %v1372_v4 = vpack.c.bf16 %v582_v52, %v582_v52  ;;  %v1864_v54 = vunpack.c.l.b16 %v1340_v20 }
  0xcd   :  { %v917_v6 = vrot.slane %v916_v48, 1  ;;  %v694_v8 = vadd.f32 %v693_v51, %v692_v43  ;;  %v1139_v11 = vrot.slane %v1138_v3, 2  ;;  %v1880_v12 = vunpack.c.l.b16 %v1356_v9  ;;  %3584 = vmatpush1.bf16.msra.mxu0 %v4422_v47  ;;  %v4448_v47 = vld [vmem:[%s6279_s1 + $0x424] ss:$8 sps:$4 sm:$0xff]   ;;  %v4419_v9 = vld [vmem:[%s6279_s1 + $0x570] ss:$8 sps:$4 sm:$0xff]  }
  0xce   :  { %v806_v10 = vadd.f32 %v805_v25, %v804_v38  ;;  %v1028_v13 = vadd.f32 %v1027_v57, %v1026_v49  ;;  %v1896_v63 = vunpack.c.l.b16 %v1372_v4  ;;  %3585 = vmatprep.subr.bf16.mxu0 %v4430_v5  ;;  %v5455_v21 = vunpack.c.l.bf16 %v5436_v7 }
  0xcf   :  { %v918_v59 = vadd.f32 %v917_v6, %v916_v48  ;;  %v1140_v22 = vadd.f32 %v1139_v11, %v1138_v3  ;;  %v1388_v16 = vpack.c.bf16 %v694_v8, %v694_v8  ;;  %v2035_v17 = vsel %vm1986_vm1, %v1880_v12, %v1864_v54  ;;  %v4446_v8 = vld [vmem:[%s6279_s1 + $0x420] ss:$8 sps:$4 sm:$0xff]  }
  0xd0   :  { %v1404_v26 = vpack.c.bf16 %v806_v10, %v806_v10  ;;  %v1029_v19 = vrot.slane %v1028_v13, 1  ;;  %v2036_v46 = vsel %vm1988_vm2, %v1896_v63, %v2035_v17  ;;  %v5480_v27 = vunpack.c.l.bf16 %v5444_v44 }
  0xd1   :  { %v1420_v45 = vpack.c.bf16 %v918_v59, %v918_v59  ;;  %v1141_v1 = vrot.slane %v1140_v22, 1  ;;  %v1912_v23 = vunpack.c.l.b16 %v1388_v16  ;;  %3586 = vmatpush1.bf16.msra.mxu0 %v4428_v56  ;;  %v5491_v24 = vunpack.c.l.bf16 %v5452_v15  ;;  %v4427_v59 = vld [vmem:[%s6279_s1 + $0x564] ss:$8 sps:$4 sm:$0xff]  }
  0xd2   :  { %v1928_v53 = vunpack.c.l.b16 %v1404_v26  ;;  %v1030_v28 = vadd.f32 %v1029_v19, %v1028_v13  ;;  %3587 = vmatprep.subr.bf16.mxu0 %v4436_v14  ;;  %v5497_v50 = vunpack.c.l.bf16 %v5461_v60  ;;  %v5500_v31 = vunpack.c.l.bf16 %v5466_v18  ;;  %v4454_v13 = vld [vmem:[%s6279_s1 + $0x414] ss:$8 sps:$4 sm:$0xff]  }
  0xd3   :  { %v1944_v29 = vunpack.c.l.b16 %v1420_v45  ;;  %v1142_v32 = vadd.f32 %v1141_v1, %v1140_v22  ;;  %v2037_v61 = vsel %vm1990_vm3, %v1912_v23, %v2036_v46  ;;  %v5504_v30 = vunpack.c.l.bf16 %v5472_v55  ;;  %v4425_v45 = vld [vmem:[%s6279_s1 + $0x560] ss:$8 sps:$4 sm:$0xff]  }
  0xd4   :  { %v5507_v33 = vunpack.c.l.bf16 %v5477_v0  ;;  %v1436_v35 = vpack.c.bf16 %v1030_v28, %v1030_v28  ;;  %v2038_v36 = vsel %vm1992_vm4, %v1928_v53, %v2037_v61  ;;  %v5511_v37 = vunpack.c.l.bf16 %v5488_v58  ;;  %v4433_v61 = vld [vmem:[%s6279_s1 + $0x554] ss:$8 sps:$4 sm:$0xff]  }
  0xd5   :  { %v185_v40 = vcombine.high %v5455_v21, %v5455_v21  ;;  %v1452_v2 = vpack.c.bf16 %v1142_v32, %v1142_v32  ;;  %v2039_v41 = vsel %vm1994_vm5, %v1944_v29, %v2038_v36  ;;  %3588 = vmatpush1.bf16.msra.mxu0 %v4434_v62  ;;  %v193_v43 = vcombine.high %v5480_v27, %v5480_v27  ;;  %v4452_v62 = vld [vmem:[%s6279_s1 + $0x410] ss:$8 sps:$4 sm:$0xff]  }
  0xd6   :  { %v201_v38 = vcombine.high %v5491_v24, %v5491_v24  ;;  %v1960_v39 = vunpack.c.l.b16 %v1436_v35  ;;  %3589 = vmatprep.subr.bf16.mxu0 %v4442_v34  ;;  %v209_v52 = vcombine.high %v5497_v50, %v5497_v50  ;;  %v217_v48 = vcombine.high %v5500_v31, %v5500_v31  ;;  %v4460_v35 = vld [vmem:[%s6279_s1 + $0x404] ss:$8 sps:$4 sm:$0xff]  }
  0xd7   :  { %v225_v49 = vcombine.high %v5504_v30, %v5504_v30  ;;  %v1976_v20 = vunpack.c.l.b16 %v1452_v2  ;;  %v233_v5 = vcombine.high %v5507_v33, %v5507_v33  ;;  %v241_v51 = vcombine.high %v5511_v37, %v5511_v37 }
  0xd8   :  { %v373_v25 = vsel %vm309_vm0, %v185_v40, 0.0  ;;  %v2040_v3 = vsel %vm1996_vm6, %v1960_v39, %v2039_v41  ;;  %v485_v57 = vsel %vm309_vm0, %v193_v43, 0.0  ;;  %v597_v4 = vsel %vm309_vm0, %v201_v38, 0.0 }
  0xd9   :  { %v374_v6 = vrot.slane %v373_v25, 4  ;;  %v2041_v54 = vsel %vm1998_vm7, %v1976_v20, %v2040_v3  ;;  %3590 = vmatpush1.bf16.msra.mxu0 %v4440_v42  ;;  %v486_v10 = vrot.slane %v485_v57, 4  ;;  %v598_v11 = vrot.slane %v597_v4, 4 }
  0xda   :  { %v709_v12 = vsel %vm309_vm0, %v209_v52, 0.0  ;;  %v2111_v56 = vpack.c.b16 %v2041_v54, %v2041_v54  ;;  %3591 = vmatprep.subr.bf16.mxu0 %v4448_v47  ;;  %v821_v22 = vsel %vm309_vm0, %v217_v48, 0.0  ;;  %v933_v19 = vsel %vm309_vm0, %v225_v49, 0.0  ;;  %v4431_v47 = vld [vmem:[%s6279_s1 + $0x550] ss:$8 sps:$4 sm:$0xff]  }
  0xdb   :  { %v375_v63 = vadd.f32 %v374_v6, %v373_v25  ;;  %v710_v14 = vrot.slane %v709_v12, 4  ;;  %v487_v16 = vadd.f32 %v486_v10, %v485_v57  ;;  %v599_v26 = vadd.f32 %v598_v11, %v597_v4  ;;  %v4439_v6 = vld [vmem:[%s6279_s1 + $0x544] ss:$8 sps:$4 sm:$0xff]   ;;  %v4466_v57 = vld [vmem:[%s6279_s1 + $0x4f4] ss:$8 sps:$4 sm:$0xff]  }
  0xdc   :  { %v822_v17 = vrot.slane %v821_v22, 4  ;;  %3573 = vmatmul.mubr.bf16.vlgmr.msra.gmra.mxu1 %v2111_v56  ;;  %v934_v23 = vrot.slane %v933_v19, 4  ;;  %v1045_v53 = vsel %vm309_vm0, %v233_v5, 0.0  ;;  %v1157_v41 = vsel %vm309_vm0, %v241_v51, 0.0  ;;  %v4458_v5 = vld [vmem:[%s6279_s1 + $0x400] ss:$8 sps:$4 sm:$0xff]  }
  0xdd   :  { %v376_v46 = vrot.slane %v375_v63, 2  ;;  %v711_v1 = vadd.f32 %v710_v14, %v709_v12  ;;  %3623 = vmatpush1.bf16.msra.mxu1 %v4419_v9  ;;  %3592 = vmatpush1.bf16.msra.mxu0 %v4446_v8  ;;  %v488_v28 = vrot.slane %v487_v16, 2  ;;  %v600_v29 = vrot.slane %v599_v26, 2 }
  0xde   :  { %v823_v34 = vadd.f32 %v822_v17, %v821_v22  ;;  %v1046_v32 = vrot.slane %v1045_v53, 4  ;;  %3624 = vmatprep.subr.bf16.mxu1 %v4427_v59  ;;  %3593 = vmatprep.subr.bf16.mxu0 %v4454_v13  ;;  %v935_v2 = vadd.f32 %v934_v23, %v933_v19  ;;  %v1158_v20 = vrot.slane %v1157_v41, 4  ;;  %v4472_v23 = vld [vmem:[%s6279_s1 + $0x4e4] ss:$8 sps:$4 sm:$0xff]  }
  0xdf   :  { %v377_v36 = vadd.f32 %v376_v46, %v375_v63  ;;  %v712_v40 = vrot.slane %v711_v1, 2  ;;  %v489_v42 = vadd.f32 %v488_v28, %v487_v16  ;;  %v601_v43 = vadd.f32 %v600_v29, %v599_v26  ;;  %v4437_v16 = vld [vmem:[%s6279_s1 + $0x540] ss:$8 sps:$4 sm:$0xff]   ;;  %v4464_v26 = vld [vmem:[%s6279_s1 + $0x4f0] ss:$8 sps:$4 sm:$0xff]  }
  0xe0   :  { %v824_v38 = vrot.slane %v823_v34, 2  ;;  %v1047_v39 = vadd.f32 %v1046_v32, %v1045_v53  ;;  %v936_v49 = vrot.slane %v935_v2, 2  ;;  %v1159_v10 = vadd.f32 %v1158_v20, %v1157_v41 }
  0xe1   :  { %v378_v52 = vrot.slane %v377_v36, 1  ;;  %v713_v48 = vadd.f32 %v712_v40, %v711_v1  ;;  %3625 = vmatpush1.bf16.msra.mxu1 %v4425_v45  ;;  %3594 = vmatpush1.bf16.msra.mxu0 %v4452_v62  ;;  %v490_v25 = vrot.slane %v489_v42, 1  ;;  %v602_v51 = vrot.slane %v601_v43, 1  ;;  %v4445_v1 = vld [vmem:[%s6279_s1 + $0x534] ss:$8 sps:$4 sm:$0xff]  }
  0xe2   :  { %v825_v3 = vadd.f32 %v824_v38, %v823_v34  ;;  %v1048_v9 = vrot.slane %v1047_v39, 2  ;;  %3626 = vmatprep.subr.bf16.mxu1 %v4433_v61  ;;  %3595 = vmatprep.subr.bf16.mxu0 %v4460_v35  ;;  %v937_v8 = vadd.f32 %v936_v49, %v935_v2  ;;  %v1160_v14 = vrot.slane %v1159_v10, 2 }
  0xe3   :  { %v379_v4 = vadd.f32 %v378_v52, %v377_v36  ;;  %v714_v54 = vrot.slane %v713_v48, 1  ;;  %v491_v11 = vadd.f32 %v490_v25, %v489_v42  ;;  %v603_v12 = vadd.f32 %v602_v51, %v601_v43  ;;  %v4443_v42 = vld [vmem:[%s6279_s1 + $0x530] ss:$8 sps:$4 sm:$0xff]   ;;  %v4470_v43 = vld [vmem:[%s6279_s1 + $0x4e0] ss:$8 sps:$4 sm:$0xff]  }
  0xe4   :  { %v826_v56 = vrot.slane %v825_v3, 1  ;;  %v1049_v59 = vadd.f32 %v1048_v9, %v1047_v39  ;;  %v938_v63 = vrot.slane %v937_v8, 1  ;;  %v1161_v62 = vadd.f32 %v1160_v14, %v1159_v10  ;;  %v4457_v10 = vld [vmem:[%s6279_s1 + $0x514] ss:$8 sps:$4 sm:$0xff]  }
  0xe5   :  { %v715_v13 = vadd.f32 %v714_v54, %v713_v48  ;;  %v1343_v22 = vpack.c.bf16 %v379_v4, %v379_v4  ;;  %3627 = vmatpush1.bf16.msra.mxu1 %v4431_v47  ;;  %3596 = vmatpush1.bf16.msra.mxu0 %v4458_v5  ;;  %v1359_v45 = vpack.c.bf16 %v491_v11, %v491_v11  ;;  %v5595_v41 = vunpack.c.h.bf16 %v5436_v7  ;;  %v4451_v7 = vld [vmem:[%s6279_s1 + $0x524] ss:$8 sps:$4 sm:$0xff]   ;;  %v4478_v48 = vld [vmem:[%s6279_s1 + $0x4d4] ss:$8 sps:$4 sm:$0xff]  }
  0xe6   :  { %v827_v17 = vadd.f32 %v826_v56, %v825_v3  ;;  %v1050_v19 = vrot.slane %v1049_v59, 1  ;;  %v1375_v46 = vpack.c.bf16 %v603_v12, %v603_v12  ;;  %3628 = vmatprep.subr.bf16.mxu1 %v4439_v6  ;;  %3597 = vmatprep.subr.bf16.mxu0 %v4466_v57  ;;  %v939_v53 = vadd.f32 %v938_v63, %v937_v8  ;;  %v4484_v11 = vld [vmem:[%s6279_s1 + $0x4c4] ss:$8 sps:$4 sm:$0xff]  }
  0xe7   :  { %v1391_v28 = vpack.c.bf16 %v715_v13, %v715_v13  ;;  %v1867_v29 = vunpack.c.l.b16 %v1343_v22  ;;  %v1883_v61 = vunpack.c.l.b16 %v1359_v45  ;;  %v1162_v36 = vrot.slane %v1161_v62, 1  ;;  %v4455_v13 = vld [vmem:[%s6279_s1 + $0x510] ss:$8 sps:$4 sm:$0xff]  }
  0xe8   :  { %v1051_v34 = vadd.f32 %v1050_v19, %v1049_v59  ;;  %v1407_v32 = vpack.c.bf16 %v827_v17, %v827_v17  ;;  %v1899_v35 = vunpack.c.l.b16 %v1375_v46  ;;  %v1423_v40 = vpack.c.bf16 %v939_v53, %v939_v53 }
  0xe9   :  { %v1915_v2 = vunpack.c.l.b16 %v1391_v28  ;;  %3629 = vmatpush1.bf16.msra.mxu1 %v4437_v16  ;;  %3598 = vmatpush2.bf16.msra.mxu0 %v4464_v26  ;;  %v2056_v47 = vsel %vm1986_vm1, %v1883_v61, %v1867_v29  ;;  %v5605_v52 = vunpack.c.h.bf16 %v5444_v44  ;;  %v1163_v49 = vadd.f32 %v1162_v36, %v1161_v62  ;;  %v4463_v26 = vld [vmem:[%s6279_s1 + $0x504] ss:$8 sps:$4 sm:$0xff]   ;;  %v4490_v29 = vld [vmem:[%s6279_s1 + $0x4b4] ss:$8 sps:$4 sm:$0xff]  }
  0xea   :  { %v1439_v38 = vpack.c.bf16 %v1051_v34, %v1051_v34  ;;  %v1931_v39 = vunpack.c.l.b16 %v1407_v32  ;;  %3630 = vmatprep.subr.bf16.mxu1 %v4445_v1  ;;  %3599 = vmatprep.subr.bf16.mxu0 %v4472_v23  ;;  %v1947_v20 = vunpack.c.l.b16 %v1423_v40  ;;  %v2057_v5 = vsel %vm1988_vm2, %v1899_v35, %v2056_v47  ;;  %v4482_v1 = vld [vmem:[%s6279_s1 + $0x4c0] ss:$8 sps:$4 sm:$0xff]  }
  0xeb   :  { %v5615_v25 = vunpack.c.h.bf16 %v5452_v15  ;;  %v2058_v44 = vsel %vm1990_vm3, %v1915_v2, %v2057_v5  ;;  %v5619_v3 = vunpack.c.h.bf16 %v5461_v60  ;;  %v5622_v9 = vunpack.c.h.bf16 %v5466_v18  ;;  %v4449_v15 = vld [vmem:[%s6279_s1 + $0x520] ss:$8 sps:$4 sm:$0xff]   ;;  %v4476_v60 = vld [vmem:[%s6279_s1 + $0x4d0] ss:$8 sps:$4 sm:$0xff]  }
  0xec   :  { %v1963_v51 = vunpack.c.l.b16 %v1439_v38  ;;  %v1455_v6 = vpack.c.bf16 %v1163_v49, %v1163_v49  ;;  %v2059_v57 = vsel %vm1992_vm4, %v1931_v39, %v2058_v44  ;;  %v5626_v4 = vunpack.c.h.bf16 %v5472_v55  ;;  %v4469_v44 = vld [vmem:[%s6279_s1 + $0x5f4] ss:$8 sps:$4 sm:$0xff]  }
  0xed   :  { %v5629_v54 = vunpack.c.h.bf16 %v5477_v0  ;;  %3631 = vmatpush1.bf16.msra.mxu1 %v4443_v42  ;;  %3600 = vmatpush2.bf16.msra.mxu0 %v4470_v43  ;;  %v2060_v18 = vsel %vm1994_vm5, %v1947_v20, %v2059_v57  ;;  %v5639_v8 = vunpack.c.h.bf16 %v5488_v58  ;;  %v186_v55 = vcombine.high %v5595_v41, %v5595_v41  ;;  %v4461_v43 = vld [vmem:[%s6279_s1 + $0x500] ss:$8 sps:$4 sm:$0xff]  }
  0xee   :  { %v194_v0 = vcombine.high %v5605_v52, %v5605_v52  ;;  %3632 = vmatprep.subr.bf16.mxu1 %v4451_v7  ;;  %3601 = vmatprep.subr.bf16.mxu0 %v4478_v48  ;;  %v1979_v12 = vunpack.c.l.b16 %v1455_v6  ;;  %v2061_v58 = vsel %vm1996_vm6, %v1963_v51, %v2060_v18  ;;  %v202_v56 = vcombine.high %v5615_v25, %v5615_v25  ;;  %v4488_v48 = vld [vmem:[%s6279_s1 + $0x4b0] ss:$8 sps:$4 sm:$0xff]   ;;  %v4496_v6 = vld [vmem:[%s6279_s1 + $0x4a4] ss:$8 sps:$4 sm:$0xff]  }
  0xef   :  { %v210_v59 = vcombine.high %v5619_v3, %v5619_v3  ;;  %v218_v63 = vcombine.high %v5622_v9, %v5622_v9  ;;  %v226_v14 = vcombine.high %v5626_v4, %v5626_v4  ;;  %v234_v22 = vcombine.high %v5629_v54, %v5629_v54 }
  0xf0   :  { %v242_v16 = vcombine.high %v5639_v8, %v5639_v8  ;;  %v2062_v17 = vsel %vm1998_vm7, %v1979_v12, %v2061_v58  ;;  %v387_v19 = vsel %vm309_vm0, %v186_v55, 0.0  ;;  %v499_v45 = vsel %vm309_vm0, %v194_v0, 0.0  ;;  %v4467_v12 = vld [vmem:[%s6279_s1 + $0x5f0] ss:$8 sps:$4 sm:$0xff]  }
  0xf1   :  { %v611_v46 = vsel %vm309_vm0, %v202_v56, 0.0  ;;  %3633 = vmatpush1.bf16.msra.mxu1 %v4449_v15  ;;  %3602 = vmatpush2.bf16.msra.mxu0 %v4476_v60  ;;  %v2114_v23 = vpack.c.b16 %v2062_v17, %v2062_v17  ;;  %v388_v53 = vrot.slane %v387_v19, 4  ;;  %v500_v62 = vrot.slane %v499_v45, 4  ;;  %v4475_v17 = vld [vmem:[%s6279_s1 + $0x5e4] ss:$8 sps:$4 sm:$0xff]  }
  0xf2   :  { %v612_v28 = vrot.slane %v611_v46, 4  ;;  %3634 = vmatprep.subr.bf16.mxu1 %v4457_v10  ;;  %3603 = vmatprep.subr.bf16.mxu0 %v4484_v11  ;;  %v723_v34 = vsel %vm309_vm0, %v210_v59, 0.0  ;;  %v835_v32 = vsel %vm309_vm0, %v218_v63, 0.0  ;;  %v947_v61 = vsel %vm309_vm0, %v226_v14, 0.0  ;;  %v4494_v63 = vld [vmem:[%s6279_s1 + $0x4a0] ss:$8 sps:$4 sm:$0xff]  }
  0xf3   :  { %v1059_v35 = vsel %vm309_vm0, %v234_v22, 0.0  ;;  %3613 = vmatprep.mubr.bf16.mxu0 %v2114_v23  ;;  %v389_v36 = vadd.f32 %v388_v53, %v387_v19  ;;  %v501_v40 = vadd.f32 %v500_v62, %v499_v45  ;;  %v724_v42 = vrot.slane %v723_v34, 4  ;;  %v4502_v19 = vld [vmem:[%s6279_s1 + $0x494] ss:$8 sps:$4 sm:$0xff]  }
  0xf4   :  { %v613_v2 = vadd.f32 %v612_v28, %v611_v46  ;;  %v836_v38 = vrot.slane %v835_v32, 4  ;;  %v948_v39 = vrot.slane %v947_v61, 4  ;;  %v1060_v47 = vrot.slane %v1059_v35, 4 }
  0xf5   :  { %v1171_v7 = vsel %vm309_vm0, %v242_v16, 0.0  ;;  %3635 = vmatpush1.bf16.msra.mxu1 %v4455_v13  ;;  %3604 = vmatpush2.bf16.msra.mxu0 %v4482_v1  ;;  %v390_v49 = vrot.slane %v389_v36, 2  ;;  %v502_v20 = vrot.slane %v501_v40, 2  ;;  %v725_v51 = vadd.f32 %v724_v42, %v723_v34 }
  0xf6   :  { %v614_v5 = vrot.slane %v613_v2, 2  ;;  %3636 = vmatprep.subr.bf16.mxu1 %v4463_v26  ;;  %3605 = vmatprep.subr.bf16.mxu0 %v4490_v29  ;;  %v837_v57 = vadd.f32 %v836_v38, %v835_v32  ;;  %v949_v15 = vadd.f32 %v948_v39, %v947_v61  ;;  %v1061_v60 = vadd.f32 %v1060_v47, %v1059_v35  ;;  %v4481_v39 = vld [vmem:[%s6279_s1 + $0x5d4] ss:$8 sps:$4 sm:$0xff]   ;;  %v4508_v47 = vld [vmem:[%s6279_s1 + $0x484] ss:$8 sps:$4 sm:$0xff]  }
  0xf7   :  { %v1172_v18 = vrot.slane %v1171_v7, 4  ;;  %v391_v55 = vadd.f32 %v390_v49, %v389_v36  ;;  %v503_v0 = vadd.f32 %v502_v20, %v501_v40  ;;  %v726_v11 = vrot.slane %v725_v51, 2  ;;  %v4473_v36 = vld [vmem:[%s6279_s1 + $0x5e0] ss:$8 sps:$4 sm:$0xff]   ;;  %v4500_v40 = vld [vmem:[%s6279_s1 + $0x490] ss:$8 sps:$4 sm:$0xff]  }
  0xf8   :  { %v615_v10 = vadd.f32 %v614_v5, %v613_v2  ;;  %v838_v58 = vrot.slane %v837_v57, 2  ;;  %v950_v56 = vrot.slane %v949_v15, 2  ;;  %v1062_v59 = vrot.slane %v1061_v60, 2 }
  0xf9   :  { %v1173_v13 = vadd.f32 %v1172_v18, %v1171_v7  ;;  %3637 = vmatpush1.bf16.msra.mxu1 %v4461_v43  ;;  %3606 = vmatpush2.bf16.msra.mxu0 %v4488_v48  ;;  %v392_v14 = vrot.slane %v391_v55, 1  ;;  %v504_v22 = vrot.slane %v503_v0, 1  ;;  %v727_v26 = vadd.f32 %v726_v11, %v725_v51  ;;  %v4479_v18 = vld [vmem:[%s6279_s1 + $0x5d0] ss:$8 sps:$4 sm:$0xff]  }
  0xfa   :  { %v616_v16 = vrot.slane %v615_v10, 1  ;;  %3638 = vmatprep.subr.bf16.mxu1 %v4469_v44  ;;  %3607 = vmatprep.subr.bf16.mxu0 %v4496_v6  ;;  %v839_v45 = vadd.f32 %v838_v58, %v837_v57  ;;  %v951_v46 = vadd.f32 %v950_v56, %v949_v15  ;;  %v1063_v1 = vadd.f32 %v1062_v59, %v1061_v60  ;;  %v4487_v58 = vld [vmem:[%s6279_s1 + $0x5c4] ss:$8 sps:$4 sm:$0xff]  }
  0xfb   :  { %v1174_v23 = vrot.slane %v1173_v13, 2  ;;  %v393_v53 = vadd.f32 %v392_v14, %v391_v55  ;;  %v505_v62 = vadd.f32 %v504_v22, %v503_v0  ;;  %v728_v29 = vrot.slane %v727_v26, 1  ;;  %v4506_v55 = vld [vmem:[%s6279_s1 + $0x480] ss:$8 sps:$4 sm:$0xff]   ;;  %v4514_v14 = vld [vmem:[%s6279_s1 + $0x674] ss:$8 sps:$4 sm:$0xff]  }
  0xfc   :  { %v617_v28 = vadd.f32 %v616_v16, %v615_v10  ;;  %v840_v34 = vrot.slane %v839_v45, 1  ;;  %v952_v32 = vrot.slane %v951_v46, 1  ;;  %v1064_v61 = vrot.slane %v1063_v1, 1 }
  0xfd   :  { %v1175_v35 = vadd.f32 %v1174_v23, %v1173_v13  ;;  %3639 = vmatpush2.bf16.msra.mxu1 %v4467_v12  ;;  %3608 = vmatpush2.bf16.msra.mxu0 %v4494_v63  ;;  %v729_v2 = vadd.f32 %v728_v29, %v727_v26  ;;  %v1345_v42 = vpack.c.bf16 %v393_v53, %v393_v53  ;;  %v366_v38 = vsel %vm309_vm0, %v5455_v21, 0.0  ;;  %v4485_v23 = vld [vmem:[%s6279_s1 + $0x5c0] ss:$8 sps:$4 sm:$0xff]  }
  0xfe   :  { %v1361_v43 = vpack.c.bf16 %v505_v62, %v505_v62  ;;  %3640 = vmatprep.subr.bf16.mxu1 %v4475_v17  ;;  %3609 = vmatprep.subr.bf16.mxu0 %v4502_v19  ;;  %v841_v7 = vadd.f32 %v840_v34, %v839_v45  ;;  %v953_v48 = vadd.f32 %v952_v32, %v951_v46  ;;  %v367_v12 = vrot.slane %v366_v38, 4 }
  0xff   :  { %v1065_v49 = vadd.f32 %v1064_v61, %v1063_v1  ;;  %v1176_v20 = vrot.slane %v1175_v35, 1  ;;  %v1377_v5 = vpack.c.bf16 %v617_v28, %v617_v28  ;;  %v1393_v51 = vpack.c.bf16 %v729_v2, %v729_v2  ;;  %v4493_v28 = vld [vmem:[%s6279_s1 + $0x5b4] ss:$8 sps:$4 sm:$0xff]  }
 0x100   :  { %v1869_v44 = vunpack.c.l.b16 %v1345_v42  ;;  %v1885_v6 = vunpack.c.l.b16 %v1361_v43  ;;  %v1409_v21 = vpack.c.bf16 %v841_v7, %v841_v7  ;;  %v1425_v15 = vpack.c.bf16 %v953_v48, %v953_v48 }
 0x101   :  { %v1177_v57 = vadd.f32 %v1176_v20, %v1175_v35  ;;  %v1441_v60 = vpack.c.bf16 %v1065_v49, %v1065_v49  ;;  %3641 = vmatpush2.bf16.msra.mxu1 %v4473_v36  ;;  %3610 = vmatpush2.bf16.msra.mxu0 %v4500_v40  ;;  %v1901_v0 = vunpack.c.l.b16 %v1377_v5  ;;  %v1917_v10 = vunpack.c.l.b16 %v1393_v51  ;;  %v4499_v49 = vld [vmem:[%s6279_s1 + $0x5a4] ss:$8 sps:$4 sm:$0xff]  }
 0x102   :  { %v2070_v11 = vsel %vm1986_vm1, %v1885_v6, %v1869_v44  ;;  %3642 = vmatprep.subr.bf16.mxu1 %v4481_v39  ;;  %3611 = vmatprep.subr.bf16.mxu0 %v4508_v47  ;;  %v1933_v59 = vunpack.c.l.b16 %v1409_v21  ;;  %v1949_v13 = vunpack.c.l.b16 %v1425_v15  ;;  %v368_v16 = vadd.f32 %v367_v12, %v366_v38  ;;  %v4491_v38 = vld [vmem:[%s6279_s1 + $0x5b0] ss:$8 sps:$4 sm:$0xff]  }
 0x103   :  { %v1457_v56 = vpack.c.bf16 %v1177_v57, %v1177_v57  ;;  %v1965_v63 = vunpack.c.l.b16 %v1441_v60  ;;  %v2071_v22 = vsel %vm1988_vm2, %v1901_v0, %v2070_v11  ;;  %v478_v26 = vsel %vm309_vm0, %v5480_v27, 0.0  ;;  %v4497_v0 = vld [vmem:[%s6279_s1 + $0x5a0] ss:$8 sps:$4 sm:$0xff]  }
 0x104   :  { %v590_v17 = vsel %vm309_vm0, %v5491_v24, 0.0  ;;  %v2072_v45 = vsel %vm1990_vm3, %v1917_v10, %v2071_v22  ;;  %v479_v46 = vrot.slane %v478_v26, 4  ;;  %v369_v62 = vrot.slane %v368_v16, 2 }
 0x105   :  { %v1981_v19 = vunpack.c.l.b16 %v1457_v56  ;;  %v591_v1 = vrot.slane %v590_v17, 4  ;;  %3643 = vmatpush2.bf16.msra.mxu1 %v4479_v18  ;;  %3612 = vmatpush2.bf16.msra.mxu0 %v4506_v55  ;;  %v2073_v53 = vsel %vm1992_vm4, %v1933_v59, %v2072_v45  ;;  %v702_v27 = vsel %vm309_vm0, %v5497_v50, 0.0 }
 0x106   :  { %v814_v24 = vsel %vm309_vm0, %v5500_v31, 0.0  ;;  %3644 = vmatprep.subr.bf16.mxu1 %v4487_v58  ;;  %v2074_v29 = vsel %vm1994_vm5, %v1949_v13, %v2073_v53  ;;  %v480_v34 = vadd.f32 %v479_v46, %v478_v26  ;;  %v703_v61 = vrot.slane %v702_v27, 4  ;;  %3663 = vmatprep.subr.bf16.mxu0 %v4514_v14  ;;  %v4505_v58 = vld [vmem:[%s6279_s1 + $0x594] ss:$8 sps:$4 sm:$0xff]   ;;  %v4503_v46 = vld [vmem:[%s6279_s1 + $0x590] ss:$8 sps:$4 sm:$0xff]  }
 0x107   :  { %v592_v32 = vadd.f32 %v591_v1, %v590_v17  ;;  %v2075_v35 = vsel %vm1996_vm6, %v1965_v63, %v2074_v29  ;;  %v370_v36 = vadd.f32 %v369_v62, %v368_v16  ;;  %v815_v40 = vrot.slane %v814_v24, 4 }
 0x108   :  { %v926_v50 = vsel %vm309_vm0, %v5504_v30, 0.0  ;;  %v2076_v31 = vsel %vm1998_vm7, %v1981_v19, %v2075_v35  ;;  %v481_v2 = vrot.slane %v480_v34, 2  ;;  %v704_v43 = vadd.f32 %v703_v61, %v702_v27  ;;  %v4511_v27 = vld [vmem:[%s6279_s1 + $0x584] ss:$8 sps:$4 sm:$0xff]  }
 0x109   :  { %v593_v42 = vrot.slane %v592_v32, 2  ;;  %3645 = vmatpush2.bf16.msra.mxu1 %v4485_v23  ;;  %v2116_v39 = vpack.c.b16 %v2076_v31, %v2076_v31  ;;  %v371_v47 = vrot.slane %v370_v36, 1  ;;  %v816_v7 = vadd.f32 %v815_v40, %v814_v24 }
 0x10a   :  { %v927_v48 = vrot.slane %v926_v50, 4  ;;  %3646 = vmatprep.subr.bf16.mxu1 %v4493_v28  ;;  %v482_v30 = vadd.f32 %v481_v2, %v480_v34  ;;  %v705_v5 = vrot.slane %v704_v43, 2  ;;  %v1038_v51 = vsel %vm309_vm0, %v5507_v33, 0.0 }
 0x10b   :  { %v594_v20 = vadd.f32 %v593_v42, %v592_v32  ;;  %3654 = vmatprep.mubr.bf16.mxu1 %v2116_v39  ;;  %v372_v44 = vadd.f32 %v371_v47, %v370_v36  ;;  %v817_v6 = vrot.slane %v816_v7, 2  ;;  %v1039_v21 = vrot.slane %v1038_v51, 4  ;;  %v4509_v42 = vld [vmem:[%s6279_s1 + $0x580] ss:$8 sps:$4 sm:$0xff]  }
 0x10c   :  { %v928_v57 = vadd.f32 %v927_v48, %v926_v50  ;;  %v483_v15 = vrot.slane %v482_v30, 1  ;;  %v706_v18 = vadd.f32 %v705_v5, %v704_v43  ;;  %v1150_v55 = vsel %vm309_vm0, %v5511_v37, 0.0 }
 0x10d   :  { %v595_v60 = vrot.slane %v594_v20, 1  ;;  %3647 = vmatpush2.bf16.msra.mxu1 %v4491_v38  ;;  %v818_v10 = vadd.f32 %v817_v6, %v816_v7  ;;  %v1040_v12 = vadd.f32 %v1039_v21, %v1038_v51  ;;  %v1151_v33 = vrot.slane %v1150_v55, 4 }
 0x10e   :  { %v929_v11 = vrot.slane %v928_v57, 2  ;;  %3648 = vmatprep.subr.bf16.mxu1 %v4499_v49  ;;  %v484_v56 = vadd.f32 %v483_v15, %v482_v30  ;;  %v707_v13 = vrot.slane %v706_v18, 1  ;;  %v1342_v63 = vpack.c.bf16 %v372_v44, %v372_v44 }
 0x10f   :  { %v596_v59 = vadd.f32 %v595_v60, %v594_v20  ;;  %v819_v14 = vrot.slane %v818_v10, 1  ;;  %v1041_v22 = vrot.slane %v1040_v12, 2  ;;  %v1152_v16 = vadd.f32 %v1151_v33, %v1150_v55 }
 0x110   :  { %v930_v37 = vadd.f32 %v929_v11, %v928_v57  ;;  %v708_v26 = vadd.f32 %v707_v13, %v706_v18  ;;  %v1358_v17 = vpack.c.bf16 %v484_v56, %v484_v56  ;;  %v1866_v45 = vunpack.c.l.b16 %v1342_v63 }
 0x111   :  { %v1374_v19 = vpack.c.bf16 %v596_v59, %v596_v59  ;;  %3649 = vmatpush2.bf16.msra.mxu1 %v4497_v0  ;;  %v820_v1 = vadd.f32 %v819_v14, %v818_v10  ;;  %v1042_v53 = vadd.f32 %v1041_v22, %v1040_v12  ;;  %v1153_v62 = vrot.slane %v1152_v16, 2 }
 0x112   :  { %v931_v23 = vrot.slane %v930_v37, 1  ;;  %3650 = vmatprep.subr.bf16.mxu1 %v4505_v58  ;;  %v1390_v24 = vpack.c.bf16 %v708_v26, %v708_v26  ;;  %v1882_v28 = vunpack.c.l.b16 %v1358_v17  ;;  %v380_v34 = vsel %vm309_vm0, %v5595_v41, 0.0  ;;  %v4512_v26 = vld [vmem:[%s6279_s1 + $0x670] ss:$8 sps:$4 sm:$0xff]  }
 0x113   :  { %v1898_v29 = vunpack.c.l.b16 %v1374_v19  ;;  %v1043_v61 = vrot.slane %v1042_v53, 1  ;;  %v1154_v35 = vadd.f32 %v1153_v62, %v1152_v16  ;;  %v1406_v36 = vpack.c.bf16 %v820_v1, %v820_v1 }
 0x114   :  { %v932_v32 = vadd.f32 %v931_v23, %v930_v37  ;;  %v1914_v40 = vunpack.c.l.b16 %v1390_v24  ;;  %v2049_v50 = vsel %vm1986_vm1, %v1882_v28, %v1866_v45  ;;  %v381_v31 = vrot.slane %v380_v34, 4 }
 0x115   :  { %v492_v2 = vsel %vm309_vm0, %v5605_v52, 0.0  ;;  %3651 = vmatpush2.bf16.msra.mxu1 %v4503_v46  ;;  %v1044_v43 = vadd.f32 %v1043_v61, %v1042_v53  ;;  %v1155_v38 = vrot.slane %v1154_v35, 1  ;;  %v1930_v41 = vunpack.c.l.b16 %v1406_v36  ;;  %v4517_v52 = vld [vmem:[%s6279_s1 + $0x774] ss:$8 sps:$4 sm:$0xff]   ;;  %v4518_v61 = vld [vmem:[%s6279_s1 + $0x660] ss:$8 sps:$4 sm:$0xff]  }
 0x116   :  { %v1422_v39 = vpack.c.bf16 %v932_v32, %v932_v32  ;;  %3652 = vmatprep.subr.bf16.mxu1 %v4511_v27  ;;  %v2050_v47 = vsel %vm1988_vm2, %v1898_v29, %v2049_v50  ;;  %v382_v7 = vadd.f32 %v381_v31, %v380_v34  ;;  %v493_v48 = vrot.slane %v492_v2, 4 }
 0x117   :  { %v604_v49 = vsel %vm309_vm0, %v5615_v25, 0.0  ;;  %v1156_v30 = vadd.f32 %v1155_v38, %v1154_v35  ;;  %v1438_v20 = vpack.c.bf16 %v1044_v43, %v1044_v43  ;;  %v2051_v51 = vsel %vm1990_vm3, %v1914_v40, %v2050_v47  ;;  %v5821_v35 = vld [vmem:[%s6280_s0 + $0x18] sm:$0xff] }
 0x118   :  { %v1946_v5 = vunpack.c.l.b16 %v1422_v39  ;;  %v2052_v44 = vsel %vm1992_vm4, %v1930_v41, %v2051_v51  ;;  %v383_v6 = vrot.slane %v382_v7, 2  ;;  %v494_v57 = vadd.f32 %v493_v48, %v492_v2  ;;  %v5829_v39 = vld [vmem:[%s6280_s0 + $0x38] sm:$0xff] }
 0x119   :  { %v605_v21 = vrot.slane %v604_v49, 4  ;;  %3653 = vmatpush2.bf16.msra.mxu1 %v4509_v42  ;;  %v1454_v15 = vpack.c.bf16 %v1156_v30, %v1156_v30  ;;  %v1962_v60 = vunpack.c.l.b16 %v1438_v20  ;;  %v716_v25 = vsel %vm309_vm0, %v5619_v3, 0.0  ;;  %v5840_v51 = vld [vmem:[%s6280_s0 + $0x58] sm:$0xff] }
 0x11a   :  { %v2053_v18 = vsel %vm1994_vm5, %v1946_v5, %v2052_v44  ;;  %v384_v55 = vadd.f32 %v383_v6, %v382_v7  ;;  %v495_v0 = vrot.slane %v494_v57, 2  ;;  %v717_v11 = vrot.slane %v716_v25, 4  ;;  %3704 = vmatprep.subr.bf16.mxu1 %v4517_v52  ;;  %v4524_v5 = vld [vmem:[%s6279_s1 + $0x650] ss:$8 sps:$4 sm:$0xff]  }
 0x11b   :  { %v606_v10 = vadd.f32 %v605_v21, %v604_v49  ;;  %v1978_v12 = vunpack.c.l.b16 %v1454_v15  ;;  %v2054_v33 = vsel %vm1996_vm6, %v1962_v60, %v2053_v18  ;;  %v828_v58 = vsel %vm309_vm0, %v5622_v9, 0.0  ;;  %v5845_v44 = vld [vmem:[%s6280_s0 + $0x78] sm:$0xff]  ;;  %v4532_v15 = vld [vmem:[%s6279_s1 + $0x644] ss:$8 sps:$4 sm:$0xff]  }
 0x11c   :  { %v940_v56 = vsel %vm309_vm0, %v5626_v4, 0.0  ;;  %v385_v59 = vrot.slane %v384_v55, 1  ;;  %v496_v13 = vadd.f32 %v495_v0, %v494_v57  ;;  %v718_v14 = vadd.f32 %v717_v11, %v716_v25  ;;  %v4520_v4 = vld [vmem:[%s6279_s1 + $0x664] ss:$8 sps:$4 sm:$0xff]   ;;  %v5862_v11 = vld [vmem:[%s6280_s0 + $0xb8] sm:$0xff] }
 0x11d   :  { %v607_v63 = vrot.slane %v606_v10, 2  ;;  %v2055_v3 = vsel %vm1998_vm7, %v1978_v12, %v2054_v33  ;;  %v829_v37 = vrot.slane %v828_v58, 4  ;;  %v941_v22 = vrot.slane %v940_v56, 4  ;;  %v5867_v12 = vld [vmem:[%s6280_s0 + $0xd8] sm:$0xff] }
 0x11e   :  { %v1052_v16 = vsel %vm309_vm0, %v5629_v54, 0.0  ;;  %v2113_v17 = vpack.c.b16 %v2055_v3, %v2055_v3  ;;  %v386_v9 = vadd.f32 %v385_v59, %v384_v55  ;;  %v497_v19 = vrot.slane %v496_v13, 1 }
 0x11f   :  { %v608_v45 = vadd.f32 %v607_v63, %v606_v10  ;;  %v719_v46 = vrot.slane %v718_v14, 2  ;;  %v830_v1 = vadd.f32 %v829_v37, %v828_v58  ;;  %v942_v23 = vadd.f32 %v941_v22, %v940_v56  ;;  %v5857_v10 = vld [vmem:[%s6280_s0 + $0x98] sm:$0xff]  ;;  %v4530_v37 = vld [vmem:[%s6279_s1 + $0x640] ss:$8 sps:$4 sm:$0xff]  }
 0x120   :  { %v1053_v53 = vrot.slane %v1052_v16, 4  ;;  %3614 = vmatmul.mubr.bf16.vlgmr.msra.gmra.mxu0 %v2113_v17  ;;  %v498_v62 = vadd.f32 %v497_v19, %v496_v13  ;;  %v1164_v54 = vsel %vm309_vm0, %v5639_v8, 0.0  ;;  %v1344_v24 = vpack.c.bf16 %v386_v9, %v386_v9  ;;  %v4526_v8 = vld [vmem:[%s6279_s1 + $0x654] ss:$8 sps:$4 sm:$0xff]  }
 0x121   :  { %v609_v27 = vrot.slane %v608_v45, 1  ;;  %v720_v28 = vadd.f32 %v719_v46, %v718_v14  ;;  %v831_v29 = vrot.slane %v830_v1, 2  ;;  %v943_v34 = vrot.slane %v942_v23, 2  ;;  %3664 = vmatpush1.bf16.msra.mxu0 %v4512_v26  ;;  %v5882_v22 = vld [vmem:[%s6280_s0 + $0xf8] sm:$0xff] }
 0x122   :  { %v1054_v32 = vadd.f32 %v1053_v53, %v1052_v16  ;;  %v1165_v40 = vrot.slane %v1164_v54, 4  ;;  %v1360_v50 = vpack.c.bf16 %v498_v62, %v498_v62  ;;  %v1868_v31 = vunpack.c.l.b16 %v1344_v24  ;;  %3665 = vmatprep.subr.bf16.mxu0 %v4520_v4  ;;  %v4538_v26 = vld [vmem:[%s6279_s1 + $0x634] ss:$8 sps:$4 sm:$0xff]  }
 0x123   :  { %v610_v36 = vadd.f32 %v609_v27, %v608_v45  ;;  %v721_v2 = vrot.slane %v720_v28, 1  ;;  %v832_v42 = vadd.f32 %v831_v29, %v830_v1  ;;  %v944_v43 = vadd.f32 %v943_v34, %v942_v23 }
 0x124   :  { %v1055_v38 = vrot.slane %v1054_v32, 2  ;;  %v1166_v41 = vadd.f32 %v1165_v40, %v1164_v54  ;;  %v1884_v7 = vunpack.c.l.b16 %v1360_v50  ;;  %v5832_v48 = vunpack.c.l.bf16 %v5821_v35 }
 0x125   :  { %v1376_v47 = vpack.c.bf16 %v610_v36, %v610_v36  ;;  %v722_v49 = vadd.f32 %v721_v2, %v720_v28  ;;  %v833_v52 = vrot.slane %v832_v42, 1  ;;  %v945_v30 = vrot.slane %v944_v43, 1  ;;  %3666 = vmatpush1.bf16.msra.mxu0 %v4518_v61  ;;  %v4536_v28 = vld [vmem:[%s6279_s1 + $0x630] ss:$8 sps:$4 sm:$0xff]   ;;  %v4544_v36 = vld [vmem:[%s6279_s1 + $0x624] ss:$8 sps:$4 sm:$0xff]  }
 0x126   :  { %v1056_v20 = vadd.f32 %v1055_v38, %v1054_v32  ;;  %v1167_v6 = vrot.slane %v1166_v41, 2  ;;  %v2063_v21 = vsel %vm1986_vm1, %v1884_v7, %v1868_v31  ;;  %3667 = vmatprep.subr.bf16.mxu0 %v4526_v8  ;;  %v5852_v60 = vunpack.c.l.bf16 %v5829_v39  ;;  %v4542_v7 = vld [vmem:[%s6279_s1 + $0x620] ss:$8 sps:$4 sm:$0xff]  }
 0x127   :  { %v1900_v57 = vunpack.c.l.b16 %v1376_v47  ;;  %v834_v18 = vadd.f32 %v833_v52, %v832_v42  ;;  %v946_v25 = vadd.f32 %v945_v30, %v944_v43  ;;  %v1392_v0 = vpack.c.bf16 %v722_v49, %v722_v49 }
 0x128   :  { %v1057_v55 = vrot.slane %v1056_v20, 1  ;;  %v1168_v33 = vadd.f32 %v1167_v6, %v1166_v41  ;;  %v5871_v56 = vunpack.c.l.bf16 %v5840_v51  ;;  %v5874_v59 = vunpack.c.l.bf16 %v5845_v44 }
 0x129   :  { %v2064_v58 = vsel %vm1988_vm2, %v1900_v57, %v2063_v21  ;;  %v1408_v63 = vpack.c.bf16 %v834_v18, %v834_v18  ;;  %v1424_v14 = vpack.c.bf16 %v946_v25, %v946_v25  ;;  %v1916_v3 = vunpack.c.l.b16 %v1392_v0  ;;  %3668 = vmatpush1.bf16.msra.mxu0 %v4524_v5  ;;  %v4515_v57 = vld [vmem:[%s6279_s1 + $0x770] ss:$8 sps:$4 sm:$0xff]   ;;  %v4550_v21 = vld [vmem:[%s6279_s1 + $0x614] ss:$8 sps:$4 sm:$0xff]   ;;  %v4523_v0 = vld [vmem:[%s6279_s1 + $0x764] ss:$8 sps:$4 sm:$0xff]  }
 0x12a   :  { %v1058_v13 = vadd.f32 %v1057_v55, %v1056_v20  ;;  %v1169_v16 = vrot.slane %v1168_v33, 1  ;;  %3669 = vmatprep.subr.bf16.mxu0 %v4532_v15  ;;  %v5888_v17 = vunpack.c.l.bf16 %v5857_v10  ;;  %v5891_v9 = vunpack.c.l.bf16 %v5862_v11 }
 0x12b   :  { %v5894_v19 = vunpack.c.l.bf16 %v5867_v12  ;;  %v1932_v4 = vunpack.c.l.b16 %v1408_v63  ;;  %v1948_v46 = vunpack.c.l.b16 %v1424_v14  ;;  %v2065_v1 = vsel %vm1990_vm3, %v1916_v3, %v2064_v58 }
 0x12c   :  { %v1440_v45 = vpack.c.bf16 %v1058_v13, %v1058_v13  ;;  %v1170_v23 = vadd.f32 %v1169_v16, %v1168_v33  ;;  %v5898_v53 = vunpack.c.l.bf16 %v5882_v22  ;;  %v187_v62 = vcombine.high %v5832_v48, %v5832_v48 }
 0x12d   :  { %v195_v27 = vcombine.high %v5852_v60, %v5852_v60  ;;  %v2066_v24 = vsel %vm1992_vm4, %v1932_v4, %v2065_v1  ;;  %3670 = vmatpush1.bf16.msra.mxu0 %v4530_v37  ;;  %v203_v29 = vcombine.high %v5871_v56, %v5871_v56  ;;  %v211_v34 = vcombine.high %v5874_v59, %v5874_v59 }
 0x12e   :  { %v1964_v54 = vunpack.c.l.b16 %v1440_v45  ;;  %v1456_v32 = vpack.c.bf16 %v1170_v23, %v1170_v23  ;;  %v2067_v61 = vsel %vm1994_vm5, %v1948_v46, %v2066_v24  ;;  %3671 = vmatprep.subr.bf16.mxu0 %v4538_v26  ;;  %v219_v40 = vcombine.high %v5888_v17, %v5888_v17  ;;  %v4548_v26 = vld [vmem:[%s6279_s1 + $0x610] ss:$8 sps:$4 sm:$0xff]  }
 0x12f   :  { %v227_v50 = vcombine.high %v5891_v9, %v5891_v9  ;;  %v235_v8 = vcombine.high %v5894_v19, %v5894_v19  ;;  %v243_v2 = vcombine.high %v5898_v53, %v5898_v53  ;;  %v401_v42 = vsel %vm309_vm0, %v187_v62, 0.0  ;;  %v4521_v62 = vld [vmem:[%s6279_s1 + $0x760] ss:$8 sps:$4 sm:$0xff]  }
 0x130   :  { %v2068_v31 = vsel %vm1996_vm6, %v1964_v54, %v2067_v61  ;;  %v1980_v43 = vunpack.c.l.b16 %v1456_v32  ;;  %v402_v38 = vrot.slane %v401_v42, 4  ;;  %v513_v41 = vsel %vm309_vm0, %v195_v27, 0.0  ;;  %v4556_v27 = vld [vmem:[%s6279_s1 + $0x604] ss:$8 sps:$4 sm:$0xff]  }
 0x131   :  { %v625_v47 = vsel %vm309_vm0, %v203_v29, 0.0  ;;  %3672 = vmatpush1.bf16.msra.mxu0 %v4536_v28  ;;  %v514_v49 = vrot.slane %v513_v41, 4  ;;  %v737_v30 = vsel %vm309_vm0, %v211_v34, 0.0  ;;  %v849_v20 = vsel %vm309_vm0, %v219_v40, 0.0  ;;  %v5933_v5 = vpop.f32.mrf.mxu0  ;;  %v4529_v34 = vld [vmem:[%s6279_s1 + $0x754] ss:$8 sps:$4 sm:$0xff]  }
 0x132   :  { %v626_v52 = vrot.slane %v625_v47, 4  ;;  %v2069_v6 = vsel %vm1998_vm7, %v1980_v43, %v2068_v31  ;;  %3673 = vmatprep.subr.bf16.mxu0 %v4544_v36  ;;  %v403_v15 = vadd.f32 %v402_v38, %v401_v42  ;;  %v738_v18 = vrot.slane %v737_v30, 4  ;;  %v4554_v43 = vld [vmem:[%s6279_s1 + $0x600] ss:$8 sps:$4 sm:$0xff]  }
 0x133   :  { %v850_v25 = vrot.slane %v849_v20, 4  ;;  %v2115_v55 = vpack.c.b16 %v2069_v6, %v2069_v6  ;;  %v515_v33 = vadd.f32 %v514_v49, %v513_v41  ;;  %v961_v13 = vsel %vm309_vm0, %v227_v50, 0.0  ;;  %v5946_v63 = vpop.f32.mrf.mxu0  ;;  %v4527_v49 = vld [vmem:[%s6279_s1 + $0x750] ss:$8 sps:$4 sm:$0xff]  }
 0x134   :  { %v627_v58 = vadd.f32 %v626_v52, %v625_v47  ;;  %v404_v14 = vrot.slane %v403_v15, 2  ;;  %v739_v3 = vadd.f32 %v738_v18, %v737_v30  ;;  %v962_v16 = vrot.slane %v961_v13, 4  ;;  %v4562_v52 = vld [vmem:[%s6279_s1 + $0x6f4] ss:$8 sps:$4 sm:$0xff]  }
 0x135   :  { %v851_v37 = vadd.f32 %v850_v25, %v849_v20  ;;  %3655 = vmatmul.mubr.bf16.vlgmr.msra.gmra.mxu1 %v2115_v55  ;;  %3674 = vmatpush1.bf16.msra.mxu0 %v4542_v7  ;;  %v516_v45 = vrot.slane %v515_v33, 2  ;;  %v1073_v46 = vsel %vm309_vm0, %v235_v8, 0.0  ;;  %v1185_v1 = vsel %vm309_vm0, %v243_v2, 0.0  ;;  %v3455_v23 = vpop.f32.mrf.mxu0 }
 0x136   :  { %v628_v4 = vrot.slane %v627_v58, 2  ;;  %3705 = vmatpush1.bf16.msra.mxu1 %v4515_v57  ;;  %3675 = vmatprep.subr.bf16.mxu0 %v4550_v21  ;;  %v405_v54 = vadd.f32 %v404_v14, %v403_v15  ;;  %v740_v24 = vrot.slane %v739_v3, 2  ;;  %v963_v29 = vadd.f32 %v962_v16, %v961_v13  ;;  %v4535_v21 = vld [vmem:[%s6279_s1 + $0x744] ss:$8 sps:$4 sm:$0xff]   ;;  %v4560_v14 = vld [vmem:[%s6279_s1 + $0x6f0] ss:$8 sps:$4 sm:$0xff]  }
 0x137   :  { %v852_v28 = vrot.slane %v851_v37, 2  ;;  %3706 = vmatprep.subr.bf16.mxu1 %v4523_v0  ;;  %v517_v32 = vadd.f32 %v516_v45, %v515_v33  ;;  %v1074_v36 = vrot.slane %v1073_v46, 4  ;;  %v1186_v40 = vrot.slane %v1185_v1, 4  ;;  %v3456_v50 = vpop.f32.mrf.mxu0  ;;  %v4533_v45 = vld [vmem:[%s6279_s1 + $0x740] ss:$8 sps:$4 sm:$0xff]  }
 0x138   :  { %v629_v61 = vadd.f32 %v628_v4, %v627_v58  ;;  %v406_v31 = vrot.slane %v405_v54, 1  ;;  %v741_v8 = vadd.f32 %v740_v24, %v739_v3  ;;  %v964_v42 = vrot.slane %v963_v29, 2  ;;  %v4568_v4 = vld [vmem:[%s6279_s1 + $0x6e4] ss:$8 sps:$4 sm:$0xff]  }
 0x139   :  { %v853_v2 = vadd.f32 %v852_v28, %v851_v37  ;;  %3676 = vmatpush1.bf16.msra.mxu0 %v4548_v26  ;;  %v518_v38 = vrot.slane %v517_v32, 1  ;;  %v1075_v47 = vadd.f32 %v1074_v36, %v1073_v46  ;;  %v1187_v7 = vadd.f32 %v1186_v40, %v1185_v1  ;;  %v4566_v40 = vld [vmem:[%s6279_s1 + $0x6e0] ss:$8 sps:$4 sm:$0xff]  }
 0x13a   :  { %v630_v41 = vrot.slane %v629_v61, 1  ;;  %3707 = vmatpush1.bf16.msra.mxu1 %v4521_v62  ;;  %3677 = vmatprep.subr.bf16.mxu0 %v4556_v27  ;;  %v407_v30 = vadd.f32 %v406_v31, %v405_v54  ;;  %v742_v20 = vrot.slane %v741_v8, 1  ;;  %v965_v57 = vadd.f32 %v964_v42, %v963_v29  ;;  %v4541_v27 = vld [vmem:[%s6279_s1 + $0x734] ss:$8 sps:$4 sm:$0xff]   ;;  %v4539_v42 = vld [vmem:[%s6279_s1 + $0x730] ss:$8 sps:$4 sm:$0xff]  }
 0x13b   :  { %v854_v6 = vrot.slane %v853_v2, 1  ;;  %3708 = vmatprep.subr.bf16.mxu1 %v4529_v34  ;;  %v519_v15 = vadd.f32 %v518_v38, %v517_v32  ;;  %v1076_v25 = vrot.slane %v1075_v47, 2  ;;  %v1188_v55 = vrot.slane %v1187_v7, 2 }
 0x13c   :  { %v631_v18 = vadd.f32 %v630_v41, %v629_v61  ;;  %v743_v0 = vadd.f32 %v742_v20, %v741_v8  ;;  %v966_v58 = vrot.slane %v965_v57, 1  ;;  %v1347_v13 = vpack.c.bf16 %v407_v30, %v407_v30 }
 0x13d   :  { %v855_v33 = vadd.f32 %v854_v6, %v853_v2  ;;  %3678 = vmatpush1.bf16.msra.mxu0 %v4554_v43  ;;  %v1077_v3 = vadd.f32 %v1076_v25, %v1075_v47  ;;  %v1189_v37 = vadd.f32 %v1188_v55, %v1187_v7  ;;  %v1363_v16 = vpack.c.bf16 %v519_v15, %v519_v15 }
 0x13e   :  { %v1379_v26 = vpack.c.bf16 %v631_v18, %v631_v18  ;;  %3709 = vmatpush1.bf16.msra.mxu1 %v4527_v49  ;;  %3679 = vmatprep.subr.bf16.mxu0 %v4562_v52  ;;  %v967_v46 = vadd.f32 %v966_v58, %v965_v57  ;;  %v1395_v1 = vpack.c.bf16 %v743_v0, %v743_v0  ;;  %v1871_v62 = vunpack.c.l.b16 %v1347_v13  ;;  %v4572_v57 = vld [vmem:[%s6279_s1 + $0x6d0] ss:$8 sps:$4 sm:$0xff]   ;;  %v4553_v58 = vld [vmem:[%s6279_s1 + $0x714] ss:$8 sps:$4 sm:$0xff]  }
 0x13f   :  { %v1411_v23 = vpack.c.bf16 %v855_v33, %v855_v33  ;;  %3710 = vmatprep.subr.bf16.mxu1 %v4535_v21  ;;  %v1078_v54 = vrot.slane %v1077_v3, 1  ;;  %v1190_v24 = vrot.slane %v1189_v37, 1  ;;  %v1887_v28 = vunpack.c.l.b16 %v1363_v16 }
 0x140   :  { %v1903_v29 = vunpack.c.l.b16 %v1379_v26  ;;  %v1427_v34 = vpack.c.bf16 %v967_v46, %v967_v46  ;;  %v1919_v32 = vunpack.c.l.b16 %v1395_v1  ;;  %v5987_v36 = vunpack.c.h.bf16 %v5821_v35  ;;  %v4574_v35 = vld [vmem:[%s6279_s1 + $0x6d4] ss:$8 sps:$4 sm:$0xff]   ;;  %v4551_v26 = vld [vmem:[%s6279_s1 + $0x710] ss:$8 sps:$4 sm:$0xff]  }
 0x141   :  { %v1935_v61 = vunpack.c.l.b16 %v1411_v23  ;;  %3680 = vmatpush2.bf16.msra.mxu0 %v4560_v14  ;;  %v1079_v50 = vadd.f32 %v1078_v54, %v1077_v3  ;;  %v1191_v31 = vadd.f32 %v1190_v24, %v1189_v37  ;;  %v2084_v8 = vsel %vm1986_vm1, %v1887_v28, %v1871_v62  ;;  %v4578_v23 = vld [vmem:[%s6279_s1 + $0x6c0] ss:$8 sps:$4 sm:$0xff]  }
 0x142   :  { %v5994_v2 = vunpack.c.h.bf16 %v5829_v39  ;;  %3711 = vmatpush1.bf16.msra.mxu1 %v4533_v45  ;;  %3681 = vmatprep.subr.bf16.mxu0 %v4568_v4  ;;  %v1951_v43 = vunpack.c.l.b16 %v1427_v34  ;;  %v2085_v38 = vsel %vm1988_vm2, %v1903_v29, %v2084_v8  ;;  %v6004_v41 = vunpack.c.h.bf16 %v5840_v51  ;;  %v4547_v39 = vld [vmem:[%s6279_s1 + $0x724] ss:$8 sps:$4 sm:$0xff]   ;;  %v4586_v29 = vld [vmem:[%s6279_s1 + $0x6b4] ss:$8 sps:$4 sm:$0xff]  }
 0x143   :  { %v6007_v47 = vunpack.c.h.bf16 %v5845_v44  ;;  %3712 = vmatprep.subr.bf16.mxu1 %v4541_v27  ;;  %v1443_v7 = vpack.c.bf16 %v1079_v50, %v1079_v50  ;;  %v1459_v49 = vpack.c.bf16 %v1191_v31, %v1191_v31  ;;  %v2086_v52 = vsel %vm1990_vm3, %v1919_v32, %v2085_v38  ;;  %v4559_v50 = vld [vmem:[%s6279_s1 + $0x704] ss:$8 sps:$4 sm:$0xff]  }
 0x144   :  { %v6014_v30 = vunpack.c.h.bf16 %v5857_v10  ;;  %v2087_v20 = vsel %vm1992_vm4, %v1935_v61, %v2086_v52  ;;  %v6018_v51 = vunpack.c.h.bf16 %v5862_v11  ;;  %v6021_v44 = vunpack.c.h.bf16 %v5867_v12  ;;  %v4545_v12 = vld [vmem:[%s6279_s1 + $0x720] ss:$8 sps:$4 sm:$0xff]  }
 0x145   :  { %v6024_v6 = vunpack.c.h.bf16 %v5882_v22  ;;  %3682 = vmatpush2.bf16.msra.mxu0 %v4566_v40  ;;  %v1967_v21 = vunpack.c.l.b16 %v1443_v7  ;;  %v1983_v15 = vunpack.c.l.b16 %v1459_v49  ;;  %v2088_v10 = vsel %vm1994_vm5, %v1951_v43, %v2087_v20  ;;  %v4580_v22 = vld [vmem:[%s6279_s1 + $0x6c4] ss:$8 sps:$4 sm:$0xff]   ;;  %v4557_v52 = vld [vmem:[%s6279_s1 + $0x700] ss:$8 sps:$4 sm:$0xff]   ;;  %v4584_v20 = vld [vmem:[%s6279_s1 + $0x6b0] ss:$8 sps:$4 sm:$0xff]  }
 0x146   :  { %v188_v18 = vcombine.high %v5987_v36, %v5987_v36  ;;  %v6032_v11 = vpop.f32.mrf.mxu1  ;;  %3713 = vmatpush1.bf16.msra.mxu1 %v4539_v42  ;;  %3683 = vmatprep.subr.bf16.mxu0 %v4574_v35  ;;  %v196_v25 = vcombine.high %v5994_v2, %v5994_v2  ;;  %v204_v55 = vcombine.high %v6004_v41, %v6004_v41  ;;  %v1720_v33 = vlaneseq }
 0x147   :  { %v212_v0 = vcombine.high %v6007_v47, %v6007_v47  ;;  %3714 = vmatprep.subr.bf16.mxu1 %v4547_v39  ;;  %v2089_v13 = vsel %vm1996_vm6, %v1967_v21, %v2088_v10  ;;  %v220_v14 = vcombine.high %v6014_v30, %v6014_v30  ;;  %v228_v3 = vcombine.high %v6018_v51, %v6018_v51 }
 0x148   :  { %v236_v37 = vcombine.high %v6021_v44, %v6021_v44  ;;  %v6056_v16 = vpop.f32.mrf.mxu1  ;;  %v2090_v45 = vsel %vm1998_vm7, %v1983_v15, %v2089_v13  ;;  %v244_v4 = vcombine.high %v6024_v6, %v6024_v6  ;;  %v415_v46 = vsel %vm309_vm0, %v188_v18, 0.0  ;;  %v4592_v18 = vld [vmem:[%s6279_s1 + $0x6a4] ss:$8 sps:$4 sm:$0xff]  }
 0x149   :  { %v527_v1 = vsel %vm309_vm0, %v196_v25, 0.0  ;;  %3684 = vmatpush2.bf16.msra.mxu0 %v4572_v57  ;;  %v2118_v62 = vpack.c.b16 %v2090_v45, %v2090_v45  ;;  %v416_v27 = vrot.slane %v415_v46, 4  ;;  %v639_v24 = vsel %vm309_vm0, %v204_v55, 0.0 }
 0x14a   :  { %v528_v54 = vrot.slane %v527_v1, 4  ;;  %v3496_v28 = vpop.f32.mrf.mxu1  ;;  %3715 = vmatpush1.bf16.msra.mxu1 %v4545_v12  ;;  %3685 = vmatprep.subr.bf16.mxu0 %v4580_v22  ;;  %v640_v34 = vrot.slane %v639_v24, 4  ;;  %v751_v32 = vsel %vm309_vm0, %v212_v0, 0.0  ;;  %v863_v61 = vsel %vm309_vm0, %v220_v14, 0.0  ;;  %v4565_v0 = vld [vmem:[%s6279_s1 + $0x7f4] ss:$8 sps:$4 sm:$0xff]  }
 0x14b   :  { %v975_v40 = vsel %vm309_vm0, %v228_v3, 0.0  ;;  %3716 = vmatprep.subr.bf16.mxu1 %v4553_v58  ;;  %3695 = vmatprep.mubr.bf16.mxu0 %v2118_v62  ;;  %v417_v31 = vadd.f32 %v416_v27, %v415_v46  ;;  %v752_v42 = vrot.slane %v751_v32, 4  ;;  %v864_v35 = vrot.slane %v863_v61, 4  ;;  %v4563_v46 = vld [vmem:[%s6279_s1 + $0x7f0] ss:$8 sps:$4 sm:$0xff]  }
 0x14c   :  { %v529_v8 = vadd.f32 %v528_v54, %v527_v1  ;;  %v3497_v43 = vpop.f32.mrf.mxu1  ;;  %v641_v38 = vadd.f32 %v640_v34, %v639_v24  ;;  %v976_v39 = vrot.slane %v975_v40, 4  ;;  %v1087_v7 = vsel %vm309_vm0, %v236_v37, 0.0  ;;  %v4590_v1 = vld [vmem:[%s6279_s1 + $0x6a0] ss:$8 sps:$4 sm:$0xff]   ;;  %v4598_v24 = vld [vmem:[%s6279_s1 + $0x694] ss:$8 sps:$4 sm:$0xff]  }
 0x14d   :  { %v1199_v49 = vsel %vm309_vm0, %v244_v4, 0.0  ;;  %3686 = vmatpush2.bf16.msra.mxu0 %v4578_v23  ;;  %v418_v57 = vrot.slane %v417_v31, 2  ;;  %v753_v15 = vadd.f32 %v752_v42, %v751_v32  ;;  %v865_v10 = vadd.f32 %v864_v35, %v863_v61  ;;  %v4571_v61 = vld [vmem:[%s6279_s1 + $0x7e4] ss:$8 sps:$4 sm:$0xff]  }
 0x14e   :  { %v530_v21 = vrot.slane %v529_v8, 2  ;;  %3717 = vmatpush1.bf16.msra.mxu1 %v4551_v26  ;;  %3687 = vmatprep.subr.bf16.mxu0 %v4586_v29  ;;  %v642_v12 = vrot.slane %v641_v38, 2  ;;  %v977_v22 = vadd.f32 %v976_v39, %v975_v40  ;;  %v1088_v25 = vrot.slane %v1087_v7, 4  ;;  %v4596_v39 = vld [vmem:[%s6279_s1 + $0x690] ss:$8 sps:$4 sm:$0xff]  }
 0x14f   :  { %v1200_v55 = vrot.slane %v1199_v49, 4  ;;  %3718 = vmatprep.subr.bf16.mxu1 %v4559_v50  ;;  %v419_v58 = vadd.f32 %v418_v57, %v417_v31  ;;  %v754_v14 = vrot.slane %v753_v15, 2  ;;  %v866_v3 = vrot.slane %v865_v10, 2  ;;  %v4569_v57 = vld [vmem:[%s6279_s1 + $0x7e0] ss:$8 sps:$4 sm:$0xff]  }
 0x150   :  { %v531_v13 = vadd.f32 %v530_v21, %v529_v8  ;;  %v643_v37 = vadd.f32 %v642_v12, %v641_v38  ;;  %v978_v26 = vrot.slane %v977_v22, 2  ;;  %v1089_v45 = vadd.f32 %v1088_v25, %v1087_v7  ;;  %v4604_v21 = vld [vmem:[%s6279_s1 + $0x684] ss:$8 sps:$4 sm:$0xff]  }
 0x151   :  { %v1201_v4 = vadd.f32 %v1200_v55, %v1199_v49  ;;  %3688 = vmatpush2.bf16.msra.mxu0 %v4584_v20  ;;  %v420_v23 = vrot.slane %v419_v58, 1  ;;  %v755_v27 = vadd.f32 %v754_v14, %v753_v15  ;;  %v867_v54 = vadd.f32 %v866_v3, %v865_v10 }
 0x152   :  { %v532_v62 = vrot.slane %v531_v13, 1  ;;  %3719 = vmatpush1.bf16.msra.mxu1 %v4557_v52  ;;  %3689 = vmatprep.subr.bf16.mxu0 %v4592_v18  ;;  %v644_v28 = vrot.slane %v643_v37, 1  ;;  %v979_v29 = vadd.f32 %v978_v26, %v977_v22  ;;  %v1090_v34 = vrot.slane %v1089_v45, 2  ;;  %v4577_v22 = vld [vmem:[%s6279_s1 + $0x7d4] ss:$8 sps:$4 sm:$0xff]  }
 0x153   :  { %v1202_v32 = vrot.slane %v1201_v4, 2  ;;  %3720 = vmatprep.subr.bf16.mxu1 %v4565_v0  ;;  %v421_v40 = vadd.f32 %v420_v23, %v419_v58  ;;  %v756_v31 = vrot.slane %v755_v27, 1  ;;  %v868_v8 = vrot.slane %v867_v54, 1  ;;  %v4602_v26 = vld [vmem:[%s6279_s1 + $0x680] ss:$8 sps:$4 sm:$0xff]  }
 0x154   :  { %v533_v50 = vadd.f32 %v532_v62, %v531_v13  ;;  %v645_v42 = vadd.f32 %v644_v28, %v643_v37  ;;  %v980_v35 = vrot.slane %v979_v29, 1  ;;  %v1091_v43 = vadd.f32 %v1090_v34, %v1089_v45  ;;  %v4575_v23 = vld [vmem:[%s6279_s1 + $0x7d0] ss:$8 sps:$4 sm:$0xff]   ;;  %v6131_v28 = vld [vmem:[%s6281_s2] sm:$0x3] }
 0x155   :  { %v1203_v38 = vadd.f32 %v1202_v32, %v1201_v4  ;;  %3690 = vmatpush2.bf16.msra.mxu0 %v4590_v1  ;;  %v757_v7 = vadd.f32 %v756_v31, %v755_v27  ;;  %v869_v49 = vadd.f32 %v868_v8, %v867_v54  ;;  %v1349_v52 = vpack.c.bf16 %v421_v40, %v421_v40 }
 0x156   :  { %v1365_v20 = vpack.c.bf16 %v533_v50, %v533_v50  ;;  %3721 = vmatpush2.bf16.msra.mxu1 %v4563_v46  ;;  %3691 = vmatprep.subr.bf16.mxu0 %v4598_v24  ;;  %v981_v15 = vadd.f32 %v980_v35, %v979_v29  ;;  %v1092_v10 = vrot.slane %v1091_v43, 1  ;;  %v1381_v12 = vpack.c.bf16 %v645_v42, %v645_v42 }
 0x157   :  { %v1204_v18 = vrot.slane %v1203_v38, 1  ;;  %3722 = vmatprep.subr.bf16.mxu1 %v4571_v61  ;;  %v1397_v25 = vpack.c.bf16 %v757_v7, %v757_v7  ;;  %v1413_v55 = vpack.c.bf16 %v869_v49, %v869_v49  ;;  %v1873_v0 = vunpack.c.l.b16 %v1349_v52  ;;  %v4589_v52 = vld [vmem:[%s6279_s1 + $0x7b4] ss:$8 sps:$4 sm:$0xff]  }
 0x158   :  { %v1889_v58 = vunpack.c.l.b16 %v1365_v20  ;;  %v1093_v13 = vadd.f32 %v1092_v10, %v1091_v43  ;;  %v1429_v3 = vpack.c.bf16 %v981_v15, %v981_v15  ;;  %v1905_v37 = vunpack.c.l.b16 %v1381_v12 }
 0x159   :  { %v1205_v14 = vadd.f32 %v1204_v18, %v1203_v38  ;;  %3692 = vmatpush2.bf16.msra.mxu0 %v4596_v39  ;;  %v1921_v45 = vunpack.c.l.b16 %v1397_v25  ;;  %v1937_v4 = vunpack.c.l.b16 %v1413_v55  ;;  %v6122_v1 = vshrl.u32 %v1720_v33, 7  ;;  %v4583_v33 = vld [vmem:[%s6279_s1 + $0x7c4] ss:$8 sps:$4 sm:$0xff]  }
 0x15a   :  { %v2098_v46 = vsel %vm1986_vm1, %v1889_v58, %v1873_v0  ;;  %3723 = vmatpush2.bf16.msra.mxu1 %v4569_v57  ;;  %3693 = vmatprep.subr.bf16.mxu0 %v4604_v21  ;;  %v1445_v62 = vpack.c.bf16 %v1093_v13, %v1093_v13  ;;  %v1953_v54 = vunpack.c.l.b16 %v1429_v3  ;;  %v394_v32 = vsel %vm309_vm0, %v5832_v48, 0.0  ;;  %v4581_v48 = vld [vmem:[%s6279_s1 + $0x7c0] ss:$8 sps:$4 sm:$0xff]   ;;  %v4587_v0 = vld [vmem:[%s6279_s1 + $0x7b0] ss:$8 sps:$4 sm:$0xff]  }
 0x15b   :  { %v1461_v27 = vpack.c.bf16 %v1205_v14, %v1205_v14  ;;  %v2099_v24 = vsel %vm1988_vm2, %v1905_v37, %v2098_v46  ;;  %3724 = vmatprep.subr.bf16.mxu1 %v4577_v22  ;;  %v1722_v34 = vsub.s32 0, %v6122_v1  ;;  %v506_v61 = vsel %vm309_vm0, %v5852_v60, 0.0 }
 0x15c   :  { %v2100_v29 = vsel %vm1990_vm3, %v1921_v45, %v2099_v24  ;;  %v1969_v40 = vunpack.c.l.b16 %v1445_v62  ;;  %v395_v8 = vrot.slane %v394_v32, 4  ;;  %v507_v43 = vrot.slane %v506_v61, 4 }
 0x15d   :  { %v1985_v50 = vunpack.c.l.b16 %v1461_v27  ;;  %v2101_v31 = vsel %vm1992_vm4, %v1937_v4, %v2100_v29  ;;  %3694 = vmatpush2.bf16.msra.mxu0 %v4602_v26  ;;  %v1723_v35 = vrot.slane %v6131_v28, %v1722_v34  ;;  %v618_v38 = vsel %vm309_vm0, %v5871_v56, 0.0 }
 0x15e   :  { %v2102_v42 = vsel %vm1994_vm5, %v1953_v54, %v2101_v31  ;;  %3725 = vmatpush2.bf16.msra.mxu1 %v4575_v23  ;;  %v396_v39 = vadd.f32 %v395_v8, %v394_v32  ;;  %v619_v7 = vrot.slane %v618_v38, 4  ;;  %v730_v49 = vsel %vm309_vm0, %v5874_v59, 0.0  ;;  %v4601_v32 = vld [vmem:[%s6279_s1 + $0x794] ss:$8 sps:$4 sm:$0xff]  }
 0x15f   :  { %v2103_v60 = vsel %vm1996_vm6, %v1969_v40, %v2102_v42  ;;  %3726 = vmatprep.subr.bf16.mxu1 %v4583_v33  ;;  %v3452_v56 = vadd.f32 %v5933_v5, %v1723_v35  ;;  %v508_v57 = vadd.f32 %v507_v43, %v506_v61  ;;  %v731_v21 = vrot.slane %v730_v49, 4 }
 0x160   :  { %v2104_v20 = vsel %vm1998_vm7, %v1985_v50, %v2103_v60  ;;  %v397_v10 = vrot.slane %v396_v39, 2  ;;  %v620_v18 = vadd.f32 %v619_v7, %v618_v38  ;;  %v842_v12 = vsel %vm309_vm0, %v5888_v17, 0.0 }
 0x161   :  { %v2120_v15 = vpack.c.b16 %v2104_v20, %v2104_v20  ;;  %v6161_v22 = vadd.f32 %v6032_v11, %v3452_v56  ;;  %v509_v59 = vrot.slane %v508_v57, 2  ;;  %v732_v25 = vadd.f32 %v731_v21, %v730_v49  ;;  %v4595_v11 = vld [vmem:[%s6279_s1 + $0x7a4] ss:$8 sps:$4 sm:$0xff]  }
 0x162   :  { %v843_v55 = vrot.slane %v842_v12, 4  ;;  %3727 = vmatpush2.bf16.msra.mxu1 %v4581_v48  ;;  %v398_v5 = vadd.f32 %v397_v10, %v396_v39  ;;  %v621_v58 = vrot.slane %v620_v18, 2  ;;  %v954_v13 = vsel %vm309_vm0, %v5891_v9, 0.0  ;;  %v4599_v39 = vld [vmem:[%s6279_s1 + $0x790] ss:$8 sps:$4 sm:$0xff]  }
 0x163   :  { %3736 = vmatprep.mubr.bf16.mxu1 %v2120_v15  ;;  %v1066_v17 = vsel %vm309_vm0, %v5894_v19, 0.0  ;;  %3728 = vmatprep.subr.bf16.mxu1 %v4589_v52  ;;  %v510_v14 = vadd.f32 %v509_v59, %v508_v57  ;;  %v733_v3 = vrot.slane %v732_v25, 2  ;;  %v955_v26 = vrot.slane %v954_v13, 4  ;;  %v4593_v19 = vld [vmem:[%s6279_s1 + $0x7a0] ss:$8 sps:$4 sm:$0xff]  }
 0x164   :  { %v844_v37 = vadd.f32 %v843_v55, %v842_v12  ;;  %v399_v45 = vrot.slane %v398_v5, 1  ;;  %v622_v4 = vadd.f32 %v621_v58, %v620_v18  ;;  %v1067_v46 = vrot.slane %v1066_v17, 4  ;;  %v4607_v56 = vld [vmem:[%s6279_s1 + $0x784] ss:$8 sps:$4 sm:$0xff]  }
 0x165   :  { %v1178_v23 = vsel %vm309_vm0, %v5898_v53, 0.0  ;;  %v511_v62 = vrot.slane %v510_v14, 1  ;;  %v734_v9 = vadd.f32 %v733_v3, %v732_v25  ;;  %v956_v54 = vadd.f32 %v955_v26, %v954_v13  ;;  %v4605_v13 = vld [vmem:[%s6279_s1 + $0x780] ss:$8 sps:$4 sm:$0xff]  }
 0x166   :  { %v845_v27 = vrot.slane %v844_v37, 2  ;;  %3729 = vmatpush2.bf16.msra.mxu1 %v4587_v0  ;;  %v400_v24 = vadd.f32 %v399_v45, %v398_v5  ;;  %v623_v33 = vrot.slane %v622_v4, 1  ;;  %v1068_v29 = vadd.f32 %v1067_v46, %v1066_v17 }
 0x167   :  { %v1179_v34 = vrot.slane %v1178_v23, 4  ;;  %3730 = vmatprep.subr.bf16.mxu1 %v4595_v11  ;;  %v512_v61 = vadd.f32 %v511_v62, %v510_v14  ;;  %v735_v53 = vrot.slane %v734_v9, 1  ;;  %v957_v50 = vrot.slane %v956_v54, 2 }
 0x168   :  { %v846_v40 = vadd.f32 %v845_v27, %v844_v37  ;;  %v624_v31 = vadd.f32 %v623_v33, %v622_v4  ;;  %v1069_v8 = vrot.slane %v1068_v29, 2  ;;  %v1346_v35 = vpack.c.bf16 %v400_v24, %v400_v24 }
 0x169   :  { %v1180_v42 = vadd.f32 %v1179_v34, %v1178_v23  ;;  %v736_v43 = vadd.f32 %v735_v53, %v734_v9  ;;  %v958_v48 = vadd.f32 %v957_v50, %v956_v54  ;;  %v1362_v60 = vpack.c.bf16 %v512_v61, %v512_v61 }
 0x16a   :  { %v847_v38 = vrot.slane %v846_v40, 1  ;;  %3731 = vmatpush2.bf16.msra.mxu1 %v4593_v19  ;;  %v1070_v7 = vadd.f32 %v1069_v8, %v1068_v29  ;;  %v1378_v52 = vpack.c.bf16 %v624_v31, %v624_v31  ;;  %v1870_v20 = vunpack.c.l.b16 %v1346_v35 }
 0x16b   :  { %v1181_v49 = vrot.slane %v1180_v42, 2  ;;  %3732 = vmatprep.subr.bf16.mxu1 %v4601_v32  ;;  %v959_v21 = vrot.slane %v958_v48, 1  ;;  %v1394_v15 = vpack.c.bf16 %v736_v43, %v736_v43  ;;  %v1886_v10 = vunpack.c.l.b16 %v1362_v60 }
 0x16c   :  { %v848_v57 = vadd.f32 %v847_v38, %v846_v40  ;;  %v1071_v18 = vrot.slane %v1070_v7, 1  ;;  %v1902_v59 = vunpack.c.l.b16 %v1378_v52  ;;  %v408_v25 = vsel %vm309_vm0, %v5987_v36, 0.0 }
 0x16d   :  { %v1182_v12 = vadd.f32 %v1181_v49, %v1180_v42  ;;  %v960_v55 = vadd.f32 %v959_v21, %v958_v48  ;;  %v1918_v5 = vunpack.c.l.b16 %v1394_v15  ;;  %v2077_v58 = vsel %vm1986_vm1, %v1886_v10, %v1870_v20 }
 0x16e   :  { %v1410_v0 = vpack.c.bf16 %v848_v57, %v848_v57  ;;  %3733 = vmatpush2.bf16.msra.mxu1 %v4599_v39  ;;  %v1072_v17 = vadd.f32 %v1071_v18, %v1070_v7  ;;  %v2078_v14 = vsel %vm1988_vm2, %v1902_v59, %v2077_v58  ;;  %v409_v3 = vrot.slane %v408_v25, 4 }
 0x16f   :  { %v1183_v11 = vrot.slane %v1182_v12, 1  ;;  %3734 = vmatprep.subr.bf16.mxu1 %v4607_v56  ;;  %v1426_v37 = vpack.c.bf16 %v960_v55, %v960_v55  ;;  %v2079_v36 = vsel %vm1990_vm3, %v1918_v5, %v2078_v14  ;;  %v520_v45 = vsel %vm309_vm0, %v5994_v2, 0.0 }
 0x170   :  { %v1934_v26 = vunpack.c.l.b16 %v1410_v0  ;;  %v1442_v46 = vpack.c.bf16 %v1072_v17, %v1072_v17  ;;  %v410_v23 = vadd.f32 %v409_v3, %v408_v25  ;;  %v521_v62 = vrot.slane %v520_v45, 4 }
 0x171   :  { %v1184_v4 = vadd.f32 %v1183_v11, %v1182_v12  ;;  %v1950_v9 = vunpack.c.l.b16 %v1426_v37  ;;  %v632_v54 = vsel %vm309_vm0, %v6004_v41, 0.0  ;;  %v744_v19 = vsel %vm309_vm0, %v6007_v47, 0.0 }
 0x172   :  { %v2080_v27 = vsel %vm1992_vm4, %v1934_v26, %v2079_v36  ;;  %3735 = vmatpush2.bf16.msra.mxu1 %v4605_v13  ;;  %v1966_v33 = vunpack.c.l.b16 %v1442_v46  ;;  %v411_v29 = vrot.slane %v410_v23, 2  ;;  %v522_v34 = vadd.f32 %v521_v62, %v520_v45  ;;  %v4610_v62 = vld [vmem:[%s6282_s3 + $0x70] sm:$0xff]  }
 0x173   :  { %v1458_v24 = vpack.c.bf16 %v1184_v4, %v1184_v4  ;;  %v2081_v2 = vsel %vm1994_vm5, %v1950_v9, %v2080_v27  ;;  %v633_v32 = vrot.slane %v632_v54, 4  ;;  %v745_v61 = vrot.slane %v744_v19, 4 }
 0x174   :  { %v856_v53 = vsel %vm309_vm0, %v6014_v30, 0.0  ;;  %v2082_v50 = vsel %vm1996_vm6, %v1966_v33, %v2081_v2  ;;  %v412_v31 = vadd.f32 %v411_v29, %v410_v23  ;;  %v523_v41 = vrot.slane %v522_v34, 2  ;;  %v4609_v23 = vld [vmem:[%s6282_s3 + $0x38] sm:$0xff]  }
 0x175   :  { %v1982_v40 = vunpack.c.l.b16 %v1458_v24  ;;  %v634_v8 = vadd.f32 %v633_v32, %v632_v54  ;;  %v746_v42 = vadd.f32 %v745_v61, %v744_v19  ;;  %v857_v47 = vrot.slane %v856_v53, 4 }
 0x176   :  { %v968_v35 = vsel %vm309_vm0, %v6018_v51, 0.0  ;;  %v413_v38 = vrot.slane %v412_v31, 1  ;;  %v524_v48 = vadd.f32 %v523_v41, %v522_v34  ;;  %v1080_v57 = vsel %vm309_vm0, %v6021_v44, 0.0  ;;  %v4608_v44 = vld [vmem:[%s6282_s3 + $0x78] sm:$0xff]  }
 0x177   :  { %v2083_v43 = vsel %vm1998_vm7, %v1982_v40, %v2082_v50  ;;  %v969_v60 = vrot.slane %v968_v35, 4  ;;  %v635_v7 = vrot.slane %v634_v8, 2  ;;  %v747_v49 = vrot.slane %v746_v42, 2  ;;  %4202 = vmatprep.subr.bf16.mxu0 %v4608_v44  ;;  %v4612_v40 = vld [vmem:[%s6282_s3 + $0x68] sm:$0xff]  }
 0x178   :  { %v2117_v39 = vpack.c.b16 %v2083_v43, %v2083_v43  ;;  %v858_v30 = vadd.f32 %v857_v47, %v856_v53  ;;  %v414_v52 = vadd.f32 %v413_v38, %v412_v31  ;;  %v525_v20 = vrot.slane %v524_v48, 1  ;;  %v4613_v43 = vld [vmem:[%s6282_s3 + $0x28] sm:$0xff]  }
 0x179   :  { %v970_v56 = vadd.f32 %v969_v60, %v968_v35  ;;  %v636_v21 = vadd.f32 %v635_v7, %v634_v8  ;;  %v748_v15 = vadd.f32 %v747_v49, %v746_v42  ;;  %v1081_v51 = vrot.slane %v1080_v57, 4  ;;  %v4620_v44 = vld [vmem:[%s6282_s3 + $0x48] sm:$0xff]  }
 0x17a   :  { %3696 = vmatmul.mubr.bf16.vlgmr.msra.gmra.mxu0 %v2117_v39  ;;  %v859_v10 = vrot.slane %v858_v30, 2  ;;  %v526_v18 = vadd.f32 %v525_v20, %v524_v48  ;;  %v1192_v59 = vsel %vm309_vm0, %v6024_v6, 0.0  ;;  %v1348_v25 = vpack.c.bf16 %v414_v52, %v414_v52  ;;  %v4614_v39 = vld [vmem:[%s6282_s3 + $0x60] sm:$0xff]   ;;  %v4616_v20 = vld [vmem:[%s6282_s3 + $0x58] sm:$0xff]  }
 0x17b   :  { %v971_v12 = vrot.slane %v970_v56, 2  ;;  %v637_v55 = vrot.slane %v636_v21, 1  ;;  %v749_v0 = vrot.slane %v748_v15, 1  ;;  %v1082_v58 = vadd.f32 %v1081_v51, %v1080_v57  ;;  %4203 = vmatpush3.bf16.msra.mxu0 %v4609_v23 }
 0x17c   :  { %v860_v5 = vadd.f32 %v859_v10, %v858_v30  ;;  %v1193_v17 = vrot.slane %v1192_v59, 4  ;;  %v1364_v11 = vpack.c.bf16 %v526_v18, %v526_v18  ;;  %v1872_v14 = vunpack.c.l.b16 %v1348_v25  ;;  %4204 = vmatprep.subr.bf16.mxu0 %v4610_v62  ;;  %v4615_v30 = vld [vmem:[%s6282_s3 + $0x20] sm:$0xff]   ;;  %v4617_v25 = vld [vmem:[%s6282_s3 + $0x18] sm:$0xff]  }
 0x17d   :  { %v972_v13 = vadd.f32 %v971_v12, %v970_v56  ;;  %v638_v3 = vadd.f32 %v637_v55, %v636_v21  ;;  %v750_v37 = vadd.f32 %v749_v0, %v748_v15  ;;  %v1083_v36 = vrot.slane %v1082_v58, 2 }
 0x17e   :  { %v861_v26 = vrot.slane %v860_v5, 1  ;;  %v1194_v4 = vadd.f32 %v1193_v17, %v1192_v59  ;;  %v1888_v6 = vunpack.c.l.b16 %v1364_v11  ;;  %v1726_v46 = vsub.s32 1, %v6122_v1  ;;  %v4611_v1 = vld [vmem:[%s6282_s3 + $0x30] sm:$0xff]  }
 0x17f   :  { %v973_v45 = vrot.slane %v972_v13, 1  ;;  %v1084_v27 = vadd.f32 %v1083_v36, %v1082_v58  ;;  %v1380_v54 = vpack.c.bf16 %v638_v3, %v638_v3  ;;  %v1396_v19 = vpack.c.bf16 %v750_v37, %v750_v37  ;;  %4205 = vmatpush3.bf16.msra.mxu0 %v4611_v1  ;;  %v4618_v11 = vld [vmem:[%s6282_s3 + $0x50] sm:$0xff]   ;;  %v4621_v3 = vld [vmem:[%s6282_s3 + $0x8] sm:$0xff]   ;;  %v4622_v37 = vld [vmem:[%s6282_s3 + $0x40] sm:$0xff]  }
 0x180   :  { %v862_v9 = vadd.f32 %v861_v26, %v860_v5  ;;  %v1195_v33 = vrot.slane %v1194_v4, 2  ;;  %v2091_v29 = vsel %vm1986_vm1, %v1888_v6, %v1872_v14  ;;  %v1727_v34 = vrot.slane %v6131_v28, %v1726_v46  ;;  %4206 = vmatprep.subr.bf16.mxu0 %v4612_v40  ;;  %v4619_v14 = vld [vmem:[%s6282_s3 + $0x10] sm:$0xff]   ;;  %v4623_v26 = vld [vmem:[%s6282_s3] sm:$0xff]  }
 0x181   :  { %v974_v24 = vadd.f32 %v973_v45, %v972_v13  ;;  %v1085_v2 = vrot.slane %v1084_v27, 1  ;;  %v1904_v61 = vunpack.c.l.b16 %v1380_v54  ;;  %v1920_v53 = vunpack.c.l.b16 %v1396_v19 }
 0x182   :  { %v1412_v32 = vpack.c.bf16 %v862_v9, %v862_v9  ;;  %v1196_v50 = vadd.f32 %v1195_v33, %v1194_v4  ;;  %v3454_v60 = vadd.f32 %v5946_v63, %v1727_v34 }
 0x183   :  { %v1428_v31 = vpack.c.bf16 %v974_v24, %v974_v24  ;;  %v1086_v41 = vadd.f32 %v1085_v2, %v1084_v27  ;;  %v2092_v28 = vsel %vm1988_vm2, %v1904_v61, %v2091_v29  ;;  %4207 = vmatpush3.bf16.msra.mxu0 %v4613_v43  ;;  %v4185_v43 = vld [vmem:[%s6283_s4] ss:$0 sm:$0xff] }
 0x184   :  { %v1936_v8 = vunpack.c.l.b16 %v1412_v32  ;;  %v1197_v42 = vrot.slane %v1196_v50, 1  ;;  %v2093_v35 = vsel %vm1990_vm3, %v1920_v53, %v2092_v28  ;;  %v3495_v21 = vadd.f32 %v6056_v16, %v3454_v60  ;;  %4208 = vmatprep.subr.bf16.mxu0 %v4614_v39 }
 0x185   :  { %v1952_v47 = vunpack.c.l.b16 %v1428_v31  ;;  %v1444_v38 = vpack.c.bf16 %v1086_v41, %v1086_v41 }
 0x186   :  { %v2094_v48 = vsel %vm1992_vm4, %v1936_v8, %v2093_v35  ;;  %v1198_v7 = vadd.f32 %v1197_v42, %v1196_v50 }
 0x187   :  { %v2095_v49 = vsel %vm1994_vm5, %v1952_v47, %v2094_v48  ;;  %v1968_v52 = vunpack.c.l.b16 %v1444_v38  ;;  %4209 = vmatpush3.bf16.msra.mxu0 %v4615_v30 }
 0x188   :  { %v1460_v56 = vpack.c.bf16 %v1198_v7, %v1198_v7  ;;  %v3533_v57 = vpop.f32.mrf.mxu0  ;;  %4210 = vmatprep.subr.bf16.mxu0 %v4616_v20 }
 0x189   :  { %v2096_v63 = vsel %vm1996_vm6, %v1968_v52, %v2095_v49  ;;  %v3534_v15 = vadd.f32 %v3533_v57, %v6161_v22 }
 0x18a   :  { %v1984_v10 = vunpack.c.l.b16 %v1460_v56  ;;  %v3535_v51 = vpop.f32.mrf.mxu0 }
 0x18b   :  { %v3536_v18 = vadd.f32 %v3535_v51, %v3495_v21  ;;  %4211 = vmatpush3.bf16.msra.mxu0 %v4617_v25 }
 0x18c   :  { %v2097_v12 = vsel %vm1998_vm7, %v1984_v10, %v2096_v63  ;;  %v3537_v59 = vpop.f32.mrf.mxu0  ;;  %4212 = vmatprep.subr.bf16.mxu0 %v4618_v11 }
 0x18d   :  { %v2119_v55 = vpack.c.b16 %v2097_v12, %v2097_v12 }
 0x18e   :  { %v3538_v0 = vpop.f32.mrf.mxu0 }
 0x18f   :  { %3737 = vmatmul.mubr.bf16.vlgmr.msra.gmra.mxu1 %v2119_v55  ;;  %4213 = vmatpush3.bf16.msra.mxu0 %v4619_v14 }
 0x190   :  { %4214 = vmatprep.subr.bf16.mxu0 %v4620_v44 }
 0x193   :  { %4215 = vmatpush3.bf16.msra.mxu0 %v4621_v3 }
 0x194   :  { %4216 = vmatprep.subr.bf16.mxu0 %v4622_v37 }
 0x197   :  { %4217 = vmatpush3.bf16.msra.mxu0 %v4623_v26 }
 0x19c   :  { %v3574_v16 = vpop.f32.mrf.mxu1 }
 0x19d   :  { %v3575_v5 = vadd.f32 %v3574_v16, %v3534_v15 }
 0x19e   :  { %v3576_v22 = vpop.f32.mrf.mxu1 }
 0x19f   :  { %v3577_v58 = vadd.f32 %v3576_v22, %v3536_v18 }
 0x1a0   :  { %v3578_v13 = vpop.f32.mrf.mxu1 }
 0x1a2   :  { %v3579_v17 = vpop.f32.mrf.mxu1 }
 0x1e0   :  { %v3615_v36 = vpop.f32.mrf.mxu0 }
 0x1e1   :  { %v3616_v45 = vadd.f32 %v3615_v36, %v3575_v5 }
 0x1e2   :  { %v3617_v4 = vpop.f32.mrf.mxu0 }
 0x1e3   :  { %v3618_v6 = vadd.f32 %v3617_v4, %v3577_v58 }
 0x1e4   :  { %v3619_v46 = vpop.f32.mrf.mxu0 }
 0x1e6   :  { %v3620_v23 = vpop.f32.mrf.mxu0 }
 0x1f5   :  { %v3656_v62 = vpop.f32.mrf.mxu1 }
 0x1f6   :  { %v3657_v9 = vadd.f32 %v3656_v62, %v3616_v45 }
 0x1f7   :  { %v3658_v27 = vpop.f32.mrf.mxu1 }
 0x1f8   :  { %v3659_v54 = vadd.f32 %v3658_v27, %v3618_v6 }
 0x1f9   :  { %v3660_v19 = vpop.f32.mrf.mxu1 }
 0x1fb   :  { %v3661_v24 = vpop.f32.mrf.mxu1 }
 0x23a   :  { %v3697_v33 = vpop.f32.mrf.mxu0 }
 0x23b   :  { %v3698_v2 = vadd.f32 %v3697_v33, %v3657_v9 }
 0x23c   :  { %v3699_v29 = vpop.f32.mrf.mxu0 }
 0x23d   :  { %v3700_v32 = vadd.f32 %v3699_v29, %v3659_v54 }
 0x23e   :  { %v3701_v34 = vpop.f32.mrf.mxu0 }
 0x240   :  { %v3702_v1 = vpop.f32.mrf.mxu0 }
 0x24f   :  { %v3738_v61 = vpop.f32.mrf.mxu1 }
 0x250   :  { %v3739_v53 = vadd.f32 %v3738_v61, %v3698_v2 }
 0x251   :  { %v3740_v40 = vpop.f32.mrf.mxu1 }
 0x252   :  { %v3741_v50 = vadd.f32 %v3740_v40, %v3700_v32  ;;  %v3745_v31 = vmax.f32 %v3739_v53, 0.0 }
 0x253   :  { %v3742_v41 = vpop.f32.mrf.mxu1 }
 0x254   :  { %v3746_v8 = vmax.f32 %v3741_v50, 0.0  ;;  %v3747_v47 = vpack.c.bf16 %v3745_v31, %v3745_v31 }
 0x255   :  { %v3743_v28 = vpop.f32.mrf.mxu1 }
 0x256   :  { %v3748_v42 = vpack.c.bf16 %v3746_v8, %v3746_v8 }
 0x258   :  { %3916 = vmatprep.mubr.bf16.mxu0 %v3748_v42 }
 0x259   :  { %3917 = vmatmul.mubr.bf16.vlgmr.msra.gmra.mxu0 %v3747_v47 }
 0x319   :  { %v4218_v35 = vpop.f32.mrf.mxu0 }
 0x31b   :  { %v4219_v38 = vpop.f32.mrf.mxu0 }
 0x31c   :  { %v4220_v48 = vadd.f32 %v4219_v38, %v4218_v35 }
 0x31d   :  { %v4221_v60 = vpop.f32.mrf.mxu0 }
 0x31e   :  { %v3919_v39 = vadd.f32 %v4220_v48, %v4185_v43 }
 0x31f   :  { %v4222_v7 = vpop.f32.mrf.mxu0 }
 0x320   :  { %3924 = vst [vmem:[%s6284_s5] sm:$0xff] %v3919_v39 }

</bundles_post_ra>
